<compile_context>
chip_gen: v7x
topology: tpu7x:2x2x1
jax: 0.10.0
libtpu: 0.0.40
codegen_flags: <defaults>
</compile_context>

<pallas_src>
import functools

import jax
import jax.numpy as jnp
from jax.experimental import pallas as pl
from jax.experimental.pallas import tpu as pltpu


def _num_tensorcores():
    """2 TensorCores per device on v7x; 1 on v5e/v6e (and safe default)."""
    try:
        kind = getattr(jax.devices()[0], "device_kind", "").lower()
        if "v7" in kind:
            return 2
    except Exception:
        pass
    return 1


def residual_cross_attention_kernel(left_ref, right_ref, wq_ref, wkv_ref,
                                    bo_ref, out_ref, *,
                                    tb, seq_m, seq_n, num_heads, dhead,
                                    d_inner, d_query):
    """Residual + multi-head cross attention for a block of TB batch elements.

    Block views:
      left_ref  : (TB*M, Dq)          right_ref : (TB*N, Dc)
      wq_ref    : (Dq, D)   (softmax scale pre-folded)
      wkv_ref   : (Dc, D + H*Dq)  (K weights | per-head V@Wo folded weights)
      bo_ref    : (1, Dq)
      out_ref   : (TB*M, Dq)
    """
    left = left_ref[...]                                     # (TB*M, Dq)
    right = right_ref[...]                                   # (TB*N, Dc)

    # Fused projections: one full-height MXU matmul for Q, one for K | V@Wo.
    q = jnp.dot(left, wq_ref[...],
                preferred_element_type=jnp.float32)          # (TB*M, D)
    kvp = jnp.dot(right, wkv_ref[...],
                  preferred_element_type=jnp.float32)        # (TB*N, D + H*Dq)

    # Leading-dim splits only (layout preserving).
    q3 = q.reshape(tb, seq_m, d_inner)                       # (TB, M, D)
    k3 = kvp[:, :d_inner].reshape(tb, seq_n, d_inner)        # (TB, N, D)
    vp3 = kvp[:, d_inner:].reshape(tb, seq_n,
                                   num_heads * d_query)      # (TB, N, H*Dq)

    # Heads: batched (over TB) attention per head.  Because Wo is folded into
    # V, each head contributes directly into the (TB, M, Dq) accumulator:
    #   attn_h @ (V_h @ Wo_h)  ==  (attn_h @ V_h) @ Wo_h
    acc = jnp.zeros((tb, seq_m, d_query), jnp.float32)
    for h in range(num_heads):
        lo = h * dhead
        qh = q3[:, :, lo:lo + dhead]                         # (TB, M, dh)
        kh = k3[:, :, lo:lo + dhead]                         # (TB, N, dh)

        s = jnp.einsum('bmd,bnd->bmn', qh, kh,
                       preferred_element_type=jnp.float32)   # (TB, M, N)
        s = s - jnp.max(s, axis=-1, keepdims=True)
        p = jnp.exp(s)
        attn = p / jnp.sum(p, axis=-1, keepdims=True)        # exact divide

        vph = vp3[:, :, h * d_query:(h + 1) * d_query]       # (TB, N, Dq)
        acc = acc + jnp.einsum('bmn,bnq->bmq', attn, vph,
                               preferred_element_type=jnp.float32)

    # Output bias + residual (Residual: args[0] + module(*args)).
    out = acc.reshape(tb * seq_m, d_query) + bo_ref[...] + left
    out_ref[...] = out.astype(out_ref.dtype)


def residual_cross_attention(left, right, wq, wk, wv, wo, bo, *,
                             num_heads, dhead):
    B, M, Dq = left.shape
    _, N, Dc = right.shape
    D = num_heads * dhead
    assert wq.shape == (Dq, D) and wk.shape == (Dc, D) and wv.shape == (Dc, D)
    assert wo.shape == (D, Dq) and bo.shape == (Dq,)

    # ---- host-side weight folding ------------------------------------------
    scale = dhead ** (-0.5)
    wq_scaled = (wq * scale).astype(wq.dtype)               # fold softmax scale
    # Fold Wo into the V projection per head: wvo[:, h*Dq:(h+1)*Dq] =
    #   wv[:, h*dh:(h+1)*dh] @ wo[h*dh:(h+1)*dh, :]   -> (Dc, H*Dq)
    wvo = jnp.einsum('chd,hdq->chq',
                     wv.reshape(Dc, num_heads, dhead),
                     wo.reshape(num_heads, dhead, Dq)).reshape(Dc, num_heads * Dq)
    wkv = jnp.concatenate([wk, wvo], axis=1)                 # (Dc, D + H*Dq)
    bo2 = bo.reshape(1, Dq)

    # ---- generation-aware grid ---------------------------------------------
    # 1 step on single-TC chips (v5e/v6e), 2 parallel steps on v7x.  Pad the
    # batch so the split is always even (no tb=1 / odd-grid degradation).
    grid_b = _num_tensorcores() if B >= _num_tensorcores() else 1
    Bp = grid_b * pl.cdiv(B, grid_b)
    if Bp != B:
        pad = Bp - B
        left_p = jnp.concatenate(
            [left, jnp.zeros((pad, M, Dq), left.dtype)], axis=0)
        right_p = jnp.concatenate(
            [right, jnp.zeros((pad, N, Dc), right.dtype)], axis=0)
    else:
        left_p, right_p = left, right
    tb = Bp // grid_b

    # Sequence-flattened 2-D slabs: full-height projection matmuls, no
    # relayout-heavy reshapes in-kernel.
    left2d = left_p.reshape(Bp * M, Dq)
    right2d = right_p.reshape(Bp * N, Dc)

    kernel = functools.partial(
        residual_cross_attention_kernel,
        tb=tb, seq_m=M, seq_n=N, num_heads=num_heads, dhead=dhead,
        d_inner=D, d_query=Dq)

    out2d = pl.pallas_call(
        kernel,
        out_shape=jax.ShapeDtypeStruct((Bp * M, Dq), left.dtype),
        grid_spec=pltpu.PrefetchScalarGridSpec(
            num_scalar_prefetch=0,
            grid=(grid_b,),
            in_specs=[
                pl.BlockSpec((tb * M, Dq), lambda b: (b, 0)),
                pl.BlockSpec((tb * N, Dc), lambda b: (b, 0)),
                pl.BlockSpec((Dq, D), lambda b: (0, 0)),
                pl.BlockSpec((Dc, D + num_heads * Dq), lambda b: (0, 0)),
                pl.BlockSpec((1, Dq), lambda b: (0, 0)),
            ],
            out_specs=pl.BlockSpec((tb * M, Dq), lambda b: (b, 0)),
        ),
        compiler_params=pltpu.CompilerParams(
            dimension_semantics=("parallel",)),
    )(left2d, right2d, wq_scaled, wkv, bo2)

    out = out2d.reshape(Bp, M, Dq)
    if Bp != B:
        out = out[:B]
    return out


def residual_cross_attention_ref(left, right, wq, wk, wv, wo, bo, *,
                                 num_heads, dhead):
    """Pure-JAX reference mirroring Residual(CrossAttention)."""
    B, M, Dq = left.shape
    _, N, Dc = right.shape
    scale = dhead ** (-0.5)
    q = left @ wq                                            # (B, M, D)
    k = right @ wk                                           # (B, N, D)
    v = right @ wv                                           # (B, N, D)
    q = q.reshape(B, M, num_heads, dhead).transpose(0, 2, 1, 3)
    k = k.reshape(B, N, num_heads, dhead).transpose(0, 2, 1, 3)
    v = v.reshape(B, N, num_heads, dhead).transpose(0, 2, 1, 3)
    sim = scale * jnp.einsum('bhmd,bhnd->bhmn', q, k)
    attn = jax.nn.softmax(sim, axis=-1)
    out = jnp.einsum('bhmn,bhnd->bhmd', attn, v)
    out = out.transpose(0, 2, 1, 3).reshape(B, M, -1)
    return left + (out @ wo + bo)                            # Residual wrapper


if __name__ == "__main__":
    # Small shapes consistent with the module's forward.
    B, M, N = 32, 8, 8
    Dquery, Dcontext = 32, 16
    num_heads, Dhead = 4, 8
    D = num_heads * Dhead

    key = jax.random.PRNGKey(0)
    k1, k2, k3, k4, k5, k6, k7 = jax.random.split(key, 7)

    left = jax.random.normal(k1, (B, M, Dquery), dtype=jnp.float32)
    right = jax.random.normal(k2, (B, N, Dcontext), dtype=jnp.float32)

    wq = 0.1 * jax.random.normal(k3, (Dquery, D), dtype=jnp.float32)
    wk = 0.1 * jax.random.normal(k4, (Dcontext, D), dtype=jnp.float32)
    wv = 0.1 * jax.random.normal(k5, (Dcontext, D), dtype=jnp.float32)
    wo = 0.1 * jax.random.normal(k6, (D, Dquery), dtype=jnp.float32)
    bo = 0.1 * jax.random.normal(k7, (Dquery,), dtype=jnp.float32)

    out = residual_cross_attention(left, right, wq, wk, wv, wo, bo,
                                   num_heads=num_heads, dhead=Dhead)
    out = jax.block_until_ready(out)

    ref = residual_cross_attention_ref(left, right, wq, wk, wv, wo, bo,
                                       num_heads=num_heads, dhead=Dhead)
    assert out.shape == (B, M, Dquery)
    # Exact softmax divide -> tight tolerance restored.
    assert jnp.allclose(out, ref, atol=1e-4, rtol=1e-4)

    print("KERNEL_OK")
</pallas_src>

<mosaic_0001>
module attributes {stable_mosaic.version = 11 : i64} {
  func.func @residual_cross_attention_kernel(%arg0: i32, %arg1: memref<256x32xf32, #tpu.memory_space<vmem>>, %arg2: memref<256x16xf32, #tpu.memory_space<vmem>>, %arg3: memref<32x32xf32, #tpu.memory_space<vmem>>, %arg4: memref<16x160xf32, #tpu.memory_space<vmem>>, %arg5: memref<1x32xf32, #tpu.memory_space<vmem>>, %arg6: memref<256x32xf32, #tpu.memory_space<vmem>>) attributes {dimension_semantics = [#tpu.dimension_semantics<parallel>], iteration_bounds = array<i64: 1>, scalar_prefetch = 0 : i64, scratch_operands = 0 : i64, tpu.core_type = #tpu.core_type<tc>, window_params = [{transform_indices = @transform_0, window_bounds = array<i64: 256, 32>}, {transform_indices = @transform_1, window_bounds = array<i64: 256, 16>}, {pipeline_mode = #tpu.pipeline_mode<synchronous>, transform_indices = @transform_2, window_bounds = array<i64: 32, 32>}, {pipeline_mode = #tpu.pipeline_mode<synchronous>, transform_indices = @transform_3, window_bounds = array<i64: 16, 160>}, {pipeline_mode = #tpu.pipeline_mode<synchronous>, transform_indices = @transform_4, window_bounds = array<i64: 1, 32>}, {transform_indices = @transform_5, window_bounds = array<i64: 256, 32>}]} {
    %c0 = arith.constant 0 : index
    %c0_0 = arith.constant 0 : index
    %0 = vector.load %arg1[%c0, %c0_0] : memref<256x32xf32, #tpu.memory_space<vmem>>, vector<256x32xf32>
    %c0_1 = arith.constant 0 : index
    %c0_2 = arith.constant 0 : index
    %1 = vector.load %arg2[%c0_1, %c0_2] : memref<256x16xf32, #tpu.memory_space<vmem>>, vector<256x16xf32>
    %c0_3 = arith.constant 0 : index
    %c0_4 = arith.constant 0 : index
    %2 = vector.load %arg3[%c0_3, %c0_4] : memref<32x32xf32, #tpu.memory_space<vmem>>, vector<32x32xf32>
    %cst = arith.constant dense<0.000000e+00> : vector<256x32xf32>
    %3 = tpu.matmul %0, %2, %cst {dimension_numbers = #tpu.dot_dimension_numbers<[1], [0], [0], [1], [0, 0, 1, 1], [], []>} : vector<256x32xf32>, vector<32x32xf32>, vector<256x32xf32> -> vector<256x32xf32>
    %c0_5 = arith.constant 0 : index
    %c0_6 = arith.constant 0 : index
    %4 = vector.load %arg4[%c0_5, %c0_6] : memref<16x160xf32, #tpu.memory_space<vmem>>, vector<16x160xf32>
    %cst_7 = arith.constant dense<0.000000e+00> : vector<256x160xf32>
    %5 = tpu.matmul %1, %4, %cst_7 {dimension_numbers = #tpu.dot_dimension_numbers<[1], [0], [0], [1], [0, 0, 1, 1], [], []>} : vector<256x16xf32>, vector<16x160xf32>, vector<256x160xf32> -> vector<256x160xf32>
    %6 = vector.shape_cast %3 : vector<256x32xf32> to vector<32x8x32xf32>
    %7 = vector.extract_strided_slice %5 {offsets = [0, 0], sizes = [256, 32], strides = [1, 1]} : vector<256x160xf32> to vector<256x32xf32>
    %8 = vector.shape_cast %7 : vector<256x32xf32> to vector<32x8x32xf32>
    %9 = vector.extract_strided_slice %5 {offsets = [0, 32], sizes = [256, 128], strides = [1, 1]} : vector<256x160xf32> to vector<256x128xf32>
    %10 = vector.shape_cast %9 : vector<256x128xf32> to vector<32x8x128xf32>
    %cst_8 = arith.constant 0.000000e+00 : f32
    %11 = vector.broadcast %cst_8 : f32 to vector<32x8x32xf32>
    %12 = vector.extract_strided_slice %6 {offsets = [0, 0, 0], sizes = [32, 8, 8], strides = [1, 1, 1]} : vector<32x8x32xf32> to vector<32x8x8xf32>
    %13 = vector.extract_strided_slice %8 {offsets = [0, 0, 0], sizes = [32, 8, 8], strides = [1, 1, 1]} : vector<32x8x32xf32> to vector<32x8x8xf32>
    "tpu.trace_start"() <{level = 10 : i32, message = "bmd,bnd->bmn"}> : () -> ()
    %cst_9 = arith.constant dense<0.000000e+00> : vector<32x8x8xf32>
    %14 = tpu.matmul %12, %13, %cst_9 {dimension_numbers = #tpu.dot_dimension_numbers<[2], [2], [1], [1], [0, 0, 0, 1, 1, 1], [0], [0]>} : vector<32x8x8xf32>, vector<32x8x8xf32>, vector<32x8x8xf32> -> vector<32x8x8xf32>
    "tpu.trace_stop"() : () -> ()
    %cst_10 = arith.constant dense<0xFF800000> : vector<32x8xf32>
    %15 = vector.multi_reduction <maximumf>, %14, %cst_10 [2] : vector<32x8x8xf32> to vector<32x8xf32>
    %16 = vector.shape_cast %15 : vector<32x8xf32> to vector<32x8x1xf32>
    %17 = vector.broadcast %16 : vector<32x8x1xf32> to vector<32x8x8xf32>
    %18 = arith.subf %14, %17 : vector<32x8x8xf32>
    %19 = math.exp %18 : vector<32x8x8xf32>
    %cst_11 = arith.constant dense<0.000000e+00> : vector<32x8xf32>
    %20 = vector.multi_reduction <add>, %19, %cst_11 [2] : vector<32x8x8xf32> to vector<32x8xf32>
    %21 = vector.shape_cast %20 : vector<32x8xf32> to vector<32x8x1xf32>
    %22 = vector.broadcast %21 : vector<32x8x1xf32> to vector<32x8x8xf32>
    %23 = arith.divf %19, %22 : vector<32x8x8xf32>
    %24 = vector.extract_strided_slice %10 {offsets = [0, 0, 0], sizes = [32, 8, 32], strides = [1, 1, 1]} : vector<32x8x128xf32> to vector<32x8x32xf32>
    "tpu.trace_start"() <{level = 10 : i32, message = "bmn,bnq->bmq"}> : () -> ()
    %cst_12 = arith.constant dense<0.000000e+00> : vector<32x8x32xf32>
    %25 = tpu.matmul %23, %24, %cst_12 {dimension_numbers = #tpu.dot_dimension_numbers<[2], [1], [1], [2], [0, 0, 0, 1, 1, 2], [0], [0]>} : vector<32x8x8xf32>, vector<32x8x32xf32>, vector<32x8x32xf32> -> vector<32x8x32xf32>
    "tpu.trace_stop"() : () -> ()
    %26 = arith.addf %11, %25 : vector<32x8x32xf32>
    %27 = vector.extract_strided_slice %6 {offsets = [0, 0, 8], sizes = [32, 8, 8], strides = [1, 1, 1]} : vector<32x8x32xf32> to vector<32x8x8xf32>
    %28 = vector.extract_strided_slice %8 {offsets = [0, 0, 8], sizes = [32, 8, 8], strides = [1, 1, 1]} : vector<32x8x32xf32> to vector<32x8x8xf32>
    "tpu.trace_start"() <{level = 10 : i32, message = "bmd,bnd->bmn"}> : () -> ()
    %cst_13 = arith.constant dense<0.000000e+00> : vector<32x8x8xf32>
    %29 = tpu.matmul %27, %28, %cst_13 {dimension_numbers = #tpu.dot_dimension_numbers<[2], [2], [1], [1], [0, 0, 0, 1, 1, 1], [0], [0]>} : vector<32x8x8xf32>, vector<32x8x8xf32>, vector<32x8x8xf32> -> vector<32x8x8xf32>
    "tpu.trace_stop"() : () -> ()
    %cst_14 = arith.constant dense<0xFF800000> : vector<32x8xf32>
    %30 = vector.multi_reduction <maximumf>, %29, %cst_14 [2] : vector<32x8x8xf32> to vector<32x8xf32>
    %31 = vector.shape_cast %30 : vector<32x8xf32> to vector<32x8x1xf32>
    %32 = vector.broadcast %31 : vector<32x8x1xf32> to vector<32x8x8xf32>
    %33 = arith.subf %29, %32 : vector<32x8x8xf32>
    %34 = math.exp %33 : vector<32x8x8xf32>
    %cst_15 = arith.constant dense<0.000000e+00> : vector<32x8xf32>
    %35 = vector.multi_reduction <add>, %34, %cst_15 [2] : vector<32x8x8xf32> to vector<32x8xf32>
    %36 = vector.shape_cast %35 : vector<32x8xf32> to vector<32x8x1xf32>
    %37 = vector.broadcast %36 : vector<32x8x1xf32> to vector<32x8x8xf32>
    %38 = arith.divf %34, %37 : vector<32x8x8xf32>
    %39 = vector.extract_strided_slice %10 {offsets = [0, 0, 32], sizes = [32, 8, 32], strides = [1, 1, 1]} : vector<32x8x128xf32> to vector<32x8x32xf32>
    "tpu.trace_start"() <{level = 10 : i32, message = "bmn,bnq->bmq"}> : () -> ()
    %cst_16 = arith.constant dense<0.000000e+00> : vector<32x8x32xf32>
    %40 = tpu.matmul %38, %39, %cst_16 {dimension_numbers = #tpu.dot_dimension_numbers<[2], [1], [1], [2], [0, 0, 0, 1, 1, 2], [0], [0]>} : vector<32x8x8xf32>, vector<32x8x32xf32>, vector<32x8x32xf32> -> vector<32x8x32xf32>
    "tpu.trace_stop"() : () -> ()
    %41 = arith.addf %26, %40 : vector<32x8x32xf32>
    %42 = vector.extract_strided_slice %6 {offsets = [0, 0, 16], sizes = [32, 8, 8], strides = [1, 1, 1]} : vector<32x8x32xf32> to vector<32x8x8xf32>
    %43 = vector.extract_strided_slice %8 {offsets = [0, 0, 16], sizes = [32, 8, 8], strides = [1, 1, 1]} : vector<32x8x32xf32> to vector<32x8x8xf32>
    "tpu.trace_start"() <{level = 10 : i32, message = "bmd,bnd->bmn"}> : () -> ()
    %cst_17 = arith.constant dense<0.000000e+00> : vector<32x8x8xf32>
    %44 = tpu.matmul %42, %43, %cst_17 {dimension_numbers = #tpu.dot_dimension_numbers<[2], [2], [1], [1], [0, 0, 0, 1, 1, 1], [0], [0]>} : vector<32x8x8xf32>, vector<32x8x8xf32>, vector<32x8x8xf32> -> vector<32x8x8xf32>
    "tpu.trace_stop"() : () -> ()
    %cst_18 = arith.constant dense<0xFF800000> : vector<32x8xf32>
    %45 = vector.multi_reduction <maximumf>, %44, %cst_18 [2] : vector<32x8x8xf32> to vector<32x8xf32>
    %46 = vector.shape_cast %45 : vector<32x8xf32> to vector<32x8x1xf32>
    %47 = vector.broadcast %46 : vector<32x8x1xf32> to vector<32x8x8xf32>
    %48 = arith.subf %44, %47 : vector<32x8x8xf32>
    %49 = math.exp %48 : vector<32x8x8xf32>
    %cst_19 = arith.constant dense<0.000000e+00> : vector<32x8xf32>
    %50 = vector.multi_reduction <add>, %49, %cst_19 [2] : vector<32x8x8xf32> to vector<32x8xf32>
    %51 = vector.shape_cast %50 : vector<32x8xf32> to vector<32x8x1xf32>
    %52 = vector.broadcast %51 : vector<32x8x1xf32> to vector<32x8x8xf32>
    %53 = arith.divf %49, %52 : vector<32x8x8xf32>
    %54 = vector.extract_strided_slice %10 {offsets = [0, 0, 64], sizes = [32, 8, 32], strides = [1, 1, 1]} : vector<32x8x128xf32> to vector<32x8x32xf32>
    "tpu.trace_start"() <{level = 10 : i32, message = "bmn,bnq->bmq"}> : () -> ()
    %cst_20 = arith.constant dense<0.000000e+00> : vector<32x8x32xf32>
    %55 = tpu.matmul %53, %54, %cst_20 {dimension_numbers = #tpu.dot_dimension_numbers<[2], [1], [1], [2], [0, 0, 0, 1, 1, 2], [0], [0]>} : vector<32x8x8xf32>, vector<32x8x32xf32>, vector<32x8x32xf32> -> vector<32x8x32xf32>
    "tpu.trace_stop"() : () -> ()
    %56 = arith.addf %41, %55 : vector<32x8x32xf32>
    %57 = vector.extract_strided_slice %6 {offsets = [0, 0, 24], sizes = [32, 8, 8], strides = [1, 1, 1]} : vector<32x8x32xf32> to vector<32x8x8xf32>
    %58 = vector.extract_strided_slice %8 {offsets = [0, 0, 24], sizes = [32, 8, 8], strides = [1, 1, 1]} : vector<32x8x32xf32> to vector<32x8x8xf32>
    "tpu.trace_start"() <{level = 10 : i32, message = "bmd,bnd->bmn"}> : () -> ()
    %cst_21 = arith.constant dense<0.000000e+00> : vector<32x8x8xf32>
    %59 = tpu.matmul %57, %58, %cst_21 {dimension_numbers = #tpu.dot_dimension_numbers<[2], [2], [1], [1], [0, 0, 0, 1, 1, 1], [0], [0]>} : vector<32x8x8xf32>, vector<32x8x8xf32>, vector<32x8x8xf32> -> vector<32x8x8xf32>
    "tpu.trace_stop"() : () -> ()
    %cst_22 = arith.constant dense<0xFF800000> : vector<32x8xf32>
    %60 = vector.multi_reduction <maximumf>, %59, %cst_22 [2] : vector<32x8x8xf32> to vector<32x8xf32>
    %61 = vector.shape_cast %60 : vector<32x8xf32> to vector<32x8x1xf32>
    %62 = vector.broadcast %61 : vector<32x8x1xf32> to vector<32x8x8xf32>
    %63 = arith.subf %59, %62 : vector<32x8x8xf32>
    %64 = math.exp %63 : vector<32x8x8xf32>
    %cst_23 = arith.constant dense<0.000000e+00> : vector<32x8xf32>
    %65 = vector.multi_reduction <add>, %64, %cst_23 [2] : vector<32x8x8xf32> to vector<32x8xf32>
    %66 = vector.shape_cast %65 : vector<32x8xf32> to vector<32x8x1xf32>
    %67 = vector.broadcast %66 : vector<32x8x1xf32> to vector<32x8x8xf32>
    %68 = arith.divf %64, %67 : vector<32x8x8xf32>
    %69 = vector.extract_strided_slice %10 {offsets = [0, 0, 96], sizes = [32, 8, 32], strides = [1, 1, 1]} : vector<32x8x128xf32> to vector<32x8x32xf32>
    "tpu.trace_start"() <{level = 10 : i32, message = "bmn,bnq->bmq"}> : () -> ()
    %cst_24 = arith.constant dense<0.000000e+00> : vector<32x8x32xf32>
    %70 = tpu.matmul %68, %69, %cst_24 {dimension_numbers = #tpu.dot_dimension_numbers<[2], [1], [1], [2], [0, 0, 0, 1, 1, 2], [0], [0]>} : vector<32x8x8xf32>, vector<32x8x32xf32>, vector<32x8x32xf32> -> vector<32x8x32xf32>
    "tpu.trace_stop"() : () -> ()
    %71 = arith.addf %56, %70 : vector<32x8x32xf32>
    %72 = vector.shape_cast %71 : vector<32x8x32xf32> to vector<256x32xf32>
    %c0_25 = arith.constant 0 : index
    %c0_26 = arith.constant 0 : index
    %73 = vector.load %arg5[%c0_25, %c0_26] : memref<1x32xf32, #tpu.memory_space<vmem>>, vector<1x32xf32>
    %74 = vector.broadcast %73 : vector<1x32xf32> to vector<256x32xf32>
    %75 = arith.addf %72, %74 : vector<256x32xf32>
    %76 = arith.addf %75, %0 : vector<256x32xf32>
    %c0_27 = arith.constant 0 : index
    %c0_28 = arith.constant 0 : index
    %77 = vector.load %arg6[%c0_27, %c0_28] : memref<256x32xf32, #tpu.memory_space<vmem>>, vector<256x32xf32>
    tpu.vector_store %arg6[%c0_27, %c0_28], %76 {strides = array<i32>} : memref<256x32xf32, #tpu.memory_space<vmem>>, vector<256x32xf32>,
    return
  }
  func.func @transform_0(%arg0: i32) -> (i32, i32) {
    %c0_i32 = arith.constant 0 : i32
    %c0_i32_0 = arith.constant 0 : i32
    return %arg0, %c0_i32 : i32, i32
  }
  func.func @transform_1(%arg0: i32) -> (i32, i32) {
    %c0_i32 = arith.constant 0 : i32
    %c0_i32_0 = arith.constant 0 : i32
    return %arg0, %c0_i32 : i32, i32
  }
  func.func @transform_2(%arg0: i32) -> (i32, i32) {
    %c0_i32 = arith.constant 0 : i32
    %c0_i32_0 = arith.constant 0 : i32
    %c0_i32_1 = arith.constant 0 : i32
    return %c0_i32, %c0_i32_0 : i32, i32
  }
  func.func @transform_3(%arg0: i32) -> (i32, i32) {
    %c0_i32 = arith.constant 0 : i32
    %c0_i32_0 = arith.constant 0 : i32
    %c0_i32_1 = arith.constant 0 : i32
    return %c0_i32, %c0_i32_0 : i32, i32
  }
  func.func @transform_4(%arg0: i32) -> (i32, i32) {
    %c0_i32 = arith.constant 0 : i32
    %c0_i32_0 = arith.constant 0 : i32
    %c0_i32_1 = arith.constant 0 : i32
    return %c0_i32, %c0_i32_0 : i32, i32
  }
  func.func @transform_5(%arg0: i32) -> (i32, i32) {
    %c0_i32 = arith.constant 0 : i32
    %c0_i32_0 = arith.constant 0 : i32
    return %arg0, %c0_i32 : i32, i32
  }
}

</mosaic_0001>

<bundles_post_ra>
// kernel: tpu_custom_call.1
= control target key start
LH: loop header
LB: loop body
LE: loop exit
PB: predicated region body
PF: predicated region fallthrough
CT: control target
= control target key end

     0   :  { %v29463_v3 = vmov 0.0   ;;  %vm88_vm0 = vcmask 261120   ;;  %vm414_vm1 = vcmask 130048   ;;  %vm24798_vm2 = vmmov 0   ;;  %s24799_s27 = smov 64   ;;  %s24800_s28 = smov 120   ;;  %s29439_s2 = inlined_call_operand.vmem [shape: f32[32,32], index: 2, kind: input, shape index: {}]   ;;  %s29440_s3 = inlined_call_operand.vmem [shape: f32[16,160], index: 3, kind: input, shape index: {}]   ;;  %s29441_s0 = inlined_call_operand.vmem [shape: f32[256,32], index: 0, kind: input, shape index: {}]   ;;  %s29442_s1 = inlined_call_operand.vmem [shape: f32[256,16], index: 1, kind: input, shape index: {}]   ;;  %s29443_s4 = inlined_call_operand.vmem [shape: f32[1,32], index: 4, kind: input, shape index: {}]   ;;  %s29444_s5 = inlined_call_operand.vmem [shape: f32[256,32], index: 5, kind: output, shape index: {}]  }
   0x1   :  { %v84_v0 = vld [vmem:[%s29439_s2] sm:$0xff]  ;;  %v85_v1 = vld [vmem:[%s29439_s2 + $0x8] sm:$0xff]  ;;  %575 = vmatprep.mubr.f32.mxu1 %v29463_v3  ;;  %v413_v5 = vld [vmem:[%s29440_s3 + $0x18] sm:$0xff]  ;;  %vm768_vm3 = vcmask 64512   ;;  %s24802_s29 = smov 112   ;;  %s24803_s30 = smov 32  }
   0x2   :  { %v411_v2 = vld [vmem:[%s29440_s3 + $0x8] sm:$0xff]  ;;  %v24233_v4 = vpack.c.bf16 %v85_v1, %v84_v0  ;;  %v410_v6 = vld [vmem:[%s29440_s3] sm:$0xff]  ;;  %v412_v7 = vld [vmem:[%s29440_s3 + $0x10] sm:$0xff]  ;;  %s24804_s6 = smov 104  }
   0x3   :  { %v24241_v8 = vpack.c.bf16 %v413_v5, %v411_v2  ;;  %v24243_v9 = vpack.c.bf16 %v412_v7, %v410_v6  ;;  %v86_v10 = vld [vmem:[%s29439_s2 + $0x10] sm:$0xff]  ;;  %v87_v11 = vld [vmem:[%s29439_s2 + $0x18] sm:$0xff]  ;;  %v20_v13 = vld [vmem:[%s29441_s0] sm:$0xff] }
   0x4   :  { %24234 = vmatprep.subr.bf16.mxu0 %v24233_v4  ;;  %v24237_v12 = vpack.c.bf16 %v87_v11, %v86_v10  ;;  %v52_v14 = vld [vmem:[%s29442_s1] sm:$0xff]  ;;  %22905 = vmatprep.mubr.msk.f32.mxu0 %vm88_vm0, %v20_v13  ;;  %v21_v15 = vld [vmem:[%s29441_s0 + $0x8] sm:$0xff]  ;;  %v22_v17 = vld [vmem:[%s29441_s0 + $0x10] sm:$0xff] }
   0x5   :  { %24242 = vmatprep.subr.bf16.mxu1 %v24241_v8  ;;  %24236 = vmatpush3.bf16.msra.mxu0 %v24233_v4  ;;  %v53_v16 = vld [vmem:[%s29442_s1 + $0x8] sm:$0xff]  ;;  %v23_v18 = vld [vmem:[%s29441_s0 + $0x18] sm:$0xff]  ;;  %v54_v19 = vld [vmem:[%s29442_s1 + $0x10] sm:$0xff] }
   0x6   :  { %24244 = vmatpush1.bf16.msra.mxu1 %v24243_v9  ;;  %24238 = vmatprep.subr.bf16.mxu0 %v24237_v12  ;;  %v24_v20 = vld [vmem:[%s29441_s0 + $0x20] sm:$0xff]  ;;  %v25_v21 = vld [vmem:[%s29441_s0 + $0x28] sm:$0xff]  ;;  %v55_v22 = vld [vmem:[%s29442_s1 + $0x18] sm:$0xff] }
   0x7   :  { %23033 = vmatprep.subr.mxu1 %v29463_v3  ;;  %v26_v23 = vld [vmem:[%s29441_s0 + $0x30] sm:$0xff]  ;;  %v27_v24 = vld [vmem:[%s29441_s0 + $0x38] sm:$0xff]  ;;  %v56_v25 = vld [vmem:[%s29442_s1 + $0x20] sm:$0xff] }
   0x8   :  { %v28_v26 = vld [vmem:[%s29441_s0 + $0x40] sm:$0xff]  ;;  %v29_v27 = vld [vmem:[%s29441_s0 + $0x48] sm:$0xff]  ;;  %v30_v29 = vld [vmem:[%s29441_s0 + $0x50] sm:$0xff] }
   0x9   :  { %21932 = vmatmul.mubr.msk.f32.vlgmr.msra.gmra.mrb[0].mxu1 %vm414_vm1, %v52_v14  ;;  %24240 = vmatpush3.bf16.msra.mxu0 %v24237_v12  ;;  %v57_v28 = vld [vmem:[%s29442_s1 + $0x28] sm:$0xff]  ;;  %v31_v30 = vld [vmem:[%s29441_s0 + $0x58] sm:$0xff]  ;;  %v58_v31 = vld [vmem:[%s29442_s1 + $0x30] sm:$0xff] }
   0xa   :  { %581 = vmatprep.mubr.f32.mxu1 %v29463_v3  ;;  %22953 = vmatprep.subr.mxu0 %v29463_v3  ;;  %v32_v32 = vld [vmem:[%s29441_s0 + $0x60] sm:$0xff]  ;;  %v33_v33 = vld [vmem:[%s29441_s0 + $0x68] sm:$0xff]  ;;  %v59_v34 = vld [vmem:[%s29442_s1 + $0x38] sm:$0xff] }
   0xb   :  { %v34_v35 = vld [vmem:[%s29441_s0 + $0x70] sm:$0xff]  ;;  %v35_v36 = vld [vmem:[%s29441_s0 + $0x78] sm:$0xff]  ;;  %v60_v37 = vld [vmem:[%s29442_s1 + $0x40] sm:$0xff] }
   0xc   :  { %22906 = vmatmul.mubr.msk.f32.vlgmr.msra.gmra.mrb[0].mxu0 %vm88_vm0, %v21_v15  ;;  %v36_v38 = vld [vmem:[%s29441_s0 + $0x80] sm:$0xff]  ;;  %v37_v39 = vld [vmem:[%s29441_s0 + $0x88] sm:$0xff]  ;;  %v38_v41 = vld [vmem:[%s29441_s0 + $0x90] sm:$0xff] }
   0xd   :  { %21933 = vmatmul.mubr.msk.f32.gmra.mrb[2].mxu1 %vm414_vm1, %v53_v16  ;;  %22908 = vmatprep.mubr.msk.f32.mxu0 %vm88_vm0, %v22_v17  ;;  %v61_v40 = vld [vmem:[%s29442_s1 + $0x48] sm:$0xff]  ;;  %v39_v42 = vld [vmem:[%s29441_s0 + $0x98] sm:$0xff]  ;;  %v62_v43 = vld [vmem:[%s29442_s1 + $0x50] sm:$0xff] }
   0xe   :  { %587 = vmatprep.mubr.f32.mxu1 %v29463_v3  ;;  %v40_v44 = vld [vmem:[%s29441_s0 + $0xa0] sm:$0xff]  ;;  %v41_v45 = vld [vmem:[%s29441_s0 + $0xa8] sm:$0xff]  ;;  %v63_v46 = vld [vmem:[%s29442_s1 + $0x58] sm:$0xff] }
   0xf   :  { %v42_v47 = vld [vmem:[%s29441_s0 + $0xb0] sm:$0xff]  ;;  %v43_v48 = vld [vmem:[%s29441_s0 + $0xb8] sm:$0xff]  ;;  %v64_v49 = vld [vmem:[%s29442_s1 + $0x60] sm:$0xff] }
  0x10   :  { %22909 = vmatmul.mubr.msk.f32.gmra.mrb[2].mxu0 %vm88_vm0, %v23_v18  ;;  %v44_v50 = vld [vmem:[%s29441_s0 + $0xc0] sm:$0xff]  ;;  %v45_v51 = vld [vmem:[%s29441_s0 + $0xc8] sm:$0xff]  ;;  %v46_v53 = vld [vmem:[%s29441_s0 + $0xd0] sm:$0xff] }
  0x11   :  { %21934 = vmatmul.mubr.msk.f32.gmra.mrb[4].mxu1 %vm414_vm1, %v54_v19  ;;  %22911 = vmatprep.mubr.msk.f32.mxu0 %vm88_vm0, %v24_v20  ;;  %v65_v52 = vld [vmem:[%s29442_s1 + $0x68] sm:$0xff]  ;;  %v47_v54 = vld [vmem:[%s29441_s0 + $0xd8] sm:$0xff]  ;;  %v66_v55 = vld [vmem:[%s29442_s1 + $0x70] sm:$0xff] }
  0x12   :  { %593 = vmatprep.mubr.f32.mxu1 %v29463_v3  ;;  %v48_v56 = vld [vmem:[%s29441_s0 + $0xe0] sm:$0xff]  ;;  %v49_v57 = vld [vmem:[%s29441_s0 + $0xe8] sm:$0xff]  ;;  %v67_v58 = vld [vmem:[%s29442_s1 + $0x78] sm:$0xff] }
  0x13   :  { %v50_v59 = vld [vmem:[%s29441_s0 + $0xf0] sm:$0xff]  ;;  %v51_v60 = vld [vmem:[%s29441_s0 + $0xf8] sm:$0xff]  ;;  %v68_v61 = vld [vmem:[%s29442_s1 + $0x80] sm:$0xff] }
  0x14   :  { %22912 = vmatmul.mubr.msk.f32.gmra.mrb[4].mxu0 %vm88_vm0, %v25_v21  ;;  %v69_v62 = vld [vmem:[%s29442_s1 + $0x88] sm:$0xff]  ;;  %v70_v63 = vld [vmem:[%s29442_s1 + $0x90] sm:$0xff]  ;;  %v71_v0 = vld [vmem:[%s29442_s1 + $0x98] sm:$0xff] }
  0x15   :  { %21935 = vmatmul.mubr.msk.f32.gmra.mrb[6].mxu1 %vm414_vm1, %v55_v22  ;;  %22914 = vmatprep.mubr.msk.f32.mxu0 %vm88_vm0, %v26_v23  ;;  %v72_v1 = vld [vmem:[%s29442_s1 + $0xa0] sm:$0xff]  ;;  %v73_v2 = vld [vmem:[%s29442_s1 + $0xa8] sm:$0xff]  ;;  %v74_v4 = vld [vmem:[%s29442_s1 + $0xb0] sm:$0xff] }
  0x16   :  { %599 = vmatprep.mubr.f32.mxu1 %v29463_v3  ;;  %v75_v5 = vld [vmem:[%s29442_s1 + $0xb8] sm:$0xff]  ;;  %v76_v6 = vld [vmem:[%s29442_s1 + $0xc0] sm:$0xff]  ;;  %v77_v7 = vld [vmem:[%s29442_s1 + $0xc8] sm:$0xff] }
  0x17   :  { %v78_v8 = vld [vmem:[%s29442_s1 + $0xd0] sm:$0xff]  ;;  %v79_v9 = vld [vmem:[%s29442_s1 + $0xd8] sm:$0xff]  ;;  %v80_v10 = vld [vmem:[%s29442_s1 + $0xe0] sm:$0xff] }
  0x18   :  { %22915 = vmatmul.mubr.msk.f32.gmra.mrb[6].mxu0 %vm88_vm0, %v27_v24  ;;  %v81_v11 = vld [vmem:[%s29442_s1 + $0xe8] sm:$0xff]  ;;  %v82_v12 = vld [vmem:[%s29442_s1 + $0xf0] sm:$0xff]  ;;  %v83_v13 = vld [vmem:[%s29442_s1 + $0xf8] sm:$0xff]  ;;  %s24801_s1 = smov 96  }
  0x19   :  { %21936 = vmatmul.mubr.msk.f32.gmra.mrb[8].mxu1 %vm414_vm1, %v56_v25  ;;  %22917 = vmatprep.mubr.msk.f32.mxu0 %vm88_vm0, %v28_v26 }
  0x1a   :  { %605 = vmatprep.mubr.f32.mxu1 %v29463_v3 }
  0x1c   :  { %22918 = vmatmul.mubr.msk.f32.gmra.mrb[8].mxu0 %vm88_vm0, %v29_v27 }
  0x1d   :  { %21937 = vmatmul.mubr.msk.f32.gmra.mrb[10].mxu1 %vm414_vm1, %v57_v28  ;;  %22920 = vmatprep.mubr.msk.f32.mxu0 %vm88_vm0, %v30_v29 }
  0x1e   :  { %611 = vmatprep.mubr.f32.mxu1 %v29463_v3 }
  0x20   :  { %22921 = vmatmul.mubr.msk.f32.gmra.mrb[10].mxu0 %vm88_vm0, %v31_v30 }
  0x21   :  { %21938 = vmatmul.mubr.msk.f32.gmra.mrb[12].mxu1 %vm414_vm1, %v58_v31  ;;  %22923 = vmatprep.mubr.msk.f32.mxu0 %vm88_vm0, %v32_v32 }
  0x22   :  { %617 = vmatprep.mubr.f32.mxu1 %v29463_v3 }
  0x24   :  { %22924 = vmatmul.mubr.msk.f32.gmra.mrb[12].mxu0 %vm88_vm0, %v33_v33 }
  0x25   :  { %21939 = vmatmul.mubr.msk.f32.gmra.mrb[14].mxu1 %vm414_vm1, %v59_v34  ;;  %22926 = vmatprep.mubr.msk.f32.mxu0 %vm88_vm0, %v34_v35 }
  0x26   :  { %623 = vmatprep.mubr.f32.mxu1 %v29463_v3 }
  0x28   :  { %22927 = vmatmul.mubr.msk.f32.gmra.mrb[14].mxu0 %vm88_vm0, %v35_v36 }
  0x29   :  { %21940 = vmatmul.mubr.msk.f32.gmra.mrb[16].mxu1 %vm414_vm1, %v60_v37  ;;  %22929 = vmatprep.mubr.msk.f32.mxu0 %vm88_vm0, %v36_v38 }
  0x2a   :  { %629 = vmatprep.mubr.f32.mxu1 %v29463_v3 }
  0x2c   :  { %22930 = vmatmul.mubr.msk.f32.gmra.mrb[16].mxu0 %vm88_vm0, %v37_v39 }
  0x2d   :  { %21941 = vmatmul.mubr.msk.f32.gmra.mrb[18].mxu1 %vm414_vm1, %v61_v40  ;;  %22932 = vmatprep.mubr.msk.f32.mxu0 %vm88_vm0, %v38_v41 }
  0x2e   :  { %635 = vmatprep.mubr.f32.mxu1 %v29463_v3 }
  0x30   :  { %22933 = vmatmul.mubr.msk.f32.gmra.mrb[18].mxu0 %vm88_vm0, %v39_v42 }
  0x31   :  { %21942 = vmatmul.mubr.msk.f32.gmra.mrb[20].mxu1 %vm414_vm1, %v62_v43  ;;  %22935 = vmatprep.mubr.msk.f32.mxu0 %vm88_vm0, %v40_v44 }
  0x32   :  { %641 = vmatprep.mubr.f32.mxu1 %v29463_v3 }
  0x34   :  { %22936 = vmatmul.mubr.msk.f32.gmra.mrb[20].mxu0 %vm88_vm0, %v41_v45 }
  0x35   :  { %21943 = vmatmul.mubr.msk.f32.gmra.mrb[22].mxu1 %vm414_vm1, %v63_v46  ;;  %22938 = vmatprep.mubr.msk.f32.mxu0 %vm88_vm0, %v42_v47 }
  0x36   :  { %647 = vmatprep.mubr.f32.mxu1 %v29463_v3 }
  0x38   :  { %22939 = vmatmul.mubr.msk.f32.gmra.mrb[22].mxu0 %vm88_vm0, %v43_v48 }
  0x39   :  { %21944 = vmatmul.mubr.msk.f32.gmra.mrb[24].mxu1 %vm414_vm1, %v64_v49  ;;  %22941 = vmatprep.mubr.msk.f32.mxu0 %vm88_vm0, %v44_v50 }
  0x3a   :  { %653 = vmatprep.mubr.f32.mxu1 %v29463_v3 }
  0x3c   :  { %22942 = vmatmul.mubr.msk.f32.gmra.mrb[24].mxu0 %vm88_vm0, %v45_v51 }
  0x3d   :  { %21945 = vmatmul.mubr.msk.f32.gmra.mrb[26].mxu1 %vm414_vm1, %v65_v52  ;;  %22944 = vmatprep.mubr.msk.f32.mxu0 %vm88_vm0, %v46_v53 }
  0x3e   :  { %659 = vmatprep.mubr.f32.mxu1 %v29463_v3 }
  0x40   :  { %22945 = vmatmul.mubr.msk.f32.gmra.mrb[26].mxu0 %vm88_vm0, %v47_v54 }
  0x41   :  { %21946 = vmatmul.mubr.msk.f32.gmra.mrb[28].mxu1 %vm414_vm1, %v66_v55  ;;  %22947 = vmatprep.mubr.msk.f32.mxu0 %vm88_vm0, %v48_v56 }
  0x42   :  { %665 = vmatprep.mubr.f32.mxu1 %v29463_v3 }
  0x44   :  { %22948 = vmatmul.mubr.msk.f32.gmra.mrb[28].mxu0 %vm88_vm0, %v49_v57 }
  0x45   :  { %21947 = vmatmul.mubr.msk.f32.gmra.mrb[30].mxu1 %vm414_vm1, %v67_v58  ;;  %22950 = vmatprep.mubr.msk.f32.mxu0 %vm88_vm0, %v50_v59 }
  0x46   :  { %671 = vmatprep.mubr.f32.mxu1 %v29463_v3 }
  0x48   :  { %22951 = vmatmul.mubr.msk.f32.gmra.mrb[30].mxu0 %vm88_vm0, %v51_v60 }
  0x49   :  { %21948 = vmatmul.mubr.msk.f32.gmra.mrb[32].mxu1 %vm414_vm1, %v68_v61  ;;  %22955 = vmatprep.mubr.msk.f32.mxu0 %vm24798_vm2, %v29463_v3 }
  0x4a   :  { %677 = vmatprep.mubr.f32.mxu1 %v29463_v3 }
  0x4d   :  { %21949 = vmatmul.mubr.msk.f32.gmra.mrb[34].mxu1 %vm414_vm1, %v69_v62 }
  0x4e   :  { %683 = vmatprep.mubr.f32.mxu1 %v29463_v3 }
  0x51   :  { %21950 = vmatmul.mubr.msk.f32.gmra.mrb[36].mxu1 %vm414_vm1, %v70_v63 }
  0x52   :  { %689 = vmatprep.mubr.f32.mxu1 %v29463_v3 }
  0x55   :  { %21951 = vmatmul.mubr.msk.f32.gmra.mrb[38].mxu1 %vm414_vm1, %v71_v0 }
  0x56   :  { %695 = vmatprep.mubr.f32.mxu1 %v29463_v3 }
  0x59   :  { %21952 = vmatmul.mubr.msk.f32.gmra.mrb[40].mxu1 %vm414_vm1, %v72_v1 }
  0x5a   :  { %701 = vmatprep.mubr.f32.mxu1 %v29463_v3 }
  0x5d   :  { %21953 = vmatmul.mubr.msk.f32.gmra.mrb[42].mxu1 %vm414_vm1, %v73_v2 }
  0x5e   :  { %707 = vmatprep.mubr.f32.mxu1 %v29463_v3 }
  0x61   :  { %21954 = vmatmul.mubr.msk.f32.gmra.mrb[44].mxu1 %vm414_vm1, %v74_v4 }
  0x62   :  { %713 = vmatprep.mubr.f32.mxu1 %v29463_v3 }
  0x65   :  { %21955 = vmatmul.mubr.msk.f32.gmra.mrb[46].mxu1 %vm414_vm1, %v75_v5 }
  0x66   :  { %719 = vmatprep.mubr.f32.mxu1 %v29463_v3 }
  0x69   :  { %21956 = vmatmul.mubr.msk.f32.gmra.mrb[48].mxu1 %vm414_vm1, %v76_v6 }
  0x6a   :  { %725 = vmatprep.mubr.f32.mxu1 %v29463_v3 }
  0x6d   :  { %21957 = vmatmul.mubr.msk.f32.gmra.mrb[50].mxu1 %vm414_vm1, %v77_v7 }
  0x6e   :  { %731 = vmatprep.mubr.f32.mxu1 %v29463_v3 }
  0x71   :  { %21958 = vmatmul.mubr.msk.f32.gmra.mrb[52].mxu1 %vm414_vm1, %v78_v8 }
  0x72   :  { %737 = vmatprep.mubr.f32.mxu1 %v29463_v3 }
  0x75   :  { %21959 = vmatmul.mubr.msk.f32.gmra.mrb[54].mxu1 %vm414_vm1, %v79_v9 }
  0x76   :  { %743 = vmatprep.mubr.f32.mxu1 %v29463_v3 }
  0x79   :  { %21960 = vmatmul.mubr.msk.f32.gmra.mrb[56].mxu1 %vm414_vm1, %v80_v10 }
  0x7a   :  { %749 = vmatprep.mubr.f32.mxu1 %v29463_v3 }
  0x7d   :  { %21961 = vmatmul.mubr.msk.f32.gmra.mrb[58].mxu1 %vm414_vm1, %v81_v11 }
  0x7e   :  { %755 = vmatprep.mubr.f32.mxu1 %v29463_v3 }
  0x81   :  { %21962 = vmatmul.mubr.msk.f32.gmra.mrb[60].mxu1 %vm414_vm1, %v82_v12 }
  0x82   :  { %761 = vmatprep.mubr.f32.mxu1 %v29463_v3 }
  0x85   :  { %21963 = vmatmul.mubr.msk.f32.gmra.mrb[62].mxu1 %vm414_vm1, %v83_v13 }
  0x86   :  { %23035 = vmatprep.mubr.msk.f32.mxu1 %vm24798_vm2, %v29463_v3 }
  0xdc   :  { %v25153_v14 = vpop.f32.mrb[0].mxu1 }
  0xdd   :  { %29647 = vst [vmem:[#allocation2_spill] sm:$0xff] %v25153_v14  ;;  %6401 = vrot.lane.b32.xlu1 %v25153_v14, %s24799_s27  ;;  %3555 = vrot.lane.b32.xlu0 %v25153_v14, %s24800_s28  ;;  %v25159_v15 = vpop.f32.mrb[1].mxu1 }
  0xde   :  { %29648 = vst [vmem:[#allocation3_spill] sm:$0xff] %v25159_v15  ;;  %22954 = vmatpush3.xpose.msk.msra.mxu0 %vm768_vm3, %v25153_v14 }
  0xdf   :  { %v25163_v16 = vpop.f32.mrb[0].mxu0  ;;  %22958 = vmatprep.subr.mxu0 %v29463_v3 }
  0xe0   :  { %29649 = vst [vmem:[#allocation4_spill] sm:$0xff] %v25163_v16  ;;  %v25166_v17 = vpop.f32.mrb[2].mxu1  ;;  %v25168_v18 = vpop.f32.mrb[1].mxu0 }
  0xe1   :  { %29650 = vst [vmem:[#allocation5_spill] sm:$0xff] %v25166_v17  ;;  %29651 = vst [vmem:[#allocation6_spill] sm:$0xff] %v25168_v18  ;;  %3633 = vrot.lane.b32.xlu0 %v25166_v17, %s24800_s28  ;;  %v25172_v19 = vpop.f32.mrb[3].mxu1  ;;  %3631 = vrot.lane.b32.xlu1 %v25163_v16, %s24800_s28 }
  0xe2   :  { %29652 = vst [vmem:[#allocation7_spill] sm:$0xff] %v25172_v19  ;;  %22956 = vmatmul.mubr.msk.f32.vlgmr.msra.gmra.mrb[32].mxu0 %vm768_vm3, %v25168_v18 }
  0xe3   :  { %22959 = vmatpush3.xpose.msk.msra.mxu0 %vm768_vm3, %v25166_v17  ;;  %22960 = vmatprep.mubr.msk.f32.mxu0 %vm24798_vm2, %v29463_v3  ;;  %v25182_v20 = vpop.f32.mrb[2].mxu0 }
  0xe4   :  { %29653 = vst [vmem:[#allocation8_spill] sm:$0xff] %v25182_v20  ;;  %v25184_v21 = vpop.f32.mrb[4].mxu1  ;;  %22963 = vmatprep.subr.mxu0 %v29463_v3  ;;  %v25187_v22 = vpop.f32.mrb[3].mxu0 }
  0xe5   :  { %29654 = vst [vmem:[#allocation9_spill] sm:$0xff] %v25184_v21  ;;  %29655 = vst [vmem:[#allocation10_spill] sm:$0xff] %v25187_v22  ;;  %6477 = vrot.lane.b32.xlu0 %v25166_v17, %s24799_s27  ;;  %v25191_v23 = vpop.f32.mrb[5].mxu1  ;;  %3553 = vrot.lane.b32.xlu1 %v25168_v18, %s24800_s28 }
  0xe6   :  { %29656 = vst [vmem:[#allocation11_spill] sm:$0xff] %v25191_v23  ;;  %22961 = vmatmul.mubr.msk.f32.vlgmr.msra.gmra.mrb[34].mxu0 %vm768_vm3, %v25163_v16 }
  0xe7   :  { %22964 = vmatpush3.xpose.msk.msra.mxu0 %vm768_vm3, %v25184_v21  ;;  %22965 = vmatprep.mubr.msk.f32.mxu0 %vm24798_vm2, %v29463_v3  ;;  %v25201_v24 = vpop.f32.mrb[4].mxu0 }
  0xe8   :  { %29657 = vst [vmem:[#allocation12_spill] sm:$0xff] %v25201_v24  ;;  %v25203_v25 = vpop.f32.mrb[6].mxu1  ;;  %22968 = vmatprep.subr.mxu0 %v29463_v3  ;;  %v25206_v26 = vpop.f32.mrb[5].mxu0 }
  0xe9   :  { %29658 = vst [vmem:[#allocation13_spill] sm:$0xff] %v25203_v25  ;;  %29659 = vst [vmem:[#allocation14_spill] sm:$0xff] %v25206_v26  ;;  %3711 = vrot.lane.b32.xlu0 %v25184_v21, %s24800_s28  ;;  %v25210_v27 = vpop.f32.mrb[7].mxu1  ;;  %3787 = vrot.lane.b32.xlu1 %v25182_v20, %s24800_s28 }
  0xea   :  { %29660 = vst [vmem:[#allocation15_spill] sm:$0xff] %v25210_v27  ;;  %22966 = vmatmul.mubr.msk.f32.vlgmr.msra.gmra.mrb[36].mxu0 %vm768_vm3, %v25187_v22 }
  0xeb   :  { %22969 = vmatpush3.xpose.msk.msra.mxu0 %vm768_vm3, %v25203_v25  ;;  %22970 = vmatprep.mubr.msk.f32.mxu0 %vm24798_vm2, %v29463_v3  ;;  %v25220_v28 = vpop.f32.mrb[6].mxu0 }
  0xec   :  { %29661 = vst [vmem:[#allocation16_spill] sm:$0xff] %v25220_v28  ;;  %v25222_v29 = vpop.f32.mrb[8].mxu1  ;;  %22973 = vmatprep.subr.mxu0 %v29463_v3  ;;  %v25225_v30 = vpop.f32.mrb[7].mxu0 }
  0xed   :  { %29662 = vst [vmem:[#allocation17_spill] sm:$0xff] %v25222_v29  ;;  %29663 = vst [vmem:[#allocation18_spill] sm:$0xff] %v25225_v30  ;;  %v25227_v31 = vpop.f32.mrb[9].mxu1  ;;  %6553 = vrot.lane.b32.xlu1 %v25184_v21, %s24799_s27  ;;  %3709 = vrot.lane.b32.xlu0 %v25187_v22, %s24800_s28 }
  0xee   :  { %29664 = vst [vmem:[#allocation19_spill] sm:$0xff] %v25227_v31  ;;  %22971 = vmatmul.mubr.msk.f32.vlgmr.msra.gmra.mrb[38].mxu0 %vm768_vm3, %v25182_v20 }
  0xef   :  { %22974 = vmatpush3.xpose.msk.msra.mxu0 %vm768_vm3, %v25222_v29  ;;  %22975 = vmatprep.mubr.msk.f32.mxu0 %vm24798_vm2, %v29463_v3  ;;  %v25239_v32 = vpop.f32.mrb[8].mxu0 }
  0xf0   :  { %29665 = vst [vmem:[#allocation20_spill] sm:$0xff] %v25239_v32  ;;  %v25241_v33 = vpop.f32.mrb[10].mxu1  ;;  %22978 = vmatprep.subr.mxu0 %v29463_v3  ;;  %v25244_v34 = vpop.f32.mrb[9].mxu0 }
  0xf1   :  { %29666 = vst [vmem:[#allocation21_spill] sm:$0xff] %v25241_v33  ;;  %29667 = vst [vmem:[#allocation22_spill] sm:$0xff] %v25244_v34  ;;  %v25246_v35 = vpop.f32.mrb[11].mxu1  ;;  %3789 = vrot.lane.b32.xlu1 %v25203_v25, %s24800_s28  ;;  %6629 = vrot.lane.b32.xlu0 %v25203_v25, %s24799_s27 }
  0xf2   :  { %29668 = vst [vmem:[#allocation23_spill] sm:$0xff] %v25246_v35  ;;  %22976 = vmatmul.mubr.msk.f32.vlgmr.msra.gmra.mrb[40].mxu0 %vm768_vm3, %v25206_v26 }
  0xf3   :  { %22979 = vmatpush3.xpose.msk.msra.mxu0 %vm768_vm3, %v25241_v33  ;;  %22980 = vmatprep.mubr.msk.f32.mxu0 %vm24798_vm2, %v29463_v3  ;;  %v25258_v36 = vpop.f32.mrb[10].mxu0 }
  0xf4   :  { %29669 = vst [vmem:[#allocation24_spill] sm:$0xff] %v25258_v36  ;;  %v25260_v37 = vpop.f32.mrb[12].mxu1  ;;  %22983 = vmatprep.subr.mxu0 %v29463_v3  ;;  %v25263_v38 = vpop.f32.mrb[11].mxu0 }
  0xf5   :  { %29670 = vst [vmem:[#allocation25_spill] sm:$0xff] %v25260_v37  ;;  %29671 = vst [vmem:[#allocation26_spill] sm:$0xff] %v25263_v38  ;;  %v25265_v39 = vpop.f32.mrb[13].mxu1  ;;  %3943 = vrot.lane.b32.xlu1 %v25201_v24, %s24800_s28  ;;  %3865 = vrot.lane.b32.xlu0 %v25206_v26, %s24800_s28 }
  0xf6   :  { %29672 = vst [vmem:[#allocation27_spill] sm:$0xff] %v25265_v39  ;;  %22981 = vmatmul.mubr.msk.f32.vlgmr.msra.gmra.mrb[42].mxu0 %vm768_vm3, %v25201_v24 }
  0xf7   :  { %22984 = vmatpush3.xpose.msk.msra.mxu0 %vm768_vm3, %v25260_v37  ;;  %22985 = vmatprep.mubr.msk.f32.mxu0 %vm24798_vm2, %v29463_v3  ;;  %v25277_v40 = vpop.f32.mrb[12].mxu0 }
  0xf8   :  { %29673 = vst [vmem:[#allocation28_spill] sm:$0xff] %v25277_v40  ;;  %v25279_v41 = vpop.f32.mrb[14].mxu1  ;;  %22988 = vmatprep.subr.mxu0 %v29463_v3  ;;  %v25282_v42 = vpop.f32.mrb[13].mxu0 }
  0xf9   :  { %29674 = vst [vmem:[#allocation29_spill] sm:$0xff] %v25279_v41  ;;  %29675 = vst [vmem:[#allocation30_spill] sm:$0xff] %v25282_v42  ;;  %v25284_v43 = vpop.f32.mrb[15].mxu1  ;;  %3867 = vrot.lane.b32.xlu0 %v25222_v29, %s24800_s28  ;;  %4099 = vrot.lane.b32.xlu1 %v25220_v28, %s24800_s28 }
  0xfa   :  { %29676 = vst [vmem:[#allocation31_spill] sm:$0xff] %v25284_v43  ;;  %22986 = vmatmul.mubr.msk.f32.vlgmr.msra.gmra.mrb[44].mxu0 %vm768_vm3, %v25225_v30 }
  0xfb   :  { %22989 = vmatpush3.xpose.msk.msra.mxu0 %vm768_vm3, %v25279_v41  ;;  %22990 = vmatprep.mubr.msk.f32.mxu0 %vm24798_vm2, %v29463_v3  ;;  %v25296_v44 = vpop.f32.mrb[14].mxu0 }
  0xfc   :  { %29677 = vst [vmem:[#allocation32_spill] sm:$0xff] %v25296_v44  ;;  %v25298_v45 = vpop.f32.mrb[16].mxu1  ;;  %22993 = vmatprep.subr.mxu0 %v29463_v3  ;;  %v25301_v46 = vpop.f32.mrb[15].mxu0 }
  0xfd   :  { %29678 = vst [vmem:[#allocation33_spill] sm:$0xff] %v25298_v45  ;;  %29679 = vst [vmem:[#allocation34_spill] sm:$0xff] %v25301_v46  ;;  %v25303_v47 = vpop.f32.mrb[17].mxu1  ;;  %6705 = vrot.lane.b32.xlu1 %v25222_v29, %s24799_s27  ;;  %4021 = vrot.lane.b32.xlu0 %v25225_v30, %s24800_s28 }
  0xfe   :  { %29680 = vst [vmem:[#allocation35_spill] sm:$0xff] %v25303_v47  ;;  %22991 = vmatmul.mubr.msk.f32.vlgmr.msra.gmra.mrb[46].mxu0 %vm768_vm3, %v25220_v28 }
  0xff   :  { %22994 = vmatpush3.xpose.msk.msra.mxu0 %vm768_vm3, %v25298_v45  ;;  %22995 = vmatprep.mubr.msk.f32.mxu0 %vm24798_vm2, %v29463_v3  ;;  %v25315_v48 = vpop.f32.mrb[16].mxu0 }
 0x100   :  { %29681 = vst [vmem:[#allocation36_spill] sm:$0xff] %v25315_v48  ;;  %v25317_v49 = vpop.f32.mrb[18].mxu1  ;;  %22998 = vmatprep.subr.mxu0 %v29463_v3  ;;  %v25320_v50 = vpop.f32.mrb[17].mxu0 }
 0x101   :  { %29682 = vst [vmem:[#allocation37_spill] sm:$0xff] %v25317_v49  ;;  %29683 = vst [vmem:[#allocation38_spill] sm:$0xff] %v25320_v50  ;;  %v25322_v51 = vpop.f32.mrb[19].mxu1  ;;  %3945 = vrot.lane.b32.xlu1 %v25241_v33, %s24800_s28  ;;  %6781 = vrot.lane.b32.xlu0 %v25241_v33, %s24799_s27 }
 0x102   :  { %29684 = vst [vmem:[#allocation39_spill] sm:$0xff] %v25322_v51  ;;  %22996 = vmatmul.mubr.msk.f32.vlgmr.msra.gmra.mrb[48].mxu0 %vm768_vm3, %v25244_v34 }
 0x103   :  { %22999 = vmatpush3.xpose.msk.msra.mxu0 %vm768_vm3, %v25317_v49  ;;  %23000 = vmatprep.mubr.msk.f32.mxu0 %vm24798_vm2, %v29463_v3  ;;  %v25334_v52 = vpop.f32.mrb[18].mxu0 }
 0x104   :  { %29685 = vst [vmem:[#allocation40_spill] sm:$0xff] %v25334_v52  ;;  %v25336_v53 = vpop.f32.mrb[20].mxu1  ;;  %23003 = vmatprep.subr.mxu0 %v29463_v3  ;;  %v25339_v54 = vpop.f32.mrb[19].mxu0 }
 0x105   :  { %29686 = vst [vmem:[#allocation41_spill] sm:$0xff] %v25336_v53  ;;  %29687 = vst [vmem:[#allocation42_spill] sm:$0xff] %v25339_v54  ;;  %v25341_v55 = vpop.f32.mrb[21].mxu1  ;;  %4255 = vrot.lane.b32.xlu1 %v25239_v32, %s24800_s28  ;;  %4177 = vrot.lane.b32.xlu0 %v25244_v34, %s24800_s28 }
 0x106   :  { %29688 = vst [vmem:[#allocation43_spill] sm:$0xff] %v25341_v55  ;;  %23001 = vmatmul.mubr.msk.f32.vlgmr.msra.gmra.mrb[50].mxu0 %vm768_vm3, %v25239_v32 }
 0x107   :  { %23004 = vmatpush3.xpose.msk.msra.mxu0 %vm768_vm3, %v25336_v53  ;;  %23005 = vmatprep.mubr.msk.f32.mxu0 %vm24798_vm2, %v29463_v3  ;;  %v25353_v56 = vpop.f32.mrb[20].mxu0 }
 0x108   :  { %29689 = vst [vmem:[#allocation44_spill] sm:$0xff] %v25353_v56  ;;  %v25355_v57 = vpop.f32.mrb[22].mxu1  ;;  %23008 = vmatprep.subr.mxu0 %v29463_v3  ;;  %v25358_v58 = vpop.f32.mrb[21].mxu0 }
 0x109   :  { %29690 = vst [vmem:[#allocation45_spill] sm:$0xff] %v25355_v57  ;;  %29691 = vst [vmem:[#allocation46_spill] sm:$0xff] %v25358_v58  ;;  %v25360_v59 = vpop.f32.mrb[23].mxu1  ;;  %4023 = vrot.lane.b32.xlu0 %v25260_v37, %s24800_s28  ;;  %4411 = vrot.lane.b32.xlu1 %v25258_v36, %s24800_s28 }
 0x10a   :  { %29692 = vst [vmem:[#allocation47_spill] sm:$0xff] %v25360_v59  ;;  %23006 = vmatmul.mubr.msk.f32.vlgmr.msra.gmra.mrb[52].mxu0 %vm768_vm3, %v25263_v38 }
 0x10b   :  { %23009 = vmatpush3.xpose.msk.msra.mxu0 %vm768_vm3, %v25355_v57  ;;  %23010 = vmatprep.mubr.msk.f32.mxu0 %vm24798_vm2, %v29463_v3  ;;  %v25372_v60 = vpop.f32.mrb[22].mxu0 }
 0x10c   :  { %29693 = vst [vmem:[#allocation48_spill] sm:$0xff] %v25372_v60  ;;  %v25374_v61 = vpop.f32.mrb[24].mxu1  ;;  %23013 = vmatprep.subr.mxu0 %v29463_v3  ;;  %v25377_v62 = vpop.f32.mrb[23].mxu0 }
 0x10d   :  { %29694 = vst [vmem:[#allocation49_spill] sm:$0xff] %v25374_v61  ;;  %29695 = vst [vmem:[#allocation50_spill] sm:$0xff] %v25377_v62  ;;  %v25379_v63 = vpop.f32.mrb[25].mxu1  ;;  %6857 = vrot.lane.b32.xlu1 %v25260_v37, %s24799_s27  ;;  %4333 = vrot.lane.b32.xlu0 %v25263_v38, %s24800_s28 }
 0x10e   :  { %29696 = vst [vmem:[#allocation51_spill] sm:$0xff] %v25379_v63  ;;  %23011 = vmatmul.mubr.msk.f32.vlgmr.msra.gmra.mrb[54].mxu0 %vm768_vm3, %v25258_v36 }
 0x10f   :  { %23014 = vmatpush3.xpose.msk.msra.mxu0 %vm768_vm3, %v25374_v61  ;;  %23015 = vmatprep.mubr.msk.f32.mxu0 %vm24798_vm2, %v29463_v3  ;;  %v25391_v0 = vpop.f32.mrb[24].mxu0 }
 0x110   :  { %29697 = vst [vmem:[#allocation52_spill] sm:$0xff] %v25391_v0  ;;  %v25393_v1 = vpop.f32.mrb[26].mxu1  ;;  %23018 = vmatprep.subr.mxu0 %v29463_v3  ;;  %v25396_v2 = vpop.f32.mrb[25].mxu0 }
 0x111   :  { %29698 = vst [vmem:[#allocation53_spill] sm:$0xff] %v25393_v1  ;;  %29699 = vst [vmem:[#allocation54_spill] sm:$0xff] %v25396_v2  ;;  %v25398_v4 = vpop.f32.mrb[27].mxu1  ;;  %4101 = vrot.lane.b32.xlu1 %v25279_v41, %s24800_s28  ;;  %6933 = vrot.lane.b32.xlu0 %v25279_v41, %s24799_s27 }
 0x112   :  { %29700 = vst [vmem:[#allocation55_spill] sm:$0xff] %v25398_v4  ;;  %23016 = vmatmul.mubr.msk.f32.vlgmr.msra.gmra.mrb[56].mxu0 %vm768_vm3, %v25282_v42 }
 0x113   :  { %23019 = vmatpush3.xpose.msk.msra.mxu0 %vm768_vm3, %v25393_v1  ;;  %23020 = vmatprep.mubr.msk.f32.mxu0 %vm24798_vm2, %v29463_v3  ;;  %v25410_v5 = vpop.f32.mrb[26].mxu0 }
 0x114   :  { %29701 = vst [vmem:[#allocation56_spill] sm:$0xff] %v25410_v5  ;;  %v25412_v6 = vpop.f32.mrb[28].mxu1  ;;  %23023 = vmatprep.subr.mxu0 %v29463_v3  ;;  %v25415_v7 = vpop.f32.mrb[27].mxu0 }
 0x115   :  { %29702 = vst [vmem:[#allocation57_spill] sm:$0xff] %v25412_v6  ;;  %29703 = vst [vmem:[#allocation58_spill] sm:$0xff] %v25415_v7  ;;  %v25417_v8 = vpop.f32.mrb[29].mxu1  ;;  %4567 = vrot.lane.b32.xlu1 %v25277_v40, %s24800_s28  ;;  %4489 = vrot.lane.b32.xlu0 %v25282_v42, %s24800_s28 }
 0x116   :  { %29704 = vst [vmem:[#allocation59_spill] sm:$0xff] %v25417_v8  ;;  %23021 = vmatmul.mubr.msk.f32.vlgmr.msra.gmra.mrb[58].mxu0 %vm768_vm3, %v25277_v40 }
 0x117   :  { %23024 = vmatpush3.xpose.msk.msra.mxu0 %vm768_vm3, %v25412_v6  ;;  %23025 = vmatprep.mubr.msk.f32.mxu0 %vm24798_vm2, %v29463_v3  ;;  %v25429_v9 = vpop.f32.mrb[28].mxu0 }
 0x118   :  { %29705 = vst [vmem:[#allocation60_spill] sm:$0xff] %v25429_v9  ;;  %v25431_v10 = vpop.f32.mrb[30].mxu1  ;;  %23028 = vmatprep.subr.mxu0 %v29463_v3  ;;  %v25434_v11 = vpop.f32.mrb[29].mxu0 }
 0x119   :  { %29706 = vst [vmem:[#allocation61_spill] sm:$0xff] %v25431_v10  ;;  %29707 = vst [vmem:[#allocation62_spill] sm:$0xff] %v25434_v11  ;;  %v25436_v12 = vpop.f32.mrb[31].mxu1  ;;  %4179 = vrot.lane.b32.xlu0 %v25298_v45, %s24800_s28  ;;  %4723 = vrot.lane.b32.xlu1 %v25296_v44, %s24800_s28 }
 0x11a   :  { %29708 = vst [vmem:[#allocation63_spill] sm:$0xff] %v25436_v12  ;;  %23026 = vmatmul.mubr.msk.f32.vlgmr.msra.gmra.mrb[60].mxu0 %vm768_vm3, %v25301_v46 }
 0x11b   :  { %23029 = vmatpush3.xpose.msk.msra.mxu0 %vm768_vm3, %v25431_v10  ;;  %23030 = vmatprep.mubr.msk.f32.mxu0 %vm24798_vm2, %v29463_v3  ;;  %v25448_v13 = vpop.f32.mrb[30].mxu0 }
 0x11c   :  { %29709 = vst [vmem:[#allocation64_spill] sm:$0xff] %v25448_v13  ;;  %v25450_v8 = vpop.f32.mrb[32].mxu1  ;;  %23038 = vmatprep.subr.mxu0 %v29463_v3  ;;  %v25453_v12 = vpop.f32.mrb[31].mxu0 }
 0x11d   :  { %29710 = vst [vmem:[#allocation65_spill] sm:$0xff] %v25450_v8  ;;  %29711 = vst [vmem:[#allocation66_spill] sm:$0xff] %v25453_v12  ;;  %v25455_v4 = vpop.f32.mrb[33].mxu1  ;;  %23034 = vmatpush3.xpose.msk.msra.mxu1 %vm768_vm3, %v25450_v8  ;;  %7009 = vrot.lane.b32.xlu1 %v25298_v45, %s24799_s27 }
 0x11e   :  { %29712 = vst [vmem:[#allocation67_spill] sm:$0xff] %v25455_v4  ;;  %4645 = vrot.lane.b32.xlu0 %v25301_v46, %s24800_s28  ;;  %23031 = vmatmul.mubr.msk.f32.vlgmr.msra.gmra.mrb[62].mxu0 %vm768_vm3, %v25296_v44 }
 0x11f   :  { %23040 = vmatprep.mubr.msk.f32.mxu0 %vm24798_vm2, %v29463_v3  ;;  %23043 = vmatprep.subr.mxu1 %v29463_v3 }
 0x120   :  { %v25468_v63 = vpop.f32.mrb[34].mxu1  ;;  %23036 = vmatmul.mubr.msk.f32.vlgmr.msra.gmra.mrb[64].mxu1 %vm768_vm3, %v25320_v50 }
 0x121   :  { %29713 = vst [vmem:[#allocation68_spill] sm:$0xff] %v25468_v63  ;;  %4257 = vrot.lane.b32.xlu1 %v25317_v49, %s24800_s28  ;;  %23039 = vmatpush3.xpose.msk.msra.mxu0 %vm768_vm3, %v25468_v63  ;;  %v25476_v4 = vpop.f32.mrb[35].mxu1 }
 0x122   :  { %29714 = vst [vmem:[#allocation69_spill] sm:$0xff] %v25476_v4  ;;  %7085 = vrot.lane.b32.xlu0 %v25317_v49, %s24799_s27  ;;  %23045 = vmatprep.mubr.msk.f32.mxu1 %vm24798_vm2, %v29463_v3 }
 0x123   :  { %23048 = vmatprep.subr.mxu0 %v29463_v3 }
 0x124   :  { %v25483_v59 = vpop.f32.mrb[36].mxu1  ;;  %23041 = vmatmul.mubr.msk.f32.vlgmr.msra.gmra.mrb[64].mxu0 %vm768_vm3, %v25315_v48 }
 0x125   :  { %29715 = vst [vmem:[#allocation70_spill] sm:$0xff] %v25483_v59  ;;  %4879 = vrot.lane.b32.xlu1 %v25315_v48, %s24800_s28  ;;  %23044 = vmatpush3.xpose.msk.msra.mxu1 %vm768_vm3, %v25483_v59  ;;  %v25491_v4 = vpop.f32.mrb[37].mxu1 }
 0x126   :  { %29716 = vst [vmem:[#allocation71_spill] sm:$0xff] %v25491_v4  ;;  %4801 = vrot.lane.b32.xlu0 %v25320_v50, %s24800_s28  ;;  %23050 = vmatprep.mubr.msk.f32.mxu0 %vm24798_vm2, %v29463_v3 }
 0x127   :  { %23053 = vmatprep.subr.mxu1 %v29463_v3 }
 0x128   :  { %v25498_v55 = vpop.f32.mrb[38].mxu1  ;;  %23046 = vmatmul.mubr.msk.f32.vlgmr.msra.gmra.mrb[66].mxu1 %vm768_vm3, %v25339_v54 }
 0x129   :  { %29717 = vst [vmem:[#allocation72_spill] sm:$0xff] %v25498_v55  ;;  %23049 = vmatpush3.xpose.msk.msra.mxu0 %vm768_vm3, %v25498_v55  ;;  %5035 = vrot.lane.b32.xlu1 %v25334_v52, %s24800_s28  ;;  %v25506_v4 = vpop.f32.mrb[39].mxu1 }
 0x12a   :  { %29718 = vst [vmem:[#allocation73_spill] sm:$0xff] %v25506_v4  ;;  %4335 = vrot.lane.b32.xlu0 %v25336_v53, %s24800_s28  ;;  %23055 = vmatprep.mubr.msk.f32.mxu1 %vm24798_vm2, %v29463_v3 }
 0x12b   :  { %23058 = vmatprep.subr.mxu0 %v29463_v3 }
 0x12c   :  { %v25513_v51 = vpop.f32.mrb[40].mxu1  ;;  %23051 = vmatmul.mubr.msk.f32.vlgmr.msra.gmra.mrb[66].mxu0 %vm768_vm3, %v25334_v52 }
 0x12d   :  { %29719 = vst [vmem:[#allocation74_spill] sm:$0xff] %v25513_v51  ;;  %7161 = vrot.lane.b32.xlu1 %v25336_v53, %s24799_s27  ;;  %23054 = vmatpush3.xpose.msk.msra.mxu1 %vm768_vm3, %v25513_v51  ;;  %v25521_v4 = vpop.f32.mrb[41].mxu1 }
 0x12e   :  { %29720 = vst [vmem:[#allocation75_spill] sm:$0xff] %v25521_v4  ;;  %4957 = vrot.lane.b32.xlu0 %v25339_v54, %s24800_s28  ;;  %23060 = vmatprep.mubr.msk.f32.mxu0 %vm24798_vm2, %v29463_v3 }
 0x12f   :  { %23063 = vmatprep.subr.mxu1 %v29463_v3 }
 0x130   :  { %v25528_v47 = vpop.f32.mrb[42].mxu1  ;;  %23056 = vmatmul.mubr.msk.f32.vlgmr.msra.gmra.mrb[68].mxu1 %vm768_vm3, %v25358_v58 }
 0x131   :  { %29721 = vst [vmem:[#allocation76_spill] sm:$0xff] %v25528_v47  ;;  %4413 = vrot.lane.b32.xlu1 %v25355_v57, %s24800_s28  ;;  %23059 = vmatpush3.xpose.msk.msra.mxu0 %vm768_vm3, %v25528_v47  ;;  %v25536_v4 = vpop.f32.mrb[43].mxu1 }
 0x132   :  { %29722 = vst [vmem:[#allocation77_spill] sm:$0xff] %v25536_v4  ;;  %7237 = vrot.lane.b32.xlu0 %v25355_v57, %s24799_s27  ;;  %23065 = vmatprep.mubr.msk.f32.mxu1 %vm24798_vm2, %v29463_v3 }
 0x133   :  { %23068 = vmatprep.subr.mxu0 %v29463_v3 }
 0x134   :  { %v25543_v43 = vpop.f32.mrb[44].mxu1  ;;  %23061 = vmatmul.mubr.msk.f32.vlgmr.msra.gmra.mrb[68].mxu0 %vm768_vm3, %v25353_v56 }
 0x135   :  { %29723 = vst [vmem:[#allocation78_spill] sm:$0xff] %v25543_v43  ;;  %5191 = vrot.lane.b32.xlu1 %v25353_v56, %s24800_s28  ;;  %23064 = vmatpush3.xpose.msk.msra.mxu1 %vm768_vm3, %v25543_v43  ;;  %v25551_v4 = vpop.f32.mrb[45].mxu1 }
 0x136   :  { %29724 = vst [vmem:[#allocation79_spill] sm:$0xff] %v25551_v4  ;;  %5113 = vrot.lane.b32.xlu0 %v25358_v58, %s24800_s28  ;;  %23070 = vmatprep.mubr.msk.f32.mxu0 %vm24798_vm2, %v29463_v3 }
 0x137   :  { %23073 = vmatprep.subr.mxu1 %v29463_v3 }
 0x138   :  { %v25558_v39 = vpop.f32.mrb[46].mxu1  ;;  %23066 = vmatmul.mubr.msk.f32.vlgmr.msra.gmra.mrb[70].mxu1 %vm768_vm3, %v25377_v62 }
 0x139   :  { %29725 = vst [vmem:[#allocation80_spill] sm:$0xff] %v25558_v39  ;;  %23069 = vmatpush3.xpose.msk.msra.mxu0 %vm768_vm3, %v25558_v39  ;;  %5347 = vrot.lane.b32.xlu1 %v25372_v60, %s24800_s28  ;;  %v25566_v4 = vpop.f32.mrb[47].mxu1 }
 0x13a   :  { %29726 = vst [vmem:[#allocation81_spill] sm:$0xff] %v25566_v4  ;;  %4491 = vrot.lane.b32.xlu0 %v25374_v61, %s24800_s28  ;;  %23075 = vmatprep.mubr.msk.f32.mxu1 %vm24798_vm2, %v29463_v3 }
 0x13b   :  { %23078 = vmatprep.subr.mxu0 %v29463_v3 }
 0x13c   :  { %v25573_v35 = vpop.f32.mrb[48].mxu1  ;;  %23071 = vmatmul.mubr.msk.f32.vlgmr.msra.gmra.mrb[70].mxu0 %vm768_vm3, %v25372_v60 }
 0x13d   :  { %29727 = vst [vmem:[#allocation82_spill] sm:$0xff] %v25573_v35  ;;  %7313 = vrot.lane.b32.xlu1 %v25374_v61, %s24799_s27  ;;  %23074 = vmatpush3.xpose.msk.msra.mxu1 %vm768_vm3, %v25573_v35  ;;  %v25581_v4 = vpop.f32.mrb[49].mxu1 }
 0x13e   :  { %29728 = vst [vmem:[#allocation83_spill] sm:$0xff] %v25581_v4  ;;  %5269 = vrot.lane.b32.xlu0 %v25377_v62, %s24800_s28  ;;  %23080 = vmatprep.mubr.msk.f32.mxu0 %vm24798_vm2, %v29463_v3 }
 0x13f   :  { %23083 = vmatprep.subr.mxu1 %v29463_v3 }
 0x140   :  { %v25588_v31 = vpop.f32.mrb[50].mxu1  ;;  %23076 = vmatmul.mubr.msk.f32.vlgmr.msra.gmra.mrb[72].mxu1 %vm768_vm3, %v25396_v2 }
 0x141   :  { %29729 = vst [vmem:[#allocation84_spill] sm:$0xff] %v25588_v31  ;;  %4569 = vrot.lane.b32.xlu1 %v25393_v1, %s24800_s28  ;;  %23079 = vmatpush3.xpose.msk.msra.mxu0 %vm768_vm3, %v25588_v31  ;;  %v25596_v4 = vpop.f32.mrb[51].mxu1 }
 0x142   :  { %29730 = vst [vmem:[#allocation85_spill] sm:$0xff] %v25596_v4  ;;  %7389 = vrot.lane.b32.xlu0 %v25393_v1, %s24799_s27  ;;  %23085 = vmatprep.mubr.msk.f32.mxu1 %vm24798_vm2, %v29463_v3 }
 0x143   :  { %23088 = vmatprep.subr.mxu0 %v29463_v3 }
 0x144   :  { %v25603_v27 = vpop.f32.mrb[52].mxu1  ;;  %23081 = vmatmul.mubr.msk.f32.vlgmr.msra.gmra.mrb[72].mxu0 %vm768_vm3, %v25391_v0 }
 0x145   :  { %29731 = vst [vmem:[#allocation86_spill] sm:$0xff] %v25603_v27  ;;  %5503 = vrot.lane.b32.xlu1 %v25391_v0, %s24800_s28  ;;  %23084 = vmatpush3.xpose.msk.msra.mxu1 %vm768_vm3, %v25603_v27  ;;  %v25611_v4 = vpop.f32.mrb[53].mxu1 }
 0x146   :  { %29732 = vst [vmem:[#allocation87_spill] sm:$0xff] %v25611_v4  ;;  %5425 = vrot.lane.b32.xlu0 %v25396_v2, %s24800_s28  ;;  %23090 = vmatprep.mubr.msk.f32.mxu0 %vm24798_vm2, %v29463_v3 }
 0x147   :  { %23093 = vmatprep.subr.mxu1 %v29463_v3 }
 0x148   :  { %v25618_v23 = vpop.f32.mrb[54].mxu1  ;;  %23086 = vmatmul.mubr.msk.f32.vlgmr.msra.gmra.mrb[74].mxu1 %vm768_vm3, %v25415_v7 }
 0x149   :  { %29733 = vst [vmem:[#allocation88_spill] sm:$0xff] %v25618_v23  ;;  %23089 = vmatpush3.xpose.msk.msra.mxu0 %vm768_vm3, %v25618_v23  ;;  %5659 = vrot.lane.b32.xlu1 %v25410_v5, %s24800_s28  ;;  %v25626_v4 = vpop.f32.mrb[55].mxu1 }
 0x14a   :  { %29734 = vst [vmem:[#allocation89_spill] sm:$0xff] %v25626_v4  ;;  %4647 = vrot.lane.b32.xlu0 %v25412_v6, %s24800_s28  ;;  %23095 = vmatprep.mubr.msk.f32.mxu1 %vm24798_vm2, %v29463_v3 }
 0x14b   :  { %23098 = vmatprep.subr.mxu0 %v29463_v3 }
 0x14c   :  { %v25633_v19 = vpop.f32.mrb[56].mxu1  ;;  %23091 = vmatmul.mubr.msk.f32.vlgmr.msra.gmra.mrb[74].mxu0 %vm768_vm3, %v25410_v5 }
 0x14d   :  { %29735 = vst [vmem:[#allocation90_spill] sm:$0xff] %v25633_v19  ;;  %7465 = vrot.lane.b32.xlu1 %v25412_v6, %s24799_s27  ;;  %23094 = vmatpush3.xpose.msk.msra.mxu1 %vm768_vm3, %v25633_v19  ;;  %v25641_v4 = vpop.f32.mrb[57].mxu1 }
 0x14e   :  { %29736 = vst [vmem:[#allocation91_spill] sm:$0xff] %v25641_v4  ;;  %5581 = vrot.lane.b32.xlu0 %v25415_v7, %s24800_s28  ;;  %23100 = vmatprep.mubr.msk.f32.mxu0 %vm24798_vm2, %v29463_v3 }
 0x14f   :  { %v25647_v15 = vpop.permute.xlu1 %6401  ;;  %v3556_v2 = vpop.permute.xlu0 %3555  ;;  %23103 = vmatprep.subr.mxu1 %v29463_v3 }
 0x150   :  { %v25650_v5 = vpop.f32.mrb[58].mxu1  ;;  %23096 = vmatmul.mubr.msk.f32.vlgmr.msra.gmra.mrb[76].mxu1 %vm768_vm3, %v25434_v11 }
 0x151   :  { %29737 = vst [vmem:[#allocation92_spill] sm:$0xff] %v25650_v5  ;;  %4725 = vrot.lane.b32.xlu1 %v25431_v10, %s24800_s28  ;;  %23099 = vmatpush3.xpose.msk.msra.mxu0 %vm768_vm3, %v25650_v5  ;;  %v25658_v4 = vpop.f32.mrb[59].mxu1 }
 0x152   :  { %29738 = vst [vmem:[#allocation93_spill] sm:$0xff] %v25658_v4  ;;  %7541 = vrot.lane.b32.xlu0 %v25431_v10, %s24799_s27  ;;  %23105 = vmatprep.mubr.msk.f32.mxu1 %vm24798_vm2, %v29463_v3 }
 0x153   :  { %v3634_v7 = vpop.permute.xlu0 %3633  ;;  %v3632_v0 = vpop.permute.xlu1 %3631  ;;  %23108 = vmatprep.subr.mxu0 %v29463_v3 }
 0x154   :  { %v25665_v62 = vpop.f32.mrb[60].mxu1  ;;  %23101 = vmatmul.mubr.msk.f32.vlgmr.msra.gmra.mrb[76].mxu0 %vm768_vm3, %v25429_v9 }
 0x155   :  { %29739 = vst [vmem:[#allocation94_spill] sm:$0xff] %v25665_v62  ;;  %5815 = vrot.lane.b32.xlu1 %v25429_v9, %s24800_s28  ;;  %23104 = vmatpush3.xpose.msk.msra.mxu1 %vm768_vm3, %v25665_v62  ;;  %v25673_v4 = vpop.f32.mrb[61].mxu1  ;;  %v29743_v9 = vmov 0.0  }
 0x156   :  { %29740 = vst [vmem:[#allocation95_spill] sm:$0xff] %v25673_v4  ;;  %5737 = vrot.lane.b32.xlu0 %v25434_v11, %s24800_s28  ;;  %23113 = vmatprep.subr.mxu1 %v29463_v3 }
 0x157   :  { %v25678_v60 = vpop.permute.xlu0 %6477  ;;  %v3554_v58 = vpop.permute.xlu1 %3553  ;;  %23110 = vmatprep.mubr.msk.f32.mxu0 %vm24798_vm2, %v29463_v3 }
 0x158   :  { %v25682_v56 = vpop.f32.mrb[62].mxu1  ;;  %23106 = vmatmul.mubr.msk.f32.vlgmr.msra.gmra.mrb[78].mxu1 %vm768_vm3, %v25453_v12 }
 0x159   :  { %29741 = vst [vmem:[#allocation96_spill] sm:$0xff] %v25682_v56  ;;  %23109 = vmatpush3.xpose.msk.msra.mxu0 %vm768_vm3, %v25682_v56  ;;  %5971 = vrot.lane.b32.xlu1 %v25448_v13, %s24800_s28  ;;  %v25690_v4 = vpop.f32.mrb[63].mxu1 }
 0x15a   :  { %29742 = vst [vmem:[#allocation97_spill] sm:$0xff] %v25690_v4  ;;  %4803 = vrot.lane.b32.xlu0 %v25450_v8, %s24800_s28  ;;  %23114 = vmatpush3.xpose.msk.msra.mxu1 %vm768_vm3, %v3556_v2 }
 0x15b   :  { %v3712_v11 = vpop.permute.xlu0 %3711  ;;  %v3788_v3 = vpop.permute.xlu1 %3787  ;;  %23115 = vmatprep.mubr.msk.f32.mxu1 %vm24798_vm2, %v29743_v9  ;;  %23118 = vmatprep.subr.mxu0 %v29743_v9 }
 0x15c   :  { %23111 = vmatmul.mubr.msk.f32.vlgmr.msra.gmra.mrb[78].mxu0 %vm768_vm3, %v25448_v13  ;;  %23123 = vmatprep.subr.mxu1 %v29743_v9 }
 0x15d   :  { %23116 = vmatmul.mubr.msk.f32.vlgmr.msra.gmra.mrb[80].mxu1 %vm768_vm3, %v3554_v58  ;;  %7617 = vrot.lane.b32.xlu1 %v25450_v8, %s24799_s27 }
 0x15e   :  { %23119 = vmatpush3.xpose.msk.msra.mxu0 %vm768_vm3, %v3634_v7  ;;  %5893 = vrot.lane.b32.xlu0 %v25453_v12, %s24800_s28 }
 0x15f   :  { %23124 = vmatpush3.xpose.msk.msra.mxu1 %vm768_vm3, %v3712_v11  ;;  %v25708_v2 = vpop.permute.xlu1 %6553  ;;  %v3710_v4 = vpop.permute.xlu0 %3709  ;;  %23120 = vmatprep.mubr.msk.f32.mxu0 %vm24798_vm2, %v29743_v9 }
 0x160   :  { %23125 = vmatprep.mubr.msk.f32.mxu1 %vm24798_vm2, %v29743_v9  ;;  %23128 = vmatprep.subr.mxu0 %v29743_v9 }
 0x161   :  { %23121 = vmatmul.mubr.msk.f32.vlgmr.msra.gmra.mrb[80].mxu0 %vm768_vm3, %v3632_v0  ;;  %4881 = vrot.lane.b32.xlu1 %v25468_v63, %s24800_s28 }
 0x162   :  { %4959 = vrot.lane.b32.xlu0 %v25483_v59, %s24800_s28  ;;  %23126 = vmatmul.mubr.msk.f32.vlgmr.msra.gmra.mrb[82].mxu1 %vm768_vm3, %v3710_v4 }
 0x163   :  { %v3790_v58 = vpop.permute.xlu1 %3789  ;;  %v25721_v7 = vpop.permute.xlu0 %6629  ;;  %23130 = vmatprep.mubr.msk.f32.mxu0 %vm24798_vm2, %v29743_v9  ;;  %23133 = vmatprep.subr.mxu1 %v29743_v9 }
 0x164   :  { %23129 = vmatpush3.xpose.msk.msra.mxu0 %vm768_vm3, %v3790_v58  ;;  %23135 = vmatprep.mubr.msk.f32.mxu1 %vm24798_vm2, %v29743_v9 }
 0x165   :  { %5037 = vrot.lane.b32.xlu1 %v25498_v55, %s24800_s28  ;;  %23138 = vmatprep.subr.mxu0 %v29743_v9 }
 0x166   :  { %5115 = vrot.lane.b32.xlu0 %v25513_v51, %s24800_s28 }
 0x167   :  { %v3944_v0 = vpop.permute.xlu1 %3943  ;;  %v3866_v4 = vpop.permute.xlu0 %3865  ;;  %23131 = vmatmul.mubr.msk.f32.vlgmr.msra.gmra.mrb[82].mxu0 %vm768_vm3, %v3788_v3 }
 0x168   :  { %23140 = vmatprep.mubr.msk.f32.mxu0 %vm24798_vm2, %v29743_v9 }
 0x169   :  { %7769 = vrot.lane.b32.xlu1 %v25483_v59, %s24799_s27 }
 0x16a   :  { %7693 = vrot.lane.b32.xlu0 %v25468_v63, %s24799_s27 }
 0x16b   :  { %v3868_v11 = vpop.permute.xlu0 %3867  ;;  %v4100_v58 = vpop.permute.xlu1 %4099 }
 0x16c   :  { %23134 = vmatpush3.xpose.msk.msra.mxu1 %vm768_vm3, %v3868_v11 }
 0x16d   :  { %5193 = vrot.lane.b32.xlu1 %v25528_v47, %s24800_s28  ;;  %23143 = vmatprep.subr.mxu1 %v29743_v9 }
 0x16e   :  { %5271 = vrot.lane.b32.xlu0 %v25543_v43, %s24800_s28 }
 0x16f   :  { %v25747_v3 = vpop.permute.xlu1 %6705  ;;  %v4022_v12 = vpop.permute.xlu0 %4021  ;;  %23136 = vmatmul.mubr.msk.f32.vlgmr.msra.gmra.mrb[84].mxu1 %vm768_vm3, %v3866_v4 }
 0x170   :  { %23145 = vmatprep.mubr.msk.f32.mxu1 %vm24798_vm2, %v29743_v9 }
 0x171   :  { %5349 = vrot.lane.b32.xlu1 %v25558_v39, %s24800_s28 }
 0x172   :  { %5427 = vrot.lane.b32.xlu0 %v25573_v35, %s24800_s28 }
 0x173   :  { %v3946_v11 = vpop.permute.xlu1 %3945  ;;  %v25756_v13 = vpop.permute.xlu0 %6781 }
 0x174   :  { %23139 = vmatpush3.xpose.msk.msra.mxu0 %vm768_vm3, %v3946_v11 }
 0x175   :  { %5505 = vrot.lane.b32.xlu1 %v25588_v31, %s24800_s28  ;;  %23148 = vmatprep.subr.mxu0 %v29743_v9 }
 0x176   :  { %5583 = vrot.lane.b32.xlu0 %v25603_v27, %s24800_s28 }
 0x177   :  { %v4256_v4 = vpop.permute.xlu1 %4255  ;;  %v4178_v54 = vpop.permute.xlu0 %4177  ;;  %23141 = vmatmul.mubr.msk.f32.vlgmr.msra.gmra.mrb[84].mxu0 %vm768_vm3, %v3944_v0 }
 0x178   :  { %23150 = vmatprep.mubr.msk.f32.mxu0 %vm24798_vm2, %v29743_v9 }
 0x179   :  { %5661 = vrot.lane.b32.xlu1 %v25618_v23, %s24800_s28 }
 0x17a   :  { %5739 = vrot.lane.b32.xlu0 %v25633_v19, %s24800_s28 }
 0x17b   :  { %v4024_v11 = vpop.permute.xlu0 %4023  ;;  %v4412_v52 = vpop.permute.xlu1 %4411 }
 0x17c   :  { %23144 = vmatpush3.xpose.msk.msra.mxu1 %vm768_vm3, %v4024_v11 }
 0x17d   :  { %5817 = vrot.lane.b32.xlu1 %v25650_v5, %s24800_s28  ;;  %23153 = vmatprep.subr.mxu1 %v29743_v9 }
 0x17e   :  { %5895 = vrot.lane.b32.xlu0 %v25665_v62, %s24800_s28 }
 0x17f   :  { %v25777_v0 = vpop.permute.xlu1 %6857  ;;  %v4334_v50 = vpop.permute.xlu0 %4333  ;;  %23146 = vmatmul.mubr.msk.f32.vlgmr.msra.gmra.mrb[86].mxu1 %vm768_vm3, %v4022_v12 }
 0x180   :  { %23155 = vmatprep.mubr.msk.f32.mxu1 %vm24798_vm2, %v29743_v9 }
 0x181   :  { %5973 = vrot.lane.b32.xlu1 %v25682_v56, %s24800_s28 }
 0x182   :  { %7845 = vrot.lane.b32.xlu0 %v25498_v55, %s24799_s27 }
 0x183   :  { %v4102_v11 = vpop.permute.xlu1 %4101  ;;  %v25786_v48 = vpop.permute.xlu0 %6933 }
 0x184   :  { %23149 = vmatpush3.xpose.msk.msra.mxu0 %vm768_vm3, %v4102_v11 }
 0x185   :  { %23158 = vmatprep.subr.mxu0 %v29743_v9 }
 0x187   :  { %v4568_v46 = vpop.permute.xlu1 %4567  ;;  %v4490_v44 = vpop.permute.xlu0 %4489  ;;  %23151 = vmatmul.mubr.msk.f32.vlgmr.msra.gmra.mrb[86].mxu0 %vm768_vm3, %v4100_v58 }
 0x188   :  { %23160 = vmatprep.mubr.msk.f32.mxu0 %vm24798_vm2, %v29743_v9 }
 0x18b   :  { %v4180_v12 = vpop.permute.xlu0 %4179  ;;  %v25793_v42 = vpop.permute.xlu1 %4723 }
 0x18c   :  { %23154 = vmatpush3.xpose.msk.msra.mxu1 %vm768_vm3, %v4180_v12 }
 0x18d   :  { %23163 = vmatprep.subr.mxu1 %v29743_v9 }
 0x18f   :  { %v25797_v40 = vpop.permute.xlu1 %7009  ;;  %23156 = vmatmul.mubr.msk.f32.vlgmr.msra.gmra.mrb[88].mxu1 %vm768_vm3, %v4178_v54 }
 0x190   :  { %v4646_v11 = vpop.permute.xlu0 %4645  ;;  %23165 = vmatprep.mubr.msk.f32.mxu1 %vm24798_vm2, %v29743_v9 }
 0x193   :  { %v4258_v38 = vpop.permute.xlu1 %4257 }
 0x194   :  { %v25802_v58 = vpop.permute.xlu0 %7085  ;;  %23159 = vmatpush3.xpose.msk.msra.mxu0 %vm768_vm3, %v4258_v38 }
 0x195   :  { %23168 = vmatprep.subr.mxu0 %v29743_v9 }
 0x197   :  { %v25806_v36 = vpop.permute.xlu1 %4879  ;;  %23161 = vmatmul.mubr.msk.f32.vlgmr.msra.gmra.mrb[88].mxu0 %vm768_vm3, %v4256_v4 }
 0x198   :  { %v25809_v12 = vpop.permute.xlu0 %4801  ;;  %23170 = vmatprep.mubr.msk.f32.mxu0 %vm24798_vm2, %v29743_v9 }
 0x19b   :  { %v25813_v54 = vpop.permute.xlu1 %5035 }
 0x19c   :  { %v4336_v34 = vpop.permute.xlu0 %4335 }
 0x19d   :  { %23164 = vmatpush3.xpose.msk.msra.mxu1 %vm768_vm3, %v4336_v34 }
 0x19e   :  { %23173 = vmatprep.subr.mxu1 %v29743_v9 }
 0x19f   :  { %v25817_v32 = vpop.permute.xlu1 %7161 }
 0x1a0   :  { %v25819_v38 = vpop.permute.xlu0 %4957  ;;  %23166 = vmatmul.mubr.msk.f32.vlgmr.msra.gmra.mrb[90].mxu1 %vm768_vm3, %v4334_v50 }
 0x1a1   :  { %23175 = vmatprep.mubr.msk.f32.mxu1 %vm24798_vm2, %v29743_v9 }
 0x1a3   :  { %v4414_v4 = vpop.permute.xlu1 %4413 }
 0x1a4   :  { %v25824_v30 = vpop.permute.xlu0 %7237  ;;  %23169 = vmatpush3.xpose.msk.msra.mxu0 %vm768_vm3, %v4414_v4 }
 0x1a5   :  { %23178 = vmatprep.subr.mxu0 %v29743_v9 }
 0x1a7   :  { %v25828_v28 = vpop.permute.xlu1 %5191  ;;  %23171 = vmatmul.mubr.msk.f32.vlgmr.msra.gmra.mrb[90].mxu0 %vm768_vm3, %v4412_v52 }
 0x1a8   :  { %v25831_v34 = vpop.permute.xlu0 %5113  ;;  %23180 = vmatprep.mubr.msk.f32.mxu0 %vm24798_vm2, %v29743_v9 }
 0x1ab   :  { %v25835_v50 = vpop.permute.xlu1 %5347 }
 0x1ac   :  { %v4492_v26 = vpop.permute.xlu0 %4491 }
 0x1ad   :  { %23174 = vmatpush3.xpose.msk.msra.mxu1 %vm768_vm3, %v4492_v26 }
 0x1ae   :  { %23183 = vmatprep.subr.mxu1 %v29743_v9 }
 0x1af   :  { %v25839_v24 = vpop.permute.xlu1 %7313 }
 0x1b0   :  { %v25841_v4 = vpop.permute.xlu0 %5269  ;;  %23176 = vmatmul.mubr.msk.f32.vlgmr.msra.gmra.mrb[92].mxu1 %vm768_vm3, %v4490_v44 }
 0x1b1   :  { %23185 = vmatprep.mubr.msk.f32.mxu1 %vm24798_vm2, %v29743_v9 }
 0x1b3   :  { %v4570_v52 = vpop.permute.xlu1 %4569 }
 0x1b4   :  { %v25846_v22 = vpop.permute.xlu0 %7389  ;;  %23179 = vmatpush3.xpose.msk.msra.mxu0 %vm768_vm3, %v4570_v52 }
 0x1b5   :  { %29744 = vst [vmem:[#allocation98_spill] sm:$0xff] %v25846_v22  ;;  %v25849_v20 = vpop.f32.mrb[32].mxu0  ;;  %23188 = vmatprep.subr.mxu0 %v29743_v9 }
 0x1b6   :  { %v3201_v26 = vsel %vm768_vm3, %v25849_v20, -inf  ;;  %v22957_v18 = vpop.f32.mrb[33].mxu0 }
 0x1b7   :  { %v25854_v16 = vpop.permute.xlu1 %5503  ;;  %23181 = vmatmul.mubr.msk.f32.vlgmr.msra.gmra.mrb[92].mxu0 %vm768_vm3, %v4568_v46  ;;  %3202 = vmax.xlane.f32.xlu1 %v3201_v26 }
 0x1b8   :  { %v25857_v44 = vpop.permute.xlu0 %5425  ;;  %23190 = vmatprep.mubr.msk.f32.mxu0 %vm24798_vm2, %v29743_v9 }
 0x1b9   :  { %v25861_v55 = vpop.f32.mrb[34].mxu0 }
 0x1ba   :  { %v3204_v52 = vsel %vm768_vm3, %v25861_v55, -inf  ;;  %v22962_v59 = vpop.f32.mrb[35].mxu0 }
 0x1bb   :  { %v25865_v63 = vpop.permute.xlu1 %5659  ;;  %3205 = vmax.xlane.f32.xlu0 %v3204_v52 }
 0x1bc   :  { %v4648_v18 = vpop.permute.xlu0 %4647 }
 0x1bd   :  { %23184 = vmatpush3.xpose.msk.msra.mxu1 %vm768_vm3, %v4648_v18  ;;  %v25868_v8 = vpop.f32.mrb[36].mxu0 }
 0x1be   :  { %v3207_v46 = vsel %vm768_vm3, %v25868_v8, -inf  ;;  %v22967_v26 = vpop.f32.mrb[37].mxu0  ;;  %23193 = vmatprep.subr.mxu1 %v29743_v9 }
 0x1bf   :  { %v25873_v10 = vpop.permute.xlu1 %7465  ;;  %3208 = vmax.xlane.f32.xlu1 %v3207_v46 }
 0x1c0   :  { %29745 = vst [vmem:[#allocation99_spill] sm:$0xff] %v25873_v10  ;;  %v25875_v6 = vpop.permute.xlu0 %5581  ;;  %23186 = vmatmul.mubr.msk.f32.vlgmr.msra.gmra.mrb[94].mxu1 %vm768_vm3, %v4646_v11 }
 0x1c1   :  { %v25878_v59 = vpop.f32.mrb[38].mxu0  ;;  %23195 = vmatprep.mubr.msk.f32.mxu1 %vm24798_vm2, %v29743_v9 }
 0x1c2   :  { %v3210_v52 = vsel %vm768_vm3, %v25878_v59, -inf  ;;  %v22972_v18 = vpop.f32.mrb[39].mxu0 }
 0x1c3   :  { %v4726_v1 = vpop.permute.xlu1 %4725  ;;  %3211 = vmax.xlane.f32.xlu0 %v3210_v52 }
 0x1c4   :  { %v25884_v26 = vpop.permute.xlu0 %7541  ;;  %23189 = vmatpush3.xpose.msk.msra.mxu0 %vm768_vm3, %v4726_v1 }
 0x1c5   :  { %29746 = vst [vmem:[#allocation100_spill] sm:$0xff] %v25884_v26  ;;  %v25887_v46 = vpop.f32.mrb[40].mxu0  ;;  %23198 = vmatprep.subr.mxu0 %v29743_v9 }
 0x1c6   :  { %29747 = vst [vmem:[#allocation101_spill] sm:$0xff] %v25887_v46  ;;  %v3213_v11 = vsel %vm768_vm3, %v25887_v46, -inf  ;;  %v22977_v61 = vpop.f32.mrb[41].mxu0 }
 0x1c7   :  { %v25892_v57 = vpop.permute.xlu1 %5815  ;;  %23191 = vmatmul.mubr.msk.f32.vlgmr.msra.gmra.mrb[94].mxu0 %vm768_vm3, %v25793_v42  ;;  %3214 = vmax.xlane.f32.xlu1 %v3213_v11 }
 0x1c8   :  { %v25896_v18 = vpop.permute.xlu0 %5737  ;;  %23200 = vmatprep.mubr.msk.f32.mxu0 %vm24798_vm2, %v29743_v9 }
 0x1c9   :  { %v25900_v1 = vpop.f32.mrb[42].mxu0 }
 0x1ca   :  { %29748 = vst [vmem:[#allocation102_spill] sm:$0xff] %v25900_v1  ;;  %v3216_v52 = vsel %vm768_vm3, %v25900_v1, -inf  ;;  %v22982_v53 = vpop.f32.mrb[43].mxu0 }
 0x1cb   :  { %v25904_v49 = vpop.permute.xlu1 %5971  ;;  %3217 = vmax.xlane.f32.xlu0 %v3216_v52 }
 0x1cc   :  { %v4804_v61 = vpop.permute.xlu0 %4803 }
 0x1cd   :  { %23194 = vmatpush3.xpose.msk.msra.mxu1 %vm768_vm3, %v4804_v61  ;;  %v25907_v45 = vpop.f32.mrb[44].mxu0 }
 0x1ce   :  { %29749 = vst [vmem:[#allocation103_spill] sm:$0xff] %v25907_v45  ;;  %v3219_v42 = vsel %vm768_vm3, %v25907_v45, -inf  ;;  %v22987_v11 = vpop.f32.mrb[45].mxu0  ;;  %23203 = vmatprep.subr.mxu1 %v29743_v9 }
 0x1cf   :  { %v25912_v41 = vpop.permute.xlu1 %7617  ;;  %3220 = vmax.xlane.f32.xlu1 %v3219_v42 }
 0x1d0   :  { %29750 = vst [vmem:[#allocation104_spill] sm:$0xff] %v25912_v41  ;;  %v25914_v37 = vpop.permute.xlu0 %5893  ;;  %23196 = vmatmul.mubr.msk.f32.vlgmr.msra.gmra.mrb[96].mxu1 %vm768_vm3, %v25809_v12 }
 0x1d1   :  { %v25918_v53 = vpop.f32.mrb[46].mxu0  ;;  %23205 = vmatprep.mubr.msk.f32.mxu1 %vm24798_vm2, %v29743_v9 }
 0x1d2   :  { %29751 = vst [vmem:[#allocation105_spill] sm:$0xff] %v25918_v53  ;;  %v3222_v52 = vsel %vm768_vm3, %v25918_v53, -inf  ;;  %v22992_v61 = vpop.f32.mrb[47].mxu0 }
 0x1d3   :  { %v4882_v11 = vpop.permute.xlu1 %4881  ;;  %3223 = vmax.xlane.f32.xlu0 %v3222_v52 }
 0x1d4   :  { %v4960_v33 = vpop.permute.xlu0 %4959  ;;  %23199 = vmatpush3.xpose.msk.msra.mxu0 %vm768_vm3, %v4882_v11 }
 0x1d5   :  { %23204 = vmatpush3.xpose.msk.msra.mxu1 %vm768_vm3, %v4960_v33  ;;  %v25926_v42 = vpop.f32.mrb[48].mxu0  ;;  %23208 = vmatprep.subr.mxu0 %v29743_v9 }
 0x1d6   :  { %29752 = vst [vmem:[#allocation106_spill] sm:$0xff] %v25926_v42  ;;  %23213 = vmatprep.subr.mxu1 %v29743_v9  ;;  %v3225_v12 = vsel %vm768_vm3, %v25926_v42, -inf  ;;  %v22997_v29 = vpop.f32.mrb[49].mxu0 }
 0x1d7   :  { %v5038_v25 = vpop.permute.xlu1 %5037  ;;  %23201 = vmatmul.mubr.msk.f32.vlgmr.msra.gmra.mrb[96].mxu0 %vm768_vm3, %v25806_v36  ;;  %3226 = vmax.xlane.f32.xlu1 %v3225_v12 }
 0x1d8   :  { %v5116_v52 = vpop.permute.xlu0 %5115  ;;  %23206 = vmatmul.mubr.msk.f32.vlgmr.msra.gmra.mrb[98].mxu1 %vm768_vm3, %v25819_v38  ;;  %23209 = vmatpush3.xpose.msk.msra.mxu0 %vm768_vm3, %v5038_v25 }
 0x1d9   :  { %23214 = vmatpush3.xpose.msk.msra.mxu1 %vm768_vm3, %v5116_v52  ;;  %v25938_v33 = vpop.f32.mrb[50].mxu0  ;;  %23210 = vmatprep.mubr.msk.f32.mxu0 %vm24798_vm2, %v29743_v9 }
 0x1da   :  { %29753 = vst [vmem:[#allocation107_spill] sm:$0xff] %v25938_v33  ;;  %23215 = vmatprep.mubr.msk.f32.mxu1 %vm24798_vm2, %v29743_v9  ;;  %v3228_v29 = vsel %vm768_vm3, %v25938_v33, -inf  ;;  %v23002_v36 = vpop.f32.mrb[51].mxu0  ;;  %23218 = vmatprep.subr.mxu0 %v29743_v9 }
 0x1db   :  { %v25947_v61 = vpop.permute.xlu1 %7769  ;;  %23211 = vmatmul.mubr.msk.f32.vlgmr.msra.gmra.mrb[98].mxu0 %vm768_vm3, %v25813_v54  ;;  %3229 = vmax.xlane.f32.xlu0 %v3228_v29 }
 0x1dc   :  { %29754 = vst [vmem:[#allocation108_spill] sm:$0xff] %v25947_v61  ;;  %v25951_v25 = vpop.permute.xlu0 %7693  ;;  %23216 = vmatmul.mubr.msk.f32.vlgmr.msra.gmra.mrb[100].mxu1 %vm768_vm3, %v25831_v34  ;;  %23223 = vmatprep.subr.mxu1 %v29743_v9 }
 0x1dd   :  { %29755 = vst [vmem:[#allocation109_spill] sm:$0xff] %v25951_v25  ;;  %v25956_v38 = vpop.f32.mrb[52].mxu0  ;;  %23220 = vmatprep.mubr.msk.f32.mxu0 %vm24798_vm2, %v29743_v9  ;;  %23225 = vmatprep.mubr.msk.f32.mxu1 %vm24798_vm2, %v29743_v9 }
 0x1de   :  { %29756 = vst [vmem:[#allocation110_spill] sm:$0xff] %v25956_v38  ;;  %v3231_v11 = vsel %vm768_vm3, %v25956_v38, -inf  ;;  %v23007_v54 = vpop.f32.mrb[53].mxu0 }
 0x1df   :  { %v5194_v12 = vpop.permute.xlu1 %5193  ;;  %3232 = vmax.xlane.f32.xlu1 %v3231_v11 }
 0x1e0   :  { %v5272_v52 = vpop.permute.xlu0 %5271  ;;  %23219 = vmatpush3.xpose.msk.msra.mxu0 %vm768_vm3, %v5194_v12 }
 0x1e1   :  { %23224 = vmatpush3.xpose.msk.msra.mxu1 %vm768_vm3, %v5272_v52  ;;  %v25966_v34 = vpop.f32.mrb[54].mxu0  ;;  %23228 = vmatprep.subr.mxu0 %v29743_v9 }
 0x1e2   :  { %29757 = vst [vmem:[#allocation111_spill] sm:$0xff] %v25966_v34  ;;  %23233 = vmatprep.subr.mxu1 %v29743_v9  ;;  %v3234_v29 = vsel %vm768_vm3, %v25966_v34, -inf  ;;  %v23012_v36 = vpop.f32.mrb[55].mxu0 }
 0x1e3   :  { %v5350_v21 = vpop.permute.xlu1 %5349  ;;  %23221 = vmatmul.mubr.msk.f32.vlgmr.msra.gmra.mrb[100].mxu0 %vm768_vm3, %v25828_v28  ;;  %3235 = vmax.xlane.f32.xlu0 %v3234_v29 }
 0x1e4   :  { %v5428_v11 = vpop.permute.xlu0 %5427  ;;  %23226 = vmatmul.mubr.msk.f32.vlgmr.msra.gmra.mrb[102].mxu1 %vm768_vm3, %v25841_v4  ;;  %23229 = vmatpush3.xpose.msk.msra.mxu0 %vm768_vm3, %v5350_v21 }
 0x1e5   :  { %23234 = vmatpush3.xpose.msk.msra.mxu1 %vm768_vm3, %v5428_v11  ;;  %v25978_v54 = vpop.f32.mrb[56].mxu0  ;;  %23230 = vmatprep.mubr.msk.f32.mxu0 %vm24798_vm2, %v29743_v9 }
 0x1e6   :  { %29758 = vst [vmem:[#allocation112_spill] sm:$0xff] %v25978_v54  ;;  %23235 = vmatprep.mubr.msk.f32.mxu1 %vm24798_vm2, %v29743_v9  ;;  %23238 = vmatprep.subr.mxu0 %v29743_v9  ;;  %v3237_v28 = vsel %vm768_vm3, %v25978_v54, -inf  ;;  %v23017_v12 = vpop.f32.mrb[57].mxu0 }
 0x1e7   :  { %v5506_v52 = vpop.permute.xlu1 %5505  ;;  %23231 = vmatmul.mubr.msk.f32.vlgmr.msra.gmra.mrb[102].mxu0 %vm768_vm3, %v25835_v50  ;;  %23243 = vmatprep.subr.mxu1 %v29743_v9 }
 0x1e8   :  { %v5584_v21 = vpop.permute.xlu0 %5583  ;;  %23236 = vmatmul.mubr.msk.f32.vlgmr.msra.gmra.mrb[104].mxu1 %vm768_vm3, %v25857_v44  ;;  %3238 = vmax.xlane.f32.xlu1 %v3237_v28 }
 0x1e9   :  { %23239 = vmatpush3.xpose.msk.msra.mxu0 %vm768_vm3, %v5506_v52  ;;  %23244 = vmatpush3.xpose.msk.msra.mxu1 %vm768_vm3, %v5584_v21  ;;  %v25994_v4 = vpop.f32.mrb[58].mxu0 }
 0x1ea   :  { %29759 = vst [vmem:[#allocation113_spill] sm:$0xff] %v25994_v4  ;;  %23240 = vmatprep.mubr.msk.f32.mxu0 %vm24798_vm2, %v29743_v9  ;;  %23245 = vmatprep.mubr.msk.f32.mxu1 %vm24798_vm2, %v29743_v9  ;;  %v3240_v50 = vsel %vm768_vm3, %v25994_v4, -inf  ;;  %v23022_v29 = vpop.f32.mrb[59].mxu0 }
 0x1eb   :  { %v5662_v36 = vpop.permute.xlu1 %5661  ;;  %23248 = vmatprep.subr.mxu0 %v29743_v9  ;;  %23253 = vmatprep.subr.mxu1 %v29743_v9 }
 0x1ec   :  { %23241 = vmatmul.mubr.msk.f32.vlgmr.msra.gmra.mrb[104].mxu0 %vm768_vm3, %v25854_v16  ;;  %v5740_v44 = vpop.permute.xlu0 %5739  ;;  %23246 = vmatmul.mubr.msk.f32.vlgmr.msra.gmra.mrb[106].mxu1 %vm768_vm3, %v25875_v6 }
 0x1ed   :  { %3241 = vmax.xlane.f32.xlu0 %v3240_v50  ;;  %23249 = vmatpush3.xpose.msk.msra.mxu0 %vm768_vm3, %v5662_v36  ;;  %v26009_v11 = vpop.f32.mrb[60].mxu0 }
 0x1ee   :  { %29760 = vst [vmem:[#allocation114_spill] sm:$0xff] %v26009_v11  ;;  %23254 = vmatpush3.xpose.msk.msra.mxu1 %vm768_vm3, %v5740_v44  ;;  %23250 = vmatprep.mubr.msk.f32.mxu0 %vm24798_vm2, %v29743_v9  ;;  %v3243_v28 = vsel %vm768_vm3, %v26009_v11, -inf  ;;  %v23027_v12 = vpop.f32.mrb[61].mxu0 }
 0x1ef   :  { %23255 = vmatprep.mubr.msk.f32.mxu1 %vm24798_vm2, %v29743_v9  ;;  %v5818_v16 = vpop.permute.xlu1 %5817  ;;  %23258 = vmatprep.subr.mxu0 %v29743_v9 }
 0x1f0   :  { %23251 = vmatmul.mubr.msk.f32.vlgmr.msra.gmra.mrb[106].mxu0 %vm768_vm3, %v25865_v63  ;;  %v5896_v6 = vpop.permute.xlu0 %5895  ;;  %23263 = vmatprep.subr.mxu1 %v29743_v9 }
 0x1f1   :  { %23256 = vmatmul.mubr.msk.f32.vlgmr.msra.gmra.mrb[108].mxu1 %vm768_vm3, %v25896_v18  ;;  %3244 = vmax.xlane.f32.xlu1 %v3243_v28  ;;  %v26024_v52 = vpop.f32.mrb[62].mxu0 }
 0x1f2   :  { %29761 = vst [vmem:[#allocation115_spill] sm:$0xff] %v26024_v52  ;;  %23259 = vmatpush3.xpose.msk.msra.mxu0 %vm768_vm3, %v5818_v16  ;;  %23264 = vmatpush3.xpose.msk.msra.mxu1 %vm768_vm3, %v5896_v6  ;;  %v23032_v21 = vpop.f32.mrb[63].mxu0  ;;  %v3246_v18 = vsel %vm768_vm3, %v26024_v52, -inf }
 0x1f3   :  { %23260 = vmatprep.mubr.msk.f32.mxu0 %vm24798_vm2, %v29743_v9  ;;  %23265 = vmatprep.mubr.msk.f32.mxu1 %vm24798_vm2, %v29743_v9  ;;  %v26032_v63 = vpop.f32.mrb[64].mxu1  ;;  %v5974_v50 = vpop.permute.xlu1 %5973 }
 0x1f4   :  { %29762 = vst [vmem:[#allocation116_spill] sm:$0xff] %v26032_v63  ;;  %23268 = vmatprep.subr.mxu0 %v29743_v9  ;;  %23273 = vmatprep.subr.mxu1 %v29743_v9  ;;  %v3249_v29 = vsel %vm768_vm3, %v26032_v63, -inf  ;;  %v23037_v36 = vpop.f32.mrb[65].mxu1  ;;  %v26166_v17 = vpop.permute.xlu0 %7845 }
 0x1f5   :  { %23261 = vmatmul.mubr.msk.f32.vlgmr.msra.gmra.mrb[108].mxu0 %vm768_vm3, %v25892_v57  ;;  %23266 = vmatmul.mubr.msk.f32.vlgmr.msra.gmra.mrb[110].mxu1 %vm768_vm3, %v25914_v37  ;;  %29778 = vst [vmem:[#allocation132_spill] sm:$0xff] %v26166_v17 }
 0x1f6   :  { %3247 = vmax.xlane.f32.xlu0 %v3246_v18  ;;  %23269 = vmatpush3.xpose.msk.msra.mxu0 %vm768_vm3, %v5974_v50 }
 0x1f7   :  { %23274 = vmatpush3.msra.mxu1 %v25647_v15  ;;  %3250 = vmax.xlane.f32.xlu1 %v3249_v29  ;;  %v26046_v44 = vpop.f32.mrb[64].mxu0 }
 0x1f8   :  { %29763 = vst [vmem:[#allocation117_spill] sm:$0xff] %v26046_v44  ;;  %23270 = vmatprep.mubr.msk.f32.mxu0 %vm24798_vm2, %v29743_v9  ;;  %23278 = vmatprep.subr.mxu0 %v29743_v9  ;;  %v3252_v28 = vsel %vm768_vm3, %v26046_v44, -inf  ;;  %v23042_v57 = vpop.f32.mrb[65].mxu0 }
 0x1f9   :  { %23271 = vmatmul.mubr.msk.f32.vlgmr.msra.gmra.mrb[110].mxu0 %vm768_vm3, %v25904_v49  ;;  %23275 = vmatprep.mubr.msk.f32.mxu1 %vm24798_vm2, %v29743_v9 }
 0x1fa   :  { %23279 = vmatpush3.msra.mxu0 %v25678_v60  ;;  %3253 = vmax.xlane.f32.xlu0 %v3252_v28 }
 0x1fb   :  { %v26058_v15 = vpop.f32.mrb[66].mxu1  ;;  %23283 = vmatprep.subr.mxu1 %v29743_v9  ;;  %23280 = vmatprep.mubr.msk.f32.mxu0 %vm24798_vm2, %v29743_v9 }
 0x1fc   :  { %29764 = vst [vmem:[#allocation118_spill] sm:$0xff] %v26058_v15  ;;  %v3255_v37 = vsel %vm768_vm3, %v26058_v15, -inf  ;;  %v23047_v12 = vpop.f32.mrb[67].mxu1  ;;  %23288 = vmatprep.subr.mxu0 %v29743_v9 }
 0x1fd   :  { %3256 = vmax.xlane.f32.xlu1 %v3255_v37 }
 0x1ff   :  { %v26066_v49 = vpop.f32.mrb[66].mxu0 }
 0x200   :  { %29765 = vst [vmem:[#allocation119_spill] sm:$0xff] %v26066_v49  ;;  %v3258_v60 = vsel %vm768_vm3, %v26066_v49, -inf  ;;  %v23052_v16 = vpop.f32.mrb[67].mxu0 }
 0x201   :  { %3259 = vmax.xlane.f32.xlu0 %v3258_v60 }
 0x203   :  { %v26070_v6 = vpop.f32.mrb[68].mxu1 }
 0x204   :  { %29766 = vst [vmem:[#allocation120_spill] sm:$0xff] %v26070_v6  ;;  %v3261_v21 = vsel %vm768_vm3, %v26070_v6, -inf  ;;  %v23057_v50 = vpop.f32.mrb[69].mxu1 }
 0x205   :  { %3262 = vmax.xlane.f32.xlu1 %v3261_v21 }
 0x207   :  { %v26074_v18 = vpop.f32.mrb[68].mxu0 }
 0x208   :  { %29767 = vst [vmem:[#allocation121_spill] sm:$0xff] %v26074_v18  ;;  %v3264_v29 = vsel %vm768_vm3, %v26074_v18, -inf  ;;  %v23062_v36 = vpop.f32.mrb[69].mxu0 }
 0x209   :  { %3265 = vmax.xlane.f32.xlu0 %v3264_v29 }
 0x20b   :  { %v26078_v28 = vpop.f32.mrb[70].mxu1 }
 0x20c   :  { %29768 = vst [vmem:[#allocation122_spill] sm:$0xff] %v26078_v28  ;;  %v3267_v57 = vsel %vm768_vm3, %v26078_v28, -inf  ;;  %v23067_v37 = vpop.f32.mrb[71].mxu1 }
 0x20d   :  { %3268 = vmax.xlane.f32.xlu1 %v3267_v57 }
 0x20f   :  { %v26082_v12 = vpop.f32.mrb[70].mxu0 }
 0x210   :  { %29769 = vst [vmem:[#allocation123_spill] sm:$0xff] %v26082_v12  ;;  %v3270_v60 = vsel %vm768_vm3, %v26082_v12, -inf  ;;  %v23072_v16 = vpop.f32.mrb[71].mxu0 }
 0x211   :  { %3271 = vmax.xlane.f32.xlu0 %v3270_v60 }
 0x213   :  { %v26086_v21 = vpop.f32.mrb[72].mxu1 }
 0x214   :  { %29770 = vst [vmem:[#allocation124_spill] sm:$0xff] %v26086_v21  ;;  %v3273_v50 = vsel %vm768_vm3, %v26086_v21, -inf  ;;  %v23077_v29 = vpop.f32.mrb[73].mxu1 }
 0x215   :  { %3274 = vmax.xlane.f32.xlu1 %v3273_v50 }
 0x217   :  { %v26090_v36 = vpop.f32.mrb[72].mxu0 }
 0x218   :  { %29771 = vst [vmem:[#allocation125_spill] sm:$0xff] %v26090_v36  ;;  %v3276_v37 = vsel %vm768_vm3, %v26090_v36, -inf  ;;  %v23082_v57 = vpop.f32.mrb[73].mxu0 }
 0x219   :  { %3277 = vmax.xlane.f32.xlu0 %v3276_v37 }
 0x21b   :  { %v26094_v28 = vpop.f32.mrb[74].mxu1 }
 0x21c   :  { %29772 = vst [vmem:[#allocation126_spill] sm:$0xff] %v26094_v28  ;;  %v3279_v16 = vsel %vm768_vm3, %v26094_v28, -inf  ;;  %v23087_v60 = vpop.f32.mrb[75].mxu1 }
 0x21d   :  { %3280 = vmax.xlane.f32.xlu1 %v3279_v16 }
 0x21f   :  { %v26098_v12 = vpop.f32.mrb[74].mxu0 }
 0x220   :  { %29773 = vst [vmem:[#allocation127_spill] sm:$0xff] %v26098_v12  ;;  %v3282_v29 = vsel %vm768_vm3, %v26098_v12, -inf  ;;  %v23092_v50 = vpop.f32.mrb[75].mxu0 }
 0x221   :  { %3283 = vmax.xlane.f32.xlu0 %v3282_v29 }
 0x223   :  { %v26102_v21 = vpop.f32.mrb[76].mxu1 }
 0x224   :  { %29774 = vst [vmem:[#allocation128_spill] sm:$0xff] %v26102_v21  ;;  %v3285_v57 = vsel %vm768_vm3, %v26102_v21, -inf  ;;  %v23097_v37 = vpop.f32.mrb[77].mxu1 }
 0x225   :  { %3286 = vmax.xlane.f32.xlu1 %v3285_v57 }
 0x227   :  { %v26106_v36 = vpop.f32.mrb[76].mxu0 }
 0x228   :  { %29775 = vst [vmem:[#allocation129_spill] sm:$0xff] %v26106_v36  ;;  %v3288_v60 = vsel %vm768_vm3, %v26106_v36, -inf  ;;  %v23102_v16 = vpop.f32.mrb[77].mxu0 }
 0x229   :  { %3289 = vmax.xlane.f32.xlu0 %v3288_v60 }
 0x22b   :  { %v26110_v28 = vpop.f32.mrb[78].mxu1 }
 0x22c   :  { %29776 = vst [vmem:[#allocation130_spill] sm:$0xff] %v26110_v28  ;;  %v3291_v50 = vsel %vm768_vm3, %v26110_v28, -inf  ;;  %v23107_v29 = vpop.f32.mrb[79].mxu1 }
 0x22d   :  { %3292 = vmax.xlane.f32.xlu1 %v3291_v50 }
 0x22f   :  { %v26114_v12 = vpop.f32.mrb[78].mxu0 }
 0x230   :  { %29777 = vst [vmem:[#allocation131_spill] sm:$0xff] %v26114_v12  ;;  %v26116_v18 = vpop.f32.mrb[80].mxu1  ;;  %v23112_v37 = vpop.f32.mrb[79].mxu0  ;;  %v3294_v16 = vsel %vm768_vm3, %v26114_v12, -inf }
 0x231   :  { %v23117_v57 = vpop.f32.mrb[81].mxu1  ;;  %v6049_v21 = vsel %vm768_vm3, %v26116_v18, -inf }
 0x232   :  { %6050 = vmax.xlane.f32.xlu0 %v6049_v21 }
 0x234   :  { %v26120_v36 = vpop.f32.mrb[80].mxu0 }
 0x235   :  { %v23122_v60 = vpop.f32.mrb[81].mxu0  ;;  %v6052_v29 = vsel %vm768_vm3, %v26120_v36, -inf  ;;  %v26126_v50 = vpop.f32.mrb[82].mxu1 }
 0x236   :  { %3295 = vmax.xlane.f32.xlu0 %v3294_v16  ;;  %6053 = vmax.xlane.f32.xlu1 %v6052_v29  ;;  %v23127_v28 = vpop.f32.mrb[83].mxu1  ;;  %v6055_v37 = vsel %vm768_vm3, %v26126_v50, -inf }
 0x23a   :  { %6056 = vmax.xlane.f32.xlu0 %v6055_v37  ;;  %v26130_v57 = vpop.f32.mrb[82].mxu0 }
 0x23b   :  { %v23132_v21 = vpop.f32.mrb[83].mxu0  ;;  %v6058_v60 = vsel %vm768_vm3, %v26130_v57, -inf }
 0x23e   :  { %6059 = vmax.xlane.f32.xlu0 %v6058_v60 }
 0x242   :  { %v26134_v12 = vpop.f32.mrb[84].mxu1 }
 0x243   :  { %v23137_v6 = vpop.f32.mrb[85].mxu1  ;;  %v6061_v49 = vsel %vm768_vm3, %v26134_v12, -inf }
 0x244   :  { %6062 = vmax.xlane.f32.xlu1 %v6061_v49 }
 0x248   :  { %v26170_v14 = vpop.xlane.xlu0 %3205 }
 0x24a   :  { %v26138_v16 = vpop.f32.mrb[84].mxu0 }
 0x24b   :  { %v23142_v28 = vpop.f32.mrb[85].mxu0  ;;  %v6064_v29 = vsel %vm768_vm3, %v26138_v16, -inf }
 0x24c   :  { %6065 = vmax.xlane.f32.xlu0 %v6064_v29 }
 0x252   :  { %v26142_v37 = vpop.f32.mrb[86].mxu1 }
 0x253   :  { %v23147_v21 = vpop.f32.mrb[87].mxu1  ;;  %v6067_v60 = vsel %vm768_vm3, %v26142_v37, -inf }
 0x254   :  { %6068 = vmax.xlane.f32.xlu1 %v6067_v60 }
 0x25a   :  { %v26146_v15 = vpop.f32.mrb[86].mxu0 }
 0x25b   :  { %v23152_v6 = vpop.f32.mrb[87].mxu0  ;;  %v6070_v49 = vsel %vm768_vm3, %v26146_v15, -inf }
 0x25c   :  { %6071 = vmax.xlane.f32.xlu0 %v6070_v49 }
 0x262   :  { %v26150_v44 = vpop.f32.mrb[88].mxu1 }
 0x263   :  { %v23157_v28 = vpop.f32.mrb[89].mxu1  ;;  %v6073_v29 = vsel %vm768_vm3, %v26150_v44, -inf }
 0x264   :  { %6074 = vmax.xlane.f32.xlu1 %v6073_v29 }
 0x26a   :  { %v26154_v63 = vpop.f32.mrb[88].mxu0 }
 0x26b   :  { %v23162_v21 = vpop.f32.mrb[89].mxu0  ;;  %v6076_v60 = vsel %vm768_vm3, %v26154_v63, -inf }
 0x26c   :  { %6077 = vmax.xlane.f32.xlu0 %v6076_v60  ;;  %v26168_v21 = vpop.xlane.xlu1 %3202 }
 0x273   :  { %v26158_v52 = vpop.f32.mrb[90].mxu1 }
 0x274   :  { %v23167_v6 = vpop.f32.mrb[91].mxu1  ;;  %v6079_v49 = vsel %vm768_vm3, %v26158_v52, -inf }
 0x275   :  { %6080 = vmax.xlane.f32.xlu1 %v6079_v49  ;;  %v26176_v49 = vpop.xlane.xlu1 %3208 }
 0x279   :  { %v26180_v54 = vpop.xlane.xlu1 %3214 }
 0x27a   :  { %v26162_v11 = vpop.f32.mrb[90].mxu0  ;;  %29779 = vst [vmem:[#allocation133_spill] sm:$0xff] %v26180_v54 }
 0x27b   :  { %v23172_v28 = vpop.f32.mrb[91].mxu0  ;;  %v6082_v29 = vsel %vm768_vm3, %v26162_v11, -inf }
 0x27c   :  { %6083 = vmax.xlane.f32.xlu0 %v6082_v29  ;;  %v26178_v28 = vpop.xlane.xlu0 %3211 }
 0x280   :  { %v26182_v29 = vpop.xlane.xlu0 %3217 }
 0x281   :  { %29780 = vst [vmem:[#allocation134_spill] sm:$0xff] %v26182_v29 }
 0x283   :  { %v26172_v60 = vpop.f32.mrb[92].mxu1 }
 0x284   :  { %v23177_v6 = vpop.f32.mrb[93].mxu1  ;;  %v6085_v4 = vsel %vm768_vm3, %v26172_v60, -inf  ;;  %v26190_v38 = vpop.xlane.xlu0 %3223 }
 0x285   :  { %6086 = vmax.xlane.f32.xlu1 %v6085_v4  ;;  %v26188_v6 = vpop.xlane.xlu1 %3220  ;;  %29782 = vst [vmem:[#allocation136_spill] sm:$0xff] %v26190_v38 }
 0x286   :  { %29781 = vst [vmem:[#allocation135_spill] sm:$0xff] %v26188_v6 }
 0x288   :  { %v26194_v4 = vpop.xlane.xlu0 %3229 }
 0x289   :  { %v26192_v5 = vpop.xlane.xlu1 %3226  ;;  %29784 = vst [vmem:[#allocation138_spill] sm:$0xff] %v26194_v4 }
 0x28a   :  { %v26184_v56 = vpop.f32.mrb[92].mxu0  ;;  %29783 = vst [vmem:[#allocation137_spill] sm:$0xff] %v26192_v5 }
 0x28b   :  { %v23182_v62 = vpop.f32.mrb[93].mxu0  ;;  %v6088_v34 = vsel %vm768_vm3, %v26184_v56, -inf }
 0x28c   :  { %6089 = vmax.xlane.f32.xlu0 %v6088_v34  ;;  %v26202_v62 = vpop.xlane.xlu0 %3235 }
 0x28d   :  { %v26200_v23 = vpop.xlane.xlu1 %3232  ;;  %29786 = vst [vmem:[#allocation140_spill] sm:$0xff] %v26202_v62 }
 0x28e   :  { %29785 = vst [vmem:[#allocation139_spill] sm:$0xff] %v26200_v23 }
 0x290   :  { %v26206_v27 = vpop.xlane.xlu0 %3241 }
 0x291   :  { %v26204_v34 = vpop.xlane.xlu1 %3238  ;;  %29788 = vst [vmem:[#allocation142_spill] sm:$0xff] %v26206_v27 }
 0x292   :  { %29787 = vst [vmem:[#allocation141_spill] sm:$0xff] %v26204_v34 }
 0x293   :  { %v26196_v19 = vpop.f32.mrb[94].mxu1 }
 0x294   :  { %v23187_v33 = vpop.f32.mrb[95].mxu1  ;;  %v6091_v42 = vsel %vm768_vm3, %v26196_v19, -inf  ;;  %v26214_v38 = vpop.xlane.xlu0 %3247 }
 0x295   :  { %6092 = vmax.xlane.f32.xlu1 %v6091_v42  ;;  %v26212_v33 = vpop.xlane.xlu1 %3244  ;;  %29790 = vst [vmem:[#allocation144_spill] sm:$0xff] %v26214_v38 }
 0x296   :  { %29789 = vst [vmem:[#allocation143_spill] sm:$0xff] %v26212_v33 }
 0x298   :  { %v26218_v42 = vpop.xlane.xlu0 %3253 }
 0x299   :  { %v26216_v45 = vpop.xlane.xlu1 %3250  ;;  %29792 = vst [vmem:[#allocation146_spill] sm:$0xff] %v26218_v42 }
 0x29a   :  { %v26208_v53 = vpop.f32.mrb[94].mxu0  ;;  %29791 = vst [vmem:[#allocation145_spill] sm:$0xff] %v26216_v45 }
 0x29b   :  { %v23192_v5 = vpop.f32.mrb[95].mxu0  ;;  %v6094_v4 = vsel %vm768_vm3, %v26208_v53, -inf }
 0x29c   :  { %6095 = vmax.xlane.f32.xlu0 %v6094_v4  ;;  %v26226_v5 = vpop.xlane.xlu0 %3259 }
 0x29d   :  { %v26224_v23 = vpop.xlane.xlu1 %3256  ;;  %29794 = vst [vmem:[#allocation148_spill] sm:$0xff] %v26226_v5 }
 0x29e   :  { %29793 = vst [vmem:[#allocation147_spill] sm:$0xff] %v26224_v23 }
 0x2a0   :  { %v26230_v33 = vpop.xlane.xlu0 %3265 }
 0x2a1   :  { %v26228_v4 = vpop.xlane.xlu1 %3262  ;;  %29796 = vst [vmem:[#allocation150_spill] sm:$0xff] %v26230_v33 }
 0x2a2   :  { %29795 = vst [vmem:[#allocation149_spill] sm:$0xff] %v26228_v4 }
 0x2a3   :  { %v26220_v62 = vpop.f32.mrb[96].mxu1 }
 0x2a4   :  { %v23197_v34 = vpop.f32.mrb[97].mxu1  ;;  %v6097_v27 = vsel %vm768_vm3, %v26220_v62, -inf  ;;  %v26242_v5 = vpop.xlane.xlu0 %3271 }
 0x2a5   :  { %6098 = vmax.xlane.f32.xlu1 %v6097_v27  ;;  %v26240_v27 = vpop.xlane.xlu1 %3268  ;;  %29798 = vst [vmem:[#allocation152_spill] sm:$0xff] %v26242_v5 }
 0x2a6   :  { %29797 = vst [vmem:[#allocation151_spill] sm:$0xff] %v26240_v27 }
 0x2a9   :  { %v26252_v17 = vpop.xlane.xlu1 %3274 }
 0x2aa   :  { %v26232_v38 = vpop.f32.mrb[96].mxu0  ;;  %29799 = vst [vmem:[#allocation153_spill] sm:$0xff] %v26252_v17 }
 0x2ab   :  { %v26234_v45 = vpop.f32.mrb[98].mxu1  ;;  %v23202_v42 = vpop.f32.mrb[97].mxu0  ;;  %v6100_v34 = vsel %vm768_vm3, %v26232_v38, -inf }
 0x2ac   :  { %v23207_v6 = vpop.f32.mrb[99].mxu1  ;;  %v6103_v31 = vsel %vm768_vm3, %v26234_v45, -inf  ;;  %6101 = vmax.xlane.f32.xlu0 %v6100_v34  ;;  %v26254_v34 = vpop.xlane.xlu0 %3277 }
 0x2ad   :  { %6104 = vmax.xlane.f32.xlu1 %v6103_v31  ;;  %29800 = vst [vmem:[#allocation154_spill] sm:$0xff] %v26254_v34  ;;  %v26256_v31 = vpop.xlane.xlu1 %3280 }
 0x2ae   :  { %v26244_v4 = vpop.f32.mrb[98].mxu0  ;;  %29801 = vst [vmem:[#allocation155_spill] sm:$0xff] %v26256_v31 }
 0x2af   :  { %v26246_v33 = vpop.f32.mrb[100].mxu1  ;;  %v23212_v23 = vpop.f32.mrb[99].mxu0  ;;  %v6106_v42 = vsel %vm768_vm3, %v26244_v4, -inf }
 0x2b0   :  { %v23217_v35 = vpop.f32.mrb[101].mxu1  ;;  %v6109_v6 = vsel %vm768_vm3, %v26246_v33, -inf  ;;  %6107 = vmax.xlane.f32.xlu0 %v6106_v42  ;;  %v26258_v5 = vpop.xlane.xlu0 %3283 }
 0x2b1   :  { %6110 = vmax.xlane.f32.xlu1 %v6109_v6  ;;  %29802 = vst [vmem:[#allocation156_spill] sm:$0xff] %v26258_v5 }
 0x2b2   :  { %v26268_v6 = vpop.xlane.xlu1 %3286 }
 0x2b3   :  { %29803 = vst [vmem:[#allocation157_spill] sm:$0xff] %v26268_v6 }
 0x2b6   :  { %v26260_v27 = vpop.f32.mrb[100].mxu0  ;;  %v26270_v34 = vpop.xlane.xlu0 %3289 }
 0x2b7   :  { %v26262_v23 = vpop.f32.mrb[102].mxu1  ;;  %v23222_v61 = vpop.f32.mrb[101].mxu0  ;;  %v6112_v35 = vsel %vm768_vm3, %v26260_v27, -inf  ;;  %29804 = vst [vmem:[#allocation158_spill] sm:$0xff] %v26270_v34 }
 0x2b8   :  { %v23227_v25 = vpop.f32.mrb[103].mxu1  ;;  %v6115_v42 = vsel %vm768_vm3, %v26262_v23, -inf  ;;  %6113 = vmax.xlane.f32.xlu0 %v6112_v35 }
 0x2b9   :  { %6116 = vmax.xlane.f32.xlu1 %v6115_v42 }
 0x2ba   :  { %v26272_v31 = vpop.f32.mrb[102].mxu0  ;;  %v26280_v35 = vpop.xlane.xlu1 %3292 }
 0x2bb   :  { %v26274_v5 = vpop.f32.mrb[104].mxu1  ;;  %v23232_v17 = vpop.f32.mrb[103].mxu0  ;;  %v6118_v61 = vsel %vm768_vm3, %v26272_v31, -inf  ;;  %29805 = vst [vmem:[#allocation159_spill] sm:$0xff] %v26280_v35 }
 0x2bc   :  { %v23237_v41 = vpop.f32.mrb[105].mxu1  ;;  %v6121_v25 = vsel %vm768_vm3, %v26274_v5, -inf  ;;  %6119 = vmax.xlane.f32.xlu0 %v6118_v61 }
 0x2bd   :  { %6122 = vmax.xlane.f32.xlu1 %v6121_v25 }
 0x2bf   :  { %v26282_v6 = vpop.f32.mrb[106].mxu1  ;;  %v6051_v42 = vpop.xlane.xlu0 %6050 }
 0x2c0   :  { %v6145_v34 = vsub.f32 %v26116_v18, %v6051_v42  ;;  %v26285_v26 = vpop.f32.mrb[104].mxu0  ;;  %v23247_v1 = vpop.f32.mrb[107].mxu1  ;;  %v6127_v17 = vsel %vm768_vm3, %v26282_v6, -inf }
 0x2c1   :  { %v23242_v29 = vpop.f32.mrb[105].mxu0  ;;  %6128 = vmax.xlane.f32.xlu1 %v6127_v17  ;;  %v6124_v41 = vsel %vm768_vm3, %v26285_v26, -inf }
 0x2c2   :  { %v6177_v61 = vmul.f32 1.442695, %v6145_v34  ;;  %6125 = vmax.xlane.f32.xlu0 %v6124_v41 }
 0x2c3   :  { %v26291_v25 = vpop.xlane.xlu0 %3295  ;;  %v6054_v35 = vpop.xlane.xlu1 %6053 }
 0x2c4   :  { %29806 = vst [vmem:[#allocation160_spill] sm:$0xff] %v26291_v25  ;;  %24253 = vpow2.f32 %v6177_v61  ;;  %v26293_v10 = vpop.f32.mrb[108].mxu1  ;;  %v6146_v18 = vsub.f32 %v26120_v36, %v6054_v35  ;;  %v26296_v42 = vpop.f32.mrb[106].mxu0 }
 0x2c5   :  { %v23252_v1 = vpop.f32.mrb[107].mxu0  ;;  %v23257_v46 = vpop.f32.mrb[109].mxu1  ;;  %v6133_v29 = vsel %vm768_vm3, %v26293_v10, -inf  ;;  %v6130_v17 = vsel %vm768_vm3, %v26296_v42, -inf }
 0x2c6   :  { %v6179_v34 = vmul.f32 1.442695, %v6146_v18  ;;  %6134 = vmax.xlane.f32.xlu1 %v6133_v29  ;;  %6131 = vmax.xlane.f32.xlu0 %v6130_v17 }
 0x2c7   :  { %v6057_v41 = vpop.xlane.xlu0 %6056 }
 0x2c8   :  { %v26302_v25 = vpop.f32.mrb[110].mxu1  ;;  %v6147_v61 = vsub.f32 %v26126_v50, %v6057_v41  ;;  %v26305_v54 = vpop.f32.mrb[108].mxu0  ;;  %24255 = vpow2.f32 %v6179_v34 }
 0x2c9   :  { %v23262_v36 = vpop.f32.mrb[109].mxu0  ;;  %v23267_v35 = vpop.f32.mrb[111].mxu1  ;;  %v6139_v46 = vsel %vm768_vm3, %v26302_v25, -inf  ;;  %v6136_v1 = vsel %vm768_vm3, %v26305_v54, -inf }
 0x2ca   :  { %v6181_v39 = vmul.f32 1.442695, %v6147_v61  ;;  %6140 = vmax.xlane.f32.xlu1 %v6139_v46  ;;  %6137 = vmax.xlane.f32.xlu0 %v6136_v1 }
 0x2cb   :  { %v6060_v18 = vpop.xlane.xlu0 %6059 }
 0x2cc   :  { %24257 = vpow2.f32 %v6181_v39  ;;  %v6148_v29 = vsub.f32 %v26130_v57, %v6060_v18  ;;  %v26312_v17 = vpop.f32.mrb[110].mxu0 }
 0x2cd   :  { %v23272_v50 = vpop.f32.mrb[111].mxu0  ;;  %v6142_v34 = vsel %vm768_vm3, %v26312_v17, -inf }
 0x2ce   :  { %v26316_v41 = vpop.eup %24253  ;;  %v6183_v36 = vmul.f32 1.442695, %v6148_v29  ;;  %6143 = vmax.xlane.f32.xlu0 %v6142_v34 }
 0x2cf   :  { %v6241_v35 = vsel %vm768_vm3, %v26316_v41, 0.0 }
 0x2d0   :  { %24259 = vpow2.f32 %v6183_v36  ;;  %6242 = vadd.xlane.f32.xlu1 %v6241_v35 }
 0x2d1   :  { %v6063_v61 = vpop.xlane.xlu1 %6062 }
 0x2d2   :  { %v6149_v39 = vsub.f32 %v26134_v12, %v6063_v61  ;;  %v26321_v46 = vpop.eup %24255 }
 0x2d3   :  { %v6244_v1 = vsel %vm768_vm3, %v26321_v46, 0.0 }
 0x2d4   :  { %v6185_v57 = vmul.f32 1.442695, %v6149_v39  ;;  %6245 = vadd.xlane.f32.xlu0 %v6244_v1 }
 0x2d6   :  { %v26325_v18 = vpop.eup %24257  ;;  %24261 = vpow2.f32 %v6185_v57 }
 0x2d7   :  { %v6247_v29 = vsel %vm768_vm3, %v26325_v18, 0.0 }
 0x2d8   :  { %6248 = vadd.xlane.f32.xlu1 %v6247_v29 }
 0x2d9   :  { %v6066_v50 = vpop.xlane.xlu0 %6065 }
 0x2da   :  { %v26329_v34 = vpop.eup %24259  ;;  %v6150_v36 = vsub.f32 %v26138_v16, %v6066_v50 }
 0x2db   :  { %v6250_v12 = vsel %vm768_vm3, %v26329_v34, 0.0 }
 0x2dc   :  { %v6187_v35 = vmul.f32 1.442695, %v6150_v36  ;;  %6251 = vadd.xlane.f32.xlu0 %v6250_v12 }
 0x2de   :  { %24263 = vpow2.f32 %v6187_v35 }
 0x2e0   :  { %v26334_v61 = vpop.eup %24261 }
 0x2e1   :  { %v6069_v39 = vpop.xlane.xlu1 %6068  ;;  %v6253_v57 = vsel %vm768_vm3, %v26334_v61, 0.0 }
 0x2e2   :  { %v6151_v1 = vsub.f32 %v26142_v37, %v6069_v39  ;;  %6254 = vadd.xlane.f32.xlu1 %v6253_v57 }
 0x2e4   :  { %v6189_v29 = vmul.f32 1.442695, %v6151_v1 }
 0x2e6   :  { %24265 = vpow2.f32 %v6189_v29 }
 0x2e8   :  { %v26339_v22 = vpop.eup %24263 }
 0x2e9   :  { %v6072_v16 = vpop.xlane.xlu0 %6071  ;;  %v6256_v50 = vsel %vm768_vm3, %v26339_v22, 0.0 }
 0x2ea   :  { %v6152_v36 = vsub.f32 %v26146_v15, %v6072_v16  ;;  %6257 = vadd.xlane.f32.xlu0 %v6256_v50 }
 0x2ec   :  { %v6191_v12 = vmul.f32 1.442695, %v6152_v36 }
 0x2ee   :  { %24267 = vpow2.f32 %v6191_v12 }
 0x2f0   :  { %v26344_v35 = vpop.eup %24265 }
 0x2f1   :  { %v6075_v43 = vpop.xlane.xlu1 %6074  ;;  %v6259_v37 = vsel %vm768_vm3, %v26344_v35, 0.0 }
 0x2f2   :  { %v6153_v39 = vsub.f32 %v26150_v44, %v6075_v43  ;;  %6260 = vadd.xlane.f32.xlu1 %v6259_v37 }
 0x2f4   :  { %v6193_v57 = vmul.f32 1.442695, %v6153_v39 }
 0x2f6   :  { %24269 = vpow2.f32 %v6193_v57 }
 0x2f8   :  { %v26349_v1 = vpop.eup %24267 }
 0x2f9   :  { %v6078_v29 = vpop.xlane.xlu0 %6077  ;;  %v6262_v15 = vsel %vm768_vm3, %v26349_v1, 0.0 }
 0x2fa   :  { %v6154_v16 = vsub.f32 %v26154_v63, %v6078_v29  ;;  %6263 = vadd.xlane.f32.xlu0 %v6262_v15 }
 0x2fc   :  { %v6195_v50 = vmul.f32 1.442695, %v6154_v16 }
 0x2fe   :  { %24271 = vpow2.f32 %v6195_v50 }
 0x300   :  { %v26354_v36 = vpop.eup %24269 }
 0x301   :  { %v6265_v12 = vsel %vm768_vm3, %v26354_v36, 0.0 }
 0x302   :  { %v6081_v43 = vpop.xlane.xlu1 %6080  ;;  %6266 = vadd.xlane.f32.xlu1 %v6265_v12 }
 0x303   :  { %v6155_v44 = vsub.f32 %v26158_v52, %v6081_v43 }
 0x305   :  { %v6197_v37 = vmul.f32 1.442695, %v6155_v44 }
 0x307   :  { %24273 = vpow2.f32 %v6197_v37 }
 0x308   :  { %v26359_v39 = vpop.eup %24271 }
 0x309   :  { %v6084_v57 = vpop.xlane.xlu0 %6083  ;;  %v6268_v63 = vsel %vm768_vm3, %v26359_v39, 0.0 }
 0x30a   :  { %v6156_v29 = vsub.f32 %v26162_v11, %v6084_v57  ;;  %6269 = vadd.xlane.f32.xlu0 %v6268_v63 }
 0x30c   :  { %v6199_v15 = vmul.f32 1.442695, %v6156_v29 }
 0x30e   :  { %24275 = vpow2.f32 %v6199_v15 }
 0x311   :  { %v26364_v16 = vpop.eup %24273 }
 0x312   :  { %v6087_v50 = vpop.xlane.xlu1 %6086  ;;  %v6271_v12 = vsel %vm768_vm3, %v26364_v16, 0.0 }
 0x313   :  { %v6157_v52 = vsub.f32 %v26172_v60, %v6087_v50  ;;  %6272 = vadd.xlane.f32.xlu1 %v6271_v12 }
 0x315   :  { %v6201_v43 = vmul.f32 1.442695, %v6157_v52 }
 0x317   :  { %24277 = vpow2.f32 %v6201_v43 }
 0x318   :  { %v26369_v44 = vpop.eup %24275 }
 0x319   :  { %v6090_v37 = vpop.xlane.xlu0 %6089  ;;  %v6274_v11 = vsel %vm768_vm3, %v26369_v44, 0.0 }
 0x31a   :  { %v6158_v57 = vsub.f32 %v26184_v56, %v6090_v37  ;;  %6275 = vadd.xlane.f32.xlu0 %v6274_v11 }
 0x31c   :  { %v6203_v63 = vmul.f32 1.442695, %v6158_v57 }
 0x31e   :  { %24279 = vpow2.f32 %v6203_v63 }
 0x321   :  { %v26374_v29 = vpop.eup %24277 }
 0x322   :  { %v6093_v15 = vpop.xlane.xlu1 %6092  ;;  %v6277_v60 = vsel %vm768_vm3, %v26374_v29, 0.0 }
 0x323   :  { %v6159_v50 = vsub.f32 %v26196_v19, %v6093_v15  ;;  %6278 = vadd.xlane.f32.xlu1 %v6277_v60 }
 0x325   :  { %v6205_v12 = vmul.f32 1.442695, %v6159_v50 }
 0x327   :  { %24281 = vpow2.f32 %v6205_v12 }
 0x328   :  { %v26379_v52 = vpop.eup %24279 }
 0x329   :  { %29807 = vst [vmem:[#allocation161_spill] sm:$0xff] %v26379_v52  ;;  %v6096_v43 = vpop.xlane.xlu0 %6095  ;;  %v6280_v56 = vsel %vm768_vm3, %v26379_v52, 0.0 }
 0x32a   :  { %v6160_v37 = vsub.f32 %v26208_v53, %v6096_v43  ;;  %6281 = vadd.xlane.f32.xlu0 %v6280_v56 }
 0x32c   :  { %v6207_v11 = vmul.f32 1.442695, %v6160_v37 }
 0x32e   :  { %24283 = vpow2.f32 %v6207_v11 }
 0x331   :  { %v26384_v57 = vpop.eup %24281 }
 0x332   :  { %29808 = vst [vmem:[#allocation162_spill] sm:$0xff] %v26384_v57  ;;  %v6099_v63 = vpop.xlane.xlu1 %6098  ;;  %v6283_v19 = vsel %vm768_vm3, %v26384_v57, 0.0 }
 0x333   :  { %v6161_v15 = vsub.f32 %v26220_v62, %v6099_v63  ;;  %6284 = vadd.xlane.f32.xlu1 %v6283_v19 }
 0x335   :  { %v6209_v60 = vmul.f32 1.442695, %v6161_v15 }
 0x337   :  { %24285 = vpow2.f32 %v6209_v60 }
 0x338   :  { %v26389_v50 = vpop.eup %24283 }
 0x339   :  { %29809 = vst [vmem:[#allocation163_spill] sm:$0xff] %v26389_v50  ;;  %v6102_v12 = vpop.xlane.xlu0 %6101  ;;  %v6286_v53 = vsel %vm768_vm3, %v26389_v50, 0.0 }
 0x33a   :  { %v6105_v43 = vpop.xlane.xlu1 %6104  ;;  %v6162_v56 = vsub.f32 %v26232_v38, %v6102_v12  ;;  %6287 = vadd.xlane.f32.xlu0 %v6286_v53 }
 0x33b   :  { %v6163_v37 = vsub.f32 %v26234_v45, %v6105_v43 }
 0x33c   :  { %v6211_v11 = vmul.f32 1.442695, %v6162_v56 }
 0x33d   :  { %v6213_v52 = vmul.f32 1.442695, %v6163_v37  ;;  %v6108_v57 = vpop.xlane.xlu0 %6107 }
 0x33e   :  { %24287 = vpow2.f32 %v6211_v11  ;;  %v6111_v62 = vpop.xlane.xlu1 %6110  ;;  %v6164_v63 = vsub.f32 %v26244_v4, %v6108_v57 }
 0x33f   :  { %24289 = vpow2.f32 %v6213_v52  ;;  %v6165_v19 = vsub.f32 %v26246_v33, %v6111_v62 }
 0x340   :  { %v6215_v15 = vmul.f32 1.442695, %v6164_v63 }
 0x341   :  { %v26397_v60 = vpop.eup %24285  ;;  %v6217_v50 = vmul.f32 1.442695, %v6165_v19 }
 0x342   :  { %24291 = vpow2.f32 %v6215_v15  ;;  %v6289_v38 = vsel %vm768_vm3, %v26397_v60, 0.0 }
 0x343   :  { %24293 = vpow2.f32 %v6217_v50  ;;  %6290 = vadd.xlane.f32.xlu1 %v6289_v38 }
 0x345   :  { %v6114_v45 = vpop.xlane.xlu0 %6113 }
 0x346   :  { %v6117_v12 = vpop.xlane.xlu1 %6116  ;;  %v6166_v53 = vsub.f32 %v26260_v27, %v6114_v45 }
 0x347   :  { %v6167_v43 = vsub.f32 %v26262_v23, %v6117_v12 }
 0x348   :  { %v26403_v4 = vpop.eup %24287  ;;  %v6219_v52 = vmul.f32 1.442695, %v6166_v53 }
 0x349   :  { %v26405_v33 = vpop.eup %24289  ;;  %v6221_v57 = vmul.f32 1.442695, %v6167_v43  ;;  %v6120_v56 = vpop.xlane.xlu0 %6119  ;;  %v6292_v37 = vsel %vm768_vm3, %v26403_v4, 0.0 }
 0x34a   :  { %24295 = vpow2.f32 %v6219_v52  ;;  %v6123_v11 = vpop.xlane.xlu1 %6122  ;;  %v6168_v50 = vsub.f32 %v26272_v31, %v6120_v56  ;;  %v6295_v62 = vsel %vm768_vm3, %v26405_v33, 0.0  ;;  %6293 = vadd.xlane.f32.xlu0 %v6292_v37 }
 0x34b   :  { %24297 = vpow2.f32 %v6221_v57  ;;  %v6169_v27 = vsub.f32 %v26274_v5, %v6123_v11  ;;  %6296 = vadd.xlane.f32.xlu1 %v6295_v62  ;;  %v3297_v57 = vsub.f32 %v25849_v20, %v26168_v21 }
 0x34c   :  { %v26413_v23 = vpop.eup %24291  ;;  %v6223_v63 = vmul.f32 1.442695, %v6168_v50 }
 0x34d   :  { %v26415_v19 = vpop.eup %24293  ;;  %v6225_v15 = vmul.f32 1.442695, %v6169_v27  ;;  %v6298_v38 = vsel %vm768_vm3, %v26413_v23, 0.0  ;;  %v3329_v21 = vmul.f32 1.442695, %v3297_v57 }
 0x34e   :  { %24299 = vpow2.f32 %v6223_v63  ;;  %v6129_v45 = vpop.xlane.xlu1 %6128  ;;  %v6301_v31 = vsel %vm768_vm3, %v26415_v19, 0.0  ;;  %6299 = vadd.xlane.f32.xlu0 %v6298_v38 }
 0x34f   :  { %24301 = vpow2.f32 %v6225_v15  ;;  %v6171_v12 = vsub.f32 %v26282_v6, %v6129_v45  ;;  %v6126_v5 = vpop.xlane.xlu0 %6125  ;;  %6302 = vadd.xlane.f32.xlu1 %v6301_v31 }
 0x350   :  { %v6170_v53 = vsub.f32 %v26285_v26, %v6126_v5  ;;  %v3298_v5 = vsub.f32 %v25861_v55, %v26170_v14 }
 0x351   :  { %v6229_v43 = vmul.f32 1.442695, %v6171_v12 }
 0x352   :  { %v6227_v52 = vmul.f32 1.442695, %v6170_v53 }
 0x353   :  { %24303 = vpow2.f32 %v6229_v43  ;;  %v6135_v56 = vpop.xlane.xlu1 %6134  ;;  %v6132_v37 = vpop.xlane.xlu0 %6131 }
 0x354   :  { %v26425_v11 = vpop.eup %24295  ;;  %24305 = vpow2.f32 %v6227_v52  ;;  %v6173_v50 = vsub.f32 %v26293_v10, %v6135_v56  ;;  %v6172_v62 = vsub.f32 %v26296_v42, %v6132_v37 }
 0x355   :  { %v26429_v6 = vpop.eup %24297  ;;  %v6304_v26 = vsel %vm768_vm3, %v26425_v11, 0.0 }
 0x356   :  { %v6233_v27 = vmul.f32 1.442695, %v6173_v50  ;;  %v6231_v63 = vmul.f32 1.442695, %v6172_v62  ;;  %v6307_v20 = vsel %vm768_vm3, %v26429_v6, 0.0  ;;  %6305 = vadd.xlane.f32.xlu0 %v6304_v26 }
 0x357   :  { %v6141_v15 = vpop.xlane.xlu1 %6140  ;;  %v6138_v38 = vpop.xlane.xlu0 %6137  ;;  %6308 = vadd.xlane.f32.xlu1 %v6307_v20  ;;  %v3331_v50 = vmul.f32 1.442695, %v3298_v5 }
 0x358   :  { %v26435_v45 = vpop.eup %24299  ;;  %24307 = vpow2.f32 %v6233_v27  ;;  %v6175_v10 = vsub.f32 %v26302_v25, %v6141_v15  ;;  %v6174_v42 = vsub.f32 %v26305_v54, %v6138_v38 }
 0x359   :  { %v26439_v31 = vpop.eup %24301  ;;  %24309 = vpow2.f32 %v6231_v63  ;;  %v6310_v12 = vsel %vm768_vm3, %v26435_v45, 0.0 }
 0x35a   :  { %v6237_v53 = vmul.f32 1.442695, %v6175_v10  ;;  %v6235_v43 = vmul.f32 1.442695, %v6174_v42  ;;  %v6313_v52 = vsel %vm768_vm3, %v26439_v31, 0.0  ;;  %6311 = vadd.xlane.f32.xlu0 %v6310_v12  ;;  %24311 = vpow2.f32 %v3329_v21 }
 0x35b   :  { %v6144_v57 = vpop.xlane.xlu0 %6143  ;;  %6314 = vadd.xlane.f32.xlu1 %v6313_v52 }
 0x35c   :  { %24313 = vpow2.f32 %v6237_v53  ;;  %v6176_v54 = vsub.f32 %v26312_v17, %v6144_v57 }
 0x35d   :  { %v26448_v25 = vpop.eup %24303  ;;  %24315 = vpow2.f32 %v6235_v43  ;;  %v6243_v56 = vpop.xlane.xlu1 %6242 }
 0x35e   :  { %v26450_v37 = vpop.eup %24305  ;;  %v6239_v14 = vmul.f32 1.442695, %v6176_v54  ;;  %24317 = vrcp.f32 %v6243_v56  ;;  %v6319_v55 = vsel %vm768_vm3, %v26448_v25, 0.0 }
 0x35f   :  { %6320 = vadd.xlane.f32.xlu1 %v6319_v55  ;;  %v6316_v62 = vsel %vm768_vm3, %v26450_v37, 0.0 }
 0x360   :  { %24319 = vpow2.f32 %v6239_v14  ;;  %6317 = vadd.xlane.f32.xlu0 %v6316_v62 }
 0x361   :  { %24321 = vpow2.f32 %v3331_v50  ;;  %v6246_v17 = vpop.xlane.xlu0 %6245 }
 0x362   :  { %v26456_v26 = vpop.eup %24307  ;;  %24323 = vrcp.f32 %v6246_v17 }
 0x363   :  { %v26458_v27 = vpop.eup %24309  ;;  %v6325_v63 = vsel %vm768_vm3, %v26456_v26, 0.0 }
 0x364   :  { %6326 = vadd.xlane.f32.xlu1 %v6325_v63  ;;  %v6322_v20 = vsel %vm768_vm3, %v26458_v27, 0.0  ;;  %v26464_v21 = vpop.eup %24311 }
 0x365   :  { %6323 = vadd.xlane.f32.xlu0 %v6322_v20  ;;  %v6249_v15 = vpop.xlane.xlu1 %6248  ;;  %v3393_v57 = vsel %vm768_vm3, %v26464_v21, 0.0  ;;  %v3299_v20 = vsub.f32 %v25868_v8, %v26176_v49 }
 0x366   :  { %v26466_v38 = vpop.eup %24313  ;;  %24325 = vrcp.f32 %v6249_v15  ;;  %v3300_v15 = vsub.f32 %v25878_v59, %v26178_v28 }
 0x367   :  { %v26468_v10 = vpop.eup %24315  ;;  %v6331_v42 = vsel %vm768_vm3, %v26466_v38, 0.0 }
 0x368   :  { %v24318_v12 = vpop.eup %24317  ;;  %6332 = vadd.xlane.f32.xlu1 %v6331_v42  ;;  %v6328_v5 = vsel %vm768_vm3, %v26468_v10, 0.0  ;;  %v3335_v8 = vmul.f32 1.442695, %v3300_v15  ;;  %v29820_v15 = vld [vmem:[#allocation162_spill] sm:$0xff] }
 0x369   :  { %6329 = vadd.xlane.f32.xlu0 %v6328_v5  ;;  %v6252_v53 = vpop.xlane.xlu0 %6251  ;;  %v6338_v43 = vmul.f32 %v24318_v12, %v26316_v41 }
 0x36a   :  { %v26475_v52 = vpop.eup %24319  ;;  %24327 = vrcp.f32 %v6252_v53 }
 0x36b   :  { %23276 = vmatmul.mubr.msk.f32.vlgmr.msra.gmra.mrb[112].mxu1 %vm768_vm3, %v6338_v43  ;;  %v6334_v54 = vsel %vm768_vm3, %v26475_v52, 0.0  ;;  %v26482_v56 = vpop.eup %24321 }
 0x36c   :  { %3394 = vadd.xlane.f32.xlu1 %v3393_v57  ;;  %23284 = vmatpush3.msra.mxu1 %v25708_v2  ;;  %v24324_v50 = vpop.eup %24323  ;;  %v3396_v62 = vsel %vm768_vm3, %v26482_v56, 0.0 }
 0x36d   :  { %6335 = vadd.xlane.f32.xlu0 %v6334_v54  ;;  %23285 = vmatprep.mubr.msk.f32.mxu1 %vm24798_vm2, %v29743_v9  ;;  %v6340_v41 = vmul.f32 %v24324_v50, %v26321_v46  ;;  %v29810_v50 = vld [vmem:[#allocation78_spill] sm:$0xff] }
 0x36e   :  { %23293 = vmatprep.subr.mxu1 %v29743_v9 }
 0x36f   :  { %v6255_v14 = vpop.xlane.xlu1 %6254  ;;  %23281 = vmatmul.mubr.msk.f32.vlgmr.msra.gmra.mrb[112].mxu0 %vm768_vm3, %v6340_v41 }
 0x370   :  { %v24326_v55 = vpop.eup %24325  ;;  %24329 = vrcp.f32 %v6255_v14  ;;  %23289 = vmatpush3.msra.mxu0 %v25721_v7  ;;  %23290 = vmatprep.mubr.msk.f32.mxu0 %vm24798_vm2, %v29743_v9 }
 0x371   :  { %3397 = vadd.xlane.f32.xlu0 %v3396_v62  ;;  %v6342_v2 = vmul.f32 %v24326_v55, %v26325_v18  ;;  %23298 = vmatprep.subr.mxu0 %v29743_v9  ;;  %v29812_v55 = vld [vmem:[#allocation80_spill] sm:$0xff] }
 0x373   :  { %23286 = vmatmul.mubr.msk.f32.vlgmr.msra.gmra.mrb[114].mxu1 %vm768_vm3, %v6342_v2  ;;  %v29814_v2 = vld [vmem:[#allocation101_spill] sm:$0xff] }
 0x374   :  { %v24328_v46 = vpop.eup %24327  ;;  %23294 = vmatpush3.msra.mxu1 %v25747_v3  ;;  %23295 = vmatprep.mubr.msk.f32.mxu1 %vm24798_vm2, %v29743_v9 }
 0x375   :  { %v6344_v17 = vmul.f32 %v24328_v46, %v26329_v34  ;;  %23303 = vmatprep.subr.mxu1 %v29743_v9 }
 0x377   :  { %23291 = vmatmul.mubr.msk.f32.vlgmr.msra.gmra.mrb[114].mxu0 %vm768_vm3, %v6344_v17  ;;  %v6258_v7 = vpop.xlane.xlu0 %6257  ;;  %v29815_v17 = vld [vmem:[#allocation99_spill] sm:$0xff] }
 0x378   :  { %23299 = vmatpush3.msra.mxu0 %v25756_v13  ;;  %24331 = vrcp.f32 %v6258_v7  ;;  %23300 = vmatprep.mubr.msk.f32.mxu0 %vm24798_vm2, %v29743_v9 }
 0x379   :  { %23308 = vmatprep.subr.mxu0 %v29743_v9 }
 0x37a   :  { %v24330_v18 = vpop.eup %24329 }
 0x37b   :  { %v6346_v3 = vmul.f32 %v24330_v18, %v26334_v61 }
 0x37d   :  { %7921 = vrot.lane.b32.xlu1 %v25513_v51, %s24799_s27  ;;  %23296 = vmatmul.mubr.msk.f32.vlgmr.msra.gmra.mrb[116].mxu1 %vm768_vm3, %v6346_v3 }
 0x37e   :  { %23304 = vmatpush3.msra.mxu1 %v25777_v0  ;;  %23305 = vmatprep.mubr.msk.f32.mxu1 %vm24798_vm2, %v29743_v9 }
 0x37f   :  { %v6261_v13 = vpop.xlane.xlu1 %6260  ;;  %23313 = vmatprep.subr.mxu1 %v29743_v9 }
 0x380   :  { %24333 = vrcp.f32 %v6261_v13  ;;  %v29816_v13 = vld [vmem:[#allocation161_spill] sm:$0xff] }
 0x382   :  { %v24332_v34 = vpop.eup %24331 }
 0x383   :  { %v6348_v63 = vmul.f32 %v24332_v34, %v26339_v22 }
 0x385   :  { %23301 = vmatmul.mubr.msk.f32.vlgmr.msra.gmra.mrb[116].mxu0 %vm768_vm3, %v6348_v63  ;;  %v29817_v63 = vld [vmem:[#allocation134_spill] sm:$0xff] }
 0x386   :  { %23309 = vmatpush3.msra.mxu0 %v25786_v48  ;;  %23310 = vmatprep.mubr.msk.f32.mxu0 %vm24798_vm2, %v29743_v9  ;;  %v3333_v48 = vmul.f32 1.442695, %v3299_v20 }
 0x387   :  { %7997 = vrot.lane.b32.xlu0 %v25528_v47, %s24799_s27  ;;  %v6264_v0 = vpop.xlane.xlu0 %6263  ;;  %23318 = vmatprep.subr.mxu0 %v29743_v9 }
 0x388   :  { %24335 = vrcp.f32 %v6264_v0 }
 0x38a   :  { %v24334_v61 = vpop.eup %24333 }
 0x38b   :  { %v6350_v22 = vmul.f32 %v24334_v61, %v26344_v35  ;;  %v29819_v61 = vld [vmem:[#allocation100_spill] sm:$0xff] }
 0x38d   :  { %23306 = vmatmul.mubr.msk.f32.vlgmr.msra.gmra.mrb[118].mxu1 %vm768_vm3, %v6350_v22 }
 0x38e   :  { %23314 = vmatpush3.msra.mxu1 %v25797_v40  ;;  %23315 = vmatprep.mubr.msk.f32.mxu1 %vm24798_vm2, %v29743_v9 }
 0x38f   :  { %v6267_v42 = vpop.xlane.xlu1 %6266  ;;  %23323 = vmatprep.subr.mxu1 %v29743_v9 }
 0x390   :  { %24337 = vrcp.f32 %v6267_v42 }
 0x391   :  { %24339 = vpow2.f32 %v3333_v48 }
 0x392   :  { %v24336_v12 = vpop.eup %24335  ;;  %24341 = vpow2.f32 %v3335_v8 }
 0x393   :  { %v6352_v49 = vmul.f32 %v24336_v12, %v26349_v1  ;;  %v29821_v12 = vld [vmem:[#allocation104_spill] sm:$0xff] }
 0x395   :  { %23311 = vmatmul.mubr.msk.f32.vlgmr.msra.gmra.mrb[118].mxu0 %vm768_vm3, %v6352_v49 }
 0x396   :  { %23319 = vmatpush3.msra.mxu0 %v25802_v58  ;;  %23320 = vmatprep.mubr.msk.f32.mxu0 %vm24798_vm2, %v29743_v9 }
 0x397   :  { %v6270_v40 = vpop.xlane.xlu0 %6269  ;;  %23328 = vmatprep.subr.mxu0 %v29743_v9 }
 0x398   :  { %24343 = vrcp.f32 %v6270_v40 }
 0x39a   :  { %v24338_v59 = vpop.eup %24337 }
 0x39b   :  { %v6354_v28 = vmul.f32 %v24338_v59, %v26354_v36  ;;  %v26541_v35 = vpop.eup %24339  ;;  %v29822_v59 = vld [vmem:[#allocation163_spill] sm:$0xff] }
 0x39c   :  { %v3399_v58 = vsel %vm768_vm3, %v26541_v35, 0.0  ;;  %v26550_v5 = vpop.eup %24341 }
 0x39d   :  { %23316 = vmatmul.mubr.msk.f32.vlgmr.msra.gmra.mrb[120].mxu1 %vm768_vm3, %v6354_v28  ;;  %v3402_v43 = vsel %vm768_vm3, %v26550_v5, 0.0 }
 0x39e   :  { %23324 = vmatpush3.msra.mxu1 %v25817_v32  ;;  %23325 = vmatprep.mubr.msk.f32.mxu1 %vm24798_vm2, %v29743_v9 }
 0x39f   :  { %23333 = vmatprep.subr.mxu1 %v29743_v9 }
 0x3a0   :  { %v6273_v1 = vpop.xlane.xlu1 %6272 }
 0x3a1   :  { %3400 = vadd.xlane.f32.xlu1 %v3399_v58  ;;  %24345 = vrcp.f32 %v6273_v1  ;;  %v29823_v1 = vld [vmem:[#allocation109_spill] sm:$0xff] }
 0x3a2   :  { %v24344_v36 = vpop.eup %24343 }
 0x3a3   :  { %v6356_v53 = vmul.f32 %v24344_v36, %v26359_v39 }
 0x3a5   :  { %23321 = vmatmul.mubr.msk.f32.vlgmr.msra.gmra.mrb[120].mxu0 %vm768_vm3, %v6356_v53 }
 0x3a6   :  { %3403 = vadd.xlane.f32.xlu0 %v3402_v43  ;;  %23329 = vmatpush3.msra.mxu0 %v25824_v30 }
 0x3a7   :  { %v6276_v32 = vpop.xlane.xlu0 %6275  ;;  %23330 = vmatprep.mubr.msk.f32.mxu0 %vm24798_vm2, %v29743_v9  ;;  %23338 = vmatprep.subr.mxu0 %v29743_v9 }
 0x3a8   :  { %24347 = vrcp.f32 %v6276_v32 }
 0x3ab   :  { %v24346_v57 = vpop.eup %24345 }
 0x3ac   :  { %v6358_v54 = vmul.f32 %v24346_v57, %v26364_v16  ;;  %v29811_v16 = vld [vmem:[#allocation98_spill] sm:$0xff] }
 0x3ae   :  { %23326 = vmatmul.mubr.msk.f32.vlgmr.msra.gmra.mrb[122].mxu1 %vm768_vm3, %v6358_v54 }
 0x3af   :  { %23334 = vmatpush3.msra.mxu1 %v25839_v24  ;;  %23335 = vmatprep.mubr.msk.f32.mxu1 %vm24798_vm2, %v29743_v9 }
 0x3b0   :  { %v6279_v39 = vpop.xlane.xlu1 %6278  ;;  %23343 = vmatprep.subr.mxu1 %v29743_v9 }
 0x3b1   :  { %24349 = vrcp.f32 %v6279_v39 }
 0x3b2   :  { %v24348_v30 = vpop.eup %24347  ;;  %8073 = vrot.lane.b32.xlu1 %v29810_v50, %s24799_s27 }
 0x3b3   :  { %v6360_v41 = vmul.f32 %v24348_v30, %v26369_v44  ;;  %v29813_v44 = vld [vmem:[#allocation133_spill] sm:$0xff]  ;;  %v29824_v30 = vld [vmem:[#allocation108_spill] sm:$0xff] }
 0x3b4   :  { %v3301_v46 = vsub.f32 %v29814_v2, %v29813_v44 }
 0x3b5   :  { %23331 = vmatmul.mubr.msk.f32.vlgmr.msra.gmra.mrb[122].mxu0 %vm768_vm3, %v6360_v41 }
 0x3b6   :  { %23339 = vmatpush3.msra.mxu0 %v29811_v16  ;;  %23340 = vmatprep.mubr.msk.f32.mxu0 %vm24798_vm2, %v29743_v9  ;;  %v3337_v3 = vmul.f32 1.442695, %v3301_v46  ;;  %v29825_v46 = vld [vmem:[#allocation132_spill] sm:$0xff] }
 0x3b7   :  { %v6282_v24 = vpop.xlane.xlu0 %6281  ;;  %23348 = vmatprep.subr.mxu0 %v29743_v9 }
 0x3b8   :  { %24351 = vrcp.f32 %v6282_v24 }
 0x3bb   :  { %v24350_v14 = vpop.eup %24349 }
 0x3bc   :  { %8149 = vrot.lane.b32.xlu0 %v29812_v55, %s24799_s27  ;;  %v6362_v62 = vmul.f32 %v24350_v14, %v26374_v29  ;;  %v29818_v29 = vld [vmem:[#allocation102_spill] sm:$0xff] }
 0x3bd   :  { %v3302_v0 = vsub.f32 %v29818_v29, %v29817_v63  ;;  %v29828_v63 = vld [vmem:[#allocation135_spill] sm:$0xff] }
 0x3be   :  { %23336 = vmatmul.mubr.msk.f32.vlgmr.msra.gmra.mrb[124].mxu1 %vm768_vm3, %v6362_v62  ;;  %v29829_v29 = vld [vmem:[#allocation103_spill] sm:$0xff] }
 0x3bf   :  { %23344 = vmatpush3.msra.mxu1 %v29815_v17  ;;  %23345 = vmatprep.mubr.msk.f32.mxu1 %vm24798_vm2, %v29743_v9  ;;  %v3339_v22 = vmul.f32 1.442695, %v3302_v0  ;;  %v29826_v17 = vld [vmem:[#allocation82_spill] sm:$0xff]  ;;  %v3303_v0 = vsub.f32 %v29829_v29, %v29828_v63 }
 0x3c0   :  { %v6285_v7 = vpop.xlane.xlu1 %6284  ;;  %23353 = vmatprep.subr.mxu1 %v29743_v9 }
 0x3c1   :  { %24353 = vrcp.f32 %v6285_v7 }
 0x3c2   :  { %v24352_v18 = vpop.eup %24351  ;;  %24355 = vpow2.f32 %v3337_v3 }
 0x3c3   :  { %v6364_v34 = vmul.f32 %v24352_v18, %v29816_v13  ;;  %v29827_v13 = vld [vmem:[#allocation84_spill] sm:$0xff] }
 0x3c5   :  { %23341 = vmatmul.mubr.msk.f32.vlgmr.msra.gmra.mrb[124].mxu0 %vm768_vm3, %v6364_v34 }
 0x3c6   :  { %23349 = vmatpush3.msra.mxu0 %v29819_v61  ;;  %23350 = vmatprep.mubr.msk.f32.mxu0 %vm24798_vm2, %v29743_v9 }
 0x3c7   :  { %v6288_v20 = vpop.xlane.xlu0 %6287  ;;  %23358 = vmatprep.subr.mxu0 %v29743_v9 }
 0x3c8   :  { %24357 = vrcp.f32 %v6288_v20 }
 0x3c9   :  { %24359 = vpow2.f32 %v3339_v22  ;;  %v3341_v22 = vmul.f32 1.442695, %v3303_v0 }
 0x3cb   :  { %v24354_v48 = vpop.eup %24353 }
 0x3cc   :  { %v6366_v42 = vmul.f32 %v24354_v48, %v29820_v15  ;;  %v26598_v49 = vpop.eup %24355 }
 0x3cd   :  { %v3405_v58 = vsel %vm768_vm3, %v26598_v49, 0.0 }
 0x3ce   :  { %23346 = vmatmul.mubr.msk.f32.vlgmr.msra.gmra.mrb[126].mxu1 %vm768_vm3, %v6366_v42  ;;  %v29830_v42 = vld [vmem:[#allocation136_spill] sm:$0xff] }
 0x3cf   :  { %23354 = vmatpush3.msra.mxu1 %v29821_v12  ;;  %23355 = vmatprep.mubr.msk.f32.mxu1 %vm24798_vm2, %v29743_v9  ;;  %v29831_v12 = vld [vmem:[#allocation105_spill] sm:$0xff] }
 0x3d0   :  { %v6291_v8 = vpop.xlane.xlu1 %6290  ;;  %23363 = vmatprep.subr.mxu1 %v29743_v9 }
 0x3d1   :  { %24361 = vrcp.f32 %v6291_v8  ;;  %v3304_v8 = vsub.f32 %v29831_v12, %v29830_v42 }
 0x3d2   :  { %v24358_v40 = vpop.eup %24357 }
 0x3d3   :  { %v6368_v28 = vmul.f32 %v24358_v40, %v29822_v59  ;;  %v26605_v36 = vpop.eup %24359 }
 0x3d4   :  { %v3408_v32 = vsel %vm768_vm3, %v26605_v36, 0.0 }
 0x3d5   :  { %23351 = vmatmul.mubr.msk.f32.vlgmr.msra.gmra.mrb[126].mxu0 %vm768_vm3, %v6368_v28 }
 0x3d6   :  { %3406 = vadd.xlane.f32.xlu1 %v3405_v58  ;;  %23359 = vmatpush3.msra.mxu0 %v29823_v1  ;;  %v3343_v58 = vmul.f32 1.442695, %v3304_v8 }
 0x3d7   :  { %v6294_v53 = vpop.xlane.xlu0 %6293  ;;  %23360 = vmatprep.mubr.msk.f32.mxu0 %vm24798_vm2, %v29743_v9  ;;  %23368 = vmatprep.subr.mxu0 %v29743_v9 }
 0x3d8   :  { %v6297_v43 = vpop.xlane.xlu1 %6296  ;;  %24363 = vrcp.f32 %v6294_v53 }
 0x3d9   :  { %24365 = vrcp.f32 %v6297_v43 }
 0x3db   :  { %v24362_v57 = vpop.eup %24361  ;;  %3409 = vadd.xlane.f32.xlu0 %v3408_v32  ;;  %v6300_v54 = vpop.xlane.xlu0 %6299 }
 0x3dc   :  { %24367 = vrcp.f32 %v6300_v54  ;;  %v6370_v39 = vmul.f32 %v24362_v57, %v26397_v60  ;;  %v6303_v41 = vpop.xlane.xlu1 %6302 }
 0x3dd   :  { %24369 = vrcp.f32 %v6303_v41  ;;  %v29834_v41 = vld [vmem:[#allocation137_spill] sm:$0xff] }
 0x3de   :  { %23356 = vmatmul.mubr.msk.f32.vlgmr.msra.gmra.mrb[128].mxu1 %vm768_vm3, %v6370_v39 }
 0x3df   :  { %23364 = vmatpush3.msra.mxu1 %v29824_v30  ;;  %23365 = vmatprep.mubr.msk.f32.mxu1 %vm24798_vm2, %v29743_v9  ;;  %v29833_v30 = vld [vmem:[#allocation88_spill] sm:$0xff] }
 0x3e0   :  { %23373 = vmatprep.subr.mxu1 %v29743_v9 }
 0x3e2   :  { %v24364_v16 = vpop.eup %24363 }
 0x3e3   :  { %v24366_v24 = vpop.eup %24365  ;;  %v6306_v14 = vpop.xlane.xlu0 %6305  ;;  %v6372_v62 = vmul.f32 %v24364_v16, %v26403_v4  ;;  %v29835_v16 = vld [vmem:[#allocation106_spill] sm:$0xff] }
 0x3e4   :  { %v6309_v44 = vpop.xlane.xlu1 %6308  ;;  %v6374_v2 = vmul.f32 %v24366_v24, %v26405_v33  ;;  %24371 = vrcp.f32 %v6306_v14  ;;  %v3305_v24 = vsub.f32 %v29835_v16, %v29834_v41  ;;  %v29838_v41 = vld [vmem:[#allocation90_spill] sm:$0xff] }
 0x3e5   :  { %23361 = vmatmul.mubr.msk.f32.vlgmr.msra.gmra.mrb[128].mxu0 %vm768_vm3, %v6372_v62  ;;  %24373 = vpow2.f32 %v3341_v22 }
 0x3e6   :  { %v24368_v60 = vpop.eup %24367  ;;  %23366 = vmatmul.mubr.msk.f32.vlgmr.msra.gmra.mrb[130].mxu1 %vm768_vm3, %v6374_v2  ;;  %23369 = vmatpush3.msra.mxu0 %v29825_v46  ;;  %24375 = vpow2.f32 %v3343_v58  ;;  %v3345_v14 = vmul.f32 1.442695, %v3305_v24  ;;  %v29837_v46 = vld [vmem:[#allocation107_spill] sm:$0xff] }
 0x3e7   :  { %8225 = vrot.lane.b32.xlu1 %v29826_v17, %s24799_s27  ;;  %v6312_v7 = vpop.xlane.xlu0 %6311  ;;  %23370 = vmatprep.mubr.msk.f32.mxu0 %vm24798_vm2, %v29743_v9  ;;  %v6376_v18 = vmul.f32 %v24368_v60, %v26413_v23  ;;  %v24370_v15 = vpop.eup %24369  ;;  %24377 = vrcp.f32 %v6309_v44  ;;  %v29836_v60 = vld [vmem:[#allocation138_spill] sm:$0xff] }
 0x3e8   :  { %v26628_v4 = vpop.xlane.xlu1 %6314  ;;  %23375 = vmatprep.mubr.msk.f32.mxu1 %vm24798_vm2, %v29743_v9  ;;  %23378 = vmatprep.subr.mxu0 %v29743_v9  ;;  %v6378_v28 = vmul.f32 %v24370_v15, %v26415_v19  ;;  %24379 = vrcp.f32 %v6312_v7 }
 0x3e9   :  { %23371 = vmatmul.mubr.msk.f32.vlgmr.msra.gmra.mrb[130].mxu0 %vm768_vm3, %v6376_v18  ;;  %v3306_v18 = vsub.f32 %v29837_v46, %v29836_v60  ;;  %24381 = vpow2.f32 %v3345_v14  ;;  %v29840_v60 = vld [vmem:[#allocation139_spill] sm:$0xff]  ;;  %v29841_v46 = vld [vmem:[#allocation110_spill] sm:$0xff] }
 0x3ea   :  { %23380 = vmatprep.mubr.msk.f32.mxu0 %vm24798_vm2, %v29743_v9 }
 0x3eb   :  { %v3347_v0 = vmul.f32 1.442695, %v3306_v18  ;;  %v3307_v18 = vsub.f32 %v29841_v46, %v29840_v60 }
 0x3ec   :  { %v26636_v33 = vpop.xlane.xlu1 %6320 }
 0x3ed   :  { %v26638_v3 = vpop.xlane.xlu0 %6317  ;;  %24383 = vpow2.f32 %v3347_v0  ;;  %v3349_v0 = vmul.f32 1.442695, %v3307_v18 }
 0x3ee   :  { %v24372_v53 = vpop.eup %24371  ;;  %24385 = vrcp.f32 %v26628_v4 }
 0x3ef   :  { %v6380_v32 = vmul.f32 %v24372_v53, %v26425_v11  ;;  %v26670_v19 = vpop.eup %24373  ;;  %v29832_v11 = vld [vmem:[#allocation86_spill] sm:$0xff]  ;;  %24387 = vrcp.f32 %v26638_v3 }
 0x3f0   :  { %v3411_v57 = vsel %vm768_vm3, %v26670_v19, 0.0  ;;  %v26674_v54 = vpop.eup %24375  ;;  %24389 = vpow2.f32 %v3349_v0 }
 0x3f1   :  { %8301 = vrot.lane.b32.xlu0 %v29827_v13, %s24799_s27  ;;  %v26642_v23 = vpop.xlane.xlu1 %6326  ;;  %v3414_v39 = vsel %vm768_vm3, %v26674_v54, 0.0  ;;  %v24378_v2 = vpop.eup %24377 }
 0x3f2   :  { %v26644_v34 = vpop.xlane.xlu0 %6323  ;;  %v6382_v29 = vmul.f32 %v24378_v2, %v26429_v6  ;;  %v24380_v22 = vpop.eup %24379  ;;  %v29839_v2 = vld [vmem:[#allocation92_spill] sm:$0xff] }
 0x3f3   :  { %v6384_v15 = vmul.f32 %v24380_v22, %v26435_v45  ;;  %v26700_v6 = vpop.eup %24381 }
 0x3f4   :  { %v3417_v12 = vsel %vm768_vm3, %v26700_v6, 0.0 }
 0x3f5   :  { %v26648_v61 = vpop.xlane.xlu1 %6332 }
 0x3f6   :  { %v26650_v20 = vpop.xlane.xlu0 %6329 }
 0x3f9   :  { %v26652_v48 = vpop.xlane.xlu1 %3394 }
 0x3fa   :  { %v26656_v40 = vpop.xlane.xlu0 %6335 }
 0x3fd   :  { %v7922_v59 = vpop.permute.xlu1 %7921 }
 0x3fe   :  { %v26659_v1 = vpop.xlane.xlu0 %3397  ;;  %23374 = vmatpush3.msra.mxu1 %v7922_v59  ;;  %v26706_v59 = vpop.eup %24383 }
 0x3ff   :  { %23376 = vmatmul.mubr.msk.f32.vlgmr.msra.gmra.mrb[132].mxu1 %vm768_vm3, %v6378_v28  ;;  %23383 = vmatprep.subr.mxu1 %v29743_v9  ;;  %v3420_v28 = vsel %vm768_vm3, %v26706_v59, 0.0 }
 0x400   :  { %23385 = vmatprep.mubr.msk.f32.mxu1 %vm24798_vm2, %v29743_v9 }
 0x402   :  { %v7998_v43 = vpop.permute.xlu0 %7997 }
 0x403   :  { %23379 = vmatpush3.msra.mxu0 %v7998_v43 }
 0x404   :  { %23381 = vmatmul.mubr.msk.f32.vlgmr.msra.gmra.mrb[132].mxu0 %vm768_vm3, %v6380_v32  ;;  %23388 = vmatprep.subr.mxu0 %v29743_v9 }
 0x405   :  { %23390 = vmatprep.mubr.msk.f32.mxu0 %vm24798_vm2, %v29743_v9 }
 0x40b   :  { %3412 = vadd.xlane.f32.xlu1 %v3411_v57 }
 0x410   :  { %3415 = vadd.xlane.f32.xlu0 %v3414_v39 }
 0x41c   :  { %8377 = vrot.lane.b32.xlu1 %v29832_v11, %s24799_s27 }
 0x426   :  { %8453 = vrot.lane.b32.xlu0 %v29833_v30, %s24799_s27 }
 0x42e   :  { %v26684_v62 = vpop.xlane.xlu1 %3400 }
 0x432   :  { %v8074_v63 = vpop.permute.xlu1 %8073 }
 0x433   :  { %v26689_v44 = vpop.xlane.xlu0 %3403  ;;  %23384 = vmatpush3.msra.mxu1 %v8074_v63 }
 0x434   :  { %23386 = vmatmul.mubr.msk.f32.vlgmr.msra.gmra.mrb[134].mxu1 %vm768_vm3, %v6382_v29  ;;  %23393 = vmatprep.subr.mxu1 %v29743_v9 }
 0x435   :  { %23395 = vmatprep.mubr.msk.f32.mxu1 %vm24798_vm2, %v29743_v9 }
 0x437   :  { %v8150_v7 = vpop.permute.xlu0 %8149 }
 0x438   :  { %23389 = vmatpush3.msra.mxu0 %v8150_v7  ;;  %v24386_v7 = vpop.eup %24385 }
 0x439   :  { %23391 = vmatmul.mubr.msk.f32.vlgmr.msra.gmra.mrb[134].mxu0 %vm768_vm3, %v6384_v15  ;;  %23398 = vmatprep.subr.mxu0 %v29743_v9  ;;  %v29842_v15 = vld [vmem:[#allocation140_spill] sm:$0xff]  ;;  %v24388_v3 = vpop.eup %24387 }
 0x43a   :  { %23400 = vmatprep.mubr.msk.f32.mxu0 %vm24798_vm2, %v29743_v9  ;;  %v6388_v60 = vmul.f32 %v24388_v3, %v26450_v37  ;;  %v26750_v46 = vpop.eup %24389  ;;  %v29849_v3 = vld [vmem:[#allocation96_spill] sm:$0xff] }
 0x43e   :  { %v26702_v42 = vpop.f32.mrb[112].mxu1 }
 0x43f   :  { %v23277_v8 = vpop.f32.mrb[113].mxu1 }
 0x440   :  { %3418 = vadd.xlane.f32.xlu1 %v3417_v12  ;;  %v29843_v12 = vld [vmem:[#allocation111_spill] sm:$0xff] }
 0x441   :  { %v3308_v8 = vsub.f32 %v29843_v12, %v29842_v15 }
 0x442   :  { %v26708_v45 = vpop.f32.mrb[112].mxu0 }
 0x443   :  { %v23282_v58 = vpop.f32.mrb[113].mxu0 }
 0x444   :  { %v3351_v58 = vmul.f32 1.442695, %v3308_v8 }
 0x445   :  { %3421 = vadd.xlane.f32.xlu0 %v3420_v28  ;;  %v6386_v28 = vmul.f32 %v24386_v7, %v26439_v31 }
 0x446   :  { %v26712_v53 = vpop.f32.mrb[114].mxu1  ;;  %24391 = vpow2.f32 %v3351_v58 }
 0x447   :  { %v23287_v43 = vpop.f32.mrb[115].mxu1  ;;  %24393 = vrcp.f32 %v26636_v33 }
 0x448   :  { %24395 = vrcp.f32 %v26644_v34 }
 0x44a   :  { %v26714_v32 = vpop.f32.mrb[114].mxu0 }
 0x44b   :  { %v23292_v57 = vpop.f32.mrb[115].mxu0 }
 0x450   :  { %v26716_v39 = vpop.f32.mrb[116].mxu1  ;;  %v26754_v0 = vpop.eup %24391 }
 0x451   :  { %8529 = vrot.lane.b32.xlu1 %v29838_v41, %s24799_s27  ;;  %v23297_v16 = vpop.f32.mrb[117].mxu1  ;;  %v3426_v7 = vsel %vm768_vm3, %v26754_v0, 0.0 }
 0x458   :  { %v26720_v24 = vpop.f32.mrb[116].mxu0 }
 0x459   :  { %v23302_v14 = vpop.f32.mrb[117].mxu0 }
 0x45b   :  { %8605 = vrot.lane.b32.xlu0 %v29839_v2, %s24799_s27 }
 0x460   :  { %v26728_v63 = vpop.f32.mrb[118].mxu1 }
 0x461   :  { %v23307_v29 = vpop.f32.mrb[119].mxu1 }
 0x462   :  { %v3423_v29 = vsel %vm768_vm3, %v26750_v46, 0.0 }
 0x463   :  { %v26730_v22 = vpop.xlane.xlu1 %3406 }
 0x467   :  { %v8226_v4 = vpop.permute.xlu1 %8225 }
 0x468   :  { %v26735_v43 = vpop.xlane.xlu0 %3409  ;;  %23394 = vmatpush3.msra.mxu1 %v8226_v4  ;;  %v26737_v57 = vpop.f32.mrb[118].mxu0  ;;  %v29847_v4 = vld [vmem:[#allocation94_spill] sm:$0xff] }
 0x469   :  { %23396 = vmatmul.mubr.msk.f32.vlgmr.msra.gmra.mrb[136].mxu1 %vm768_vm3, %v6386_v28  ;;  %v23312_v16 = vpop.f32.mrb[119].mxu0  ;;  %23403 = vmatprep.subr.mxu1 %v29743_v9 }
 0x46a   :  { %23405 = vmatprep.mubr.msk.f32.mxu1 %vm24798_vm2, %v29743_v9 }
 0x46c   :  { %v8302_v14 = vpop.permute.xlu0 %8301 }
 0x46d   :  { %23399 = vmatpush3.msra.mxu0 %v8302_v14 }
 0x46e   :  { %23401 = vmatmul.mubr.msk.f32.vlgmr.msra.gmra.mrb[136].mxu0 %vm768_vm3, %v6388_v60  ;;  %23408 = vmatprep.subr.mxu0 %v29743_v9  ;;  %v29851_v60 = vld [vmem:[#allocation141_spill] sm:$0xff] }
 0x46f   :  { %23410 = vmatprep.mubr.msk.f32.mxu0 %vm24798_vm2, %v29743_v9 }
 0x470   :  { %v26748_v31 = vpop.f32.mrb[120].mxu1 }
 0x471   :  { %29844 = vst [vmem:[#allocation98_spill] sm:$0xff] %v26748_v31  ;;  %v23317_v18 = vpop.f32.mrb[121].mxu1 }
 0x472   :  { %v29852_v18 = vld [vmem:[#allocation112_spill] sm:$0xff] }
 0x475   :  { %3424 = vadd.xlane.f32.xlu1 %v3423_v29  ;;  %v3309_v29 = vsub.f32 %v29852_v18, %v29851_v60 }
 0x478   :  { %v26756_v37 = vpop.f32.mrb[120].mxu0 }
 0x479   :  { %29845 = vst [vmem:[#allocation133_spill] sm:$0xff] %v26756_v37  ;;  %v23322_v15 = vpop.f32.mrb[121].mxu0 }
 0x47a   :  { %3427 = vadd.xlane.f32.xlu0 %v3426_v7  ;;  %v3353_v7 = vmul.f32 1.442695, %v3309_v29 }
 0x47c   :  { %24397 = vpow2.f32 %v3353_v7 }
 0x481   :  { %v26760_v12 = vpop.f32.mrb[122].mxu1 }
 0x482   :  { %29846 = vst [vmem:[#allocation101_spill] sm:$0xff] %v26760_v12  ;;  %v23327_v8 = vpop.f32.mrb[123].mxu1  ;;  %v29855_v12 = vld [vmem:[#allocation113_spill] sm:$0xff] }
 0x486   :  { %8681 = vrot.lane.b32.xlu1 %v29847_v4, %s24799_s27 }
 0x488   :  { %v26764_v28 = vpop.f32.mrb[122].mxu0 }
 0x489   :  { %29848 = vst [vmem:[#allocation99_spill] sm:$0xff] %v26764_v28  ;;  %v23332_v58 = vpop.f32.mrb[123].mxu0  ;;  %v24394_v28 = vpop.eup %24393 }
 0x48a   :  { %v29854_v58 = vld [vmem:[#allocation142_spill] sm:$0xff]  ;;  %v24396_v60 = vpop.eup %24395 }
 0x48b   :  { %v3310_v33 = vsub.f32 %v29855_v12, %v29854_v58 }
 0x490   :  { %8757 = vrot.lane.b32.xlu0 %v29849_v3, %s24799_s27 }
 0x491   :  { %v26769_v16 = vpop.f32.mrb[124].mxu1 }
 0x492   :  { %29850 = vst [vmem:[#allocation161_spill] sm:$0xff] %v26769_v16  ;;  %v23337_v14 = vpop.f32.mrb[125].mxu1  ;;  %v6390_v16 = vmul.f32 %v24394_v28, %v26448_v25 }
 0x493   :  { %v3355_v14 = vmul.f32 1.442695, %v3310_v33 }
 0x495   :  { %24399 = vpow2.f32 %v3355_v14 }
 0x496   :  { %24401 = vrcp.f32 %v26642_v23 }
 0x497   :  { %24403 = vrcp.f32 %v26650_v20 }
 0x498   :  { %v26774_v15 = vpop.xlane.xlu1 %3412  ;;  %v26776_v8 = vpop.f32.mrb[124].mxu0 }
 0x499   :  { %29853 = vst [vmem:[#allocation134_spill] sm:$0xff] %v26776_v8  ;;  %v23342_v37 = vpop.f32.mrb[125].mxu0 }
 0x49a   :  { %v6392_v37 = vmul.f32 %v24396_v60, %v26458_v27 }
 0x49c   :  { %v8378_v31 = vpop.permute.xlu1 %8377 }
 0x49d   :  { %v26781_v4 = vpop.xlane.xlu0 %3415  ;;  %23404 = vmatpush3.msra.mxu1 %v8378_v31  ;;  %v26794_v31 = vpop.eup %24397 }
 0x49e   :  { %23406 = vmatmul.mubr.msk.f32.vlgmr.msra.gmra.mrb[138].mxu1 %vm768_vm3, %v6390_v16  ;;  %23413 = vmatprep.subr.mxu1 %v29743_v9  ;;  %v3429_v16 = vsel %vm768_vm3, %v26794_v31, 0.0 }
 0x49f   :  { %23415 = vmatprep.mubr.msk.f32.mxu1 %vm24798_vm2, %v29743_v9  ;;  %v26800_v29 = vpop.eup %24399 }
 0x4a0   :  { %v3432_v27 = vsel %vm768_vm3, %v26800_v29, 0.0 }
 0x4a1   :  { %v8454_v34 = vpop.permute.xlu0 %8453  ;;  %v26787_v12 = vpop.f32.mrb[126].mxu1 }
 0x4a2   :  { %29856 = vst [vmem:[#allocation102_spill] sm:$0xff] %v26787_v12  ;;  %23409 = vmatpush3.msra.mxu0 %v8454_v34  ;;  %v23347_v25 = vpop.f32.mrb[127].mxu1 }
 0x4a3   :  { %23411 = vmatmul.mubr.msk.f32.vlgmr.msra.gmra.mrb[138].mxu0 %vm768_vm3, %v6392_v37  ;;  %23418 = vmatprep.subr.mxu0 %v29743_v9  ;;  %v29861_v37 = vld [vmem:[#allocation2_spill] sm:$0xff] }
 0x4a4   :  { %23420 = vmatprep.mubr.msk.f32.mxu0 %vm24798_vm2, %v29743_v9 }
 0x4a8   :  { %v26796_v28 = vpop.f32.mrb[126].mxu0 }
 0x4a9   :  { %29857 = vst [vmem:[#allocation100_spill] sm:$0xff] %v26796_v28  ;;  %v23352_v18 = vpop.f32.mrb[127].mxu0  ;;  %v29867_v28 = vld [vmem:[#allocation115_spill] sm:$0xff] }
 0x4aa   :  { %3430 = vadd.xlane.f32.xlu1 %v3429_v16  ;;  %v29863_v18 = vld [vmem:[#allocation5_spill] sm:$0xff] }
 0x4af   :  { %3433 = vadd.xlane.f32.xlu0 %v3432_v27  ;;  %v29864_v27 = vld [vmem:[#allocation143_spill] sm:$0xff] }
 0x4b1   :  { %v26804_v7 = vpop.f32.mrb[128].mxu1 }
 0x4b2   :  { %29858 = vst [vmem:[#allocation162_spill] sm:$0xff] %v26804_v7  ;;  %v23357_v58 = vpop.f32.mrb[129].mxu1 }
 0x4b3   :  { %v29865_v58 = vld [vmem:[#allocation114_spill] sm:$0xff] }
 0x4b4   :  { %v3311_v7 = vsub.f32 %v29865_v58, %v29864_v27 }
 0x4b8   :  { %v26806_v33 = vpop.f32.mrb[128].mxu0 }
 0x4b9   :  { %29859 = vst [vmem:[#allocation104_spill] sm:$0xff] %v26806_v33  ;;  %v26808_v14 = vpop.f32.mrb[130].mxu1  ;;  %v23362_v60 = vpop.f32.mrb[129].mxu0  ;;  %v29866_v33 = vld [vmem:[#allocation144_spill] sm:$0xff] }
 0x4ba   :  { %29860 = vst [vmem:[#allocation163_spill] sm:$0xff] %v26808_v14  ;;  %v23367_v34 = vpop.f32.mrb[131].mxu1  ;;  %v3357_v14 = vmul.f32 1.442695, %v3311_v7  ;;  %v3312_v12 = vsub.f32 %v29867_v28, %v29866_v33 }
 0x4bb   :  { %8833 = vrot.lane.b32.xlu1 %v29861_v37, %s24801_s1  ;;  %v24402_v34 = vpop.eup %24401 }
 0x4bc   :  { %v26812_v25 = vpop.f32.mrb[130].mxu0  ;;  %24405 = vpow2.f32 %v3357_v14  ;;  %v3359_v23 = vmul.f32 1.442695, %v3312_v12  ;;  %v24404_v27 = vpop.eup %24403 }
 0x4bd   :  { %29862 = vst [vmem:[#allocation109_spill] sm:$0xff] %v26812_v25  ;;  %v23372_v16 = vpop.f32.mrb[131].mxu0  ;;  %v6396_v28 = vmul.f32 %v24404_v27, %v26468_v10 }
 0x4be   :  { %v6394_v16 = vmul.f32 %v24402_v34, %v26456_v26  ;;  %24407 = vpow2.f32 %v3359_v23  ;;  %v29871_v34 = vld [vmem:[#allocation13_spill] sm:$0xff]  ;;  %v29873_v23 = vld [vmem:[#allocation116_spill] sm:$0xff] }
 0x4bf   :  { %24409 = vrcp.f32 %v26648_v61 }
 0x4c0   :  { %24411 = vrcp.f32 %v26656_v40 }
 0x4c5   :  { %8909 = vrot.lane.b32.xlu0 %v29863_v18, %s24801_s1 }
 0x4c6   :  { %v26840_v7 = vpop.eup %24405 }
 0x4c7   :  { %v3435_v33 = vsel %vm768_vm3, %v26840_v7, 0.0 }
 0x4c8   :  { %v26844_v14 = vpop.eup %24407 }
 0x4c9   :  { %v3438_v10 = vsel %vm768_vm3, %v26844_v14, 0.0 }
 0x4cd   :  { %v26820_v60 = vpop.xlane.xlu1 %3418 }
 0x4d1   :  { %v8530_v25 = vpop.permute.xlu1 %8529 }
 0x4d2   :  { %v26825_v8 = vpop.xlane.xlu0 %3421  ;;  %v26827_v37 = vpop.f32.mrb[132].mxu1  ;;  %23414 = vmatpush3.msra.mxu1 %v8530_v25  ;;  %v29870_v25 = vld [vmem:[#allocation9_spill] sm:$0xff] }
 0x4d3   :  { %29868 = vst [vmem:[#allocation108_spill] sm:$0xff] %v26827_v37  ;;  %v23377_v58 = vpop.f32.mrb[133].mxu1  ;;  %23416 = vmatmul.mubr.msk.f32.vlgmr.msra.gmra.mrb[140].mxu1 %vm768_vm3, %v6394_v16  ;;  %23423 = vmatprep.subr.mxu1 %v29743_v9  ;;  %v29872_v16 = vld [vmem:[#allocation145_spill] sm:$0xff] }
 0x4d4   :  { %23425 = vmatprep.mubr.msk.f32.mxu1 %vm24798_vm2, %v29743_v9  ;;  %v3313_v27 = vsub.f32 %v29873_v23, %v29872_v16 }
 0x4d6   :  { %v8606_v20 = vpop.permute.xlu0 %8605  ;;  %v3361_v58 = vmul.f32 1.442695, %v3313_v27 }
 0x4d7   :  { %v26834_v26 = vpop.f32.mrb[132].mxu0  ;;  %23419 = vmatpush3.msra.mxu0 %v8606_v20 }
 0x4d8   :  { %29869 = vst [vmem:[#allocation132_spill] sm:$0xff] %v26834_v26  ;;  %v23382_v12 = vpop.f32.mrb[133].mxu0  ;;  %23421 = vmatmul.mubr.msk.f32.vlgmr.msra.gmra.mrb[140].mxu0 %vm768_vm3, %v6396_v28  ;;  %23428 = vmatprep.subr.mxu0 %v29743_v9  ;;  %v24410_v28 = vpop.eup %24409  ;;  %24413 = vpow2.f32 %v3361_v58 }
 0x4d9   :  { %23430 = vmatprep.mubr.msk.f32.mxu0 %vm24798_vm2, %v29743_v9  ;;  %v29874_v12 = vld [vmem:[#allocation146_spill] sm:$0xff]  ;;  %v6398_v37 = vmul.f32 %v24410_v28, %v26466_v38  ;;  %v24412_v16 = vpop.eup %24411 }
 0x4da   :  { %v6400_v27 = vmul.f32 %v24412_v16, %v26475_v52 }
 0x4df   :  { %3436 = vadd.xlane.f32.xlu1 %v3435_v33  ;;  %v29875_v33 = vld [vmem:[#allocation117_spill] sm:$0xff] }
 0x4e4   :  { %3439 = vadd.xlane.f32.xlu0 %v3438_v10  ;;  %v3314_v10 = vsub.f32 %v29875_v33, %v29874_v12  ;;  %v29880_v12 = vld [vmem:[#allocation17_spill] sm:$0xff] }
 0x4e5   :  { %v29881_v33 = vld [vmem:[#allocation21_spill] sm:$0xff] }
 0x4e6   :  { %v3363_v61 = vmul.f32 1.442695, %v3314_v10  ;;  %v29882_v10 = vld [vmem:[#allocation147_spill] sm:$0xff] }
 0x4e8   :  { %24415 = vpow2.f32 %v3363_v61  ;;  %v29883_v61 = vld [vmem:[#allocation118_spill] sm:$0xff] }
 0x4e9   :  { %24417 = vrcp.f32 %v26652_v48  ;;  %v3315_v16 = vsub.f32 %v29883_v61, %v29882_v10 }
 0x4ea   :  { %24419 = vrcp.f32 %v26659_v1 }
 0x4f0   :  { %8985 = vrot.lane.b32.xlu1 %v29870_v25, %s24801_s1 }
 0x4fa   :  { %9061 = vrot.lane.b32.xlu0 %v29871_v34, %s24801_s1 }
 0x502   :  { %v26856_v20 = vpop.xlane.xlu1 %3424 }
 0x506   :  { %v8682_v26 = vpop.permute.xlu1 %8681 }
 0x507   :  { %v26861_v25 = vpop.xlane.xlu0 %3427  ;;  %v26863_v34 = vpop.f32.mrb[134].mxu1  ;;  %23424 = vmatpush3.msra.mxu1 %v8682_v26 }
 0x508   :  { %29876 = vst [vmem:[#allocation135_spill] sm:$0xff] %v26863_v34  ;;  %v23387_v23 = vpop.f32.mrb[135].mxu1  ;;  %23426 = vmatmul.mubr.msk.f32.vlgmr.msra.gmra.mrb[142].mxu1 %vm768_vm3, %v6398_v37  ;;  %23433 = vmatprep.subr.mxu1 %v29743_v9  ;;  %v26876_v37 = vpop.eup %24413 }
 0x509   :  { %23435 = vmatprep.mubr.msk.f32.mxu1 %vm24798_vm2, %v29743_v9  ;;  %29878 = vst [vmem:[#allocation136_spill] sm:$0xff] %v26876_v37  ;;  %v3441_v26 = vsel %vm768_vm3, %v26876_v37, 0.0  ;;  %v26880_v28 = vpop.eup %24415  ;;  %v3365_v23 = vmul.f32 1.442695, %v3315_v16 }
 0x50a   :  { %29879 = vst [vmem:[#allocation105_spill] sm:$0xff] %v26880_v28  ;;  %v3444_v52 = vsel %vm768_vm3, %v26880_v28, 0.0 }
 0x50b   :  { %v8758_v40 = vpop.permute.xlu0 %8757  ;;  %24421 = vpow2.f32 %v3365_v23 }
 0x50c   :  { %v26870_v38 = vpop.f32.mrb[134].mxu0  ;;  %23429 = vmatpush3.msra.mxu0 %v8758_v40 }
 0x50d   :  { %29877 = vst [vmem:[#allocation103_spill] sm:$0xff] %v26870_v38  ;;  %v23392_v58 = vpop.f32.mrb[135].mxu0  ;;  %23431 = vmatmul.mubr.msk.f32.vlgmr.msra.gmra.mrb[142].mxu0 %vm768_vm3, %v6400_v27  ;;  %23438 = vmatprep.subr.mxu0 %v29743_v9  ;;  %v24418_v27 = vpop.eup %24417 }
 0x50e   :  { %23440 = vmatprep.mubr.msk.f32.mxu0 %vm24798_vm2, %v29743_v9  ;;  %v29884_v58 = vld [vmem:[#allocation148_spill] sm:$0xff]  ;;  %v3490_v34 = vmul.f32 %v24418_v27, %v26464_v21  ;;  %v24420_v10 = vpop.eup %24419 }
 0x50f   :  { %v3492_v16 = vmul.f32 %v24420_v10, %v26482_v56 }
 0x514   :  { %3442 = vadd.xlane.f32.xlu1 %v3441_v26  ;;  %v29885_v26 = vld [vmem:[#allocation119_spill] sm:$0xff] }
 0x519   :  { %3445 = vadd.xlane.f32.xlu0 %v3444_v52  ;;  %v3316_v52 = vsub.f32 %v29885_v26, %v29884_v58  ;;  %v29890_v58 = vld [vmem:[#allocation25_spill] sm:$0xff] }
 0x51a   :  { %v29891_v26 = vld [vmem:[#allocation29_spill] sm:$0xff] }
 0x51b   :  { %v3367_v48 = vmul.f32 1.442695, %v3316_v52  ;;  %v29892_v52 = vld [vmem:[#allocation149_spill] sm:$0xff] }
 0x51d   :  { %24423 = vpow2.f32 %v3367_v48  ;;  %v29893_v48 = vld [vmem:[#allocation120_spill] sm:$0xff] }
 0x51e   :  { %24425 = vrcp.f32 %v26684_v62  ;;  %v3317_v10 = vsub.f32 %v29893_v48, %v29892_v52 }
 0x51f   :  { %24427 = vrcp.f32 %v26689_v44 }
 0x525   :  { %9137 = vrot.lane.b32.xlu1 %v29880_v12, %s24801_s1 }
 0x52f   :  { %9213 = vrot.lane.b32.xlu0 %v29881_v33, %s24801_s1 }
 0x537   :  { %v26892_v40 = vpop.xlane.xlu1 %3430 }
 0x53b   :  { %v8834_v38 = vpop.permute.xlu1 %8833 }
 0x53c   :  { %v26897_v28 = vpop.xlane.xlu0 %3433  ;;  %v26899_v37 = vpop.f32.mrb[136].mxu1  ;;  %23434 = vmatpush3.msra.mxu1 %v8834_v38 }
 0x53d   :  { %29886 = vst [vmem:[#allocation137_spill] sm:$0xff] %v26899_v37  ;;  %v23397_v61 = vpop.f32.mrb[137].mxu1  ;;  %23436 = vmatmul.mubr.msk.f32.vlgmr.msra.gmra.mrb[144].mxu1 %vm768_vm3, %v3490_v34  ;;  %23443 = vmatprep.subr.mxu1 %v29743_v9  ;;  %v26912_v34 = vpop.eup %24421 }
 0x53e   :  { %23445 = vmatprep.mubr.msk.f32.mxu1 %vm24798_vm2, %v29743_v9  ;;  %29888 = vst [vmem:[#allocation138_spill] sm:$0xff] %v26912_v34  ;;  %v3447_v38 = vsel %vm768_vm3, %v26912_v34, 0.0  ;;  %v26916_v27 = vpop.eup %24423  ;;  %v3369_v61 = vmul.f32 1.442695, %v3317_v10 }
 0x53f   :  { %29889 = vst [vmem:[#allocation107_spill] sm:$0xff] %v26916_v27  ;;  %v3450_v56 = vsel %vm768_vm3, %v26916_v27, 0.0 }
 0x540   :  { %v8910_v1 = vpop.permute.xlu0 %8909  ;;  %24429 = vpow2.f32 %v3369_v61 }
 0x541   :  { %v26906_v21 = vpop.f32.mrb[136].mxu0  ;;  %23439 = vmatpush3.msra.mxu0 %v8910_v1 }
 0x542   :  { %29887 = vst [vmem:[#allocation106_spill] sm:$0xff] %v26906_v21  ;;  %v23402_v23 = vpop.f32.mrb[137].mxu0  ;;  %23441 = vmatmul.mubr.msk.f32.vlgmr.msra.gmra.mrb[144].mxu0 %vm768_vm3, %v3492_v16  ;;  %23448 = vmatprep.subr.mxu0 %v29743_v9  ;;  %v24426_v16 = vpop.eup %24425 }
 0x543   :  { %23450 = vmatprep.mubr.msk.f32.mxu0 %vm24798_vm2, %v29743_v9  ;;  %v29894_v23 = vld [vmem:[#allocation150_spill] sm:$0xff]  ;;  %v3494_v37 = vmul.f32 %v24426_v16, %v26541_v35  ;;  %v24428_v52 = vpop.eup %24427 }
 0x544   :  { %v3496_v10 = vmul.f32 %v24428_v52, %v26550_v5 }
 0x549   :  { %3448 = vadd.xlane.f32.xlu1 %v3447_v38  ;;  %v29895_v38 = vld [vmem:[#allocation121_spill] sm:$0xff] }
 0x54e   :  { %3451 = vadd.xlane.f32.xlu0 %v3450_v56  ;;  %v3318_v56 = vsub.f32 %v29895_v38, %v29894_v23  ;;  %v29900_v23 = vld [vmem:[#allocation33_spill] sm:$0xff] }
 0x54f   :  { %v29901_v38 = vld [vmem:[#allocation37_spill] sm:$0xff] }
 0x550   :  { %v3371_v62 = vmul.f32 1.442695, %v3318_v56  ;;  %v29902_v56 = vld [vmem:[#allocation151_spill] sm:$0xff] }
 0x552   :  { %24431 = vpow2.f32 %v3371_v62  ;;  %v29903_v62 = vld [vmem:[#allocation122_spill] sm:$0xff] }
 0x553   :  { %24433 = vrcp.f32 %v26730_v22  ;;  %v3319_v52 = vsub.f32 %v29903_v62, %v29902_v56 }
 0x554   :  { %24435 = vrcp.f32 %v26735_v43 }
 0x55a   :  { %9289 = vrot.lane.b32.xlu1 %v29890_v58, %s24801_s1 }
 0x564   :  { %9365 = vrot.lane.b32.xlu0 %v29891_v26, %s24801_s1 }
 0x56c   :  { %v26928_v1 = vpop.xlane.xlu1 %3436 }
 0x570   :  { %v8986_v21 = vpop.permute.xlu1 %8985 }
 0x571   :  { %v26933_v27 = vpop.xlane.xlu0 %3439  ;;  %v26935_v34 = vpop.f32.mrb[138].mxu1  ;;  %23444 = vmatpush3.msra.mxu1 %v8986_v21 }
 0x572   :  { %29896 = vst [vmem:[#allocation139_spill] sm:$0xff] %v26935_v34  ;;  %v23407_v48 = vpop.f32.mrb[139].mxu1  ;;  %23446 = vmatmul.mubr.msk.f32.vlgmr.msra.gmra.mrb[146].mxu1 %vm768_vm3, %v3494_v37  ;;  %23453 = vmatprep.subr.mxu1 %v29743_v9  ;;  %v26948_v37 = vpop.eup %24429 }
 0x573   :  { %23455 = vmatprep.mubr.msk.f32.mxu1 %vm24798_vm2, %v29743_v9  ;;  %29898 = vst [vmem:[#allocation140_spill] sm:$0xff] %v26948_v37  ;;  %v3453_v21 = vsel %vm768_vm3, %v26948_v37, 0.0  ;;  %v26952_v16 = vpop.eup %24431  ;;  %v3373_v48 = vmul.f32 1.442695, %v3319_v52 }
 0x574   :  { %29899 = vst [vmem:[#allocation111_spill] sm:$0xff] %v26952_v16  ;;  %v3456_v5 = vsel %vm768_vm3, %v26952_v16, 0.0 }
 0x575   :  { %v9062_v44 = vpop.permute.xlu0 %9061  ;;  %24437 = vpow2.f32 %v3373_v48 }
 0x576   :  { %v26942_v35 = vpop.f32.mrb[138].mxu0  ;;  %23449 = vmatpush3.msra.mxu0 %v9062_v44 }
 0x577   :  { %29897 = vst [vmem:[#allocation110_spill] sm:$0xff] %v26942_v35  ;;  %v23412_v61 = vpop.f32.mrb[139].mxu0  ;;  %23451 = vmatmul.mubr.msk.f32.vlgmr.msra.gmra.mrb[146].mxu0 %vm768_vm3, %v3496_v10  ;;  %23458 = vmatprep.subr.mxu0 %v29743_v9  ;;  %v24434_v10 = vpop.eup %24433 }
 0x578   :  { %23460 = vmatprep.mubr.msk.f32.mxu0 %vm24798_vm2, %v29743_v9  ;;  %v29904_v61 = vld [vmem:[#allocation152_spill] sm:$0xff]  ;;  %v3498_v34 = vmul.f32 %v24434_v10, %v26598_v49  ;;  %v24436_v56 = vpop.eup %24435 }
 0x579   :  { %v3500_v52 = vmul.f32 %v24436_v56, %v26605_v36 }
 0x57e   :  { %3454 = vadd.xlane.f32.xlu1 %v3453_v21  ;;  %v29905_v21 = vld [vmem:[#allocation123_spill] sm:$0xff] }
 0x583   :  { %3457 = vadd.xlane.f32.xlu0 %v3456_v5  ;;  %v3320_v5 = vsub.f32 %v29905_v21, %v29904_v61  ;;  %v29910_v61 = vld [vmem:[#allocation41_spill] sm:$0xff] }
 0x584   :  { %v29911_v21 = vld [vmem:[#allocation45_spill] sm:$0xff] }
 0x585   :  { %v3375_v22 = vmul.f32 1.442695, %v3320_v5  ;;  %v29912_v5 = vld [vmem:[#allocation153_spill] sm:$0xff] }
 0x587   :  { %24439 = vpow2.f32 %v3375_v22  ;;  %v29913_v22 = vld [vmem:[#allocation124_spill] sm:$0xff] }
 0x588   :  { %24441 = vrcp.f32 %v26774_v15  ;;  %v3321_v56 = vsub.f32 %v29913_v22, %v29912_v5 }
 0x589   :  { %24443 = vrcp.f32 %v26781_v4 }
 0x58f   :  { %9441 = vrot.lane.b32.xlu1 %v29900_v23, %s24801_s1 }
 0x599   :  { %9517 = vrot.lane.b32.xlu0 %v29901_v38, %s24801_s1 }
 0x5a1   :  { %v26964_v44 = vpop.xlane.xlu1 %3442 }
 0x5a5   :  { %v9138_v35 = vpop.permute.xlu1 %9137 }
 0x5a6   :  { %v26969_v16 = vpop.xlane.xlu0 %3445  ;;  %v26971_v37 = vpop.f32.mrb[140].mxu1  ;;  %23454 = vmatpush3.msra.mxu1 %v9138_v35 }
 0x5a7   :  { %29906 = vst [vmem:[#allocation141_spill] sm:$0xff] %v26971_v37  ;;  %v23417_v62 = vpop.f32.mrb[141].mxu1  ;;  %23456 = vmatmul.mubr.msk.f32.vlgmr.msra.gmra.mrb[148].mxu1 %vm768_vm3, %v3498_v34  ;;  %23463 = vmatprep.subr.mxu1 %v29743_v9  ;;  %v26984_v34 = vpop.eup %24437 }
 0x5a8   :  { %23465 = vmatprep.mubr.msk.f32.mxu1 %vm24798_vm2, %v29743_v9  ;;  %29908 = vst [vmem:[#allocation142_spill] sm:$0xff] %v26984_v34  ;;  %v3459_v35 = vsel %vm768_vm3, %v26984_v34, 0.0  ;;  %v26988_v10 = vpop.eup %24439  ;;  %v3377_v62 = vmul.f32 1.442695, %v3321_v56 }
 0x5a9   :  { %29909 = vst [vmem:[#allocation113_spill] sm:$0xff] %v26988_v10  ;;  %v3462_v36 = vsel %vm768_vm3, %v26988_v10, 0.0 }
 0x5aa   :  { %v9214_v43 = vpop.permute.xlu0 %9213  ;;  %24445 = vpow2.f32 %v3377_v62 }
 0x5ab   :  { %v26978_v49 = vpop.f32.mrb[140].mxu0  ;;  %23459 = vmatpush3.msra.mxu0 %v9214_v43 }
 0x5ac   :  { %29907 = vst [vmem:[#allocation112_spill] sm:$0xff] %v26978_v49  ;;  %v23422_v48 = vpop.f32.mrb[141].mxu0  ;;  %23461 = vmatmul.mubr.msk.f32.vlgmr.msra.gmra.mrb[148].mxu0 %vm768_vm3, %v3500_v52  ;;  %23468 = vmatprep.subr.mxu0 %v29743_v9  ;;  %v24442_v52 = vpop.eup %24441 }
 0x5ad   :  { %23470 = vmatprep.mubr.msk.f32.mxu0 %vm24798_vm2, %v29743_v9  ;;  %v29914_v48 = vld [vmem:[#allocation154_spill] sm:$0xff]  ;;  %v3502_v37 = vmul.f32 %v24442_v52, %v26670_v19  ;;  %v24444_v5 = vpop.eup %24443 }
 0x5ae   :  { %v3504_v56 = vmul.f32 %v24444_v5, %v26674_v54 }
 0x5b3   :  { %3460 = vadd.xlane.f32.xlu1 %v3459_v35  ;;  %v29915_v35 = vld [vmem:[#allocation125_spill] sm:$0xff] }
 0x5b8   :  { %3463 = vadd.xlane.f32.xlu0 %v3462_v36  ;;  %v3322_v36 = vsub.f32 %v29915_v35, %v29914_v48  ;;  %v29921_v48 = vld [vmem:[#allocation49_spill] sm:$0xff] }
 0x5b9   :  { %v29922_v35 = vld [vmem:[#allocation53_spill] sm:$0xff] }
 0x5ba   :  { %v3379_v15 = vmul.f32 1.442695, %v3322_v36  ;;  %v29923_v36 = vld [vmem:[#allocation155_spill] sm:$0xff] }
 0x5bc   :  { %24447 = vpow2.f32 %v3379_v15  ;;  %v29924_v15 = vld [vmem:[#allocation126_spill] sm:$0xff] }
 0x5bd   :  { %24449 = vrcp.f32 %v26820_v60  ;;  %v3323_v5 = vsub.f32 %v29924_v15, %v29923_v36 }
 0x5be   :  { %24451 = vrcp.f32 %v26825_v8 }
 0x5c4   :  { %9593 = vrot.lane.b32.xlu1 %v29910_v61, %s24801_s1 }
 0x5ce   :  { %9669 = vrot.lane.b32.xlu0 %v29911_v21, %s24801_s1 }
 0x5d6   :  { %v27000_v43 = vpop.xlane.xlu1 %3448 }
 0x5da   :  { %v9290_v49 = vpop.permute.xlu1 %9289 }
 0x5db   :  { %v27005_v10 = vpop.xlane.xlu0 %3451  ;;  %v27007_v34 = vpop.f32.mrb[142].mxu1  ;;  %23464 = vmatpush3.msra.mxu1 %v9290_v49 }
 0x5dc   :  { %29916 = vst [vmem:[#allocation143_spill] sm:$0xff] %v27005_v10  ;;  %29917 = vst [vmem:[#allocation114_spill] sm:$0xff] %v27007_v34  ;;  %v23427_v22 = vpop.f32.mrb[143].mxu1  ;;  %23466 = vmatmul.mubr.msk.f32.vlgmr.msra.gmra.mrb[150].mxu1 %vm768_vm3, %v3502_v37  ;;  %23473 = vmatprep.subr.mxu1 %v29743_v9  ;;  %v27020_v37 = vpop.eup %24445 }
 0x5dd   :  { %23475 = vmatprep.mubr.msk.f32.mxu1 %vm24798_vm2, %v29743_v9  ;;  %29919 = vst [vmem:[#allocation115_spill] sm:$0xff] %v27020_v37  ;;  %v3465_v49 = vsel %vm768_vm3, %v27020_v37, 0.0  ;;  %v27024_v52 = vpop.eup %24447  ;;  %v3381_v22 = vmul.f32 1.442695, %v3323_v5 }
 0x5de   :  { %29920 = vst [vmem:[#allocation145_spill] sm:$0xff] %v27024_v52  ;;  %v3468_v54 = vsel %vm768_vm3, %v27024_v52, 0.0 }
 0x5df   :  { %v9366_v4 = vpop.permute.xlu0 %9365  ;;  %24453 = vpow2.f32 %v3381_v22 }
 0x5e0   :  { %v27014_v19 = vpop.f32.mrb[142].mxu0  ;;  %23469 = vmatpush3.msra.mxu0 %v9366_v4 }
 0x5e1   :  { %29918 = vst [vmem:[#allocation144_spill] sm:$0xff] %v27014_v19  ;;  %v23432_v62 = vpop.f32.mrb[143].mxu0  ;;  %23471 = vmatmul.mubr.msk.f32.vlgmr.msra.gmra.mrb[150].mxu0 %vm768_vm3, %v3504_v56  ;;  %23478 = vmatprep.subr.mxu0 %v29743_v9  ;;  %v24450_v56 = vpop.eup %24449 }
 0x5e2   :  { %23480 = vmatprep.mubr.msk.f32.mxu0 %vm24798_vm2, %v29743_v9  ;;  %v29925_v62 = vld [vmem:[#allocation156_spill] sm:$0xff]  ;;  %v3506_v34 = vmul.f32 %v24450_v56, %v26700_v6  ;;  %v24452_v10 = vpop.eup %24451  ;;  %v29931_v56 = vld [vmem:[#allocation157_spill] sm:$0xff] }
 0x5e3   :  { %v3508_v6 = vmul.f32 %v24452_v10, %v26706_v59  ;;  %v29929_v10 = vld [vmem:[#allocation57_spill] sm:$0xff] }
 0x5e8   :  { %3466 = vadd.xlane.f32.xlu1 %v3465_v49  ;;  %v29926_v49 = vld [vmem:[#allocation127_spill] sm:$0xff] }
 0x5ed   :  { %3469 = vadd.xlane.f32.xlu0 %v3468_v54  ;;  %v3324_v54 = vsub.f32 %v29926_v49, %v29925_v62  ;;  %v29932_v62 = vld [vmem:[#allocation128_spill] sm:$0xff] }
 0x5ee   :  { %v3325_v49 = vsub.f32 %v29932_v62, %v29931_v56 }
 0x5ef   :  { %v3383_v60 = vmul.f32 1.442695, %v3324_v54 }
 0x5f0   :  { %v3385_v54 = vmul.f32 1.442695, %v3325_v49 }
 0x5f1   :  { %24455 = vpow2.f32 %v3383_v60 }
 0x5f2   :  { %24457 = vrcp.f32 %v26856_v20 }
 0x5f3   :  { %24459 = vrcp.f32 %v26861_v25 }
 0x5f4   :  { %24461 = vpow2.f32 %v3385_v54 }
 0x5f9   :  { %9745 = vrot.lane.b32.xlu1 %v29921_v48, %s24801_s1 }
 0x603   :  { %9821 = vrot.lane.b32.xlu0 %v29922_v35, %s24801_s1 }
 0x60b   :  { %v27036_v4 = vpop.xlane.xlu1 %3454 }
 0x60f   :  { %v9442_v19 = vpop.permute.xlu1 %9441 }
 0x610   :  { %v27041_v52 = vpop.xlane.xlu0 %3457  ;;  %v8905_v37 = vpop.f32.mrb[144].mxu1  ;;  %23474 = vmatpush3.msra.mxu1 %v9442_v19 }
 0x611   :  { %v27044_v36 = vadd.f32 %v8905_v37, %v26702_v42  ;;  %v23437_v8 = vpop.f32.mrb[145].mxu1  ;;  %23476 = vmatmul.mubr.msk.f32.vlgmr.msra.gmra.mrb[152].mxu1 %vm768_vm3, %v3506_v34  ;;  %23483 = vmatprep.subr.mxu1 %v29743_v9  ;;  %v27058_v42 = vpop.eup %24453  ;;  %v29930_v37 = vld [vmem:[#allocation61_spill] sm:$0xff] }
 0x612   :  { %23485 = vmatprep.mubr.msk.f32.mxu1 %vm24798_vm2, %v29743_v9  ;;  %v3471_v34 = vsel %vm768_vm3, %v27058_v42, 0.0  ;;  %v27062_v59 = vpop.eup %24455 }
 0x613   :  { %29927 = vst [vmem:[#allocation116_spill] sm:$0xff] %v27044_v36  ;;  %v24458_v8 = vpop.eup %24457 }
 0x614   :  { %v9518_v15 = vpop.permute.xlu0 %9517  ;;  %v24460_v36 = vpop.eup %24459 }
 0x615   :  { %v8981_v5 = vpop.f32.mrb[144].mxu0  ;;  %23479 = vmatpush3.msra.mxu0 %v9518_v15  ;;  %v29933_v15 = vld [vmem:[#allocation158_spill] sm:$0xff] }
 0x616   :  { %v27052_v19 = vadd.f32 %v8981_v5, %v26708_v45  ;;  %v23442_v22 = vpop.f32.mrb[145].mxu0  ;;  %23481 = vmatmul.mubr.msk.f32.vlgmr.msra.gmra.mrb[152].mxu0 %vm768_vm3, %v3508_v6  ;;  %23488 = vmatprep.subr.mxu0 %v29743_v9  ;;  %v3474_v45 = vsel %vm768_vm3, %v27062_v59, 0.0  ;;  %v29934_v6 = vld [vmem:[#allocation129_spill] sm:$0xff] }
 0x617   :  { %23490 = vmatprep.mubr.msk.f32.mxu0 %vm24798_vm2, %v29743_v9  ;;  %v3326_v5 = vsub.f32 %v29934_v6, %v29933_v15  ;;  %v29938_v15 = vld [vmem:[#allocation68_spill] sm:$0xff]  ;;  %v29939_v6 = vld [vmem:[#allocation159_spill] sm:$0xff] }
 0x618   :  { %29928 = vst [vmem:[#allocation146_spill] sm:$0xff] %v27052_v19 }
 0x619   :  { %v3387_v20 = vmul.f32 1.442695, %v3326_v5  ;;  %v29940_v5 = vld [vmem:[#allocation130_spill] sm:$0xff] }
 0x61b   :  { %24463 = vpow2.f32 %v3387_v20 }
 0x61c   :  { %24465 = vrcp.f32 %v26892_v40 }
 0x61d   :  { %3472 = vadd.xlane.f32.xlu1 %v3471_v34  ;;  %v3510_v34 = vmul.f32 %v24458_v8, %v26750_v46  ;;  %v3512_v46 = vmul.f32 %v24460_v36, %v26754_v0  ;;  %v29937_v36 = vld [vmem:[#allocation65_spill] sm:$0xff]  ;;  %24467 = vrcp.f32 %v26897_v28 }
 0x622   :  { %3475 = vadd.xlane.f32.xlu0 %v3474_v45 }
 0x62e   :  { %9897 = vrot.lane.b32.xlu1 %v29929_v10, %s24801_s1 }
 0x638   :  { %9973 = vrot.lane.b32.xlu0 %v29930_v37, %s24801_s1 }
 0x640   :  { %v27074_v60 = vpop.xlane.xlu1 %3460 }
 0x644   :  { %v9594_v22 = vpop.permute.xlu1 %9593 }
 0x645   :  { %v27079_v45 = vpop.xlane.xlu0 %3463  ;;  %v9057_v19 = vpop.f32.mrb[146].mxu1  ;;  %23484 = vmatpush3.msra.mxu1 %v9594_v22  ;;  %v3327_v22 = vsub.f32 %v29940_v5, %v29939_v6 }
 0x646   :  { %v27082_v56 = vadd.f32 %v9057_v19, %v26712_v53  ;;  %v23447_v25 = vpop.f32.mrb[147].mxu1  ;;  %23486 = vmatmul.mubr.msk.f32.vlgmr.msra.gmra.mrb[154].mxu1 %vm768_vm3, %v3510_v34  ;;  %23493 = vmatprep.subr.mxu1 %v29743_v9  ;;  %v27096_v53 = vpop.eup %24461 }
 0x647   :  { %23495 = vmatprep.mubr.msk.f32.mxu1 %vm24798_vm2, %v29743_v9  ;;  %v3477_v19 = vsel %vm768_vm3, %v27096_v53, 0.0  ;;  %v27100_v0 = vpop.eup %24463  ;;  %v3389_v34 = vmul.f32 1.442695, %v3327_v22 }
 0x648   :  { %29935 = vst [vmem:[#allocation117_spill] sm:$0xff] %v27082_v56  ;;  %v24466_v25 = vpop.eup %24465 }
 0x649   :  { %v9670_v62 = vpop.permute.xlu0 %9669  ;;  %24469 = vpow2.f32 %v3389_v34  ;;  %v24468_v56 = vpop.eup %24467 }
 0x64a   :  { %v9133_v49 = vpop.f32.mrb[146].mxu0  ;;  %23489 = vmatpush3.msra.mxu0 %v9670_v62  ;;  %v29941_v62 = vld [vmem:[#allocation160_spill] sm:$0xff] }
 0x64b   :  { %v27090_v54 = vadd.f32 %v9133_v49, %v26714_v32  ;;  %v23452_v8 = vpop.f32.mrb[147].mxu0  ;;  %23491 = vmatmul.mubr.msk.f32.vlgmr.msra.gmra.mrb[154].mxu0 %vm768_vm3, %v3512_v46  ;;  %23498 = vmatprep.subr.mxu0 %v29743_v9  ;;  %v3480_v32 = vsel %vm768_vm3, %v27100_v0, 0.0  ;;  %v29942_v46 = vld [vmem:[#allocation131_spill] sm:$0xff] }
 0x64c   :  { %23500 = vmatprep.mubr.msk.f32.mxu0 %vm24798_vm2, %v29743_v9  ;;  %v3328_v49 = vsub.f32 %v29942_v46, %v29941_v62  ;;  %v29946_v62 = vld [vmem:[#allocation72_spill] sm:$0xff] }
 0x64d   :  { %29936 = vst [vmem:[#allocation147_spill] sm:$0xff] %v27090_v54 }
 0x64e   :  { %v3391_v40 = vmul.f32 1.442695, %v3328_v49 }
 0x650   :  { %24471 = vpow2.f32 %v3391_v40 }
 0x651   :  { %24473 = vrcp.f32 %v26928_v1 }
 0x652   :  { %3478 = vadd.xlane.f32.xlu1 %v3477_v19  ;;  %v3514_v19 = vmul.f32 %v24466_v25, %v26794_v31  ;;  %v3516_v31 = vmul.f32 %v24468_v56, %v26800_v29  ;;  %v29945_v56 = vld [vmem:[#allocation70_spill] sm:$0xff]  ;;  %24475 = vrcp.f32 %v26933_v27 }
 0x653   :  { %24477 = vrcp.f32 %v26964_v44 }
 0x654   :  { %24479 = vrcp.f32 %v26969_v16  ;;  %v29964_v16 = vld [vmem:[#allocation24_spill] sm:$0xff] }
 0x655   :  { %24481 = vrcp.f32 %v27000_v43  ;;  %v29982_v43 = vld [vmem:[#allocation48_spill] sm:$0xff] }
 0x657   :  { %3481 = vadd.xlane.f32.xlu0 %v3480_v32 }
 0x663   :  { %10049 = vrot.lane.b32.xlu1 %v29937_v36, %s24801_s1 }
 0x66d   :  { %10125 = vrot.lane.b32.xlu0 %v29938_v15, %s24801_s1 }
 0x675   :  { %v27112_v20 = vpop.xlane.xlu1 %3466 }
 0x679   :  { %v9746_v8 = vpop.permute.xlu1 %9745 }
 0x67a   :  { %v27117_v32 = vpop.xlane.xlu0 %3469  ;;  %v9209_v54 = vpop.f32.mrb[148].mxu1  ;;  %23494 = vmatpush3.msra.mxu1 %v9746_v8 }
 0x67b   :  { %v27120_v6 = vadd.f32 %v9209_v54, %v26716_v39  ;;  %v23457_v28 = vpop.f32.mrb[149].mxu1  ;;  %23496 = vmatmul.mubr.msk.f32.vlgmr.msra.gmra.mrb[156].mxu1 %vm768_vm3, %v3514_v19  ;;  %23503 = vmatprep.subr.mxu1 %v29743_v9  ;;  %v27134_v39 = vpop.eup %24469 }
 0x67c   :  { %23505 = vmatprep.mubr.msk.f32.mxu1 %vm24798_vm2, %v29743_v9  ;;  %v3483_v54 = vsel %vm768_vm3, %v27134_v39, 0.0  ;;  %v27138_v29 = vpop.eup %24471 }
 0x67d   :  { %29943 = vst [vmem:[#allocation118_spill] sm:$0xff] %v27120_v6  ;;  %v24474_v1 = vpop.eup %24473 }
 0x67e   :  { %v9822_v5 = vpop.permute.xlu0 %9821  ;;  %v3518_v27 = vmul.f32 %v24474_v1, %v26840_v7  ;;  %v24476_v40 = vpop.eup %24475  ;;  %v29953_v1 = vld [vmem:[#allocation13_spill] sm:$0xff] }
 0x67f   :  { %v9285_v22 = vpop.f32.mrb[148].mxu0  ;;  %23499 = vmatpush3.msra.mxu0 %v9822_v5  ;;  %v24478_v44 = vpop.eup %24477 }
 0x680   :  { %v27128_v34 = vadd.f32 %v9285_v22, %v26720_v24  ;;  %v23462_v25 = vpop.f32.mrb[149].mxu0  ;;  %23501 = vmatmul.mubr.msk.f32.vlgmr.msra.gmra.mrb[156].mxu0 %vm768_vm3, %v3516_v31  ;;  %23508 = vmatprep.subr.mxu0 %v29743_v9  ;;  %v3486_v24 = vsel %vm768_vm3, %v27138_v29, 0.0  ;;  %v3520_v31 = vmul.f32 %v24476_v40, %v26844_v14  ;;  %v29950_v14 = vld [vmem:[#allocation2_spill] sm:$0xff]  ;;  %v29957_v40 = vld [vmem:[#allocation12_spill] sm:$0xff] }
 0x681   :  { %23510 = vmatprep.mubr.msk.f32.mxu0 %vm24798_vm2, %v29743_v9 }
 0x682   :  { %29944 = vst [vmem:[#allocation148_spill] sm:$0xff] %v27128_v34 }
 0x687   :  { %3484 = vadd.xlane.f32.xlu1 %v3483_v54  ;;  %v29949_v54 = vld [vmem:[#allocation94_spill] sm:$0xff] }
 0x68c   :  { %3487 = vadd.xlane.f32.xlu0 %v3486_v24  ;;  %v29952_v24 = vld [vmem:[#allocation6_spill] sm:$0xff] }
 0x698   :  { %10201 = vrot.lane.b32.xlu1 %v29945_v56, %s24801_s1 }
 0x69c   :  { %10353 = vrot.lane.b32.xlu1 %v25513_v51, %s24801_s1 }
 0x6a0   :  { %10429 = vrot.lane.b32.xlu1 %v25528_v47, %s24801_s1 }
 0x6a2   :  { %10277 = vrot.lane.b32.xlu0 %v29946_v62, %s24801_s1 }
 0x6a4   :  { %10581 = vrot.lane.b32.xlu1 %v29812_v55, %s24801_s1 }
 0x6a6   :  { %10505 = vrot.lane.b32.xlu0 %v29810_v50, %s24801_s1 }
 0x6a8   :  { %10733 = vrot.lane.b32.xlu1 %v29827_v13, %s24801_s1 }
 0x6aa   :  { %10657 = vrot.lane.b32.xlu0 %v29826_v17, %s24801_s1  ;;  %v27160_v46 = vpop.xlane.xlu1 %3472 }
 0x6ac   :  { %10885 = vrot.lane.b32.xlu1 %v29833_v30, %s24801_s1 }
 0x6ae   :  { %10809 = vrot.lane.b32.xlu0 %v29832_v11, %s24801_s1  ;;  %v9898_v49 = vpop.permute.xlu1 %9897 }
 0x6af   :  { %v27167_v8 = vpop.xlane.xlu0 %3475  ;;  %v9361_v19 = vpop.f32.mrb[150].mxu1  ;;  %23504 = vmatpush3.msra.mxu1 %v9898_v49  ;;  %v29954_v49 = vld [vmem:[#allocation9_spill] sm:$0xff] }
 0x6b0   :  { %v27170_v28 = vadd.f32 %v9361_v19, %v26728_v63  ;;  %11037 = vrot.lane.b32.xlu1 %v29839_v2, %s24801_s1  ;;  %v23467_v5 = vpop.f32.mrb[151].mxu1  ;;  %23506 = vmatmul.mubr.msk.f32.vlgmr.msra.gmra.mrb[158].mxu1 %vm768_vm3, %v3518_v27  ;;  %v29955_v27 = vld [vmem:[#allocation8_spill] sm:$0xff]  ;;  %v29956_v19 = vld [vmem:[#allocation10_spill] sm:$0xff] }
 0x6b1   :  { %23513 = vmatprep.subr.mxu1 %v29743_v9  ;;  %23515 = vmatprep.mubr.msk.f32.mxu1 %vm24798_vm2, %v29743_v9  ;;  %v29958_v5 = vld [vmem:[#allocation14_spill] sm:$0xff] }
 0x6b2   :  { %29947 = vst [vmem:[#allocation119_spill] sm:$0xff] %v27170_v28  ;;  %10961 = vrot.lane.b32.xlu0 %v29838_v41, %s24801_s1 }
 0x6b3   :  { %v9974_v7 = vpop.permute.xlu0 %9973 }
 0x6b4   :  { %v9437_v22 = vpop.f32.mrb[150].mxu0  ;;  %23509 = vmatpush3.msra.mxu0 %v9974_v7  ;;  %11189 = vrot.lane.b32.xlu1 %v29849_v3, %s24801_s1  ;;  %v29959_v7 = vld [vmem:[#allocation16_spill] sm:$0xff] }
 0x6b5   :  { %v27184_v63 = vadd.f32 %v9437_v22, %v26737_v57  ;;  %v23472_v25 = vpop.f32.mrb[151].mxu0  ;;  %23511 = vmatmul.mubr.msk.f32.vlgmr.msra.gmra.mrb[158].mxu0 %vm768_vm3, %v3520_v31  ;;  %23518 = vmatprep.subr.mxu0 %v29743_v9  ;;  %v29951_v57 = vld [vmem:[#allocation4_spill] sm:$0xff]  ;;  %v29960_v31 = vld [vmem:[#allocation18_spill] sm:$0xff] }
 0x6b6   :  { %11113 = vrot.lane.b32.xlu0 %v29949_v54, %s24801_s1  ;;  %23520 = vmatprep.mubr.msk.f32.mxu0 %vm24798_vm2, %v29743_v9  ;;  %v29961_v22 = vld [vmem:[#allocation20_spill] sm:$0xff]  ;;  %v29962_v25 = vld [vmem:[#allocation22_spill] sm:$0xff] }
 0x6b7   :  { %29948 = vst [vmem:[#allocation25_spill] sm:$0xff] %v27184_v63  ;;  %v29967_v63 = vld [vmem:[#allocation26_spill] sm:$0xff] }
 0x6b8   :  { %11345 = vrot.lane.b32.xlu1 %v29863_v18, %s24802_s29 }
 0x6ba   :  { %11267 = vrot.lane.b32.xlu0 %v29950_v14, %s24802_s29 }
 0x6bc   :  { %11343 = vrot.lane.b32.xlu1 %v29951_v57, %s24802_s29 }
 0x6be   :  { %11265 = vrot.lane.b32.xlu0 %v29952_v24, %s24802_s29 }
 0x6c0   :  { %11501 = vrot.lane.b32.xlu1 %v29953_v1, %s24802_s29 }
 0x6c2   :  { %11423 = vrot.lane.b32.xlu0 %v29954_v49, %s24802_s29 }
 0x6c4   :  { %11499 = vrot.lane.b32.xlu1 %v29955_v27, %s24802_s29  ;;  %v29965_v27 = vld [vmem:[#allocation98_spill] sm:$0xff] }
 0x6c6   :  { %11421 = vrot.lane.b32.xlu0 %v29956_v19, %s24802_s29 }
 0x6c8   :  { %11657 = vrot.lane.b32.xlu1 %v29881_v33, %s24802_s29 }
 0x6ca   :  { %11579 = vrot.lane.b32.xlu0 %v29880_v12, %s24802_s29 }
 0x6cc   :  { %11655 = vrot.lane.b32.xlu1 %v29957_v40, %s24802_s29 }
 0x6ce   :  { %11577 = vrot.lane.b32.xlu0 %v29958_v5, %s24802_s29  ;;  %v29963_v5 = vld [vmem:[#allocation136_spill] sm:$0xff] }
 0x6cf   :  { %v3522_v40 = vmul.f32 %v24478_v44, %v29963_v5 }
 0x6d0   :  { %11813 = vrot.lane.b32.xlu1 %v29891_v26, %s24802_s29 }
 0x6d2   :  { %11735 = vrot.lane.b32.xlu0 %v29890_v58, %s24802_s29 }
 0x6d4   :  { %11811 = vrot.lane.b32.xlu1 %v29959_v7, %s24802_s29 }
 0x6d6   :  { %11733 = vrot.lane.b32.xlu0 %v29960_v31, %s24802_s29 }
 0x6d8   :  { %11969 = vrot.lane.b32.xlu1 %v29901_v38, %s24802_s29 }
 0x6da   :  { %11891 = vrot.lane.b32.xlu0 %v29900_v23, %s24802_s29 }
 0x6dc   :  { %11967 = vrot.lane.b32.xlu1 %v29961_v22, %s24802_s29 }
 0x6de   :  { %11889 = vrot.lane.b32.xlu0 %v29962_v25, %s24802_s29  ;;  %v24480_v25 = vpop.eup %24479 }
 0x6df   :  { %v27234_v7 = vpop.xlane.xlu1 %3478 }
 0x6e0   :  { %12125 = vrot.lane.b32.xlu1 %v29911_v21, %s24802_s29 }
 0x6e2   :  { %12047 = vrot.lane.b32.xlu0 %v29910_v61, %s24802_s29 }
 0x6e3   :  { %v10050_v31 = vpop.permute.xlu1 %10049 }
 0x6e4   :  { %v27241_v19 = vpop.xlane.xlu0 %3481  ;;  %12123 = vrot.lane.b32.xlu1 %v29964_v16, %s24802_s29  ;;  %v9513_v22 = vpop.f32.mrb[152].mxu1  ;;  %23514 = vmatpush3.msra.mxu1 %v10050_v31  ;;  %v29968_v31 = vld [vmem:[#allocation105_spill] sm:$0xff] }
 0x6e5   :  { %v27246_v24 = vadd.f32 %v9513_v22, %v29965_v27  ;;  %v23477_v57 = vpop.f32.mrb[153].mxu1  ;;  %23516 = vmatmul.mubr.msk.f32.vlgmr.msra.gmra.mrb[160].mxu1 %vm768_vm3, %v3522_v40  ;;  %23523 = vmatprep.subr.mxu1 %v29743_v9  ;;  %v3524_v44 = vmul.f32 %v24480_v25, %v29968_v31  ;;  %v29969_v27 = vld [vmem:[#allocation133_spill] sm:$0xff]  ;;  %v29971_v22 = vld [vmem:[#allocation28_spill] sm:$0xff]  ;;  %v29972_v25 = vld [vmem:[#allocation30_spill] sm:$0xff] }
 0x6e6   :  { %12045 = vrot.lane.b32.xlu0 %v29967_v63, %s24802_s29  ;;  %23525 = vmatprep.mubr.msk.f32.mxu1 %vm24798_vm2, %v29743_v9  ;;  %v29975_v31 = vld [vmem:[#allocation36_spill] sm:$0xff]  ;;  %v29991_v63 = vld [vmem:[#allocation99_spill] sm:$0xff] }
 0x6e7   :  { %29966 = vst [vmem:[#allocation29_spill] sm:$0xff] %v27246_v24 }
 0x6e8   :  { %v10126_v5 = vpop.permute.xlu0 %10125  ;;  %12281 = vrot.lane.b32.xlu1 %v29922_v35, %s24802_s29 }
 0x6e9   :  { %v9589_v16 = vpop.f32.mrb[152].mxu0  ;;  %23519 = vmatpush3.msra.mxu0 %v10126_v5  ;;  %v29974_v5 = vld [vmem:[#allocation34_spill] sm:$0xff] }
 0x6ea   :  { %v27258_v57 = vadd.f32 %v9589_v16, %v29969_v27  ;;  %12203 = vrot.lane.b32.xlu0 %v29921_v48, %s24802_s29  ;;  %v23482_v40 = vpop.f32.mrb[153].mxu0  ;;  %23521 = vmatmul.mubr.msk.f32.vlgmr.msra.gmra.mrb[160].mxu0 %vm768_vm3, %v3524_v44  ;;  %v29973_v16 = vld [vmem:[#allocation32_spill] sm:$0xff]  ;;  %v29976_v44 = vld [vmem:[#allocation38_spill] sm:$0xff] }
 0x6eb   :  { %23528 = vmatprep.subr.mxu0 %v29743_v9  ;;  %23530 = vmatprep.mubr.msk.f32.mxu0 %vm24798_vm2, %v29743_v9  ;;  %v29977_v27 = vld [vmem:[#allocation40_spill] sm:$0xff]  ;;  %v29978_v40 = vld [vmem:[#allocation42_spill] sm:$0xff] }
 0x6ec   :  { %29970 = vst [vmem:[#allocation149_spill] sm:$0xff] %v27258_v57  ;;  %12279 = vrot.lane.b32.xlu1 %v29971_v22, %s24802_s29 }
 0x6ee   :  { %12201 = vrot.lane.b32.xlu0 %v29972_v25, %s24802_s29 }
 0x6f0   :  { %12437 = vrot.lane.b32.xlu1 %v29930_v37, %s24802_s29 }
 0x6f2   :  { %12359 = vrot.lane.b32.xlu0 %v29929_v10, %s24802_s29 }
 0x6f4   :  { %12435 = vrot.lane.b32.xlu1 %v29973_v16, %s24802_s29 }
 0x6f6   :  { %12357 = vrot.lane.b32.xlu0 %v29974_v5, %s24802_s29  ;;  %v29981_v5 = vld [vmem:[#allocation143_spill] sm:$0xff] }
 0x6f7   :  { %24483 = vrcp.f32 %v29981_v5  ;;  %v29983_v5 = vld [vmem:[#allocation50_spill] sm:$0xff] }
 0x6f8   :  { %12593 = vrot.lane.b32.xlu1 %v29938_v15, %s24802_s29  ;;  %24485 = vrcp.f32 %v27036_v4 }
 0x6f9   :  { %24487 = vrcp.f32 %v27041_v52 }
 0x6fa   :  { %12515 = vrot.lane.b32.xlu0 %v29937_v36, %s24802_s29  ;;  %24489 = vrcp.f32 %v27074_v60  ;;  %v29985_v60 = vld [vmem:[#allocation101_spill] sm:$0xff] }
 0x6fb   :  { %24491 = vrcp.f32 %v27079_v45  ;;  %v29987_v45 = vld [vmem:[#allocation52_spill] sm:$0xff] }
 0x6fc   :  { %12591 = vrot.lane.b32.xlu1 %v29975_v31, %s24802_s29  ;;  %v29980_v31 = vld [vmem:[#allocation46_spill] sm:$0xff]  ;;  %24493 = vrcp.f32 %v27112_v20  ;;  %v29988_v20 = vld [vmem:[#allocation107_spill] sm:$0xff] }
 0x6fd   :  { %24495 = vrcp.f32 %v27117_v32 }
 0x6fe   :  { %12513 = vrot.lane.b32.xlu0 %v29976_v44, %s24802_s29  ;;  %v29979_v44 = vld [vmem:[#allocation44_spill] sm:$0xff]  ;;  %24497 = vrcp.f32 %v27160_v46  ;;  %v29993_v46 = vld [vmem:[#allocation111_spill] sm:$0xff] }
 0x6ff   :  { %24499 = vrcp.f32 %v27167_v8  ;;  %v29996_v8 = vld [vmem:[#allocation58_spill] sm:$0xff] }
 0x700   :  { %12749 = vrot.lane.b32.xlu1 %v29946_v62, %s24802_s29  ;;  %24501 = vrcp.f32 %v27234_v7  ;;  %v29997_v7 = vld [vmem:[#allocation113_spill] sm:$0xff] }
 0x701   :  { %24503 = vrcp.f32 %v27241_v19  ;;  %v29999_v19 = vld [vmem:[#allocation145_spill] sm:$0xff] }
 0x702   :  { %12671 = vrot.lane.b32.xlu0 %v29945_v56, %s24802_s29 }
 0x704   :  { %12747 = vrot.lane.b32.xlu1 %v29977_v27, %s24802_s29 }
 0x706   :  { %12669 = vrot.lane.b32.xlu0 %v29978_v40, %s24802_s29 }
 0x708   :  { %12905 = vrot.lane.b32.xlu1 %v25528_v47, %s24802_s29 }
 0x70a   :  { %12827 = vrot.lane.b32.xlu0 %v25513_v51, %s24802_s29 }
 0x70c   :  { %12903 = vrot.lane.b32.xlu1 %v29979_v44, %s24802_s29  ;;  %v24482_v44 = vpop.eup %24481 }
 0x70d   :  { %v24484_v16 = vpop.eup %24483 }
 0x70e   :  { %12825 = vrot.lane.b32.xlu0 %v29980_v31, %s24802_s29  ;;  %v29984_v31 = vld [vmem:[#allocation138_spill] sm:$0xff]  ;;  %v24486_v25 = vpop.eup %24485 }
 0x70f   :  { %v3526_v27 = vmul.f32 %v24482_v44, %v29984_v31 }
 0x710   :  { %13061 = vrot.lane.b32.xlu1 %v29812_v55, %s24802_s29 }
 0x712   :  { %12983 = vrot.lane.b32.xlu0 %v29810_v50, %s24802_s29 }
 0x714   :  { %13059 = vrot.lane.b32.xlu1 %v29982_v43, %s24802_s29  ;;  %v27312_v40 = vpop.xlane.xlu1 %3484 }
 0x715   :  { %24505 = vrcp.f32 %v27312_v40 }
 0x716   :  { %12981 = vrot.lane.b32.xlu0 %v29983_v5, %s24802_s29 }
 0x718   :  { %13217 = vrot.lane.b32.xlu1 %v29827_v13, %s24802_s29  ;;  %v10202_v4 = vpop.permute.xlu1 %10201 }
 0x719   :  { %v27321_v52 = vpop.xlane.xlu0 %3487  ;;  %v9665_v43 = vpop.f32.mrb[154].mxu1  ;;  %23524 = vmatpush3.msra.mxu1 %v10202_v4  ;;  %v29989_v4 = vld [vmem:[#allocation140_spill] sm:$0xff] }
 0x71a   :  { %v27325_v22 = vadd.f32 %v9665_v43, %v29985_v60  ;;  %13139 = vrot.lane.b32.xlu0 %v29826_v17, %s24802_s29  ;;  %v23487_v5 = vpop.f32.mrb[155].mxu1  ;;  %23526 = vmatmul.mubr.msk.f32.vlgmr.msra.gmra.mrb[162].mxu1 %vm768_vm3, %v3526_v27  ;;  %v3528_v43 = vmul.f32 %v24484_v16, %v29988_v20  ;;  %v3530_v60 = vmul.f32 %v24486_v25, %v29989_v4  ;;  %v29990_v27 = vld [vmem:[#allocation54_spill] sm:$0xff]  ;;  %v29998_v4 = vld [vmem:[#allocation115_spill] sm:$0xff]  ;;  %24507 = vrcp.f32 %v27321_v52 }
 0x71b   :  { %23533 = vmatprep.subr.mxu1 %v29743_v9  ;;  %23535 = vmatprep.mubr.msk.f32.mxu1 %vm24798_vm2, %v29743_v9 }
 0x71c   :  { %29986 = vst [vmem:[#allocation120_spill] sm:$0xff] %v27325_v22  ;;  %13215 = vrot.lane.b32.xlu1 %v29987_v45, %s24802_s29  ;;  %v10354_v31 = vpop.permute.xlu1 %10353  ;;  %v24488_v22 = vpop.eup %24487 }
 0x71d   :  { %v10278_v44 = vpop.permute.xlu0 %10277  ;;  %23534 = vmatpush3.msra.mxu1 %v10354_v31  ;;  %v24490_v57 = vpop.eup %24489 }
 0x71e   :  { %13137 = vrot.lane.b32.xlu0 %v29990_v27, %s24802_s29  ;;  %v9741_v5 = vpop.f32.mrb[154].mxu0  ;;  %23529 = vmatpush3.msra.mxu0 %v10278_v44  ;;  %v24492_v31 = vpop.eup %24491 }
 0x71f   :  { %v27342_v45 = vadd.f32 %v9741_v5, %v29991_v63  ;;  %v23492_v24 = vpop.f32.mrb[155].mxu0  ;;  %23531 = vmatmul.mubr.msk.f32.vlgmr.msra.gmra.mrb[162].mxu0 %vm768_vm3, %v3528_v43  ;;  %23536 = vmatmul.mubr.msk.f32.vlgmr.msra.gmra.mrb[164].mxu1 %vm768_vm3, %v3530_v60  ;;  %v3532_v63 = vmul.f32 %v24488_v22, %v29993_v46  ;;  %v24494_v44 = vpop.eup %24493  ;;  %v29995_v43 = vld [vmem:[#allocation56_spill] sm:$0xff]  ;;  %v3536_v22 = vmul.f32 %v24492_v31, %v29997_v7 }
 0x720   :  { %13373 = vrot.lane.b32.xlu1 %v29833_v30, %s24802_s29  ;;  %23543 = vmatprep.subr.mxu1 %v29743_v9  ;;  %v10430_v32 = vpop.permute.xlu1 %10429  ;;  %v29994_v24 = vld [vmem:[#allocation142_spill] sm:$0xff]  ;;  %v3538_v60 = vmul.f32 %v24494_v44, %v29998_v4  ;;  %v24496_v5 = vpop.eup %24495 }
 0x721   :  { %29992 = vst [vmem:[#allocation150_spill] sm:$0xff] %v27342_v45  ;;  %23538 = vmatprep.subr.mxu0 %v29743_v9  ;;  %v10506_v25 = vpop.permute.xlu0 %10505  ;;  %23545 = vmatprep.mubr.msk.f32.mxu1 %vm24798_vm2, %v29743_v9  ;;  %v3534_v16 = vmul.f32 %v24490_v57, %v29994_v24  ;;  %v3540_v40 = vmul.f32 %v24496_v5, %v29999_v19  ;;  %v30002_v19 = vld [vmem:[#allocation64_spill] sm:$0xff] }
 0x722   :  { %13295 = vrot.lane.b32.xlu0 %v29832_v11, %s24802_s29  ;;  %23539 = vmatpush3.msra.mxu0 %v10430_v32 }
 0x723   :  { %23540 = vmatprep.mubr.msk.f32.mxu0 %vm24798_vm2, %v29743_v9  ;;  %23544 = vmatpush3.msra.mxu1 %v10506_v25  ;;  %v24498_v25 = vpop.eup %24497 }
 0x724   :  { %23541 = vmatmul.mubr.msk.f32.vlgmr.msra.gmra.mrb[164].mxu0 %vm768_vm3, %v3532_v63  ;;  %23546 = vmatmul.mubr.msk.f32.vlgmr.msra.gmra.mrb[166].mxu1 %vm768_vm3, %v3534_v16  ;;  %v10582_v20 = vpop.permute.xlu1 %10581  ;;  %v3542_v63 = vmul.f32 %v24498_v25, %v27058_v42  ;;  %v24500_v16 = vpop.eup %24499  ;;  %v30001_v42 = vld [vmem:[#allocation62_spill] sm:$0xff] }
 0x725   :  { %13371 = vrot.lane.b32.xlu1 %v29995_v43, %s24802_s29  ;;  %23548 = vmatprep.subr.mxu0 %v29743_v9  ;;  %v10658_v57 = vpop.permute.xlu0 %10657  ;;  %v24502_v44 = vpop.eup %24501 }
 0x726   :  { %23553 = vmatprep.subr.mxu1 %v29743_v9  ;;  %13293 = vrot.lane.b32.xlu0 %v29996_v8, %s24802_s29  ;;  %v3546_v7 = vmul.f32 %v24502_v44, %v27096_v53  ;;  %v24504_v4 = vpop.eup %24503 }
 0x727   :  { %23549 = vmatpush3.msra.mxu0 %v10582_v20  ;;  %23550 = vmatprep.mubr.msk.f32.mxu0 %vm24798_vm2, %v29743_v9  ;;  %v30000_v20 = vld [vmem:[#allocation60_spill] sm:$0xff]  ;;  %v3548_v53 = vmul.f32 %v24504_v4, %v27100_v0  ;;  %v30003_v0 = vld [vmem:[#allocation66_spill] sm:$0xff] }
 0x728   :  { %23554 = vmatpush3.msra.mxu1 %v10658_v57  ;;  %23555 = vmatprep.mubr.msk.f32.mxu1 %vm24798_vm2, %v29743_v9  ;;  %v10734_v32 = vpop.permute.xlu1 %10733  ;;  %v3544_v57 = vmul.f32 %v24500_v16, %v27062_v59 }
 0x729   :  { %23551 = vmatmul.mubr.msk.f32.vlgmr.msra.gmra.mrb[166].mxu0 %vm768_vm3, %v3536_v22  ;;  %23556 = vmatmul.mubr.msk.f32.vlgmr.msra.gmra.mrb[168].mxu1 %vm768_vm3, %v3538_v60  ;;  %v10810_v46 = vpop.permute.xlu0 %10809  ;;  %v24506_v60 = vpop.eup %24505 }
 0x72a   :  { %13529 = vrot.lane.b32.xlu1 %v29839_v2, %s24802_s29  ;;  %23558 = vmatprep.subr.mxu0 %v29743_v9  ;;  %v24508_v25 = vpop.eup %24507 }
 0x72b   :  { %23563 = vmatprep.subr.mxu1 %v29743_v9  ;;  %13451 = vrot.lane.b32.xlu0 %v29838_v41, %s24802_s29 }
 0x72c   :  { %23559 = vmatpush3.msra.mxu0 %v10734_v32  ;;  %23560 = vmatprep.mubr.msk.f32.mxu0 %vm24798_vm2, %v29743_v9  ;;  %v10886_v24 = vpop.permute.xlu1 %10885  ;;  %v3550_v32 = vmul.f32 %v24506_v60, %v27134_v39  ;;  %v3552_v39 = vmul.f32 %v24508_v25, %v27138_v29  ;;  %v30004_v60 = vld [vmem:[#allocation161_spill] sm:$0xff] }
 0x72d   :  { %23564 = vmatpush3.msra.mxu1 %v10810_v46  ;;  %23565 = vmatprep.mubr.msk.f32.mxu1 %vm24798_vm2, %v29743_v9  ;;  %v10962_v31 = vpop.permute.xlu0 %10961 }
 0x72e   :  { %23561 = vmatmul.mubr.msk.f32.vlgmr.msra.gmra.mrb[168].mxu0 %vm768_vm3, %v3540_v40  ;;  %23566 = vmatmul.mubr.msk.f32.vlgmr.msra.gmra.mrb[170].mxu1 %vm768_vm3, %v3542_v63 }
 0x72f   :  { %13527 = vrot.lane.b32.xlu1 %v30000_v20, %s24802_s29  ;;  %23568 = vmatprep.subr.mxu0 %v29743_v9 }
 0x730   :  { %23573 = vmatprep.subr.mxu1 %v29743_v9  ;;  %13449 = vrot.lane.b32.xlu0 %v30001_v42, %s24802_s29  ;;  %v11038_v52 = vpop.permute.xlu1 %11037 }
 0x731   :  { %23569 = vmatpush3.msra.mxu0 %v10886_v24  ;;  %23570 = vmatprep.mubr.msk.f32.mxu0 %vm24798_vm2, %v29743_v9  ;;  %v11114_v22 = vpop.permute.xlu0 %11113 }
 0x732   :  { %23574 = vmatpush3.msra.mxu1 %v10962_v31  ;;  %23575 = vmatprep.mubr.msk.f32.mxu1 %vm24798_vm2, %v29743_v9 }
 0x733   :  { %23571 = vmatmul.mubr.msk.f32.vlgmr.msra.gmra.mrb[170].mxu0 %vm768_vm3, %v3544_v57  ;;  %23576 = vmatmul.mubr.msk.f32.vlgmr.msra.gmra.mrb[172].mxu1 %vm768_vm3, %v3546_v7 }
 0x734   :  { %13685 = vrot.lane.b32.xlu1 %v29849_v3, %s24802_s29  ;;  %23578 = vmatprep.subr.mxu0 %v29743_v9  ;;  %v11190_v5 = vpop.permute.xlu1 %11189 }
 0x735   :  { %23583 = vmatprep.subr.mxu1 %v29743_v9  ;;  %13607 = vrot.lane.b32.xlu0 %v29949_v54, %s24802_s29  ;;  %v11268_v59 = vpop.permute.xlu0 %11267 }
 0x736   :  { %23579 = vmatpush3.msra.mxu0 %v11038_v52  ;;  %23580 = vmatprep.mubr.msk.f32.mxu0 %vm24798_vm2, %v29743_v9 }
 0x737   :  { %23584 = vmatpush3.msra.mxu1 %v11114_v22  ;;  %23585 = vmatprep.mubr.msk.f32.mxu1 %vm24798_vm2, %v29743_v9 }
 0x738   :  { %23581 = vmatmul.mubr.msk.f32.vlgmr.msra.gmra.mrb[172].mxu0 %vm768_vm3, %v3548_v53  ;;  %23586 = vmatmul.mubr.msk.f32.vlgmr.msra.gmra.mrb[174].mxu1 %vm768_vm3, %v3550_v32  ;;  %v11346_v46 = vpop.permute.xlu1 %11345 }
 0x739   :  { %13683 = vrot.lane.b32.xlu1 %v30002_v19, %s24802_s29  ;;  %23588 = vmatprep.subr.mxu0 %v29743_v9  ;;  %v11266_v40 = vpop.permute.xlu0 %11265 }
 0x73a   :  { %13605 = vrot.lane.b32.xlu0 %v30003_v0, %s24802_s29  ;;  %23589 = vmatpush3.msra.mxu0 %v11190_v5 }
 0x73b   :  { %23590 = vmatprep.mubr.msk.f32.mxu0 %vm24798_vm2, %v29743_v9  ;;  %23593 = vmatprep.subr.mxu1 %v29743_v9 }
 0x73c   :  { %23591 = vmatmul.mubr.msk.f32.vlgmr.msra.gmra.mrb[174].mxu0 %vm768_vm3, %v3552_v39  ;;  %23595 = vmatprep.mubr.msk.f32.mxu1 %vm24798_vm2, %v29743_v9  ;;  %v11344_v63 = vpop.permute.xlu1 %11343 }
 0x73d   :  { %23598 = vmatprep.subr.mxu0 %v29743_v9  ;;  %v11424_v24 = vpop.permute.xlu0 %11423  ;;  %23600 = vmatprep.mubr.msk.f32.mxu0 %vm24798_vm2, %v29743_v9 }
 0x73e   :  { %23594 = vmatpush3.xpose.msk.msra.mxu1 %vm768_vm3, %v11268_v59 }
 0x73f   :  { %23603 = vmatprep.subr.mxu1 %v29743_v9 }
 0x740   :  { %v11502_v29 = vpop.permute.xlu1 %11501 }
 0x741   :  { %23596 = vmatmul.mubr.msk.f32.vlgmr.msra.gmra.mrb[176].mxu1 %vm768_vm3, %v11266_v40  ;;  %23599 = vmatpush3.xpose.msk.msra.mxu0 %vm768_vm3, %v11346_v46  ;;  %v11422_v16 = vpop.permute.xlu0 %11421  ;;  %v30006_v46 = vld [vmem:[#allocation134_spill] sm:$0xff] }
 0x742   :  { %23604 = vmatpush3.xpose.msk.msra.mxu1 %vm768_vm3, %v11424_v24  ;;  %23605 = vmatprep.mubr.msk.f32.mxu1 %vm24798_vm2, %v29743_v9 }
 0x743   :  { %23608 = vmatprep.subr.mxu0 %v29743_v9  ;;  %23613 = vmatprep.subr.mxu1 %v29743_v9 }
 0x744   :  { %23601 = vmatmul.mubr.msk.f32.vlgmr.msra.gmra.mrb[176].mxu0 %vm768_vm3, %v11344_v63  ;;  %v11500_v31 = vpop.permute.xlu1 %11499 }
 0x745   :  { %23606 = vmatmul.mubr.msk.f32.vlgmr.msra.gmra.mrb[178].mxu1 %vm768_vm3, %v11422_v16  ;;  %23609 = vmatpush3.xpose.msk.msra.mxu0 %vm768_vm3, %v11502_v29  ;;  %v11580_v44 = vpop.permute.xlu0 %11579 }
 0x746   :  { %23610 = vmatprep.mubr.msk.f32.mxu0 %vm24798_vm2, %v29743_v9  ;;  %23614 = vmatpush3.xpose.msk.msra.mxu1 %vm768_vm3, %v11580_v44 }
 0x747   :  { %23615 = vmatprep.mubr.msk.f32.mxu1 %vm24798_vm2, %v29743_v9  ;;  %23618 = vmatprep.subr.mxu0 %v29743_v9 }
 0x748   :  { %23611 = vmatmul.mubr.msk.f32.vlgmr.msra.gmra.mrb[178].mxu0 %vm768_vm3, %v11500_v31  ;;  %v11658_v52 = vpop.permute.xlu1 %11657  ;;  %23623 = vmatprep.subr.mxu1 %v29743_v9 }
 0x749   :  { %v11578_v57 = vpop.permute.xlu0 %11577  ;;  %23619 = vmatpush3.xpose.msk.msra.mxu0 %vm768_vm3, %v11658_v52  ;;  %23620 = vmatprep.mubr.msk.f32.mxu0 %vm24798_vm2, %v29743_v9 }
 0x74a   :  { %23616 = vmatmul.mubr.msk.f32.vlgmr.msra.gmra.mrb[180].mxu1 %vm768_vm3, %v11578_v57  ;;  %23628 = vmatprep.subr.mxu0 %v29743_v9 }
 0x74b   :  { %23625 = vmatprep.mubr.msk.f32.mxu1 %vm24798_vm2, %v29743_v9 }
 0x74c   :  { %v11656_v7 = vpop.permute.xlu1 %11655 }
 0x74d   :  { %v11736_v22 = vpop.permute.xlu0 %11735  ;;  %23621 = vmatmul.mubr.msk.f32.vlgmr.msra.gmra.mrb[180].mxu0 %vm768_vm3, %v11656_v7 }
 0x74e   :  { %23624 = vmatpush3.xpose.msk.msra.mxu1 %vm768_vm3, %v11736_v22  ;;  %v9817_v4 = vpop.f32.mrb[156].mxu1  ;;  %23630 = vmatprep.mubr.msk.f32.mxu0 %vm24798_vm2, %v29743_v9 }
 0x74f   :  { %v27468_v5 = vadd.f32 %v9817_v4, %v30004_v60  ;;  %v23497_v59 = vpop.f32.mrb[157].mxu1  ;;  %23633 = vmatprep.subr.mxu1 %v29743_v9 }
 0x750   :  { %v11814_v53 = vpop.permute.xlu1 %11813 }
 0x751   :  { %30005 = vst [vmem:[#allocation121_spill] sm:$0xff] %v27468_v5  ;;  %v11734_v32 = vpop.permute.xlu0 %11733  ;;  %23629 = vmatpush3.xpose.msk.msra.mxu0 %vm768_vm3, %v11814_v53 }
 0x752   :  { %23626 = vmatmul.mubr.msk.f32.vlgmr.msra.gmra.mrb[182].mxu1 %vm768_vm3, %v11734_v32  ;;  %23638 = vmatprep.subr.mxu0 %v29743_v9 }
 0x753   :  { %v9893_v25 = vpop.f32.mrb[156].mxu0  ;;  %23635 = vmatprep.mubr.msk.f32.mxu1 %vm24798_vm2, %v29743_v9 }
 0x754   :  { %v27477_v40 = vadd.f32 %v9893_v25, %v30006_v46  ;;  %v23502_v39 = vpop.f32.mrb[157].mxu0  ;;  %v11812_v63 = vpop.permute.xlu1 %11811 }
 0x755   :  { %v11892_v24 = vpop.permute.xlu0 %11891  ;;  %23631 = vmatmul.mubr.msk.f32.vlgmr.msra.gmra.mrb[182].mxu0 %vm768_vm3, %v11812_v63 }
 0x756   :  { %30007 = vst [vmem:[#allocation33_spill] sm:$0xff] %v27477_v40  ;;  %23634 = vmatpush3.xpose.msk.msra.mxu1 %vm768_vm3, %v11892_v24  ;;  %23640 = vmatprep.mubr.msk.f32.mxu0 %vm24798_vm2, %v29743_v9  ;;  %v30026_v40 = vld [vmem:[#allocation103_spill] sm:$0xff] }
 0x757   :  { %23643 = vmatprep.subr.mxu1 %v29743_v9 }
 0x758   :  { %v11970_v29 = vpop.permute.xlu1 %11969 }
 0x759   :  { %v11890_v16 = vpop.permute.xlu0 %11889  ;;  %23639 = vmatpush3.xpose.msk.msra.mxu0 %vm768_vm3, %v11970_v29 }
 0x75a   :  { %23636 = vmatmul.mubr.msk.f32.vlgmr.msra.gmra.mrb[184].mxu1 %vm768_vm3, %v11890_v16  ;;  %23648 = vmatprep.subr.mxu0 %v29743_v9 }
 0x75b   :  { %23645 = vmatprep.mubr.msk.f32.mxu1 %vm24798_vm2, %v29743_v9 }
 0x75c   :  { %v11968_v31 = vpop.permute.xlu1 %11967 }
 0x75d   :  { %v12048_v44 = vpop.permute.xlu0 %12047  ;;  %23641 = vmatmul.mubr.msk.f32.vlgmr.msra.gmra.mrb[184].mxu0 %vm768_vm3, %v11968_v31 }
 0x75e   :  { %23644 = vmatpush3.xpose.msk.msra.mxu1 %vm768_vm3, %v12048_v44  ;;  %23650 = vmatprep.mubr.msk.f32.mxu0 %vm24798_vm2, %v29743_v9 }
 0x75f   :  { %23653 = vmatprep.subr.mxu1 %v29743_v9 }
 0x760   :  { %v12126_v52 = vpop.permute.xlu1 %12125 }
 0x761   :  { %v12046_v57 = vpop.permute.xlu0 %12045  ;;  %23649 = vmatpush3.xpose.msk.msra.mxu0 %vm768_vm3, %v12126_v52 }
 0x762   :  { %23646 = vmatmul.mubr.msk.f32.vlgmr.msra.gmra.mrb[186].mxu1 %vm768_vm3, %v12046_v57  ;;  %23658 = vmatprep.subr.mxu0 %v29743_v9  ;;  %v30008_v57 = vld [vmem:[#allocation102_spill] sm:$0xff] }
 0x763   :  { %23655 = vmatprep.mubr.msk.f32.mxu1 %vm24798_vm2, %v29743_v9 }
 0x764   :  { %v12124_v7 = vpop.permute.xlu1 %12123 }
 0x765   :  { %v12204_v22 = vpop.permute.xlu0 %12203  ;;  %23651 = vmatmul.mubr.msk.f32.vlgmr.msra.gmra.mrb[186].mxu0 %vm768_vm3, %v12124_v7 }
 0x766   :  { %23654 = vmatpush3.xpose.msk.msra.mxu1 %vm768_vm3, %v12204_v22  ;;  %23660 = vmatprep.mubr.msk.f32.mxu0 %vm24798_vm2, %v29743_v9 }
 0x767   :  { %23663 = vmatprep.subr.mxu1 %v29743_v9 }
 0x768   :  { %v12282_v4 = vpop.permute.xlu1 %12281 }
 0x769   :  { %v12202_v60 = vpop.permute.xlu0 %12201  ;;  %23659 = vmatpush3.xpose.msk.msra.mxu0 %vm768_vm3, %v12282_v4 }
 0x76a   :  { %23656 = vmatmul.mubr.msk.f32.vlgmr.msra.gmra.mrb[188].mxu1 %vm768_vm3, %v12202_v60  ;;  %23668 = vmatprep.subr.mxu0 %v29743_v9 }
 0x76b   :  { %23665 = vmatprep.mubr.msk.f32.mxu1 %vm24798_vm2, %v29743_v9 }
 0x76c   :  { %v12280_v59 = vpop.permute.xlu1 %12279 }
 0x76d   :  { %v12360_v53 = vpop.permute.xlu0 %12359  ;;  %23661 = vmatmul.mubr.msk.f32.vlgmr.msra.gmra.mrb[188].mxu0 %vm768_vm3, %v12280_v59 }
 0x76e   :  { %23664 = vmatpush3.xpose.msk.msra.mxu1 %vm768_vm3, %v12360_v53  ;;  %23670 = vmatprep.mubr.msk.f32.mxu0 %vm24798_vm2, %v29743_v9 }
 0x76f   :  { %23673 = vmatprep.subr.mxu1 %v29743_v9 }
 0x770   :  { %v12438_v32 = vpop.permute.xlu1 %12437 }
 0x771   :  { %v12358_v25 = vpop.permute.xlu0 %12357  ;;  %23669 = vmatpush3.xpose.msk.msra.mxu0 %vm768_vm3, %v12438_v32  ;;  %v30010_v32 = vld [vmem:[#allocation100_spill] sm:$0xff] }
 0x772   :  { %23666 = vmatmul.mubr.msk.f32.vlgmr.msra.gmra.mrb[190].mxu1 %vm768_vm3, %v12358_v25  ;;  %23678 = vmatprep.subr.mxu0 %v29743_v9 }
 0x773   :  { %23675 = vmatprep.mubr.msk.f32.mxu1 %vm24798_vm2, %v29743_v9 }
 0x774   :  { %v12436_v46 = vpop.permute.xlu1 %12435 }
 0x775   :  { %v12516_v39 = vpop.permute.xlu0 %12515  ;;  %23671 = vmatmul.mubr.msk.f32.vlgmr.msra.gmra.mrb[190].mxu0 %vm768_vm3, %v12436_v46 }
 0x776   :  { %23674 = vmatpush3.xpose.msk.msra.mxu1 %vm768_vm3, %v12516_v39  ;;  %23680 = vmatprep.mubr.msk.f32.mxu0 %vm24798_vm2, %v29743_v9 }
 0x777   :  { %23683 = vmatprep.subr.mxu1 %v29743_v9 }
 0x778   :  { %v12594_v63 = vpop.permute.xlu1 %12593 }
 0x779   :  { %v12514_v24 = vpop.permute.xlu0 %12513  ;;  %23679 = vmatpush3.xpose.msk.msra.mxu0 %vm768_vm3, %v12594_v63 }
 0x77a   :  { %23676 = vmatmul.mubr.msk.f32.vlgmr.msra.gmra.mrb[192].mxu1 %vm768_vm3, %v12514_v24  ;;  %23688 = vmatprep.subr.mxu0 %v29743_v9 }
 0x77b   :  { %23685 = vmatprep.mubr.msk.f32.mxu1 %vm24798_vm2, %v29743_v9 }
 0x77c   :  { %v12592_v29 = vpop.permute.xlu1 %12591 }
 0x77d   :  { %v12672_v16 = vpop.permute.xlu0 %12671  ;;  %23681 = vmatmul.mubr.msk.f32.vlgmr.msra.gmra.mrb[192].mxu0 %vm768_vm3, %v12592_v29 }
 0x77e   :  { %23684 = vmatpush3.xpose.msk.msra.mxu1 %vm768_vm3, %v12672_v16  ;;  %23690 = vmatprep.mubr.msk.f32.mxu0 %vm24798_vm2, %v29743_v9 }
 0x77f   :  { %23693 = vmatprep.subr.mxu1 %v29743_v9 }
 0x780   :  { %v12750_v31 = vpop.permute.xlu1 %12749 }
 0x781   :  { %v12670_v44 = vpop.permute.xlu0 %12669  ;;  %23689 = vmatpush3.xpose.msk.msra.mxu0 %vm768_vm3, %v12750_v31 }
 0x782   :  { %23686 = vmatmul.mubr.msk.f32.vlgmr.msra.gmra.mrb[194].mxu1 %vm768_vm3, %v12670_v44  ;;  %23698 = vmatprep.subr.mxu0 %v29743_v9 }
 0x783   :  { %v9969_v52 = vpop.f32.mrb[158].mxu1  ;;  %23695 = vmatprep.mubr.msk.f32.mxu1 %vm24798_vm2, %v29743_v9 }
 0x784   :  { %v27540_v7 = vadd.f32 %v9969_v52, %v30008_v57  ;;  %v23507_v22 = vpop.f32.mrb[159].mxu1  ;;  %v12748_v4 = vpop.permute.xlu1 %12747 }
 0x785   :  { %v12828_v60 = vpop.permute.xlu0 %12827  ;;  %23691 = vmatmul.mubr.msk.f32.vlgmr.msra.gmra.mrb[194].mxu0 %vm768_vm3, %v12748_v4 }
 0x786   :  { %30009 = vst [vmem:[#allocation37_spill] sm:$0xff] %v27540_v7  ;;  %23694 = vmatpush3.xpose.msk.msra.mxu1 %vm768_vm3, %v12828_v60  ;;  %23700 = vmatprep.mubr.msk.f32.mxu0 %vm24798_vm2, %v29743_v9 }
 0x787   :  { %23703 = vmatprep.subr.mxu1 %v29743_v9 }
 0x788   :  { %v10045_v59 = vpop.f32.mrb[158].mxu0  ;;  %v12906_v53 = vpop.permute.xlu1 %12905 }
 0x789   :  { %v27548_v25 = vadd.f32 %v10045_v59, %v30010_v32  ;;  %v12826_v46 = vpop.permute.xlu0 %12825  ;;  %v23512_v39 = vpop.f32.mrb[159].mxu0  ;;  %23699 = vmatpush3.xpose.msk.msra.mxu0 %vm768_vm3, %v12906_v53 }
 0x78a   :  { %23696 = vmatmul.mubr.msk.f32.vlgmr.msra.gmra.mrb[196].mxu1 %vm768_vm3, %v12826_v46  ;;  %23708 = vmatprep.subr.mxu0 %v29743_v9 }
 0x78b   :  { %30011 = vst [vmem:[#allocation151_spill] sm:$0xff] %v27548_v25  ;;  %23705 = vmatprep.mubr.msk.f32.mxu1 %vm24798_vm2, %v29743_v9  ;;  %v30020_v25 = vld [vmem:[#allocation108_spill] sm:$0xff] }
 0x78c   :  { %v12904_v63 = vpop.permute.xlu1 %12903 }
 0x78d   :  { %v12984_v24 = vpop.permute.xlu0 %12983  ;;  %23701 = vmatmul.mubr.msk.f32.vlgmr.msra.gmra.mrb[196].mxu0 %vm768_vm3, %v12904_v63 }
 0x78e   :  { %23704 = vmatpush3.xpose.msk.msra.mxu1 %vm768_vm3, %v12984_v24  ;;  %23710 = vmatprep.mubr.msk.f32.mxu0 %vm24798_vm2, %v29743_v9 }
 0x78f   :  { %23713 = vmatprep.subr.mxu1 %v29743_v9 }
 0x790   :  { %v13062_v29 = vpop.permute.xlu1 %13061 }
 0x791   :  { %v12982_v16 = vpop.permute.xlu0 %12981  ;;  %23709 = vmatpush3.xpose.msk.msra.mxu0 %vm768_vm3, %v13062_v29 }
 0x792   :  { %23706 = vmatmul.mubr.msk.f32.vlgmr.msra.gmra.mrb[198].mxu1 %vm768_vm3, %v12982_v16  ;;  %23718 = vmatprep.subr.mxu0 %v29743_v9 }
 0x793   :  { %23715 = vmatprep.mubr.msk.f32.mxu1 %vm24798_vm2, %v29743_v9 }
 0x794   :  { %v13060_v31 = vpop.permute.xlu1 %13059 }
 0x795   :  { %v13140_v44 = vpop.permute.xlu0 %13139  ;;  %23711 = vmatmul.mubr.msk.f32.vlgmr.msra.gmra.mrb[198].mxu0 %vm768_vm3, %v13060_v31 }
 0x796   :  { %23714 = vmatpush3.xpose.msk.msra.mxu1 %vm768_vm3, %v13140_v44  ;;  %23720 = vmatprep.mubr.msk.f32.mxu0 %vm24798_vm2, %v29743_v9 }
 0x797   :  { %23723 = vmatprep.subr.mxu1 %v29743_v9 }
 0x798   :  { %v13218_v52 = vpop.permute.xlu1 %13217 }
 0x799   :  { %v13138_v57 = vpop.permute.xlu0 %13137  ;;  %23719 = vmatpush3.xpose.msk.msra.mxu0 %vm768_vm3, %v13218_v52  ;;  %v30012_v52 = vld [vmem:[#allocation162_spill] sm:$0xff] }
 0x79a   :  { %23716 = vmatmul.mubr.msk.f32.vlgmr.msra.gmra.mrb[200].mxu1 %vm768_vm3, %v13138_v57  ;;  %23728 = vmatprep.subr.mxu0 %v29743_v9 }
 0x79b   :  { %23725 = vmatprep.mubr.msk.f32.mxu1 %vm24798_vm2, %v29743_v9 }
 0x79c   :  { %v13216_v22 = vpop.permute.xlu1 %13215 }
 0x79d   :  { %v13296_v4 = vpop.permute.xlu0 %13295  ;;  %23721 = vmatmul.mubr.msk.f32.vlgmr.msra.gmra.mrb[200].mxu0 %vm768_vm3, %v13216_v22 }
 0x79e   :  { %23724 = vmatpush3.xpose.msk.msra.mxu1 %vm768_vm3, %v13296_v4  ;;  %23730 = vmatprep.mubr.msk.f32.mxu0 %vm24798_vm2, %v29743_v9 }
 0x79f   :  { %23733 = vmatprep.subr.mxu1 %v29743_v9 }
 0x7a0   :  { %v13374_v60 = vpop.permute.xlu1 %13373 }
 0x7a1   :  { %v13294_v59 = vpop.permute.xlu0 %13293  ;;  %23729 = vmatpush3.xpose.msk.msra.mxu0 %vm768_vm3, %v13374_v60  ;;  %v30014_v60 = vld [vmem:[#allocation104_spill] sm:$0xff] }
 0x7a2   :  { %23726 = vmatmul.mubr.msk.f32.vlgmr.msra.gmra.mrb[202].mxu1 %vm768_vm3, %v13294_v59  ;;  %23738 = vmatprep.subr.mxu0 %v29743_v9 }
 0x7a3   :  { %23735 = vmatprep.mubr.msk.f32.mxu1 %vm24798_vm2, %v29743_v9 }
 0x7a4   :  { %v13372_v53 = vpop.permute.xlu1 %13371 }
 0x7a5   :  { %v13452_v32 = vpop.permute.xlu0 %13451  ;;  %23731 = vmatmul.mubr.msk.f32.vlgmr.msra.gmra.mrb[202].mxu0 %vm768_vm3, %v13372_v53 }
 0x7a6   :  { %23734 = vmatpush3.xpose.msk.msra.mxu1 %vm768_vm3, %v13452_v32  ;;  %23740 = vmatprep.mubr.msk.f32.mxu0 %vm24798_vm2, %v29743_v9 }
 0x7a7   :  { %23743 = vmatprep.subr.mxu1 %v29743_v9 }
 0x7a8   :  { %v13530_v46 = vpop.permute.xlu1 %13529 }
 0x7a9   :  { %v13450_v39 = vpop.permute.xlu0 %13449  ;;  %23739 = vmatpush3.xpose.msk.msra.mxu0 %vm768_vm3, %v13530_v46  ;;  %v30016_v46 = vld [vmem:[#allocation163_spill] sm:$0xff] }
 0x7aa   :  { %23736 = vmatmul.mubr.msk.f32.vlgmr.msra.gmra.mrb[204].mxu1 %vm768_vm3, %v13450_v39  ;;  %23748 = vmatprep.subr.mxu0 %v29743_v9 }
 0x7ab   :  { %23745 = vmatprep.mubr.msk.f32.mxu1 %vm24798_vm2, %v29743_v9 }
 0x7ac   :  { %v13528_v63 = vpop.permute.xlu1 %13527 }
 0x7ad   :  { %v13608_v24 = vpop.permute.xlu0 %13607  ;;  %23741 = vmatmul.mubr.msk.f32.vlgmr.msra.gmra.mrb[204].mxu0 %vm768_vm3, %v13528_v63 }
 0x7ae   :  { %23744 = vmatpush3.xpose.msk.msra.mxu1 %vm768_vm3, %v13608_v24  ;;  %23750 = vmatprep.mubr.msk.f32.mxu0 %vm24798_vm2, %v29743_v9 }
 0x7af   :  { %23753 = vmatprep.subr.mxu1 %v29743_v9 }
 0x7b0   :  { %v13686_v29 = vpop.permute.xlu1 %13685 }
 0x7b1   :  { %v13606_v16 = vpop.permute.xlu0 %13605  ;;  %23749 = vmatpush3.xpose.msk.msra.mxu0 %vm768_vm3, %v13686_v29 }
 0x7b2   :  { %23746 = vmatmul.mubr.msk.f32.vlgmr.msra.gmra.mrb[206].mxu1 %vm768_vm3, %v13606_v16  ;;  %23758 = vmatprep.subr.mxu0 %v29743_v9  ;;  %v30018_v16 = vld [vmem:[#allocation109_spill] sm:$0xff] }
 0x7b3   :  { %23755 = vmatprep.mubr.msk.f32.mxu1 %vm24798_vm2, %v29743_v9 }
 0x7b4   :  { %v13684_v31 = vpop.permute.xlu1 %13683 }
 0x7b5   :  { %23751 = vmatmul.mubr.msk.f32.vlgmr.msra.gmra.mrb[206].mxu0 %vm768_vm3, %v13684_v31 }
 0x7b6   :  { %23760 = vmatprep.mubr.msk.f32.mxu0 %vm24798_vm2, %v29743_v9 }
 0x7b8   :  { %v10121_v44 = vpop.f32.mrb[160].mxu1 }
 0x7b9   :  { %v27609_v57 = vadd.f32 %v10121_v44, %v30012_v52  ;;  %v23517_v22 = vpop.f32.mrb[161].mxu1 }
 0x7bb   :  { %30013 = vst [vmem:[#allocation122_spill] sm:$0xff] %v27609_v57 }
 0x7bd   :  { %v10197_v4 = vpop.f32.mrb[160].mxu0 }
 0x7be   :  { %v27612_v59 = vadd.f32 %v10197_v4, %v30014_v60  ;;  %v23522_v53 = vpop.f32.mrb[161].mxu0  ;;  %v30022_v4 = vld [vmem:[#allocation132_spill] sm:$0xff] }
 0x7bf   :  { %v30024_v53 = vld [vmem:[#allocation135_spill] sm:$0xff] }
 0x7c0   :  { %30015 = vst [vmem:[#allocation152_spill] sm:$0xff] %v27612_v59 }
 0x7ed   :  { %v10273_v32 = vpop.f32.mrb[162].mxu1 }
 0x7ee   :  { %v27615_v39 = vadd.f32 %v10273_v32, %v30016_v46  ;;  %v23527_v63 = vpop.f32.mrb[163].mxu1 }
 0x7f0   :  { %30017 = vst [vmem:[#allocation123_spill] sm:$0xff] %v27615_v39 }
 0x7f2   :  { %v10349_v24 = vpop.f32.mrb[162].mxu0  ;;  %v10425_v29 = vpop.f32.mrb[164].mxu1 }
 0x7f3   :  { %v27618_v31 = vadd.f32 %v10349_v24, %v30018_v16  ;;  %v27621_v7 = vadd.f32 %v10425_v29, %v30020_v25  ;;  %v23532_v44 = vpop.f32.mrb[163].mxu0  ;;  %v23537_v52 = vpop.f32.mrb[165].mxu1  ;;  %v30028_v16 = vld [vmem:[#allocation137_spill] sm:$0xff] }
 0x7f5   :  { %30019 = vst [vmem:[#allocation41_spill] sm:$0xff] %v27618_v31  ;;  %30021 = vst [vmem:[#allocation45_spill] sm:$0xff] %v27621_v7  ;;  %v30030_v31 = vld [vmem:[#allocation106_spill] sm:$0xff] }
 0x7f7   :  { %v10501_v22 = vpop.f32.mrb[164].mxu0  ;;  %v10577_v57 = vpop.f32.mrb[166].mxu1 }
 0x7f8   :  { %v27624_v60 = vadd.f32 %v10501_v22, %v30022_v4  ;;  %v27627_v59 = vadd.f32 %v10577_v57, %v30024_v53  ;;  %v23542_v32 = vpop.f32.mrb[165].mxu0  ;;  %v23547_v46 = vpop.f32.mrb[167].mxu1  ;;  %v30032_v4 = vld [vmem:[#allocation139_spill] sm:$0xff] }
 0x7fa   :  { %30023 = vst [vmem:[#allocation153_spill] sm:$0xff] %v27624_v60  ;;  %30025 = vst [vmem:[#allocation124_spill] sm:$0xff] %v27627_v59  ;;  %v30034_v60 = vld [vmem:[#allocation110_spill] sm:$0xff] }
 0x7fc   :  { %v10653_v63 = vpop.f32.mrb[166].mxu0  ;;  %v10729_v39 = vpop.f32.mrb[168].mxu1 }
 0x7fd   :  { %v27630_v24 = vadd.f32 %v10653_v63, %v30026_v40  ;;  %v27633_v25 = vadd.f32 %v10729_v39, %v30028_v16  ;;  %v23552_v29 = vpop.f32.mrb[167].mxu0  ;;  %v23557_v44 = vpop.f32.mrb[169].mxu1  ;;  %v30036_v63 = vld [vmem:[#allocation141_spill] sm:$0xff] }
 0x7ff   :  { %30027 = vst [vmem:[#allocation154_spill] sm:$0xff] %v27630_v24  ;;  %30029 = vst [vmem:[#allocation125_spill] sm:$0xff] %v27633_v25  ;;  %v30038_v24 = vld [vmem:[#allocation112_spill] sm:$0xff] }
 0x801   :  { %v10805_v52 = vpop.f32.mrb[168].mxu0  ;;  %v10881_v7 = vpop.f32.mrb[170].mxu1 }
 0x802   :  { %v27636_v22 = vadd.f32 %v10805_v52, %v30030_v31  ;;  %v27639_v57 = vadd.f32 %v10881_v7, %v30032_v4  ;;  %v23562_v53 = vpop.f32.mrb[169].mxu0  ;;  %v23567_v32 = vpop.f32.mrb[171].mxu1  ;;  %v30040_v52 = vld [vmem:[#allocation114_spill] sm:$0xff] }
 0x804   :  { %30031 = vst [vmem:[#allocation49_spill] sm:$0xff] %v27636_v22  ;;  %30033 = vst [vmem:[#allocation53_spill] sm:$0xff] %v27639_v57  ;;  %v30042_v57 = vld [vmem:[#allocation144_spill] sm:$0xff] }
 0x806   :  { %v10957_v46 = vpop.f32.mrb[170].mxu0  ;;  %v11033_v59 = vpop.f32.mrb[172].mxu1 }
 0x807   :  { %v27642_v40 = vadd.f32 %v10957_v46, %v30034_v60  ;;  %v27645_v39 = vadd.f32 %v11033_v59, %v30036_v63  ;;  %v23572_v16 = vpop.f32.mrb[171].mxu0  ;;  %v23577_v29 = vpop.f32.mrb[173].mxu1 }
 0x809   :  { %30035 = vst [vmem:[#allocation155_spill] sm:$0xff] %v27642_v40  ;;  %30037 = vst [vmem:[#allocation126_spill] sm:$0xff] %v27645_v39 }
 0x80b   :  { %v11109_v44 = vpop.f32.mrb[172].mxu0  ;;  %v11185_v25 = vpop.f32.mrb[174].mxu1 }
 0x80c   :  { %v27648_v31 = vadd.f32 %v11109_v44, %v30038_v24  ;;  %v27651_v7 = vadd.f32 %v11185_v25, %v30040_v52  ;;  %v23582_v4 = vpop.f32.mrb[173].mxu0  ;;  %v23587_v53 = vpop.f32.mrb[175].mxu1 }
 0x80e   :  { %30039 = vst [vmem:[#allocation156_spill] sm:$0xff] %v27648_v31  ;;  %30041 = vst [vmem:[#allocation127_spill] sm:$0xff] %v27651_v7 }
 0x80f   :  { %v11261_v32 = vpop.f32.mrb[174].mxu0 }
 0x810   :  { %v27654_v22 = vadd.f32 %v11261_v32, %v30042_v57  ;;  %v23592_v60 = vpop.f32.mrb[175].mxu0 }
 0x812   :  { %30043 = vst [vmem:[#allocation57_spill] sm:$0xff] %v27654_v22 }
 0x814   :  { %v27656_v46 = vpop.f32.mrb[176].mxu1 }
 0x815   :  { %v23597_v59 = vpop.f32.mrb[177].mxu1  ;;  %v13761_v63 = vsel %vm768_vm3, %v27656_v46, -inf }
 0x816   :  { %13762 = vmax.xlane.f32.xlu0 %v13761_v63 }
 0x817   :  { %v27660_v16 = vpop.f32.mrb[176].mxu0 }
 0x818   :  { %v23602_v24 = vpop.f32.mrb[177].mxu0  ;;  %v27662_v29 = vpop.f32.mrb[178].mxu1  ;;  %v13764_v25 = vsel %vm768_vm3, %v27660_v16, -inf }
 0x819   :  { %13765 = vmax.xlane.f32.xlu1 %v13764_v25  ;;  %v23607_v44 = vpop.f32.mrb[179].mxu1  ;;  %v13767_v57 = vsel %vm768_vm3, %v27662_v29, -inf }
 0x81a   :  { %13768 = vmax.xlane.f32.xlu0 %v13767_v57 }
 0x81b   :  { %v27668_v52 = vpop.f32.mrb[178].mxu0 }
 0x81c   :  { %v23612_v4 = vpop.f32.mrb[179].mxu0  ;;  %v13770_v53 = vsel %vm768_vm3, %v27668_v52, -inf }
 0x81d   :  { %v27672_v32 = vpop.f32.mrb[180].mxu1 }
 0x81e   :  { %13771 = vmax.xlane.f32.xlu0 %v13770_v53  ;;  %v23617_v60 = vpop.f32.mrb[181].mxu1  ;;  %v13773_v59 = vsel %vm768_vm3, %v27672_v32, -inf }
 0x81f   :  { %13774 = vmax.xlane.f32.xlu1 %v13773_v59 }
 0x820   :  { %v27676_v63 = vpop.f32.mrb[180].mxu0 }
 0x821   :  { %v23622_v24 = vpop.f32.mrb[181].mxu0  ;;  %v13776_v25 = vsel %vm768_vm3, %v27676_v63, -inf }
 0x822   :  { %13777 = vmax.xlane.f32.xlu0 %v13776_v25 }
 0x825   :  { %v27680_v44 = vpop.f32.mrb[182].mxu1 }
 0x826   :  { %v23627_v57 = vpop.f32.mrb[183].mxu1  ;;  %v13779_v4 = vsel %vm768_vm3, %v27680_v44, -inf }
 0x827   :  { %13780 = vmax.xlane.f32.xlu1 %v13779_v4 }
 0x828   :  { %v27684_v53 = vpop.f32.mrb[182].mxu0 }
 0x829   :  { %v23632_v60 = vpop.f32.mrb[183].mxu0  ;;  %v13782_v59 = vsel %vm768_vm3, %v27684_v53, -inf }
 0x82a   :  { %13783 = vmax.xlane.f32.xlu0 %v13782_v59 }
 0x82d   :  { %v27688_v22 = vpop.f32.mrb[184].mxu1 }
 0x82e   :  { %v23637_v24 = vpop.f32.mrb[185].mxu1  ;;  %v13785_v25 = vsel %vm768_vm3, %v27688_v22, -inf }
 0x82f   :  { %13786 = vmax.xlane.f32.xlu1 %v13785_v25 }
 0x830   :  { %v27692_v7 = vpop.f32.mrb[184].mxu0 }
 0x831   :  { %v23642_v57 = vpop.f32.mrb[185].mxu0  ;;  %v13788_v4 = vsel %vm768_vm3, %v27692_v7, -inf }
 0x832   :  { %13789 = vmax.xlane.f32.xlu0 %v13788_v4 }
 0x835   :  { %v27696_v31 = vpop.f32.mrb[186].mxu1 }
 0x836   :  { %v23647_v60 = vpop.f32.mrb[187].mxu1  ;;  %v13791_v59 = vsel %vm768_vm3, %v27696_v31, -inf }
 0x837   :  { %13792 = vmax.xlane.f32.xlu1 %v13791_v59 }
 0x838   :  { %v27700_v39 = vpop.f32.mrb[186].mxu0 }
 0x839   :  { %v23652_v24 = vpop.f32.mrb[187].mxu0  ;;  %v13794_v25 = vsel %vm768_vm3, %v27700_v39, -inf }
 0x83a   :  { %13795 = vmax.xlane.f32.xlu0 %v13794_v25 }
 0x83d   :  { %v27704_v40 = vpop.f32.mrb[188].mxu1 }
 0x83e   :  { %v23657_v57 = vpop.f32.mrb[189].mxu1  ;;  %v13797_v4 = vsel %vm768_vm3, %v27704_v40, -inf }
 0x83f   :  { %13798 = vmax.xlane.f32.xlu1 %v13797_v4 }
 0x840   :  { %v27708_v5 = vpop.f32.mrb[188].mxu0 }
 0x841   :  { %v23662_v60 = vpop.f32.mrb[189].mxu0  ;;  %v13800_v59 = vsel %vm768_vm3, %v27708_v5, -inf }
 0x842   :  { %13801 = vmax.xlane.f32.xlu0 %v13800_v59 }
 0x845   :  { %v27712_v0 = vpop.f32.mrb[190].mxu1 }
 0x846   :  { %v23667_v24 = vpop.f32.mrb[191].mxu1  ;;  %v13803_v25 = vsel %vm768_vm3, %v27712_v0, -inf }
 0x847   :  { %13804 = vmax.xlane.f32.xlu1 %v13803_v25 }
 0x848   :  { %v27716_v19 = vpop.f32.mrb[190].mxu0 }
 0x849   :  { %v23672_v57 = vpop.f32.mrb[191].mxu0  ;;  %v13806_v4 = vsel %vm768_vm3, %v27716_v19, -inf }
 0x84a   :  { %13807 = vmax.xlane.f32.xlu0 %v13806_v4 }
 0x84d   :  { %v27720_v42 = vpop.f32.mrb[192].mxu1 }
 0x84e   :  { %v23677_v60 = vpop.f32.mrb[193].mxu1  ;;  %v13809_v59 = vsel %vm768_vm3, %v27720_v42, -inf }
 0x84f   :  { %13810 = vmax.xlane.f32.xlu1 %v13809_v59 }
 0x850   :  { %v27724_v20 = vpop.f32.mrb[192].mxu0 }
 0x851   :  { %v23682_v24 = vpop.f32.mrb[193].mxu0  ;;  %v13812_v25 = vsel %vm768_vm3, %v27724_v20, -inf }
 0x852   :  { %13813 = vmax.xlane.f32.xlu0 %v13812_v25 }
 0x855   :  { %v27728_v8 = vpop.f32.mrb[194].mxu1 }
 0x856   :  { %v23687_v57 = vpop.f32.mrb[195].mxu1  ;;  %v13815_v4 = vsel %vm768_vm3, %v27728_v8, -inf }
 0x857   :  { %13816 = vmax.xlane.f32.xlu1 %v13815_v4 }
 0x858   :  { %v27732_v43 = vpop.f32.mrb[194].mxu0 }
 0x859   :  { %v23692_v60 = vpop.f32.mrb[195].mxu0  ;;  %v13818_v59 = vsel %vm768_vm3, %v27732_v43, -inf }
 0x85a   :  { %13819 = vmax.xlane.f32.xlu0 %v13818_v59 }
 0x85d   :  { %v27736_v45 = vpop.f32.mrb[196].mxu1 }
 0x85e   :  { %v23697_v24 = vpop.f32.mrb[197].mxu1  ;;  %v13821_v25 = vsel %vm768_vm3, %v27736_v45, -inf }
 0x85f   :  { %13822 = vmax.xlane.f32.xlu1 %v13821_v25 }
 0x860   :  { %v27740_v27 = vpop.f32.mrb[196].mxu0 }
 0x861   :  { %v23702_v57 = vpop.f32.mrb[197].mxu0  ;;  %v13824_v4 = vsel %vm768_vm3, %v27740_v27, -inf }
 0x862   :  { %13825 = vmax.xlane.f32.xlu0 %v13824_v4 }
 0x865   :  { %v27744_v54 = vpop.f32.mrb[198].mxu1 }
 0x866   :  { %v23707_v60 = vpop.f32.mrb[199].mxu1  ;;  %v13827_v59 = vsel %vm768_vm3, %v27744_v54, -inf }
 0x867   :  { %13828 = vmax.xlane.f32.xlu1 %v13827_v59 }
 0x868   :  { %v27748_v3 = vpop.f32.mrb[198].mxu0 }
 0x869   :  { %v23712_v24 = vpop.f32.mrb[199].mxu0  ;;  %v13830_v25 = vsel %vm768_vm3, %v27748_v3, -inf }
 0x86a   :  { %13831 = vmax.xlane.f32.xlu0 %v13830_v25 }
 0x86d   :  { %v27752_v41 = vpop.f32.mrb[200].mxu1 }
 0x86e   :  { %v23717_v57 = vpop.f32.mrb[201].mxu1  ;;  %v13833_v4 = vsel %vm768_vm3, %v27752_v41, -inf }
 0x86f   :  { %13834 = vmax.xlane.f32.xlu1 %v13833_v4 }
 0x870   :  { %v27756_v2 = vpop.f32.mrb[200].mxu0 }
 0x871   :  { %v23722_v60 = vpop.f32.mrb[201].mxu0  ;;  %v13836_v59 = vsel %vm768_vm3, %v27756_v2, -inf }
 0x872   :  { %13837 = vmax.xlane.f32.xlu0 %v13836_v59 }
 0x875   :  { %v27760_v28 = vpop.f32.mrb[202].mxu1 }
 0x876   :  { %v23727_v24 = vpop.f32.mrb[203].mxu1  ;;  %v13839_v25 = vsel %vm768_vm3, %v27760_v28, -inf }
 0x877   :  { %13840 = vmax.xlane.f32.xlu1 %v13839_v25 }
 0x878   :  { %v27764_v11 = vpop.f32.mrb[202].mxu0 }
 0x879   :  { %v23732_v57 = vpop.f32.mrb[203].mxu0  ;;  %v13842_v4 = vsel %vm768_vm3, %v27764_v11, -inf }
 0x87a   :  { %13843 = vmax.xlane.f32.xlu0 %v13842_v4 }
 0x87d   :  { %v27768_v30 = vpop.f32.mrb[204].mxu1 }
 0x87e   :  { %v23737_v60 = vpop.f32.mrb[205].mxu1  ;;  %v13845_v59 = vsel %vm768_vm3, %v27768_v30, -inf }
 0x87f   :  { %13846 = vmax.xlane.f32.xlu1 %v13845_v59 }
 0x880   :  { %v27772_v17 = vpop.f32.mrb[204].mxu0 }
 0x881   :  { %30044 = vst [vmem:[#allocation61_spill] sm:$0xff] %v27772_v17  ;;  %v23742_v24 = vpop.f32.mrb[205].mxu0  ;;  %v13848_v25 = vsel %vm768_vm3, %v27772_v17, -inf }
 0x882   :  { %13849 = vmax.xlane.f32.xlu0 %v13848_v25 }
 0x885   :  { %v27776_v13 = vpop.f32.mrb[206].mxu1 }
 0x886   :  { %30045 = vst [vmem:[#allocation157_spill] sm:$0xff] %v27776_v13  ;;  %v23747_v57 = vpop.f32.mrb[207].mxu1  ;;  %v13851_v4 = vsel %vm768_vm3, %v27776_v13, -inf }
 0x887   :  { %13852 = vmax.xlane.f32.xlu1 %v13851_v4 }
 0x888   :  { %v27780_v50 = vpop.f32.mrb[206].mxu0 }
 0x889   :  { %30046 = vst [vmem:[#allocation128_spill] sm:$0xff] %v27780_v50  ;;  %v23752_v60 = vpop.f32.mrb[207].mxu0  ;;  %v13854_v59 = vsel %vm768_vm3, %v27780_v50, -inf }
 0x88a   :  { %13855 = vmax.xlane.f32.xlu0 %v13854_v59 }
 0x8a3   :  { %v13763_v55 = vpop.xlane.xlu0 %13762 }
 0x8a4   :  { %v13857_v24 = vsub.f32 %v27656_v46, %v13763_v55 }
 0x8a6   :  { %v13889_v62 = vmul.f32 1.442695, %v13857_v24  ;;  %v13766_v47 = vpop.xlane.xlu1 %13765 }
 0x8a7   :  { %v13858_v25 = vsub.f32 %v27660_v16, %v13766_v47  ;;  %v13769_v51 = vpop.xlane.xlu0 %13768 }
 0x8a8   :  { %24509 = vpow2.f32 %v13889_v62  ;;  %v13859_v57 = vsub.f32 %v27662_v29, %v13769_v51 }
 0x8a9   :  { %v13891_v56 = vmul.f32 1.442695, %v13858_v25 }
 0x8aa   :  { %v13893_v4 = vmul.f32 1.442695, %v13859_v57 }
 0x8ab   :  { %24511 = vpow2.f32 %v13891_v56  ;;  %v13772_v34 = vpop.xlane.xlu0 %13771 }
 0x8ac   :  { %24513 = vpow2.f32 %v13893_v4  ;;  %v13860_v60 = vsub.f32 %v27668_v52, %v13772_v34  ;;  %v13775_v6 = vpop.xlane.xlu1 %13774 }
 0x8ad   :  { %v13861_v59 = vsub.f32 %v27672_v32, %v13775_v6 }
 0x8ae   :  { %v13895_v50 = vmul.f32 1.442695, %v13860_v60 }
 0x8af   :  { %v13897_v55 = vmul.f32 1.442695, %v13861_v59  ;;  %v13778_v46 = vpop.xlane.xlu0 %13777 }
 0x8b0   :  { %24515 = vpow2.f32 %v13895_v50  ;;  %v13862_v47 = vsub.f32 %v27676_v63, %v13778_v46 }
 0x8b1   :  { %24517 = vpow2.f32 %v13897_v55 }
 0x8b2   :  { %v27790_v62 = vpop.eup %24509  ;;  %v13899_v51 = vmul.f32 1.442695, %v13862_v47 }
 0x8b3   :  { %v13953_v56 = vsel %vm768_vm3, %v27790_v62, 0.0 }
 0x8b4   :  { %13954 = vadd.xlane.f32.xlu1 %v13953_v56  ;;  %24519 = vpow2.f32 %v13899_v51  ;;  %v13781_v16 = vpop.xlane.xlu1 %13780 }
 0x8b5   :  { %v27794_v34 = vpop.eup %24511  ;;  %v13863_v6 = vsub.f32 %v27680_v44, %v13781_v16 }
 0x8b6   :  { %v27797_v29 = vpop.eup %24513  ;;  %v13956_v50 = vsel %vm768_vm3, %v27794_v34, 0.0 }
 0x8b7   :  { %13957 = vadd.xlane.f32.xlu0 %v13956_v50  ;;  %v13901_v52 = vmul.f32 1.442695, %v13863_v6  ;;  %v13959_v32 = vsel %vm768_vm3, %v27797_v29, 0.0  ;;  %v13784_v63 = vpop.xlane.xlu0 %13783 }
 0x8b8   :  { %13960 = vadd.xlane.f32.xlu1 %v13959_v32  ;;  %v13864_v24 = vsub.f32 %v27684_v53, %v13784_v63 }
 0x8b9   :  { %24521 = vpow2.f32 %v13901_v52 }
 0x8ba   :  { %v27804_v25 = vpop.eup %24515  ;;  %v13903_v57 = vmul.f32 1.442695, %v13864_v24 }
 0x8bb   :  { %v27806_v4 = vpop.eup %24517  ;;  %v13962_v44 = vsel %vm768_vm3, %v27804_v25, 0.0 }
 0x8bc   :  { %24523 = vpow2.f32 %v13903_v57  ;;  %13963 = vadd.xlane.f32.xlu0 %v13962_v44  ;;  %v13787_v60 = vpop.xlane.xlu1 %13786  ;;  %v13965_v59 = vsel %vm768_vm3, %v27806_v4, 0.0 }
 0x8bd   :  { %v13865_v55 = vsub.f32 %v27688_v22, %v13787_v60  ;;  %13966 = vadd.xlane.f32.xlu1 %v13965_v59 }
 0x8be   :  { %v27813_v46 = vpop.eup %24519 }
 0x8bf   :  { %v13905_v53 = vmul.f32 1.442695, %v13865_v55  ;;  %v13790_v47 = vpop.xlane.xlu0 %13789  ;;  %v13968_v51 = vsel %vm768_vm3, %v27813_v46, 0.0 }
 0x8c0   :  { %v13866_v56 = vsub.f32 %v27692_v7, %v13790_v47  ;;  %13969 = vadd.xlane.f32.xlu0 %v13968_v51 }
 0x8c1   :  { %24525 = vpow2.f32 %v13905_v53 }
 0x8c2   :  { %v13907_v16 = vmul.f32 1.442695, %v13866_v56 }
 0x8c3   :  { %v27818_v6 = vpop.eup %24521 }
 0x8c4   :  { %24527 = vpow2.f32 %v13907_v16  ;;  %v13793_v50 = vpop.xlane.xlu1 %13792  ;;  %v13971_v22 = vsel %vm768_vm3, %v27818_v6, 0.0 }
 0x8c5   :  { %v13867_v52 = vsub.f32 %v27696_v31, %v13793_v50  ;;  %13972 = vadd.xlane.f32.xlu1 %v13971_v22 }
 0x8c6   :  { %v27823_v32 = vpop.eup %24523 }
 0x8c7   :  { %v13909_v63 = vmul.f32 1.442695, %v13867_v52  ;;  %v13796_v24 = vpop.xlane.xlu0 %13795  ;;  %v13974_v7 = vsel %vm768_vm3, %v27823_v32, 0.0 }
 0x8c8   :  { %v13868_v57 = vsub.f32 %v27700_v39, %v13796_v24  ;;  %13975 = vadd.xlane.f32.xlu0 %v13974_v7 }
 0x8c9   :  { %24529 = vpow2.f32 %v13909_v63 }
 0x8ca   :  { %v13911_v44 = vmul.f32 1.442695, %v13868_v57 }
 0x8cb   :  { %v27828_v60 = vpop.eup %24525 }
 0x8cc   :  { %24531 = vpow2.f32 %v13911_v44  ;;  %v13799_v59 = vpop.xlane.xlu1 %13798  ;;  %v13977_v31 = vsel %vm768_vm3, %v27828_v60, 0.0 }
 0x8cd   :  { %v13869_v55 = vsub.f32 %v27704_v40, %v13799_v59  ;;  %13978 = vadd.xlane.f32.xlu1 %v13977_v31 }
 0x8ce   :  { %v27833_v53 = vpop.eup %24527 }
 0x8cf   :  { %v13913_v47 = vmul.f32 1.442695, %v13869_v55  ;;  %v13802_v51 = vpop.xlane.xlu0 %13801  ;;  %v13980_v39 = vsel %vm768_vm3, %v27833_v53, 0.0 }
 0x8d0   :  { %v13870_v56 = vsub.f32 %v27708_v5, %v13802_v51  ;;  %13981 = vadd.xlane.f32.xlu0 %v13980_v39 }
 0x8d1   :  { %24533 = vpow2.f32 %v13913_v47 }
 0x8d2   :  { %v13915_v16 = vmul.f32 1.442695, %v13870_v56 }
 0x8d3   :  { %v27838_v50 = vpop.eup %24529 }
 0x8d4   :  { %30047 = vst [vmem:[#allocation158_spill] sm:$0xff] %v27838_v50  ;;  %24535 = vpow2.f32 %v13915_v16  ;;  %v13983_v22 = vsel %vm768_vm3, %v27838_v50, 0.0  ;;  %v13805_v57 = vpop.xlane.xlu1 %13804 }
 0x8d5   :  { %13984 = vadd.xlane.f32.xlu1 %v13983_v22  ;;  %v13871_v44 = vsub.f32 %v27712_v0, %v13805_v57 }
 0x8d6   :  { %v27842_v40 = vpop.eup %24531 }
 0x8d7   :  { %30048 = vst [vmem:[#allocation129_spill] sm:$0xff] %v27842_v40  ;;  %v13986_v52 = vsel %vm768_vm3, %v27842_v40, 0.0  ;;  %v13808_v59 = vpop.xlane.xlu0 %13807  ;;  %v13917_v55 = vmul.f32 1.442695, %v13871_v44 }
 0x8d8   :  { %13987 = vadd.xlane.f32.xlu0 %v13986_v52  ;;  %v13872_v31 = vsub.f32 %v27716_v19, %v13808_v59 }
 0x8d9   :  { %24537 = vpow2.f32 %v13917_v55 }
 0x8da   :  { %v13919_v47 = vmul.f32 1.442695, %v13872_v31 }
 0x8db   :  { %v27846_v63 = vpop.eup %24533 }
 0x8dc   :  { %30049 = vst [vmem:[#allocation159_spill] sm:$0xff] %v27846_v63  ;;  %v13989_v5 = vsel %vm768_vm3, %v27846_v63, 0.0  ;;  %24539 = vpow2.f32 %v13919_v47  ;;  %v13811_v19 = vpop.xlane.xlu1 %13810 }
 0x8dd   :  { %13990 = vadd.xlane.f32.xlu1 %v13989_v5  ;;  %v13873_v0 = vsub.f32 %v27720_v42, %v13811_v19 }
 0x8de   :  { %v27850_v24 = vpop.eup %24535 }
 0x8df   :  { %30050 = vst [vmem:[#allocation130_spill] sm:$0xff] %v27850_v24  ;;  %v13992_v7 = vsel %vm768_vm3, %v27850_v24, 0.0  ;;  %v13814_v22 = vpop.xlane.xlu0 %13813  ;;  %v13921_v5 = vmul.f32 1.442695, %v13873_v0 }
 0x8e0   :  { %13993 = vadd.xlane.f32.xlu0 %v13992_v7  ;;  %v13874_v52 = vsub.f32 %v27724_v20, %v13814_v22 }
 0x8e1   :  { %24541 = vpow2.f32 %v13921_v5 }
 0x8e2   :  { %v13923_v57 = vmul.f32 1.442695, %v13874_v52 }
 0x8e3   :  { %v27860_v51 = vpop.eup %24537 }
 0x8e4   :  { %30051 = vst [vmem:[#allocation160_spill] sm:$0xff] %v27860_v51  ;;  %v13995_v56 = vsel %vm768_vm3, %v27860_v51, 0.0  ;;  %v13817_v7 = vpop.xlane.xlu1 %13816  ;;  %24543 = vpow2.f32 %v13923_v57 }
 0x8e6   :  { %v27862_v39 = vpop.eup %24539 }
 0x8e7   :  { %30052 = vst [vmem:[#allocation131_spill] sm:$0xff] %v27862_v39  ;;  %v13998_v16 = vsel %vm768_vm3, %v27862_v39, 0.0  ;;  %v13820_v44 = vpop.xlane.xlu0 %13819 }
 0x8e8   :  { %v13876_v13 = vsub.f32 %v27732_v43, %v13820_v44 }
 0x8eb   :  { %v27884_v42 = vpop.eup %24541 }
 0x8ec   :  { %v27874_v59 = vpop.xlane.xlu1 %13822  ;;  %30053 = vst [vmem:[#allocation136_spill] sm:$0xff] %v27884_v42  ;;  %v14001_v0 = vsel %vm768_vm3, %v27884_v42, 0.0 }
 0x8ee   :  { %14113 = vrot.lane.b32.xlu1 %v29950_v14, %s24803_s30  ;;  %v27888_v20 = vpop.eup %24543 }
 0x8ef   :  { %v27876_v31 = vpop.xlane.xlu0 %13825  ;;  %30054 = vst [vmem:[#allocation98_spill] sm:$0xff] %v27888_v20  ;;  %v14004_v52 = vsel %vm768_vm3, %v27888_v20, 0.0 }
 0x8f4   :  { %v27878_v55 = vpop.xlane.xlu1 %13828 }
 0x8f6   :  { %14189 = vrot.lane.b32.xlu0 %v29863_v18, %s24803_s30 }
 0x8f7   :  { %v27880_v47 = vpop.xlane.xlu0 %13831 }
 0x912   :  { %13996 = vadd.xlane.f32.xlu1 %v13995_v56  ;;  %v27882_v56 = vpop.xlane.xlu1 %13834 }
 0x915   :  { %13999 = vadd.xlane.f32.xlu0 %v13998_v16  ;;  %v27886_v16 = vpop.xlane.xlu0 %13837 }
 0x916   :  { %v27890_v19 = vpop.xlane.xlu1 %13840 }
 0x919   :  { %v27894_v22 = vpop.xlane.xlu0 %13843 }
 0x91a   :  { %v27898_v5 = vpop.xlane.xlu1 %13846 }
 0x91d   :  { %v27900_v57 = vpop.xlane.xlu0 %13849 }
 0x923   :  { %14265 = vrot.lane.b32.xlu1 %v29954_v49, %s24803_s30  ;;  %v27902_v49 = vpop.xlane.xlu1 %13852 }
 0x924   :  { %30055 = vst [vmem:[#allocation105_spill] sm:$0xff] %v27902_v49 }
 0x92b   :  { %14341 = vrot.lane.b32.xlu0 %v29953_v1, %s24803_s30  ;;  %v27904_v1 = vpop.xlane.xlu0 %13855 }
 0x92c   :  { %30056 = vst [vmem:[#allocation133_spill] sm:$0xff] %v27904_v1 }
 0x941   :  { %v13955_v14 = vpop.xlane.xlu1 %13954 }
 0x942   :  { %24545 = vrcp.f32 %v13955_v14  ;;  %v13927_v14 = vmul.f32 1.442695, %v13876_v13 }
 0x944   :  { %v13958_v18 = vpop.xlane.xlu0 %13957 }
 0x945   :  { %v13961_v39 = vpop.xlane.xlu1 %13960  ;;  %24547 = vrcp.f32 %v13958_v18 }
 0x947   :  { %14002 = vadd.xlane.f32.xlu1 %v14001_v0 }
 0x949   :  { %v13964_v0 = vpop.xlane.xlu0 %13963 }
 0x94a   :  { %14005 = vadd.xlane.f32.xlu0 %v14004_v52  ;;  %v27908_v42 = vpop.xlane.xlu1 %13966 }
 0x94d   :  { %v27910_v51 = vpop.xlane.xlu0 %13969 }
 0x952   :  { %v27912_v20 = vpop.xlane.xlu1 %13972 }
 0x955   :  { %v27916_v52 = vpop.xlane.xlu0 %13975 }
 0x958   :  { %14417 = vrot.lane.b32.xlu1 %v29880_v12, %s24803_s30  ;;  %v13875_v12 = vsub.f32 %v27728_v8, %v13817_v7  ;;  %v13877_v8 = vsub.f32 %v27736_v45, %v27874_v59 }
 0x95a   :  { %v27918_v24 = vpop.xlane.xlu1 %13978  ;;  %v13925_v15 = vmul.f32 1.442695, %v13875_v12 }
 0x95c   :  { %24549 = vpow2.f32 %v13925_v15 }
 0x95d   :  { %v27920_v63 = vpop.xlane.xlu0 %13981  ;;  %24551 = vpow2.f32 %v13927_v14 }
 0x95e   :  { %24553 = vrcp.f32 %v13961_v39 }
 0x95f   :  { %24555 = vrcp.f32 %v13964_v0  ;;  %v13880_v0 = vsub.f32 %v27748_v3, %v27880_v47  ;;  %v13881_v47 = vsub.f32 %v27752_v41, %v27882_v56 }
 0x960   :  { %14493 = vrot.lane.b32.xlu0 %v29881_v33, %s24803_s30  ;;  %v24546_v33 = vpop.eup %24545 }
 0x961   :  { %v24548_v50 = vpop.eup %24547  ;;  %v14050_v17 = vmul.f32 %v24546_v33, %v27790_v62  ;;  %v13878_v62 = vsub.f32 %v27740_v27, %v27876_v31  ;;  %v13879_v31 = vsub.f32 %v27744_v54, %v27878_v55 }
 0x962   :  { %v27923_v1 = vpop.xlane.xlu1 %13984  ;;  %v14052_v12 = vmul.f32 %v24548_v50, %v27794_v34  ;;  %v13929_v34 = vmul.f32 1.442695, %v13877_v8 }
 0x963   :  { %v13931_v44 = vmul.f32 1.442695, %v13878_v62  ;;  %v13935_v62 = vmul.f32 1.442695, %v13880_v0  ;;  %v13884_v0 = vsub.f32 %v27764_v11, %v27894_v22 }
 0x964   :  { %24557 = vpow2.f32 %v13929_v34 }
 0x965   :  { %v27926_v49 = vpop.xlane.xlu0 %13987  ;;  %24559 = vpow2.f32 %v13931_v44 }
 0x966   :  { %v27942_v13 = vpop.eup %24549  ;;  %24561 = vrcp.f32 %v27908_v42 }
 0x967   :  { %v14007_v33 = vsel %vm768_vm3, %v27942_v13, 0.0  ;;  %24563 = vrcp.f32 %v27910_v51 }
 0x96a   :  { %v27928_v36 = vpop.xlane.xlu1 %13990 }
 0x96d   :  { %v27930_v40 = vpop.xlane.xlu0 %13993 }
 0x96e   :  { %v14114_v18 = vpop.permute.xlu1 %14113 }
 0x96f   :  { %23754 = vmatpush3.msra.mxu1 %v14114_v18 }
 0x970   :  { %23756 = vmatmul.mubr.msk.f32.vlgmr.msra.gmra.mrb[208].mxu1 %vm768_vm3, %v14050_v17  ;;  %23763 = vmatprep.subr.mxu1 %v29743_v9  ;;  %v27944_v17 = vpop.eup %24551 }
 0x971   :  { %v14190_v43 = vpop.permute.xlu0 %14189  ;;  %23765 = vmatprep.mubr.msk.f32.mxu1 %vm24798_vm2, %v29743_v9  ;;  %v14010_v15 = vsel %vm768_vm3, %v27944_v17, 0.0  ;;  %v24554_v7 = vpop.eup %24553 }
 0x972   :  { %23759 = vmatpush3.msra.mxu0 %v14190_v43  ;;  %v24556_v18 = vpop.eup %24555 }
 0x973   :  { %23761 = vmatmul.mubr.msk.f32.vlgmr.msra.gmra.mrb[208].mxu0 %vm768_vm3, %v14052_v12  ;;  %23768 = vmatprep.subr.mxu0 %v29743_v9  ;;  %v14054_v12 = vmul.f32 %v24554_v7, %v27797_v29  ;;  %v14056_v27 = vmul.f32 %v24556_v18, %v27804_v25  ;;  %v27972_v29 = vpop.eup %24557  ;;  %v13882_v18 = vsub.f32 %v27756_v2, %v27886_v16 }
 0x974   :  { %23770 = vmatprep.mubr.msk.f32.mxu0 %vm24798_vm2, %v29743_v9  ;;  %v27974_v39 = vpop.eup %24559  ;;  %v14013_v59 = vsel %vm768_vm3, %v27972_v29, 0.0 }
 0x975   :  { %v14016_v25 = vsel %vm768_vm3, %v27974_v39, 0.0  ;;  %v24562_v8 = vpop.eup %24561 }
 0x976   :  { %v24564_v7 = vpop.eup %24563  ;;  %v14058_v42 = vmul.f32 %v24562_v8, %v27806_v4 }
 0x977   :  { %v14060_v3 = vmul.f32 %v24564_v7, %v27813_v46  ;;  %v13943_v7 = vmul.f32 1.442695, %v13884_v0 }
 0x97c   :  { %14008 = vadd.xlane.f32.xlu1 %v14007_v33  ;;  %v13933_v33 = vmul.f32 1.442695, %v13879_v31 }
 0x97e   :  { %24565 = vpow2.f32 %v13933_v33 }
 0x97f   :  { %14011 = vadd.xlane.f32.xlu0 %v14010_v15  ;;  %24567 = vpow2.f32 %v13935_v62 }
 0x980   :  { %24569 = vrcp.f32 %v27912_v20 }
 0x981   :  { %24571 = vrcp.f32 %v27916_v52  ;;  %v13883_v52 = vsub.f32 %v27760_v28, %v27890_v19 }
 0x983   :  { %v13941_v33 = vmul.f32 1.442695, %v13883_v52 }
 0x988   :  { %v28004_v4 = vpop.eup %24565 }
 0x989   :  { %v28006_v51 = vpop.eup %24567  ;;  %v14019_v55 = vsel %vm768_vm3, %v28004_v4, 0.0 }
 0x98a   :  { %v14022_v46 = vsel %vm768_vm3, %v28006_v51, 0.0 }
 0x98d   :  { %14569 = vrot.lane.b32.xlu1 %v29890_v58, %s24803_s30 }
 0x995   :  { %14645 = vrot.lane.b32.xlu0 %v29891_v26, %s24803_s30 }
 0x99f   :  { %v27958_v50 = vpop.xlane.xlu1 %13996 }
 0x9a2   :  { %v27960_v14 = vpop.xlane.xlu0 %13999 }
 0x9a3   :  { %v14266_v43 = vpop.permute.xlu1 %14265 }
 0x9a4   :  { %23764 = vmatpush3.msra.mxu1 %v14266_v43  ;;  %v13937_v43 = vmul.f32 1.442695, %v13881_v47 }
 0x9a5   :  { %23766 = vmatmul.mubr.msk.f32.vlgmr.msra.gmra.mrb[210].mxu1 %vm768_vm3, %v14054_v12  ;;  %23773 = vmatprep.subr.mxu1 %v29743_v9 }
 0x9a6   :  { %v14342_v45 = vpop.permute.xlu0 %14341  ;;  %23775 = vmatprep.mubr.msk.f32.mxu1 %vm24798_vm2, %v29743_v9  ;;  %24573 = vpow2.f32 %v13937_v43 }
 0x9a7   :  { %23769 = vmatpush3.msra.mxu0 %v14342_v45  ;;  %v24570_v45 = vpop.eup %24569 }
 0x9a8   :  { %23771 = vmatmul.mubr.msk.f32.vlgmr.msra.gmra.mrb[210].mxu0 %vm768_vm3, %v14056_v27  ;;  %23778 = vmatprep.subr.mxu0 %v29743_v9  ;;  %v13939_v27 = vmul.f32 1.442695, %v13882_v18  ;;  %v14062_v20 = vmul.f32 %v24570_v45, %v27818_v6 }
 0x9a9   :  { %23780 = vmatprep.mubr.msk.f32.mxu0 %vm24798_vm2, %v29743_v9 }
 0x9aa   :  { %24575 = vpow2.f32 %v13939_v27  ;;  %v13885_v27 = vsub.f32 %v27768_v30, %v27898_v5 }
 0x9ab   :  { %24577 = vrcp.f32 %v27918_v24 }
 0x9ac   :  { %24579 = vrcp.f32 %v27920_v63  ;;  %v30057_v63 = vld [vmem:[#allocation116_spill] sm:$0xff] }
 0x9ad   :  { %24581 = vpow2.f32 %v13941_v33  ;;  %v30061_v33 = vld [vmem:[#allocation158_spill] sm:$0xff] }
 0x9ae   :  { %24583 = vpow2.f32 %v13943_v7 }
 0x9af   :  { %24585 = vrcp.f32 %v27923_v1 }
 0x9b0   :  { %24587 = vrcp.f32 %v27926_v49  ;;  %v30062_v49 = vld [vmem:[#allocation117_spill] sm:$0xff] }
 0x9b1   :  { %14014 = vadd.xlane.f32.xlu1 %v14013_v59 }
 0x9b4   :  { %14017 = vadd.xlane.f32.xlu0 %v14016_v25  ;;  %v24572_v25 = vpop.eup %24571 }
 0x9b5   :  { %v14064_v2 = vmul.f32 %v24572_v25, %v27823_v32  ;;  %v28036_v6 = vpop.eup %24573  ;;  %v30060_v25 = vld [vmem:[#allocation61_spill] sm:$0xff] }
 0x9b6   :  { %v28038_v56 = vpop.eup %24575  ;;  %v14025_v16 = vsel %vm768_vm3, %v28036_v6, 0.0 }
 0x9b7   :  { %v14028_v32 = vsel %vm768_vm3, %v28038_v56, 0.0  ;;  %v24578_v62 = vpop.eup %24577 }
 0x9b8   :  { %v14066_v24 = vmul.f32 %v24578_v62, %v27828_v60  ;;  %v30058_v60 = vld [vmem:[#allocation146_spill] sm:$0xff] }
 0x9c2   :  { %14721 = vrot.lane.b32.xlu1 %v29900_v23, %s24803_s30 }
 0x9ca   :  { %14797 = vrot.lane.b32.xlu0 %v29901_v38, %s24803_s30 }
 0x9d4   :  { %v27990_v15 = vpop.xlane.xlu1 %14002 }
 0x9d7   :  { %v27992_v34 = vpop.xlane.xlu0 %14005 }
 0x9d8   :  { %v14418_v44 = vpop.permute.xlu1 %14417 }
 0x9d9   :  { %23774 = vmatpush3.msra.mxu1 %v14418_v44 }
 0x9da   :  { %23776 = vmatmul.mubr.msk.f32.vlgmr.msra.gmra.mrb[212].mxu1 %vm768_vm3, %v14058_v42  ;;  %23783 = vmatprep.subr.mxu1 %v29743_v9  ;;  %v24580_v42 = vpop.eup %24579 }
 0x9db   :  { %v14494_v54 = vpop.permute.xlu0 %14493  ;;  %23785 = vmatprep.mubr.msk.f32.mxu1 %vm24798_vm2, %v29743_v9  ;;  %v14068_v19 = vmul.f32 %v24580_v42, %v27833_v53  ;;  %v28074_v18 = vpop.eup %24581 }
 0x9dc   :  { %23779 = vmatpush3.msra.mxu0 %v14494_v54  ;;  %v28076_v43 = vpop.eup %24583  ;;  %v14031_v53 = vsel %vm768_vm3, %v28074_v18, 0.0 }
 0x9dd   :  { %23781 = vmatmul.mubr.msk.f32.vlgmr.msra.gmra.mrb[212].mxu0 %vm768_vm3, %v14060_v3  ;;  %23788 = vmatprep.subr.mxu0 %v29743_v9  ;;  %v14034_v45 = vsel %vm768_vm3, %v28076_v43, 0.0 }
 0x9de   :  { %23790 = vmatprep.mubr.msk.f32.mxu0 %vm24798_vm2, %v29743_v9 }
 0x9e6   :  { %14020 = vadd.xlane.f32.xlu1 %v14019_v55 }
 0x9e9   :  { %14023 = vadd.xlane.f32.xlu0 %v14022_v46 }
 0x9f7   :  { %14873 = vrot.lane.b32.xlu1 %v29910_v61, %s24803_s30 }
 0x9ff   :  { %14949 = vrot.lane.b32.xlu0 %v29911_v21, %s24803_s30 }
 0xa09   :  { %v28022_v12 = vpop.xlane.xlu1 %14008 }
 0xa0c   :  { %v28024_v59 = vpop.xlane.xlu0 %14011 }
 0xa0d   :  { %v14570_v31 = vpop.permute.xlu1 %14569 }
 0xa0e   :  { %23784 = vmatpush3.msra.mxu1 %v14570_v31  ;;  %v13886_v31 = vsub.f32 %v30060_v25, %v27900_v57  ;;  %v30064_v57 = vld [vmem:[#allocation129_spill] sm:$0xff] }
 0xa0f   :  { %23786 = vmatmul.mubr.msk.f32.vlgmr.msra.gmra.mrb[214].mxu1 %vm768_vm3, %v14062_v20  ;;  %23793 = vmatprep.subr.mxu1 %v29743_v9  ;;  %v13945_v20 = vmul.f32 1.442695, %v13885_v27  ;;  %v30071_v25 = vld [vmem:[#allocation133_spill] sm:$0xff] }
 0xa10   :  { %v14646_v41 = vpop.permute.xlu0 %14645  ;;  %23795 = vmatprep.mubr.msk.f32.mxu1 %vm24798_vm2, %v29743_v9 }
 0xa11   :  { %23789 = vmatpush3.msra.mxu0 %v14646_v41  ;;  %24589 = vpow2.f32 %v13945_v20 }
 0xa12   :  { %23791 = vmatmul.mubr.msk.f32.vlgmr.msra.gmra.mrb[214].mxu0 %vm768_vm3, %v14064_v2  ;;  %23798 = vmatprep.subr.mxu0 %v29743_v9  ;;  %v24586_v2 = vpop.eup %24585 }
 0xa13   :  { %23800 = vmatprep.mubr.msk.f32.mxu0 %vm24798_vm2, %v29743_v9  ;;  %v24588_v52 = vpop.eup %24587  ;;  %v14070_v1 = vmul.f32 %v24586_v2, %v30061_v33 }
 0xa14   :  { %v14072_v42 = vmul.f32 %v24588_v52, %v30064_v57 }
 0xa1b   :  { %14026 = vadd.xlane.f32.xlu1 %v14025_v16  ;;  %v13947_v16 = vmul.f32 1.442695, %v13886_v31  ;;  %v30072_v31 = vld [vmem:[#allocation128_spill] sm:$0xff] }
 0xa1c   :  { %v13888_v20 = vsub.f32 %v30072_v31, %v30071_v25 }
 0xa1d   :  { %24591 = vpow2.f32 %v13947_v16 }
 0xa1e   :  { %14029 = vadd.xlane.f32.xlu0 %v14028_v32  ;;  %24593 = vrcp.f32 %v27928_v36 }
 0xa1f   :  { %24595 = vrcp.f32 %v27930_v40  ;;  %v30074_v40 = vld [vmem:[#allocation118_spill] sm:$0xff] }
 0xa2c   :  { %15025 = vrot.lane.b32.xlu1 %v29921_v48, %s24803_s30 }
 0xa34   :  { %15101 = vrot.lane.b32.xlu0 %v29922_v35, %s24803_s30 }
 0xa3e   :  { %v28054_v8 = vpop.xlane.xlu1 %14014 }
 0xa41   :  { %v28056_v44 = vpop.xlane.xlu0 %14017 }
 0xa42   :  { %v14722_v54 = vpop.permute.xlu1 %14721 }
 0xa43   :  { %v14185_v3 = vpop.f32.mrb[208].mxu1  ;;  %23794 = vmatpush3.msra.mxu1 %v14722_v54 }
 0xa44   :  { %v28060_v55 = vadd.f32 %v14185_v3, %v30057_v63  ;;  %v23757_v28 = vpop.f32.mrb[209].mxu1  ;;  %23796 = vmatmul.mubr.msk.f32.vlgmr.msra.gmra.mrb[216].mxu1 %vm768_vm3, %v14066_v24  ;;  %23803 = vmatprep.subr.mxu1 %v29743_v9  ;;  %v30065_v24 = vld [vmem:[#allocation147_spill] sm:$0xff] }
 0xa45   :  { %v14798_v11 = vpop.permute.xlu0 %14797  ;;  %23805 = vmatprep.mubr.msk.f32.mxu1 %vm24798_vm2, %v29743_v9  ;;  %v28112_v28 = vpop.eup %24589 }
 0xa46   :  { %v14261_v22 = vpop.f32.mrb[208].mxu0  ;;  %23799 = vmatpush3.msra.mxu0 %v14798_v11  ;;  %v28114_v11 = vpop.eup %24591 }
 0xa47   :  { %v28068_v46 = vadd.f32 %v14261_v22, %v30058_v60  ;;  %v23762_v47 = vpop.f32.mrb[209].mxu0  ;;  %23801 = vmatmul.mubr.msk.f32.vlgmr.msra.gmra.mrb[216].mxu0 %vm768_vm3, %v14068_v19  ;;  %23808 = vmatprep.subr.mxu0 %v29743_v9  ;;  %v14037_v19 = vsel %vm768_vm3, %v28112_v28, 0.0  ;;  %v14040_v22 = vsel %vm768_vm3, %v28114_v11, 0.0  ;;  %v30067_v60 = vld [vmem:[#allocation65_spill] sm:$0xff]  ;;  %v24594_v52 = vpop.eup %24593 }
 0xa48   :  { %23810 = vmatprep.mubr.msk.f32.mxu0 %vm24798_vm2, %v29743_v9  ;;  %v30068_v47 = vld [vmem:[#allocation68_spill] sm:$0xff] }
 0xa49   :  { %30059 = vst [vmem:[#allocation143_spill] sm:$0xff] %v28068_v46 }
 0xa50   :  { %14032 = vadd.xlane.f32.xlu1 %v14031_v53  ;;  %v30069_v53 = vld [vmem:[#allocation105_spill] sm:$0xff] }
 0xa53   :  { %14035 = vadd.xlane.f32.xlu0 %v14034_v45  ;;  %v30070_v45 = vld [vmem:[#allocation157_spill] sm:$0xff] }
 0xa54   :  { %v13887_v27 = vsub.f32 %v30070_v45, %v30069_v53 }
 0xa56   :  { %v13949_v2 = vmul.f32 1.442695, %v13887_v27 }
 0xa58   :  { %24597 = vpow2.f32 %v13949_v2  ;;  %v30080_v2 = vld [vmem:[#allocation74_spill] sm:$0xff] }
 0xa61   :  { %15177 = vrot.lane.b32.xlu1 %v29929_v10, %s24803_s30 }
 0xa69   :  { %15253 = vrot.lane.b32.xlu0 %v29930_v37, %s24803_s30 }
 0xa73   :  { %v28092_v41 = vpop.xlane.xlu1 %14020 }
 0xa76   :  { %v28094_v32 = vpop.xlane.xlu0 %14023 }
 0xa77   :  { %v14874_v0 = vpop.permute.xlu1 %14873 }
 0xa78   :  { %v14337_v62 = vpop.f32.mrb[210].mxu1  ;;  %23804 = vmatpush3.msra.mxu1 %v14874_v0  ;;  %v13951_v0 = vmul.f32 1.442695, %v13888_v20  ;;  %v30079_v20 = vld [vmem:[#allocation70_spill] sm:$0xff] }
 0xa79   :  { %v28098_v7 = vadd.f32 %v14337_v62, %v30062_v49  ;;  %v23767_v30 = vpop.f32.mrb[211].mxu1  ;;  %23806 = vmatmul.mubr.msk.f32.vlgmr.msra.gmra.mrb[218].mxu1 %vm768_vm3, %v14070_v1  ;;  %23813 = vmatprep.subr.mxu1 %v29743_v9  ;;  %v24596_v1 = vpop.eup %24595  ;;  %v30073_v49 = vld [vmem:[#allocation159_spill] sm:$0xff] }
 0xa7a   :  { %v14950_v5 = vpop.permute.xlu0 %14949  ;;  %23815 = vmatprep.mubr.msk.f32.mxu1 %vm24798_vm2, %v29743_v9  ;;  %v14074_v36 = vmul.f32 %v24594_v52, %v30073_v49  ;;  %24599 = vpow2.f32 %v13951_v0  ;;  %v28150_v45 = vpop.eup %24597  ;;  %v30081_v52 = vld [vmem:[#allocation76_spill] sm:$0xff] }
 0xa7b   :  { %30063 = vst [vmem:[#allocation138_spill] sm:$0xff] %v28098_v7  ;;  %v14413_v54 = vpop.f32.mrb[210].mxu0  ;;  %23809 = vmatpush3.msra.mxu0 %v14950_v5  ;;  %v14043_v25 = vsel %vm768_vm3, %v28150_v45, 0.0  ;;  %v30082_v0 = vld [vmem:[#allocation72_spill] sm:$0xff]  ;;  %24601 = vrcp.f32 %v27958_v50  ;;  %v30088_v50 = vld [vmem:[#allocation86_spill] sm:$0xff]  ;;  %v30093_v7 = vld [vmem:[#allocation131_spill] sm:$0xff] }
 0xa7c   :  { %v28106_v3 = vadd.f32 %v14413_v54, %v30065_v24  ;;  %v23772_v63 = vpop.f32.mrb[211].mxu0  ;;  %23811 = vmatmul.mubr.msk.f32.vlgmr.msra.gmra.mrb[218].mxu0 %vm768_vm3, %v14072_v42  ;;  %23818 = vmatprep.subr.mxu0 %v29743_v9  ;;  %v30076_v54 = vld [vmem:[#allocation130_spill] sm:$0xff]  ;;  %24603 = vrcp.f32 %v27960_v14  ;;  %v30085_v49 = vld [vmem:[#allocation84_spill] sm:$0xff] }
 0xa7d   :  { %23820 = vmatprep.mubr.msk.f32.mxu0 %vm24798_vm2, %v29743_v9  ;;  %v14076_v24 = vmul.f32 %v24596_v1, %v30076_v54  ;;  %v30083_v1 = vld [vmem:[#allocation80_spill] sm:$0xff]  ;;  %24605 = vrcp.f32 %v27990_v15 }
 0xa7e   :  { %30066 = vst [vmem:[#allocation101_spill] sm:$0xff] %v28106_v3  ;;  %24607 = vrcp.f32 %v27992_v34 }
 0xa7f   :  { %24609 = vrcp.f32 %v28022_v12  ;;  %v30129_v12 = vld [vmem:[#allocation48_spill] sm:$0xff] }
 0xa80   :  { %24611 = vrcp.f32 %v28024_v59  ;;  %v30130_v59 = vld [vmem:[#allocation50_spill] sm:$0xff] }
 0xa81   :  { %24613 = vrcp.f32 %v28054_v8 }
 0xa82   :  { %24615 = vrcp.f32 %v28056_v44 }
 0xa83   :  { %24617 = vrcp.f32 %v28092_v41 }
 0xa84   :  { %v28152_v27 = vpop.eup %24599  ;;  %24619 = vrcp.f32 %v28094_v32 }
 0xa85   :  { %14038 = vadd.xlane.f32.xlu1 %v14037_v19  ;;  %v30077_v19 = vld [vmem:[#allocation148_spill] sm:$0xff]  ;;  %v14046_v31 = vsel %vm768_vm3, %v28152_v27, 0.0 }
 0xa88   :  { %14041 = vadd.xlane.f32.xlu0 %v14040_v22 }
 0xa96   :  { %15329 = vrot.lane.b32.xlu1 %v30067_v60, %s24803_s30 }
 0xa9e   :  { %15405 = vrot.lane.b32.xlu0 %v30068_v47, %s24803_s30 }
 0xaa8   :  { %v28130_v16 = vpop.xlane.xlu1 %14026 }
 0xaa9   :  { %24621 = vrcp.f32 %v28130_v16 }
 0xaab   :  { %v28132_v33 = vpop.xlane.xlu0 %14029 }
 0xaac   :  { %v15026_v62 = vpop.permute.xlu1 %15025  ;;  %24623 = vrcp.f32 %v28132_v33 }
 0xaad   :  { %v14489_v30 = vpop.f32.mrb[212].mxu1  ;;  %23814 = vmatpush3.msra.mxu1 %v15026_v62  ;;  %v30084_v62 = vld [vmem:[#allocation78_spill] sm:$0xff] }
 0xaae   :  { %v28136_v5 = vadd.f32 %v14489_v30, %v30074_v40  ;;  %v23777_v57 = vpop.f32.mrb[213].mxu1  ;;  %23816 = vmatmul.mubr.msk.f32.vlgmr.msra.gmra.mrb[220].mxu1 %vm768_vm3, %v14074_v36  ;;  %23823 = vmatprep.subr.mxu1 %v29743_v9  ;;  %v30086_v36 = vld [vmem:[#allocation82_spill] sm:$0xff]  ;;  %v24602_v40 = vpop.eup %24601 }
 0xaaf   :  { %v15102_v42 = vpop.permute.xlu0 %15101  ;;  %23825 = vmatprep.mubr.msk.f32.mxu1 %vm24798_vm2, %v29743_v9  ;;  %v30087_v57 = vld [vmem:[#allocation88_spill] sm:$0xff] }
 0xab0   :  { %30075 = vst [vmem:[#allocation107_spill] sm:$0xff] %v28136_v5  ;;  %v14565_v63 = vpop.f32.mrb[212].mxu0  ;;  %23819 = vmatpush3.msra.mxu0 %v15102_v42  ;;  %v24604_v42 = vpop.eup %24603  ;;  %v30092_v5 = vld [vmem:[#allocation90_spill] sm:$0xff] }
 0xab1   :  { %v28144_v22 = vadd.f32 %v14565_v63, %v30077_v19  ;;  %v23782_v53 = vpop.f32.mrb[213].mxu0  ;;  %23821 = vmatmul.mubr.msk.f32.vlgmr.msra.gmra.mrb[220].mxu0 %vm768_vm3, %v14076_v24  ;;  %23828 = vmatprep.subr.mxu0 %v29743_v9  ;;  %v30089_v24 = vld [vmem:[#allocation160_spill] sm:$0xff]  ;;  %v14080_v46 = vmul.f32 %v24604_v42, %v30093_v7  ;;  %v30096_v7 = vld [vmem:[#allocation94_spill] sm:$0xff] }
 0xab2   :  { %23830 = vmatprep.mubr.msk.f32.mxu0 %vm24798_vm2, %v29743_v9  ;;  %v14078_v63 = vmul.f32 %v24602_v40, %v30089_v24  ;;  %v30090_v53 = vld [vmem:[#allocation119_spill] sm:$0xff]  ;;  %v30098_v42 = vld [vmem:[#allocation2_spill] sm:$0xff] }
 0xab3   :  { %30078 = vst [vmem:[#allocation140_spill] sm:$0xff] %v28144_v22 }
 0xaba   :  { %14044 = vadd.xlane.f32.xlu1 %v14043_v25 }
 0xabd   :  { %14047 = vadd.xlane.f32.xlu0 %v14046_v31  ;;  %v30091_v31 = vld [vmem:[#allocation92_spill] sm:$0xff] }
 0xacb   :  { %15481 = vrot.lane.b32.xlu1 %v30079_v20, %s24803_s30 }
 0xacf   :  { %15633 = vrot.lane.b32.xlu1 %v30080_v2, %s24803_s30 }
 0xad3   :  { %15709 = vrot.lane.b32.xlu1 %v30081_v52, %s24803_s30  ;;  %15557 = vrot.lane.b32.xlu0 %v30082_v0, %s24803_s30 }
 0xad7   :  { %15861 = vrot.lane.b32.xlu1 %v30083_v1, %s24803_s30  ;;  %15785 = vrot.lane.b32.xlu0 %v30084_v62, %s24803_s30 }
 0xadb   :  { %16013 = vrot.lane.b32.xlu1 %v30085_v49, %s24803_s30  ;;  %15937 = vrot.lane.b32.xlu0 %v30086_v36, %s24803_s30 }
 0xadd   :  { %v28176_v30 = vpop.xlane.xlu1 %14032 }
 0xade   :  { %24625 = vrcp.f32 %v28176_v30 }
 0xadf   :  { %16165 = vrot.lane.b32.xlu1 %v30087_v57, %s24803_s30  ;;  %16089 = vrot.lane.b32.xlu0 %v30088_v50, %s24803_s30 }
 0xae0   :  { %v28182_v14 = vpop.xlane.xlu0 %14035 }
 0xae1   :  { %v15178_v54 = vpop.permute.xlu1 %15177  ;;  %24627 = vrcp.f32 %v28182_v14 }
 0xae2   :  { %v14641_v19 = vpop.f32.mrb[214].mxu1  ;;  %23824 = vmatpush3.msra.mxu1 %v15178_v54  ;;  %v30094_v54 = vld [vmem:[#allocation25_spill] sm:$0xff] }
 0xae3   :  { %v28186_v25 = vadd.f32 %v14641_v19, %v30090_v53  ;;  %16317 = vrot.lane.b32.xlu1 %v30091_v31, %s24803_s30  ;;  %v23787_v22 = vpop.f32.mrb[215].mxu1  ;;  %23826 = vmatmul.mubr.msk.f32.vlgmr.msra.gmra.mrb[222].mxu1 %vm768_vm3, %v14078_v63  ;;  %v30100_v63 = vld [vmem:[#allocation6_spill] sm:$0xff]  ;;  %v30101_v53 = vld [vmem:[#allocation13_spill] sm:$0xff] }
 0xae4   :  { %16241 = vrot.lane.b32.xlu0 %v30092_v5, %s24803_s30  ;;  %v15254_v3 = vpop.permute.xlu0 %15253  ;;  %23833 = vmatprep.subr.mxu1 %v29743_v9  ;;  %v30095_v22 = vld [vmem:[#allocation96_spill] sm:$0xff] }
 0xae5   :  { %v14717_v40 = vpop.f32.mrb[214].mxu0  ;;  %23829 = vmatpush3.msra.mxu0 %v15254_v3  ;;  %23835 = vmatprep.mubr.msk.f32.mxu1 %vm24798_vm2, %v29743_v9  ;;  %v30097_v3 = vld [vmem:[#allocation5_spill] sm:$0xff] }
 0xae6   :  { %v28198_v24 = vadd.f32 %v14717_v40, %v30094_v54  ;;  %v23792_v19 = vpop.f32.mrb[215].mxu0  ;;  %23831 = vmatmul.mubr.msk.f32.vlgmr.msra.gmra.mrb[222].mxu0 %vm768_vm3, %v14080_v46  ;;  %23838 = vmatprep.subr.mxu0 %v29743_v9  ;;  %v30099_v46 = vld [vmem:[#allocation4_spill] sm:$0xff]  ;;  %v30102_v40 = vld [vmem:[#allocation9_spill] sm:$0xff] }
 0xae7   :  { %16469 = vrot.lane.b32.xlu1 %v30095_v22, %s24803_s30  ;;  %23840 = vmatprep.mubr.msk.f32.mxu0 %vm24798_vm2, %v29743_v9  ;;  %v30103_v54 = vld [vmem:[#allocation8_spill] sm:$0xff]  ;;  %v30104_v19 = vld [vmem:[#allocation10_spill] sm:$0xff] }
 0xae8   :  { %16393 = vrot.lane.b32.xlu0 %v30096_v7, %s24803_s30 }
 0xaeb   :  { %16657 = vrot.lane.b32.xlu1 %v30097_v3, %s24804_s6  ;;  %v30105_v3 = vld [vmem:[#allocation21_spill] sm:$0xff] }
 0xaec   :  { %16579 = vrot.lane.b32.xlu0 %v30098_v42, %s24804_s6  ;;  %v30106_v42 = vld [vmem:[#allocation17_spill] sm:$0xff] }
 0xaef   :  { %16655 = vrot.lane.b32.xlu1 %v30099_v46, %s24804_s6  ;;  %v30107_v46 = vld [vmem:[#allocation12_spill] sm:$0xff] }
 0xaf0   :  { %16577 = vrot.lane.b32.xlu0 %v30100_v63, %s24804_s6  ;;  %v30108_v63 = vld [vmem:[#allocation14_spill] sm:$0xff] }
 0xaf3   :  { %16813 = vrot.lane.b32.xlu1 %v30101_v53, %s24804_s6  ;;  %v30109_v53 = vld [vmem:[#allocation16_spill] sm:$0xff] }
 0xaf4   :  { %16735 = vrot.lane.b32.xlu0 %v30102_v40, %s24804_s6  ;;  %v30110_v40 = vld [vmem:[#allocation18_spill] sm:$0xff] }
 0xaf7   :  { %16811 = vrot.lane.b32.xlu1 %v30103_v54, %s24804_s6 }
 0xaf8   :  { %16733 = vrot.lane.b32.xlu0 %v30104_v19, %s24804_s6  ;;  %v24606_v19 = vpop.eup %24605 }
 0xaf9   :  { %v24608_v15 = vpop.eup %24607 }
 0xafb   :  { %16969 = vrot.lane.b32.xlu1 %v30105_v3, %s24804_s6 }
 0xafc   :  { %16891 = vrot.lane.b32.xlu0 %v30106_v42, %s24804_s6  ;;  %v30114_v42 = vld [vmem:[#allocation24_spill] sm:$0xff] }
 0xaff   :  { %16967 = vrot.lane.b32.xlu1 %v30107_v46, %s24804_s6 }
 0xb00   :  { %16889 = vrot.lane.b32.xlu0 %v30108_v63, %s24804_s6  ;;  %v30115_v63 = vld [vmem:[#allocation29_spill] sm:$0xff] }
 0xb03   :  { %17125 = vrot.lane.b32.xlu1 %v29891_v26, %s24804_s6  ;;  %v30111_v26 = vld [vmem:[#allocation20_spill] sm:$0xff] }
 0xb04   :  { %17047 = vrot.lane.b32.xlu0 %v29890_v58, %s24804_s6  ;;  %v30112_v58 = vld [vmem:[#allocation22_spill] sm:$0xff] }
 0xb07   :  { %17123 = vrot.lane.b32.xlu1 %v30109_v53, %s24804_s6 }
 0xb08   :  { %17045 = vrot.lane.b32.xlu0 %v30110_v40, %s24804_s6 }
 0xb0b   :  { %17281 = vrot.lane.b32.xlu1 %v29901_v38, %s24804_s6 }
 0xb0c   :  { %17203 = vrot.lane.b32.xlu0 %v29900_v23, %s24804_s6  ;;  %v30113_v23 = vld [vmem:[#allocation136_spill] sm:$0xff] }
 0xb0d   :  { %v14082_v3 = vmul.f32 %v24606_v19, %v30113_v23 }
 0xb0f   :  { %17279 = vrot.lane.b32.xlu1 %v30111_v26, %s24804_s6  ;;  %v30117_v26 = vld [vmem:[#allocation98_spill] sm:$0xff] }
 0xb10   :  { %17201 = vrot.lane.b32.xlu0 %v30112_v58, %s24804_s6  ;;  %v14084_v58 = vmul.f32 %v24608_v15, %v30117_v26  ;;  %v30119_v15 = vld [vmem:[#allocation28_spill] sm:$0xff] }
 0xb12   :  { %v28250_v54 = vpop.xlane.xlu1 %14038 }
 0xb13   :  { %17437 = vrot.lane.b32.xlu1 %v29911_v21, %s24804_s6  ;;  %v30116_v21 = vld [vmem:[#allocation26_spill] sm:$0xff]  ;;  %24629 = vrcp.f32 %v28250_v54 }
 0xb14   :  { %17359 = vrot.lane.b32.xlu0 %v29910_v61, %s24804_s6 }
 0xb15   :  { %v28256_v38 = vpop.xlane.xlu0 %14041 }
 0xb16   :  { %v15330_v34 = vpop.permute.xlu1 %15329  ;;  %24631 = vrcp.f32 %v28256_v38 }
 0xb17   :  { %17435 = vrot.lane.b32.xlu1 %v30114_v42, %s24804_s6  ;;  %v14793_v46 = vpop.f32.mrb[216].mxu1  ;;  %23834 = vmatpush3.msra.mxu1 %v15330_v34  ;;  %v30118_v34 = vld [vmem:[#allocation149_spill] sm:$0xff]  ;;  %v30120_v42 = vld [vmem:[#allocation30_spill] sm:$0xff] }
 0xb18   :  { %v28262_v53 = vadd.f32 %v14793_v46, %v30115_v63  ;;  %v23797_v40 = vpop.f32.mrb[217].mxu1  ;;  %23836 = vmatmul.mubr.msk.f32.vlgmr.msra.gmra.mrb[224].mxu1 %vm768_vm3, %v14082_v3  ;;  %17357 = vrot.lane.b32.xlu0 %v30116_v21, %s24804_s6  ;;  %v30123_v46 = vld [vmem:[#allocation36_spill] sm:$0xff] }
 0xb19   :  { %v15406_v61 = vpop.permute.xlu0 %15405  ;;  %23843 = vmatprep.subr.mxu1 %v29743_v9  ;;  %23845 = vmatprep.mubr.msk.f32.mxu1 %vm24798_vm2, %v29743_v9  ;;  %v30131_v63 = vld [vmem:[#allocation120_spill] sm:$0xff] }
 0xb1a   :  { %v14869_v19 = vpop.f32.mrb[216].mxu0  ;;  %23839 = vmatpush3.msra.mxu0 %v15406_v61 }
 0xb1b   :  { %17593 = vrot.lane.b32.xlu1 %v29922_v35, %s24804_s6  ;;  %v28274_v23 = vadd.f32 %v14869_v19, %v30118_v34  ;;  %v23802_v3 = vpop.f32.mrb[217].mxu0  ;;  %23841 = vmatmul.mubr.msk.f32.vlgmr.msra.gmra.mrb[224].mxu0 %vm768_vm3, %v14084_v58  ;;  %v30121_v35 = vld [vmem:[#allocation32_spill] sm:$0xff]  ;;  %v30133_v58 = vld [vmem:[#allocation54_spill] sm:$0xff] }
 0xb1c   :  { %17515 = vrot.lane.b32.xlu0 %v29921_v48, %s24804_s6  ;;  %23848 = vmatprep.subr.mxu0 %v29743_v9  ;;  %v30122_v48 = vld [vmem:[#allocation34_spill] sm:$0xff] }
 0xb1d   :  { %23850 = vmatprep.mubr.msk.f32.mxu0 %vm24798_vm2, %v29743_v9  ;;  %v30134_v19 = vld [vmem:[#allocation150_spill] sm:$0xff] }
 0xb1f   :  { %17591 = vrot.lane.b32.xlu1 %v30119_v15, %s24804_s6 }
 0xb20   :  { %17513 = vrot.lane.b32.xlu0 %v30120_v42, %s24804_s6 }
 0xb23   :  { %17749 = vrot.lane.b32.xlu1 %v29930_v37, %s24804_s6  ;;  %v30124_v37 = vld [vmem:[#allocation38_spill] sm:$0xff] }
 0xb24   :  { %17671 = vrot.lane.b32.xlu0 %v29929_v10, %s24804_s6  ;;  %v30125_v10 = vld [vmem:[#allocation40_spill] sm:$0xff] }
 0xb27   :  { %17747 = vrot.lane.b32.xlu1 %v30121_v35, %s24804_s6  ;;  %v30135_v35 = vld [vmem:[#allocation56_spill] sm:$0xff] }
 0xb28   :  { %17669 = vrot.lane.b32.xlu0 %v30122_v48, %s24804_s6 }
 0xb2b   :  { %17905 = vrot.lane.b32.xlu1 %v30068_v47, %s24804_s6  ;;  %v30126_v47 = vld [vmem:[#allocation42_spill] sm:$0xff] }
 0xb2c   :  { %17827 = vrot.lane.b32.xlu0 %v30067_v60, %s24804_s6  ;;  %v30127_v60 = vld [vmem:[#allocation44_spill] sm:$0xff] }
 0xb2f   :  { %17903 = vrot.lane.b32.xlu1 %v30123_v46, %s24804_s6 }
 0xb30   :  { %17825 = vrot.lane.b32.xlu0 %v30124_v37, %s24804_s6 }
 0xb33   :  { %18061 = vrot.lane.b32.xlu1 %v30082_v0, %s24804_s6  ;;  %v30128_v0 = vld [vmem:[#allocation46_spill] sm:$0xff] }
 0xb34   :  { %17983 = vrot.lane.b32.xlu0 %v30079_v20, %s24804_s6 }
 0xb37   :  { %18059 = vrot.lane.b32.xlu1 %v30125_v10, %s24804_s6 }
 0xb38   :  { %17981 = vrot.lane.b32.xlu0 %v30126_v47, %s24804_s6 }
 0xb3b   :  { %18217 = vrot.lane.b32.xlu1 %v30081_v52, %s24804_s6 }
 0xb3c   :  { %18139 = vrot.lane.b32.xlu0 %v30080_v2, %s24804_s6  ;;  %v24610_v2 = vpop.eup %24609 }
 0xb3d   :  { %v24612_v52 = vpop.eup %24611  ;;  %v14086_v41 = vmul.f32 %v24610_v2, %v27942_v13  ;;  %v30132_v13 = vld [vmem:[#allocation52_spill] sm:$0xff] }
 0xb3f   :  { %18215 = vrot.lane.b32.xlu1 %v30127_v60, %s24804_s6 }
 0xb40   :  { %18137 = vrot.lane.b32.xlu0 %v30128_v0, %s24804_s6 }
 0xb43   :  { %18373 = vrot.lane.b32.xlu1 %v30083_v1, %s24804_s6  ;;  %v24614_v1 = vpop.eup %24613 }
 0xb44   :  { %18295 = vrot.lane.b32.xlu0 %v30084_v62, %s24804_s6  ;;  %v14090_v61 = vmul.f32 %v24614_v1, %v27972_v29  ;;  %v24616_v26 = vpop.eup %24615 }
 0xb45   :  { %v24618_v15 = vpop.eup %24617  ;;  %v14092_v33 = vmul.f32 %v24616_v26, %v27974_v39  ;;  %v30141_v26 = vld [vmem:[#allocation121_spill] sm:$0xff] }
 0xb46   :  { %v14094_v30 = vmul.f32 %v24618_v15, %v28004_v4  ;;  %v24620_v42 = vpop.eup %24619  ;;  %v30136_v4 = vld [vmem:[#allocation58_spill] sm:$0xff] }
 0xb47   :  { %18371 = vrot.lane.b32.xlu1 %v30129_v12, %s24804_s6  ;;  %v28329_v20 = vpop.xlane.xlu1 %14044  ;;  %v14096_v14 = vmul.f32 %v24620_v42, %v28006_v51 }
 0xb48   :  { %18293 = vrot.lane.b32.xlu0 %v30130_v59, %s24804_s6  ;;  %24633 = vrcp.f32 %v28329_v20 }
 0xb4a   :  { %v28333_v8 = vpop.xlane.xlu0 %14047 }
 0xb4b   :  { %18529 = vrot.lane.b32.xlu1 %v30085_v49, %s24804_s6  ;;  %v15482_v44 = vpop.permute.xlu1 %15481  ;;  %24635 = vrcp.f32 %v28333_v8 }
 0xb4c   :  { %v14945_v62 = vpop.f32.mrb[218].mxu1  ;;  %23844 = vmatpush3.msra.mxu1 %v15482_v44  ;;  %18451 = vrot.lane.b32.xlu0 %v30086_v36, %s24804_s6  ;;  %v14088_v36 = vmul.f32 %v24612_v52, %v27944_v17 }
 0xb4d   :  { %v28343_v40 = vadd.f32 %v14945_v62, %v30131_v63  ;;  %v23807_v21 = vpop.f32.mrb[219].mxu1  ;;  %23846 = vmatmul.mubr.msk.f32.vlgmr.msra.gmra.mrb[226].mxu1 %vm768_vm3, %v14086_v41  ;;  %23853 = vmatprep.subr.mxu1 %v29743_v9 }
 0xb4e   :  { %v15558_v32 = vpop.permute.xlu0 %15557  ;;  %23855 = vmatprep.mubr.msk.f32.mxu1 %vm24798_vm2, %v29743_v9 }
 0xb4f   :  { %18527 = vrot.lane.b32.xlu1 %v30132_v13, %s24804_s6  ;;  %v15634_v16 = vpop.permute.xlu1 %15633  ;;  %v15021_v49 = vpop.f32.mrb[218].mxu0  ;;  %23849 = vmatpush3.msra.mxu0 %v15558_v32 }
 0xb50   :  { %23854 = vmatpush3.msra.mxu1 %v15634_v16  ;;  %18449 = vrot.lane.b32.xlu0 %v30133_v58, %s24804_s6  ;;  %v28357_v34 = vadd.f32 %v15021_v49, %v30134_v19  ;;  %v23812_v3 = vpop.f32.mrb[219].mxu0 }
 0xb51   :  { %23851 = vmatmul.mubr.msk.f32.vlgmr.msra.gmra.mrb[226].mxu0 %vm768_vm3, %v14088_v36  ;;  %23856 = vmatmul.mubr.msk.f32.vlgmr.msra.gmra.mrb[228].mxu1 %vm768_vm3, %v14090_v61 }
 0xb52   :  { %23863 = vmatprep.subr.mxu1 %v29743_v9  ;;  %23858 = vmatprep.subr.mxu0 %v29743_v9  ;;  %v15786_v17 = vpop.permute.xlu0 %15785 }
 0xb53   :  { %18685 = vrot.lane.b32.xlu1 %v30087_v57, %s24804_s6  ;;  %v15710_v29 = vpop.permute.xlu1 %15709  ;;  %23865 = vmatprep.mubr.msk.f32.mxu1 %vm24798_vm2, %v29743_v9  ;;  %v24622_v57 = vpop.eup %24621 }
 0xb54   :  { %18607 = vrot.lane.b32.xlu0 %v30088_v50, %s24804_s6  ;;  %23859 = vmatpush3.msra.mxu0 %v15710_v29  ;;  %v14098_v54 = vmul.f32 %v24622_v57, %v28036_v6  ;;  %v24624_v48 = vpop.eup %24623  ;;  %v30142_v29 = vld [vmem:[#allocation33_spill] sm:$0xff] }
 0xb55   :  { %23860 = vmatprep.mubr.msk.f32.mxu0 %vm24798_vm2, %v29743_v9  ;;  %23864 = vmatpush3.msra.mxu1 %v15786_v17  ;;  %v24626_v37 = vpop.eup %24625  ;;  %v14100_v51 = vmul.f32 %v24624_v48, %v28038_v56  ;;  %v30138_v56 = vld [vmem:[#allocation62_spill] sm:$0xff] }
 0xb56   :  { %23861 = vmatmul.mubr.msk.f32.vlgmr.msra.gmra.mrb[228].mxu0 %vm768_vm3, %v14092_v33  ;;  %23866 = vmatmul.mubr.msk.f32.vlgmr.msra.gmra.mrb[230].mxu1 %vm768_vm3, %v14094_v30  ;;  %v15938_v50 = vpop.permute.xlu0 %15937  ;;  %v14102_v6 = vmul.f32 %v24626_v37, %v28074_v18  ;;  %v24628_v47 = vpop.eup %24627 }
 0xb57   :  { %18683 = vrot.lane.b32.xlu1 %v30135_v35, %s24804_s6  ;;  %v15862_v39 = vpop.permute.xlu1 %15861  ;;  %23868 = vmatprep.subr.mxu0 %v29743_v9  ;;  %v24630_v60 = vpop.eup %24629  ;;  %v14104_v0 = vmul.f32 %v24628_v47, %v28076_v43 }
 0xb58   :  { %23873 = vmatprep.subr.mxu1 %v29743_v9  ;;  %18605 = vrot.lane.b32.xlu0 %v30136_v4, %s24804_s6  ;;  %v14106_v12 = vmul.f32 %v24630_v60, %v28112_v28  ;;  %v24632_v2 = vpop.eup %24631 }
 0xb59   :  { %23869 = vmatpush3.msra.mxu0 %v15862_v39  ;;  %23870 = vmatprep.mubr.msk.f32.mxu0 %vm24798_vm2, %v29743_v9  ;;  %v24634_v59 = vpop.eup %24633  ;;  %v14108_v28 = vmul.f32 %v24632_v2, %v28114_v11  ;;  %v30140_v11 = vld [vmem:[#allocation66_spill] sm:$0xff] }
 0xb5a   :  { %23874 = vmatpush3.msra.mxu1 %v15938_v50  ;;  %23875 = vmatprep.mubr.msk.f32.mxu1 %vm24798_vm2, %v29743_v9  ;;  %v16090_v46 = vpop.permute.xlu0 %16089  ;;  %v14110_v52 = vmul.f32 %v24634_v59, %v28150_v45  ;;  %v24636_v44 = vpop.eup %24635 }
 0xb5b   :  { %23871 = vmatmul.mubr.msk.f32.vlgmr.msra.gmra.mrb[230].mxu0 %vm768_vm3, %v14096_v14  ;;  %23876 = vmatmul.mubr.msk.f32.vlgmr.msra.gmra.mrb[232].mxu1 %vm768_vm3, %v14098_v54  ;;  %v16014_v10 = vpop.permute.xlu1 %16013  ;;  %v14112_v45 = vmul.f32 %v24636_v44, %v28152_v27 }
 0xb5c   :  { %18841 = vrot.lane.b32.xlu1 %v30091_v31, %s24804_s6  ;;  %23878 = vmatprep.subr.mxu0 %v29743_v9 }
 0xb5d   :  { %23883 = vmatprep.subr.mxu1 %v29743_v9  ;;  %18763 = vrot.lane.b32.xlu0 %v30092_v5, %s24804_s6  ;;  %v30137_v5 = vld [vmem:[#allocation60_spill] sm:$0xff] }
 0xb5e   :  { %23879 = vmatpush3.msra.mxu0 %v16014_v10  ;;  %23880 = vmatprep.mubr.msk.f32.mxu0 %vm24798_vm2, %v29743_v9  ;;  %v16242_v38 = vpop.permute.xlu0 %16241 }
 0xb5f   :  { %23884 = vmatpush3.msra.mxu1 %v16090_v46  ;;  %23885 = vmatprep.mubr.msk.f32.mxu1 %vm24798_vm2, %v29743_v9  ;;  %v16166_v31 = vpop.permute.xlu1 %16165 }
 0xb60   :  { %23881 = vmatmul.mubr.msk.f32.vlgmr.msra.gmra.mrb[232].mxu0 %vm768_vm3, %v14100_v51  ;;  %23886 = vmatmul.mubr.msk.f32.vlgmr.msra.gmra.mrb[234].mxu1 %vm768_vm3, %v14102_v6 }
 0xb61   :  { %18839 = vrot.lane.b32.xlu1 %v30137_v5, %s24804_s6  ;;  %23888 = vmatprep.subr.mxu0 %v29743_v9 }
 0xb62   :  { %23893 = vmatprep.subr.mxu1 %v29743_v9  ;;  %18761 = vrot.lane.b32.xlu0 %v30138_v56, %s24804_s6  ;;  %v16394_v18 = vpop.permute.xlu0 %16393 }
 0xb63   :  { %23889 = vmatpush3.msra.mxu0 %v16166_v31  ;;  %23890 = vmatprep.mubr.msk.f32.mxu0 %vm24798_vm2, %v29743_v9  ;;  %v16318_v20 = vpop.permute.xlu1 %16317 }
 0xb64   :  { %23894 = vmatpush3.msra.mxu1 %v16242_v38  ;;  %23895 = vmatprep.mubr.msk.f32.mxu1 %vm24798_vm2, %v29743_v9 }
 0xb65   :  { %23891 = vmatmul.mubr.msk.f32.vlgmr.msra.gmra.mrb[234].mxu0 %vm768_vm3, %v14104_v0  ;;  %23896 = vmatmul.mubr.msk.f32.vlgmr.msra.gmra.mrb[236].mxu1 %vm768_vm3, %v14106_v12 }
 0xb66   :  { %18997 = vrot.lane.b32.xlu1 %v30095_v22, %s24804_s6  ;;  %23898 = vmatprep.subr.mxu0 %v29743_v9  ;;  %v16580_v8 = vpop.permute.xlu0 %16579 }
 0xb67   :  { %23903 = vmatprep.subr.mxu1 %v29743_v9  ;;  %18919 = vrot.lane.b32.xlu0 %v30096_v7, %s24804_s6  ;;  %v16470_v43 = vpop.permute.xlu1 %16469  ;;  %v30139_v7 = vld [vmem:[#allocation64_spill] sm:$0xff] }
 0xb68   :  { %23899 = vmatpush3.msra.mxu0 %v16318_v20  ;;  %23900 = vmatprep.mubr.msk.f32.mxu0 %vm24798_vm2, %v29743_v9 }
 0xb69   :  { %23904 = vmatpush3.msra.mxu1 %v16394_v18  ;;  %23905 = vmatprep.mubr.msk.f32.mxu1 %vm24798_vm2, %v29743_v9 }
 0xb6a   :  { %23901 = vmatmul.mubr.msk.f32.vlgmr.msra.gmra.mrb[236].mxu0 %vm768_vm3, %v14108_v28  ;;  %23906 = vmatmul.mubr.msk.f32.vlgmr.msra.gmra.mrb[238].mxu1 %vm768_vm3, %v14110_v52  ;;  %v16578_v22 = vpop.permute.xlu0 %16577 }
 0xb6b   :  { %18995 = vrot.lane.b32.xlu1 %v30139_v7, %s24804_s6  ;;  %23908 = vmatprep.subr.mxu0 %v29743_v9  ;;  %v16658_v41 = vpop.permute.xlu1 %16657 }
 0xb6c   :  { %18917 = vrot.lane.b32.xlu0 %v30140_v11, %s24804_s6  ;;  %23909 = vmatpush3.msra.mxu0 %v16470_v43 }
 0xb6d   :  { %23910 = vmatprep.mubr.msk.f32.mxu0 %vm24798_vm2, %v29743_v9  ;;  %23913 = vmatprep.subr.mxu1 %v29743_v9 }
 0xb6e   :  { %23911 = vmatmul.mubr.msk.f32.vlgmr.msra.gmra.mrb[238].mxu0 %vm768_vm3, %v14112_v45  ;;  %23915 = vmatprep.mubr.msk.f32.mxu1 %vm24798_vm2, %v29743_v9  ;;  %v16736_v1 = vpop.permute.xlu0 %16735 }
 0xb6f   :  { %23918 = vmatprep.subr.mxu0 %v29743_v9  ;;  %v16656_v62 = vpop.permute.xlu1 %16655  ;;  %23920 = vmatprep.mubr.msk.f32.mxu0 %vm24798_vm2, %v29743_v9 }
 0xb70   :  { %23914 = vmatpush3.xpose.msk.msra.mxu1 %vm768_vm3, %v16580_v8  ;;  %v30143_v8 = vld [vmem:[#allocation37_spill] sm:$0xff] }
 0xb71   :  { %23923 = vmatprep.subr.mxu1 %v29743_v9 }
 0xb72   :  { %v16734_v27 = vpop.permute.xlu0 %16733 }
 0xb73   :  { %23916 = vmatmul.mubr.msk.f32.vlgmr.msra.gmra.mrb[240].mxu1 %vm768_vm3, %v16578_v22  ;;  %23919 = vmatpush3.xpose.msk.msra.mxu0 %vm768_vm3, %v16658_v41  ;;  %v16814_v63 = vpop.permute.xlu1 %16813  ;;  %v30144_v22 = vld [vmem:[#allocation151_spill] sm:$0xff] }
 0xb74   :  { %23924 = vmatpush3.xpose.msk.msra.mxu1 %vm768_vm3, %v16736_v1  ;;  %23925 = vmatprep.mubr.msk.f32.mxu1 %vm24798_vm2, %v29743_v9 }
 0xb75   :  { %23928 = vmatprep.subr.mxu0 %v29743_v9  ;;  %23933 = vmatprep.subr.mxu1 %v29743_v9 }
 0xb76   :  { %23921 = vmatmul.mubr.msk.f32.vlgmr.msra.gmra.mrb[240].mxu0 %vm768_vm3, %v16656_v62  ;;  %v16892_v21 = vpop.permute.xlu0 %16891 }
 0xb77   :  { %23926 = vmatmul.mubr.msk.f32.vlgmr.msra.gmra.mrb[242].mxu1 %vm768_vm3, %v16734_v27  ;;  %23929 = vmatpush3.xpose.msk.msra.mxu0 %vm768_vm3, %v16814_v63  ;;  %v16812_v32 = vpop.permute.xlu1 %16811 }
 0xb78   :  { %23930 = vmatprep.mubr.msk.f32.mxu0 %vm24798_vm2, %v29743_v9  ;;  %23934 = vmatpush3.xpose.msk.msra.mxu1 %vm768_vm3, %v16892_v21 }
 0xb79   :  { %23935 = vmatprep.mubr.msk.f32.mxu1 %vm24798_vm2, %v29743_v9  ;;  %23938 = vmatprep.subr.mxu0 %v29743_v9 }
 0xb7a   :  { %23931 = vmatmul.mubr.msk.f32.vlgmr.msra.gmra.mrb[242].mxu0 %vm768_vm3, %v16812_v32  ;;  %v16890_v13 = vpop.permute.xlu0 %16889  ;;  %23943 = vmatprep.subr.mxu1 %v29743_v9 }
 0xb7b   :  { %v16970_v16 = vpop.permute.xlu1 %16969  ;;  %23936 = vmatmul.mubr.msk.f32.vlgmr.msra.gmra.mrb[244].mxu1 %vm768_vm3, %v16890_v13  ;;  %23940 = vmatprep.mubr.msk.f32.mxu0 %vm24798_vm2, %v29743_v9 }
 0xb7c   :  { %23939 = vmatpush3.xpose.msk.msra.mxu0 %vm768_vm3, %v16970_v16  ;;  %23945 = vmatprep.mubr.msk.f32.mxu1 %vm24798_vm2, %v29743_v9 }
 0xb7d   :  { %23948 = vmatprep.subr.mxu0 %v29743_v9 }
 0xb7e   :  { %v17048_v49 = vpop.permute.xlu0 %17047 }
 0xb7f   :  { %v16968_v36 = vpop.permute.xlu1 %16967  ;;  %23944 = vmatpush3.xpose.msk.msra.mxu1 %vm768_vm3, %v17048_v49 }
 0xb80   :  { %23941 = vmatmul.mubr.msk.f32.vlgmr.msra.gmra.mrb[244].mxu0 %vm768_vm3, %v16968_v36  ;;  %23953 = vmatprep.subr.mxu1 %v29743_v9 }
 0xb81   :  { %v15097_v61 = vpop.f32.mrb[220].mxu1  ;;  %23950 = vmatprep.mubr.msk.f32.mxu0 %vm24798_vm2, %v29743_v9 }
 0xb82   :  { %v28485_v58 = vadd.f32 %v15097_v61, %v30141_v26  ;;  %v23817_v19 = vpop.f32.mrb[221].mxu1  ;;  %v17046_v3 = vpop.permute.xlu0 %17045 }
 0xb83   :  { %v17126_v15 = vpop.permute.xlu1 %17125  ;;  %23946 = vmatmul.mubr.msk.f32.vlgmr.msra.gmra.mrb[246].mxu1 %vm768_vm3, %v17046_v3 }
 0xb84   :  { %23949 = vmatpush3.xpose.msk.msra.mxu0 %vm768_vm3, %v17126_v15  ;;  %v15173_v17 = vpop.f32.mrb[220].mxu0  ;;  %23955 = vmatprep.mubr.msk.f32.mxu1 %vm24798_vm2, %v29743_v9 }
 0xb85   :  { %v28492_v33 = vadd.f32 %v15173_v17, %v30142_v29  ;;  %v23822_v30 = vpop.f32.mrb[221].mxu0  ;;  %23958 = vmatprep.subr.mxu0 %v29743_v9 }
 0xb86   :  { %v17204_v42 = vpop.permute.xlu0 %17203 }
 0xb87   :  { %v17124_v57 = vpop.permute.xlu1 %17123  ;;  %23954 = vmatpush3.xpose.msk.msra.mxu1 %vm768_vm3, %v17204_v42 }
 0xb88   :  { %23951 = vmatmul.mubr.msk.f32.vlgmr.msra.gmra.mrb[246].mxu0 %vm768_vm3, %v17124_v57  ;;  %23963 = vmatprep.subr.mxu1 %v29743_v9 }
 0xb89   :  { %23960 = vmatprep.mubr.msk.f32.mxu0 %vm24798_vm2, %v29743_v9 }
 0xb8a   :  { %v17202_v50 = vpop.permute.xlu0 %17201 }
 0xb8b   :  { %v17282_v35 = vpop.permute.xlu1 %17281  ;;  %23956 = vmatmul.mubr.msk.f32.vlgmr.msra.gmra.mrb[248].mxu1 %vm768_vm3, %v17202_v50  ;;  %v30145_v50 = vld [vmem:[#allocation3_spill] sm:$0xff] }
 0xb8c   :  { %23959 = vmatpush3.xpose.msk.msra.mxu0 %vm768_vm3, %v17282_v35  ;;  %23965 = vmatprep.mubr.msk.f32.mxu1 %vm24798_vm2, %v29743_v9 }
 0xb8d   :  { %23968 = vmatprep.subr.mxu0 %v29743_v9 }
 0xb8e   :  { %v17360_v39 = vpop.permute.xlu0 %17359 }
 0xb8f   :  { %v17280_v4 = vpop.permute.xlu1 %17279  ;;  %23964 = vmatpush3.xpose.msk.msra.mxu1 %vm768_vm3, %v17360_v39  ;;  %v30146_v39 = vld [vmem:[#allocation7_spill] sm:$0xff] }
 0xb90   :  { %23961 = vmatmul.mubr.msk.f32.vlgmr.msra.gmra.mrb[248].mxu0 %vm768_vm3, %v17280_v4  ;;  %23973 = vmatprep.subr.mxu1 %v29743_v9 }
 0xb91   :  { %23970 = vmatprep.mubr.msk.f32.mxu0 %vm24798_vm2, %v29743_v9 }
 0xb92   :  { %v17358_v14 = vpop.permute.xlu0 %17357 }
 0xb93   :  { %v17438_v54 = vpop.permute.xlu1 %17437  ;;  %23966 = vmatmul.mubr.msk.f32.vlgmr.msra.gmra.mrb[250].mxu1 %vm768_vm3, %v17358_v14  ;;  %v30147_v14 = vld [vmem:[#allocation122_spill] sm:$0xff] }
 0xb94   :  { %23969 = vmatpush3.xpose.msk.msra.mxu0 %vm768_vm3, %v17438_v54  ;;  %23975 = vmatprep.mubr.msk.f32.mxu1 %vm24798_vm2, %v29743_v9 }
 0xb95   :  { %23978 = vmatprep.subr.mxu0 %v29743_v9 }
 0xb96   :  { %v17516_v48 = vpop.permute.xlu0 %17515 }
 0xb97   :  { %v17436_v46 = vpop.permute.xlu1 %17435  ;;  %23974 = vmatpush3.xpose.msk.msra.mxu1 %vm768_vm3, %v17516_v48 }
 0xb98   :  { %23971 = vmatmul.mubr.msk.f32.vlgmr.msra.gmra.mrb[250].mxu0 %vm768_vm3, %v17436_v46  ;;  %23983 = vmatprep.subr.mxu1 %v29743_v9 }
 0xb99   :  { %23980 = vmatprep.mubr.msk.f32.mxu0 %vm24798_vm2, %v29743_v9 }
 0xb9a   :  { %v17514_v37 = vpop.permute.xlu0 %17513 }
 0xb9b   :  { %v17594_v10 = vpop.permute.xlu1 %17593  ;;  %23976 = vmatmul.mubr.msk.f32.vlgmr.msra.gmra.mrb[252].mxu1 %vm768_vm3, %v17514_v37  ;;  %v30148_v37 = vld [vmem:[#allocation152_spill] sm:$0xff] }
 0xb9c   :  { %23979 = vmatpush3.xpose.msk.msra.mxu0 %vm768_vm3, %v17594_v10  ;;  %23985 = vmatprep.mubr.msk.f32.mxu1 %vm24798_vm2, %v29743_v9 }
 0xb9d   :  { %23988 = vmatprep.subr.mxu0 %v29743_v9 }
 0xb9e   :  { %v17672_v51 = vpop.permute.xlu0 %17671 }
 0xb9f   :  { %v17592_v6 = vpop.permute.xlu1 %17591  ;;  %23984 = vmatpush3.xpose.msk.msra.mxu1 %vm768_vm3, %v17672_v51 }
 0xba0   :  { %23981 = vmatmul.mubr.msk.f32.vlgmr.msra.gmra.mrb[252].mxu0 %vm768_vm3, %v17592_v6  ;;  %23993 = vmatprep.subr.mxu1 %v29743_v9 }
 0xba1   :  { %23990 = vmatprep.mubr.msk.f32.mxu0 %vm24798_vm2, %v29743_v9 }
 0xba2   :  { %v17670_v38 = vpop.permute.xlu0 %17669 }
 0xba3   :  { %v17750_v47 = vpop.permute.xlu1 %17749  ;;  %23986 = vmatmul.mubr.msk.f32.vlgmr.msra.gmra.mrb[254].mxu1 %vm768_vm3, %v17670_v38  ;;  %v30149_v38 = vld [vmem:[#allocation123_spill] sm:$0xff] }
 0xba4   :  { %23989 = vmatpush3.xpose.msk.msra.mxu0 %vm768_vm3, %v17750_v47  ;;  %23995 = vmatprep.mubr.msk.f32.mxu1 %vm24798_vm2, %v29743_v9 }
 0xba5   :  { %23998 = vmatprep.subr.mxu0 %v29743_v9 }
 0xba6   :  { %v17828_v31 = vpop.permute.xlu0 %17827 }
 0xba7   :  { %v17748_v60 = vpop.permute.xlu1 %17747  ;;  %23994 = vmatpush3.xpose.msk.msra.mxu1 %vm768_vm3, %v17828_v31 }
 0xba8   :  { %23991 = vmatmul.mubr.msk.f32.vlgmr.msra.gmra.mrb[254].mxu0 %vm768_vm3, %v17748_v60  ;;  %24003 = vmatprep.subr.mxu1 %v29743_v9 }
 0xba9   :  { %24000 = vmatprep.mubr.msk.f32.mxu0 %vm24798_vm2, %v29743_v9 }
 0xbaa   :  { %v17826_v5 = vpop.permute.xlu0 %17825 }
 0xbab   :  { %v17906_v56 = vpop.permute.xlu1 %17905  ;;  %23996 = vmatmul.mubr.msk.f32.vlgmr.msra.gmra.mrb[0].mxu1 %vm768_vm3, %v17826_v5 }
 0xbac   :  { %23999 = vmatpush3.xpose.msk.msra.mxu0 %vm768_vm3, %v17906_v56  ;;  %24005 = vmatprep.mubr.msk.f32.mxu1 %vm24798_vm2, %v29743_v9  ;;  %v30150_v56 = vld [vmem:[#allocation41_spill] sm:$0xff] }
 0xbad   :  { %24008 = vmatprep.subr.mxu0 %v29743_v9 }
 0xbae   :  { %v17984_v18 = vpop.permute.xlu0 %17983 }
 0xbaf   :  { %v17904_v0 = vpop.permute.xlu1 %17903  ;;  %24004 = vmatpush3.xpose.msk.msra.mxu1 %vm768_vm3, %v17984_v18 }
 0xbb0   :  { %24001 = vmatmul.mubr.msk.f32.vlgmr.msra.gmra.mrb[0].mxu0 %vm768_vm3, %v17904_v0  ;;  %24013 = vmatprep.subr.mxu1 %v29743_v9  ;;  %v30151_v0 = vld [vmem:[#allocation45_spill] sm:$0xff] }
 0xbb1   :  { %24010 = vmatprep.mubr.msk.f32.mxu0 %vm24798_vm2, %v29743_v9 }
 0xbb2   :  { %v17982_v12 = vpop.permute.xlu0 %17981 }
 0xbb3   :  { %v18062_v20 = vpop.permute.xlu1 %18061  ;;  %24006 = vmatmul.mubr.msk.f32.vlgmr.msra.gmra.mrb[2].mxu1 %vm768_vm3, %v17982_v12 }
 0xbb4   :  { %24009 = vmatpush3.xpose.msk.msra.mxu0 %vm768_vm3, %v18062_v20  ;;  %24015 = vmatprep.mubr.msk.f32.mxu1 %vm24798_vm2, %v29743_v9 }
 0xbb5   :  { %24018 = vmatprep.subr.mxu0 %v29743_v9 }
 0xbb6   :  { %v15249_v2 = vpop.f32.mrb[222].mxu1  ;;  %v18140_v59 = vpop.permute.xlu0 %18139 }
 0xbb7   :  { %v28556_v43 = vadd.f32 %v15249_v2, %v30143_v8  ;;  %v23827_v28 = vpop.f32.mrb[223].mxu1  ;;  %v18060_v52 = vpop.permute.xlu1 %18059  ;;  %24014 = vmatpush3.xpose.msk.msra.mxu1 %vm768_vm3, %v18140_v59 }
 0xbb8   :  { %24011 = vmatmul.mubr.msk.f32.vlgmr.msra.gmra.mrb[2].mxu0 %vm768_vm3, %v18060_v52  ;;  %24023 = vmatprep.subr.mxu1 %v29743_v9  ;;  %v30152_v28 = vld [vmem:[#allocation153_spill] sm:$0xff] }
 0xbb9   :  { %v15325_v44 = vpop.f32.mrb[222].mxu0  ;;  %24020 = vmatprep.mubr.msk.f32.mxu0 %vm24798_vm2, %v29743_v9 }
 0xbba   :  { %v28564_v7 = vadd.f32 %v15325_v44, %v30144_v22  ;;  %v18138_v41 = vpop.permute.xlu0 %18137  ;;  %v23832_v11 = vpop.f32.mrb[223].mxu0  ;;  %v30153_v44 = vld [vmem:[#allocation124_spill] sm:$0xff] }
 0xbbb   :  { %v18218_v45 = vpop.permute.xlu1 %18217  ;;  %24016 = vmatmul.mubr.msk.f32.vlgmr.msra.gmra.mrb[4].mxu1 %vm768_vm3, %v18138_v41 }
 0xbbc   :  { %24019 = vmatpush3.xpose.msk.msra.mxu0 %vm768_vm3, %v18218_v45  ;;  %24025 = vmatprep.mubr.msk.f32.mxu1 %vm24798_vm2, %v29743_v9 }
 0xbbd   :  { %24028 = vmatprep.subr.mxu0 %v29743_v9 }
 0xbbe   :  { %v18296_v1 = vpop.permute.xlu0 %18295 }
 0xbbf   :  { %v18216_v62 = vpop.permute.xlu1 %18215  ;;  %24024 = vmatpush3.xpose.msk.msra.mxu1 %vm768_vm3, %v18296_v1 }
 0xbc0   :  { %24021 = vmatmul.mubr.msk.f32.vlgmr.msra.gmra.mrb[4].mxu0 %vm768_vm3, %v18216_v62  ;;  %24033 = vmatprep.subr.mxu1 %v29743_v9  ;;  %v30155_v62 = vld [vmem:[#allocation154_spill] sm:$0xff] }
 0xbc1   :  { %24030 = vmatprep.mubr.msk.f32.mxu0 %vm24798_vm2, %v29743_v9 }
 0xbc2   :  { %v18294_v27 = vpop.permute.xlu0 %18293 }
 0xbc3   :  { %v18374_v63 = vpop.permute.xlu1 %18373  ;;  %24026 = vmatmul.mubr.msk.f32.vlgmr.msra.gmra.mrb[6].mxu1 %vm768_vm3, %v18294_v27 }
 0xbc4   :  { %24029 = vmatpush3.xpose.msk.msra.mxu0 %vm768_vm3, %v18374_v63  ;;  %24035 = vmatprep.mubr.msk.f32.mxu1 %vm24798_vm2, %v29743_v9  ;;  %v30157_v63 = vld [vmem:[#allocation125_spill] sm:$0xff] }
 0xbc5   :  { %24038 = vmatprep.subr.mxu0 %v29743_v9 }
 0xbc6   :  { %v18452_v21 = vpop.permute.xlu0 %18451 }
 0xbc7   :  { %v18372_v32 = vpop.permute.xlu1 %18371  ;;  %24034 = vmatpush3.xpose.msk.msra.mxu1 %vm768_vm3, %v18452_v21 }
 0xbc8   :  { %24031 = vmatmul.mubr.msk.f32.vlgmr.msra.gmra.mrb[6].mxu0 %vm768_vm3, %v18372_v32  ;;  %24043 = vmatprep.subr.mxu1 %v29743_v9 }
 0xbc9   :  { %24040 = vmatprep.mubr.msk.f32.mxu0 %vm24798_vm2, %v29743_v9 }
 0xbca   :  { %v18450_v13 = vpop.permute.xlu0 %18449 }
 0xbcb   :  { %v18530_v16 = vpop.permute.xlu1 %18529  ;;  %24036 = vmatmul.mubr.msk.f32.vlgmr.msra.gmra.mrb[8].mxu1 %vm768_vm3, %v18450_v13 }
 0xbcc   :  { %24039 = vmatpush3.xpose.msk.msra.mxu0 %vm768_vm3, %v18530_v16  ;;  %24045 = vmatprep.mubr.msk.f32.mxu1 %vm24798_vm2, %v29743_v9 }
 0xbcd   :  { %24048 = vmatprep.subr.mxu0 %v29743_v9 }
 0xbce   :  { %v18608_v49 = vpop.permute.xlu0 %18607 }
 0xbcf   :  { %v18528_v36 = vpop.permute.xlu1 %18527  ;;  %24044 = vmatpush3.xpose.msk.msra.mxu1 %vm768_vm3, %v18608_v49 }
 0xbd0   :  { %24041 = vmatmul.mubr.msk.f32.vlgmr.msra.gmra.mrb[8].mxu0 %vm768_vm3, %v18528_v36  ;;  %24053 = vmatprep.subr.mxu1 %v29743_v9  ;;  %v30159_v36 = vld [vmem:[#allocation49_spill] sm:$0xff] }
 0xbd1   :  { %24050 = vmatprep.mubr.msk.f32.mxu0 %vm24798_vm2, %v29743_v9 }
 0xbd2   :  { %v18606_v61 = vpop.permute.xlu0 %18605 }
 0xbd3   :  { %v18686_v26 = vpop.permute.xlu1 %18685  ;;  %24046 = vmatmul.mubr.msk.f32.vlgmr.msra.gmra.mrb[10].mxu1 %vm768_vm3, %v18606_v61 }
 0xbd4   :  { %24049 = vmatpush3.xpose.msk.msra.mxu0 %vm768_vm3, %v18686_v26  ;;  %24055 = vmatprep.mubr.msk.f32.mxu1 %vm24798_vm2, %v29743_v9  ;;  %v30161_v26 = vld [vmem:[#allocation53_spill] sm:$0xff] }
 0xbd5   :  { %24058 = vmatprep.subr.mxu0 %v29743_v9 }
 0xbd6   :  { %v18764_v19 = vpop.permute.xlu0 %18763 }
 0xbd7   :  { %v18684_v3 = vpop.permute.xlu1 %18683  ;;  %24054 = vmatpush3.xpose.msk.msra.mxu1 %vm768_vm3, %v18764_v19 }
 0xbd8   :  { %24051 = vmatmul.mubr.msk.f32.vlgmr.msra.gmra.mrb[10].mxu0 %vm768_vm3, %v18684_v3  ;;  %24063 = vmatprep.subr.mxu1 %v29743_v9 }
 0xbd9   :  { %24060 = vmatprep.mubr.msk.f32.mxu0 %vm24798_vm2, %v29743_v9 }
 0xbda   :  { %v18762_v15 = vpop.permute.xlu0 %18761 }
 0xbdb   :  { %v18842_v17 = vpop.permute.xlu1 %18841  ;;  %24056 = vmatmul.mubr.msk.f32.vlgmr.msra.gmra.mrb[12].mxu1 %vm768_vm3, %v18762_v15 }
 0xbdc   :  { %24059 = vmatpush3.xpose.msk.msra.mxu0 %vm768_vm3, %v18842_v17  ;;  %24065 = vmatprep.mubr.msk.f32.mxu1 %vm24798_vm2, %v29743_v9 }
 0xbdd   :  { %24068 = vmatprep.subr.mxu0 %v29743_v9 }
 0xbde   :  { %v18920_v29 = vpop.permute.xlu0 %18919 }
 0xbdf   :  { %v18840_v30 = vpop.permute.xlu1 %18839  ;;  %24064 = vmatpush3.xpose.msk.msra.mxu1 %vm768_vm3, %v18920_v29 }
 0xbe0   :  { %24061 = vmatmul.mubr.msk.f32.vlgmr.msra.gmra.mrb[12].mxu0 %vm768_vm3, %v18840_v30  ;;  %24073 = vmatprep.subr.mxu1 %v29743_v9  ;;  %v30163_v30 = vld [vmem:[#allocation155_spill] sm:$0xff] }
 0xbe1   :  { %24070 = vmatprep.mubr.msk.f32.mxu0 %vm24798_vm2, %v29743_v9 }
 0xbe2   :  { %v18918_v42 = vpop.permute.xlu0 %18917 }
 0xbe3   :  { %v18998_v57 = vpop.permute.xlu1 %18997  ;;  %24066 = vmatmul.mubr.msk.f32.vlgmr.msra.gmra.mrb[14].mxu1 %vm768_vm3, %v18918_v42 }
 0xbe4   :  { %24069 = vmatpush3.xpose.msk.msra.mxu0 %vm768_vm3, %v18998_v57  ;;  %24074 = vmatpush3.msra.mxu1 %v30145_v50  ;;  %v30165_v57 = vld [vmem:[#allocation126_spill] sm:$0xff] }
 0xbe5   :  { %24078 = vmatprep.subr.mxu0 %v29743_v9  ;;  %24075 = vmatprep.mubr.msk.f32.mxu1 %vm24798_vm2, %v29743_v9 }
 0xbe6   :  { %24083 = vmatprep.subr.mxu1 %v29743_v9 }
 0xbe7   :  { %v18996_v35 = vpop.permute.xlu1 %18995 }
 0xbe8   :  { %24071 = vmatmul.mubr.msk.f32.vlgmr.msra.gmra.mrb[14].mxu0 %vm768_vm3, %v18996_v35 }
 0xbe9   :  { %24079 = vmatpush3.msra.mxu0 %v30146_v39  ;;  %24080 = vmatprep.mubr.msk.f32.mxu0 %vm24798_vm2, %v29743_v9 }
 0xbea   :  { %24088 = vmatprep.subr.mxu0 %v29743_v9 }
 0xbeb   :  { %v15401_v4 = vpop.f32.mrb[224].mxu1 }
 0xbec   :  { %v28629_v54 = vadd.f32 %v15401_v4, %v30147_v14  ;;  %v23837_v48 = vpop.f32.mrb[225].mxu1 }
 0xbed   :  { %v30167_v48 = vld [vmem:[#allocation156_spill] sm:$0xff] }
 0xbee   :  { %v15477_v46 = vpop.f32.mrb[224].mxu0 }
 0xbef   :  { %v28632_v10 = vadd.f32 %v15477_v46, %v30148_v37  ;;  %v23842_v51 = vpop.f32.mrb[225].mxu0  ;;  %v30169_v37 = vld [vmem:[#allocation127_spill] sm:$0xff] }
 0xc20   :  { %v15553_v6 = vpop.f32.mrb[226].mxu1 }
 0xc21   :  { %v28635_v47 = vadd.f32 %v15553_v6, %v30149_v38  ;;  %v23847_v31 = vpop.f32.mrb[227].mxu1 }
 0xc24   :  { %v15629_v60 = vpop.f32.mrb[226].mxu0  ;;  %v15705_v5 = vpop.f32.mrb[228].mxu1 }
 0xc25   :  { %v28638_v18 = vadd.f32 %v15629_v60, %v30150_v56  ;;  %v28641_v12 = vadd.f32 %v15705_v5, %v30151_v0  ;;  %v23852_v20 = vpop.f32.mrb[227].mxu0  ;;  %v23857_v2 = vpop.f32.mrb[229].mxu1  ;;  %v30171_v60 = vld [vmem:[#allocation57_spill] sm:$0xff] }
 0xc29   :  { %v15781_v59 = vpop.f32.mrb[228].mxu0  ;;  %v15857_v8 = vpop.f32.mrb[230].mxu1 }
 0xc2a   :  { %v28644_v52 = vadd.f32 %v15781_v59, %v30152_v28  ;;  %v28647_v22 = vadd.f32 %v15857_v8, %v30153_v44  ;;  %v23862_v41 = vpop.f32.mrb[229].mxu0  ;;  %v23867_v11 = vpop.f32.mrb[231].mxu1 }
 0xc2c   :  { %30154 = vst [vmem:[#allocation99_spill] sm:$0xff] %v28647_v22 }
 0xc2e   :  { %v15933_v45 = vpop.f32.mrb[230].mxu0  ;;  %v16009_v1 = vpop.f32.mrb[232].mxu1 }
 0xc2f   :  { %v28650_v27 = vadd.f32 %v15933_v45, %v30155_v62  ;;  %v28653_v21 = vadd.f32 %v16009_v1, %v30157_v63  ;;  %v23872_v32 = vpop.f32.mrb[231].mxu0  ;;  %v23877_v13 = vpop.f32.mrb[233].mxu1 }
 0xc31   :  { %30156 = vst [vmem:[#allocation111_spill] sm:$0xff] %v28650_v27  ;;  %30158 = vst [vmem:[#allocation142_spill] sm:$0xff] %v28653_v21 }
 0xc33   :  { %v16085_v16 = vpop.f32.mrb[232].mxu0  ;;  %v16161_v49 = vpop.f32.mrb[234].mxu1 }
 0xc34   :  { %v28656_v61 = vadd.f32 %v16085_v16, %v30159_v36  ;;  %v28659_v19 = vadd.f32 %v16161_v49, %v30161_v26  ;;  %v23882_v3 = vpop.f32.mrb[233].mxu0  ;;  %v23887_v15 = vpop.f32.mrb[235].mxu1 }
 0xc36   :  { %30160 = vst [vmem:[#allocation113_spill] sm:$0xff] %v28656_v61  ;;  %30162 = vst [vmem:[#allocation115_spill] sm:$0xff] %v28659_v19 }
 0xc38   :  { %v16237_v17 = vpop.f32.mrb[234].mxu0  ;;  %v16313_v29 = vpop.f32.mrb[236].mxu1 }
 0xc39   :  { %v28662_v42 = vadd.f32 %v16237_v17, %v30163_v30  ;;  %v28665_v50 = vadd.f32 %v16313_v29, %v30165_v57  ;;  %v23892_v35 = vpop.f32.mrb[235].mxu0  ;;  %v23897_v39 = vpop.f32.mrb[237].mxu1 }
 0xc3b   :  { %30164 = vst [vmem:[#allocation145_spill] sm:$0xff] %v28662_v42  ;;  %30166 = vst [vmem:[#allocation161_spill] sm:$0xff] %v28665_v50 }
 0xc3d   :  { %v16389_v4 = vpop.f32.mrb[236].mxu0  ;;  %v16465_v14 = vpop.f32.mrb[238].mxu1 }
 0xc3e   :  { %v28668_v46 = vadd.f32 %v16389_v4, %v30167_v48  ;;  %v28671_v51 = vadd.f32 %v16465_v14, %v30169_v37  ;;  %v23902_v6 = vpop.f32.mrb[237].mxu0  ;;  %v23907_v38 = vpop.f32.mrb[239].mxu1 }
 0xc40   :  { %30168 = vst [vmem:[#allocation134_spill] sm:$0xff] %v28668_v46  ;;  %30170 = vst [vmem:[#allocation102_spill] sm:$0xff] %v28671_v51 }
 0xc41   :  { %v16541_v31 = vpop.f32.mrb[238].mxu0 }
 0xc42   :  { %v28674_v5 = vadd.f32 %v16541_v31, %v30171_v60  ;;  %v23912_v56 = vpop.f32.mrb[239].mxu0 }
 0xc44   :  { %30172 = vst [vmem:[#allocation100_spill] sm:$0xff] %v28674_v5 }
 0xc46   :  { %v28676_v0 = vpop.f32.mrb[240].mxu1 }
 0xc47   :  { %v23917_v20 = vpop.f32.mrb[241].mxu1  ;;  %v19073_v2 = vsel %vm768_vm3, %v28676_v0, -inf }
 0xc48   :  { %19074 = vmax.xlane.f32.xlu0 %v19073_v2 }
 0xc49   :  { %v28680_v59 = vpop.f32.mrb[240].mxu0 }
 0xc4a   :  { %v23922_v8 = vpop.f32.mrb[241].mxu0  ;;  %v28682_v28 = vpop.f32.mrb[242].mxu1  ;;  %v19076_v44 = vsel %vm768_vm3, %v28680_v59, -inf }
 0xc4b   :  { %19077 = vmax.xlane.f32.xlu1 %v19076_v44  ;;  %v23927_v41 = vpop.f32.mrb[243].mxu1  ;;  %v19079_v11 = vsel %vm768_vm3, %v28682_v28, -inf }
 0xc4c   :  { %19080 = vmax.xlane.f32.xlu0 %v19079_v11 }
 0xc4d   :  { %v28688_v45 = vpop.f32.mrb[242].mxu0 }
 0xc4e   :  { %v23932_v1 = vpop.f32.mrb[243].mxu0  ;;  %v19082_v62 = vsel %vm768_vm3, %v28688_v45, -inf  ;;  %v28692_v63 = vpop.f32.mrb[244].mxu1 }
 0xc4f   :  { %v23937_v32 = vpop.f32.mrb[245].mxu1  ;;  %v19085_v13 = vsel %vm768_vm3, %v28692_v63, -inf }
 0xc50   :  { %19083 = vmax.xlane.f32.xlu0 %v19082_v62  ;;  %19086 = vmax.xlane.f32.xlu1 %v19085_v13 }
 0xc53   :  { %v28696_v16 = vpop.f32.mrb[244].mxu0 }
 0xc54   :  { %v23942_v49 = vpop.f32.mrb[245].mxu0  ;;  %v19088_v36 = vsel %vm768_vm3, %v28696_v16, -inf }
 0xc55   :  { %19089 = vmax.xlane.f32.xlu0 %v19088_v36 }
 0xc56   :  { %v28700_v26 = vpop.f32.mrb[246].mxu1 }
 0xc57   :  { %v23947_v3 = vpop.f32.mrb[247].mxu1  ;;  %v19091_v15 = vsel %vm768_vm3, %v28700_v26, -inf }
 0xc58   :  { %19092 = vmax.xlane.f32.xlu1 %v19091_v15 }
 0xc5b   :  { %v28704_v17 = vpop.f32.mrb[246].mxu0 }
 0xc5c   :  { %v23952_v29 = vpop.f32.mrb[247].mxu0  ;;  %v19094_v30 = vsel %vm768_vm3, %v28704_v17, -inf }
 0xc5d   :  { %19095 = vmax.xlane.f32.xlu0 %v19094_v30 }
 0xc5e   :  { %v28708_v57 = vpop.f32.mrb[248].mxu1 }
 0xc5f   :  { %v23957_v35 = vpop.f32.mrb[249].mxu1  ;;  %v19097_v39 = vsel %vm768_vm3, %v28708_v57, -inf }
 0xc60   :  { %19098 = vmax.xlane.f32.xlu1 %v19097_v39 }
 0xc63   :  { %v28712_v4 = vpop.f32.mrb[248].mxu0 }
 0xc64   :  { %v23962_v14 = vpop.f32.mrb[249].mxu0  ;;  %v19100_v48 = vsel %vm768_vm3, %v28712_v4, -inf }
 0xc65   :  { %19101 = vmax.xlane.f32.xlu0 %v19100_v48 }
 0xc66   :  { %v28716_v37 = vpop.f32.mrb[250].mxu1 }
 0xc67   :  { %v23967_v6 = vpop.f32.mrb[251].mxu1  ;;  %v19103_v38 = vsel %vm768_vm3, %v28716_v37, -inf }
 0xc68   :  { %19104 = vmax.xlane.f32.xlu1 %v19103_v38 }
 0xc6b   :  { %v28720_v31 = vpop.f32.mrb[250].mxu0 }
 0xc6c   :  { %v23972_v60 = vpop.f32.mrb[251].mxu0  ;;  %v19106_v56 = vsel %vm768_vm3, %v28720_v31, -inf }
 0xc6d   :  { %19107 = vmax.xlane.f32.xlu0 %v19106_v56 }
 0xc6e   :  { %v28724_v20 = vpop.f32.mrb[252].mxu1 }
 0xc6f   :  { %v23977_v2 = vpop.f32.mrb[253].mxu1  ;;  %v19109_v8 = vsel %vm768_vm3, %v28724_v20, -inf }
 0xc70   :  { %19110 = vmax.xlane.f32.xlu1 %v19109_v8 }
 0xc73   :  { %v28728_v44 = vpop.f32.mrb[252].mxu0 }
 0xc74   :  { %v23982_v41 = vpop.f32.mrb[253].mxu0  ;;  %v19112_v11 = vsel %vm768_vm3, %v28728_v44, -inf }
 0xc75   :  { %19113 = vmax.xlane.f32.xlu0 %v19112_v11 }
 0xc76   :  { %v28732_v1 = vpop.f32.mrb[254].mxu1 }
 0xc77   :  { %v23987_v62 = vpop.f32.mrb[255].mxu1  ;;  %v19115_v32 = vsel %vm768_vm3, %v28732_v1, -inf }
 0xc78   :  { %19116 = vmax.xlane.f32.xlu1 %v19115_v32 }
 0xc7b   :  { %v28736_v13 = vpop.f32.mrb[254].mxu0 }
 0xc7c   :  { %v23992_v49 = vpop.f32.mrb[255].mxu0  ;;  %v19118_v36 = vsel %vm768_vm3, %v28736_v13, -inf }
 0xc7d   :  { %19119 = vmax.xlane.f32.xlu0 %v19118_v36 }
 0xc7e   :  { %v28740_v3 = vpop.f32.mrb[0].mxu1 }
 0xc7f   :  { %v23997_v15 = vpop.f32.mrb[1].mxu1  ;;  %v19121_v29 = vsel %vm768_vm3, %v28740_v3, -inf }
 0xc80   :  { %19122 = vmax.xlane.f32.xlu1 %v19121_v29 }
 0xc83   :  { %v28744_v30 = vpop.f32.mrb[0].mxu0 }
 0xc84   :  { %v24002_v35 = vpop.f32.mrb[1].mxu0  ;;  %v19124_v39 = vsel %vm768_vm3, %v28744_v30, -inf }
 0xc85   :  { %19125 = vmax.xlane.f32.xlu0 %v19124_v39 }
 0xc86   :  { %v28748_v14 = vpop.f32.mrb[2].mxu1 }
 0xc87   :  { %v24007_v48 = vpop.f32.mrb[3].mxu1  ;;  %v19127_v6 = vsel %vm768_vm3, %v28748_v14, -inf }
 0xc88   :  { %19128 = vmax.xlane.f32.xlu1 %v19127_v6 }
 0xc8b   :  { %v28752_v38 = vpop.f32.mrb[2].mxu0 }
 0xc8c   :  { %v24012_v60 = vpop.f32.mrb[3].mxu0  ;;  %v19130_v56 = vsel %vm768_vm3, %v28752_v38, -inf }
 0xc8d   :  { %19131 = vmax.xlane.f32.xlu0 %v19130_v56 }
 0xc8e   :  { %v28756_v2 = vpop.f32.mrb[4].mxu1 }
 0xc8f   :  { %v24017_v8 = vpop.f32.mrb[5].mxu1  ;;  %v19133_v41 = vsel %vm768_vm3, %v28756_v2, -inf }
 0xc90   :  { %19134 = vmax.xlane.f32.xlu1 %v19133_v41 }
 0xc93   :  { %v28760_v11 = vpop.f32.mrb[4].mxu0 }
 0xc94   :  { %v24022_v62 = vpop.f32.mrb[5].mxu0  ;;  %v19136_v32 = vsel %vm768_vm3, %v28760_v11, -inf }
 0xc95   :  { %19137 = vmax.xlane.f32.xlu0 %v19136_v32 }
 0xc96   :  { %v28764_v49 = vpop.f32.mrb[6].mxu1 }
 0xc97   :  { %v24027_v36 = vpop.f32.mrb[7].mxu1  ;;  %v19139_v15 = vsel %vm768_vm3, %v28764_v49, -inf }
 0xc98   :  { %19140 = vmax.xlane.f32.xlu1 %v19139_v15 }
 0xc9b   :  { %v28768_v29 = vpop.f32.mrb[6].mxu0 }
 0xc9c   :  { %v24032_v35 = vpop.f32.mrb[7].mxu0  ;;  %v19142_v39 = vsel %vm768_vm3, %v28768_v29, -inf }
 0xc9d   :  { %19143 = vmax.xlane.f32.xlu0 %v19142_v39 }
 0xc9e   :  { %v28772_v48 = vpop.f32.mrb[8].mxu1 }
 0xc9f   :  { %v24037_v6 = vpop.f32.mrb[9].mxu1  ;;  %v19145_v60 = vsel %vm768_vm3, %v28772_v48, -inf }
 0xca0   :  { %19146 = vmax.xlane.f32.xlu1 %v19145_v60 }
 0xca3   :  { %v28776_v56 = vpop.f32.mrb[8].mxu0 }
 0xca4   :  { %v24042_v8 = vpop.f32.mrb[9].mxu0  ;;  %v19148_v41 = vsel %vm768_vm3, %v28776_v56, -inf }
 0xca5   :  { %19149 = vmax.xlane.f32.xlu0 %v19148_v41 }
 0xca6   :  { %v28780_v62 = vpop.f32.mrb[10].mxu1 }
 0xca7   :  { %v24047_v32 = vpop.f32.mrb[11].mxu1  ;;  %v19151_v36 = vsel %vm768_vm3, %v28780_v62, -inf }
 0xca8   :  { %19152 = vmax.xlane.f32.xlu1 %v19151_v36 }
 0xcab   :  { %v28784_v15 = vpop.f32.mrb[10].mxu0 }
 0xcac   :  { %v24052_v35 = vpop.f32.mrb[11].mxu0  ;;  %v19154_v39 = vsel %vm768_vm3, %v28784_v15, -inf }
 0xcad   :  { %19155 = vmax.xlane.f32.xlu0 %v19154_v39 }
 0xcae   :  { %v28788_v6 = vpop.f32.mrb[12].mxu1 }
 0xcaf   :  { %v24057_v60 = vpop.f32.mrb[13].mxu1  ;;  %v19157_v8 = vsel %vm768_vm3, %v28788_v6, -inf }
 0xcb0   :  { %19158 = vmax.xlane.f32.xlu1 %v19157_v8 }
 0xcb3   :  { %v28792_v41 = vpop.f32.mrb[12].mxu0 }
 0xcb4   :  { %v24062_v32 = vpop.f32.mrb[13].mxu0  ;;  %v19160_v36 = vsel %vm768_vm3, %v28792_v41, -inf }
 0xcb5   :  { %19161 = vmax.xlane.f32.xlu0 %v19160_v36 }
 0xcb6   :  { %v28796_v5 = vpop.f32.mrb[14].mxu1 }
 0xcb7   :  { %v24067_v35 = vpop.f32.mrb[15].mxu1  ;;  %v19163_v39 = vsel %vm768_vm3, %v28796_v5, -inf }
 0xcb8   :  { %19164 = vmax.xlane.f32.xlu1 %v19163_v39 }
 0xcbb   :  { %v28800_v51 = vpop.f32.mrb[14].mxu0 }
 0xcbc   :  { %v24072_v60 = vpop.f32.mrb[15].mxu0  ;;  %v19166_v8 = vsel %vm768_vm3, %v28800_v51, -inf }
 0xcbd   :  { %19167 = vmax.xlane.f32.xlu0 %v19166_v8 }
 0xcd5   :  { %v19075_v46 = vpop.xlane.xlu0 %19074 }
 0xcd6   :  { %v19169_v32 = vsub.f32 %v28676_v0, %v19075_v46 }
 0xcd8   :  { %v19201_v50 = vmul.f32 1.442695, %v19169_v32  ;;  %v19078_v42 = vpop.xlane.xlu1 %19077 }
 0xcd9   :  { %v19170_v36 = vsub.f32 %v28680_v59, %v19078_v42  ;;  %v19081_v19 = vpop.xlane.xlu0 %19080 }
 0xcda   :  { %24637 = vpow2.f32 %v19201_v50  ;;  %v19171_v35 = vsub.f32 %v28682_v28, %v19081_v19 }
 0xcdb   :  { %v19203_v61 = vmul.f32 1.442695, %v19170_v36 }
 0xcdc   :  { %v19205_v39 = vmul.f32 1.442695, %v19171_v35 }
 0xcdd   :  { %24639 = vpow2.f32 %v19203_v61  ;;  %v19084_v21 = vpop.xlane.xlu0 %19083  ;;  %v19087_v60 = vpop.xlane.xlu1 %19086 }
 0xcde   :  { %24641 = vpow2.f32 %v19205_v39  ;;  %v19172_v27 = vsub.f32 %v28688_v45, %v19084_v21  ;;  %v19173_v8 = vsub.f32 %v28692_v63, %v19087_v60 }
 0xce0   :  { %v19207_v22 = vmul.f32 1.442695, %v19172_v27  ;;  %v19209_v46 = vmul.f32 1.442695, %v19173_v8 }
 0xce2   :  { %24643 = vpow2.f32 %v19207_v22  ;;  %v19090_v0 = vpop.xlane.xlu0 %19089 }
 0xce3   :  { %24645 = vpow2.f32 %v19209_v46  ;;  %v19174_v42 = vsub.f32 %v28696_v16, %v19090_v0 }
 0xce4   :  { %v28810_v50 = vpop.eup %24637 }
 0xce5   :  { %v19265_v19 = vsel %vm768_vm3, %v28810_v50, 0.0  ;;  %v19211_v61 = vmul.f32 1.442695, %v19174_v42  ;;  %v19093_v59 = vpop.xlane.xlu1 %19092 }
 0xce6   :  { %19266 = vadd.xlane.f32.xlu1 %v19265_v19  ;;  %v19175_v28 = vsub.f32 %v28700_v26, %v19093_v59 }
 0xce7   :  { %v28815_v21 = vpop.eup %24639  ;;  %24647 = vpow2.f32 %v19211_v61 }
 0xce8   :  { %v28817_v27 = vpop.eup %24641  ;;  %v19268_v22 = vsel %vm768_vm3, %v28815_v21, 0.0  ;;  %v19213_v45 = vmul.f32 1.442695, %v19175_v28 }
 0xce9   :  { %19269 = vadd.xlane.f32.xlu0 %v19268_v22  ;;  %v19271_v63 = vsel %vm768_vm3, %v28817_v27, 0.0 }
 0xcea   :  { %24649 = vpow2.f32 %v19213_v45  ;;  %19272 = vadd.xlane.f32.xlu1 %v19271_v63  ;;  %v19096_v16 = vpop.xlane.xlu0 %19095 }
 0xceb   :  { %v19176_v32 = vsub.f32 %v28704_v17, %v19096_v16 }
 0xcec   :  { %v28824_v36 = vpop.eup %24643 }
 0xced   :  { %v28826_v26 = vpop.eup %24645  ;;  %v19215_v35 = vmul.f32 1.442695, %v19176_v32  ;;  %v19274_v39 = vsel %vm768_vm3, %v28824_v36, 0.0  ;;  %v19099_v60 = vpop.xlane.xlu1 %19098 }
 0xcee   :  { %19275 = vadd.xlane.f32.xlu0 %v19274_v39  ;;  %v19177_v8 = vsub.f32 %v28708_v57, %v19099_v60  ;;  %v19277_v46 = vsel %vm768_vm3, %v28826_v26, 0.0 }
 0xcef   :  { %24651 = vpow2.f32 %v19215_v35  ;;  %19278 = vadd.xlane.f32.xlu1 %v19277_v46 }
 0xcf0   :  { %v19217_v0 = vmul.f32 1.442695, %v19177_v8 }
 0xcf1   :  { %v28833_v42 = vpop.eup %24647 }
 0xcf2   :  { %24653 = vpow2.f32 %v19217_v0  ;;  %v19102_v17 = vpop.xlane.xlu0 %19101  ;;  %v19280_v19 = vsel %vm768_vm3, %v28833_v42, 0.0 }
 0xcf3   :  { %v19178_v61 = vsub.f32 %v28712_v4, %v19102_v17  ;;  %19281 = vadd.xlane.f32.xlu0 %v19280_v19 }
 0xcf4   :  { %v28838_v59 = vpop.eup %24649 }
 0xcf5   :  { %v19219_v28 = vmul.f32 1.442695, %v19178_v61  ;;  %v19105_v57 = vpop.xlane.xlu1 %19104  ;;  %v19283_v22 = vsel %vm768_vm3, %v28838_v59, 0.0 }
 0xcf6   :  { %v19179_v45 = vsub.f32 %v28716_v37, %v19105_v57  ;;  %19284 = vadd.xlane.f32.xlu1 %v19283_v22 }
 0xcf7   :  { %24655 = vpow2.f32 %v19219_v28 }
 0xcf8   :  { %v19221_v63 = vmul.f32 1.442695, %v19179_v45 }
 0xcf9   :  { %v28843_v16 = vpop.eup %24651 }
 0xcfa   :  { %24657 = vpow2.f32 %v19221_v63  ;;  %v19108_v32 = vpop.xlane.xlu0 %19107  ;;  %v19286_v4 = vsel %vm768_vm3, %v28843_v16, 0.0 }
 0xcfb   :  { %v19180_v35 = vsub.f32 %v28720_v31, %v19108_v32  ;;  %19287 = vadd.xlane.f32.xlu0 %v19286_v4 }
 0xcfc   :  { %v28848_v39 = vpop.eup %24653 }
 0xcfd   :  { %v19223_v60 = vmul.f32 1.442695, %v19180_v35  ;;  %v19111_v8 = vpop.xlane.xlu1 %19110  ;;  %v19289_v37 = vsel %vm768_vm3, %v28848_v39, 0.0 }
 0xcfe   :  { %v19181_v46 = vsub.f32 %v28724_v20, %v19111_v8  ;;  %19290 = vadd.xlane.f32.xlu1 %v19289_v37 }
 0xcff   :  { %24659 = vpow2.f32 %v19223_v60 }
 0xd00   :  { %v19225_v0 = vmul.f32 1.442695, %v19181_v46 }
 0xd01   :  { %v28853_v17 = vpop.eup %24655 }
 0xd02   :  { %24661 = vpow2.f32 %v19225_v0  ;;  %v19114_v19 = vpop.xlane.xlu0 %19113  ;;  %v19292_v31 = vsel %vm768_vm3, %v28853_v17, 0.0 }
 0xd03   :  { %v19182_v61 = vsub.f32 %v28728_v44, %v19114_v19  ;;  %19293 = vadd.xlane.f32.xlu0 %v19292_v31 }
 0xd04   :  { %v28858_v28 = vpop.eup %24657 }
 0xd05   :  { %v19227_v57 = vmul.f32 1.442695, %v19182_v61  ;;  %v19117_v22 = vpop.xlane.xlu1 %19116  ;;  %v19295_v20 = vsel %vm768_vm3, %v28858_v28, 0.0 }
 0xd06   :  { %v19183_v45 = vsub.f32 %v28732_v1, %v19117_v22  ;;  %19296 = vadd.xlane.f32.xlu1 %v19295_v20 }
 0xd07   :  { %24663 = vpow2.f32 %v19227_v57 }
 0xd08   :  { %v19229_v63 = vmul.f32 1.442695, %v19183_v45 }
 0xd09   :  { %v28863_v32 = vpop.eup %24659 }
 0xd0a   :  { %24665 = vpow2.f32 %v19229_v63  ;;  %v19120_v4 = vpop.xlane.xlu0 %19119  ;;  %v19298_v44 = vsel %vm768_vm3, %v28863_v32, 0.0 }
 0xd0b   :  { %v19184_v35 = vsub.f32 %v28736_v13, %v19120_v4  ;;  %19299 = vadd.xlane.f32.xlu0 %v19298_v44 }
 0xd0c   :  { %v28868_v60 = vpop.eup %24661 }
 0xd0d   :  { %v19231_v8 = vmul.f32 1.442695, %v19184_v35  ;;  %v19123_v37 = vpop.xlane.xlu1 %19122  ;;  %v19301_v1 = vsel %vm768_vm3, %v28868_v60, 0.0 }
 0xd0e   :  { %v19185_v46 = vsub.f32 %v28740_v3, %v19123_v37  ;;  %19302 = vadd.xlane.f32.xlu1 %v19301_v1 }
 0xd0f   :  { %24667 = vpow2.f32 %v19231_v8 }
 0xd10   :  { %v19233_v0 = vmul.f32 1.442695, %v19185_v46 }
 0xd11   :  { %v28873_v19 = vpop.eup %24663 }
 0xd12   :  { %24669 = vpow2.f32 %v19233_v0  ;;  %v19126_v31 = vpop.xlane.xlu0 %19125  ;;  %v19304_v13 = vsel %vm768_vm3, %v28873_v19, 0.0 }
 0xd13   :  { %v19186_v61 = vsub.f32 %v28744_v30, %v19126_v31  ;;  %19305 = vadd.xlane.f32.xlu0 %v19304_v13 }
 0xd14   :  { %v28878_v57 = vpop.eup %24665 }
 0xd15   :  { %v19235_v22 = vmul.f32 1.442695, %v19186_v61  ;;  %v19129_v20 = vpop.xlane.xlu1 %19128  ;;  %v19307_v3 = vsel %vm768_vm3, %v28878_v57, 0.0 }
 0xd16   :  { %v19187_v45 = vsub.f32 %v28748_v14, %v19129_v20  ;;  %19308 = vadd.xlane.f32.xlu1 %v19307_v3 }
 0xd17   :  { %24671 = vpow2.f32 %v19235_v22 }
 0xd18   :  { %v19237_v63 = vmul.f32 1.442695, %v19187_v45 }
 0xd19   :  { %v28883_v4 = vpop.eup %24667 }
 0xd1a   :  { %24673 = vpow2.f32 %v19237_v63  ;;  %v19132_v44 = vpop.xlane.xlu0 %19131  ;;  %v19310_v30 = vsel %vm768_vm3, %v28883_v4, 0.0 }
 0xd1b   :  { %v19188_v35 = vsub.f32 %v28752_v38, %v19132_v44  ;;  %19311 = vadd.xlane.f32.xlu0 %v19310_v30 }
 0xd1c   :  { %v28888_v8 = vpop.eup %24669 }
 0xd1d   :  { %v19239_v37 = vmul.f32 1.442695, %v19188_v35  ;;  %v19135_v1 = vpop.xlane.xlu1 %19134  ;;  %v19313_v14 = vsel %vm768_vm3, %v28888_v8, 0.0 }
 0xd1e   :  { %v19189_v46 = vsub.f32 %v28756_v2, %v19135_v1  ;;  %19314 = vadd.xlane.f32.xlu1 %v19313_v14 }
 0xd1f   :  { %24675 = vpow2.f32 %v19239_v37 }
 0xd20   :  { %v19241_v0 = vmul.f32 1.442695, %v19189_v46 }
 0xd21   :  { %v28893_v31 = vpop.eup %24671 }
 0xd22   :  { %24677 = vpow2.f32 %v19241_v0  ;;  %v19138_v13 = vpop.xlane.xlu0 %19137  ;;  %v19316_v38 = vsel %vm768_vm3, %v28893_v31, 0.0 }
 0xd23   :  { %v19190_v61 = vsub.f32 %v28760_v11, %v19138_v13  ;;  %19317 = vadd.xlane.f32.xlu0 %v19316_v38 }
 0xd24   :  { %v28898_v22 = vpop.eup %24673 }
 0xd25   :  { %v19243_v20 = vmul.f32 1.442695, %v19190_v61  ;;  %v19141_v3 = vpop.xlane.xlu1 %19140  ;;  %v19319_v2 = vsel %vm768_vm3, %v28898_v22, 0.0 }
 0xd26   :  { %v19191_v45 = vsub.f32 %v28764_v49, %v19141_v3  ;;  %19320 = vadd.xlane.f32.xlu1 %v19319_v2 }
 0xd27   :  { %24679 = vpow2.f32 %v19243_v20 }
 0xd28   :  { %v19245_v63 = vmul.f32 1.442695, %v19191_v45 }
 0xd29   :  { %v28903_v44 = vpop.eup %24675 }
 0xd2a   :  { %24681 = vpow2.f32 %v19245_v63  ;;  %v19144_v30 = vpop.xlane.xlu0 %19143  ;;  %v19322_v11 = vsel %vm768_vm3, %v28903_v44, 0.0 }
 0xd2b   :  { %v19192_v35 = vsub.f32 %v28768_v29, %v19144_v30  ;;  %19323 = vadd.xlane.f32.xlu0 %v19322_v11 }
 0xd2c   :  { %v28908_v37 = vpop.eup %24677 }
 0xd2d   :  { %v19247_v1 = vmul.f32 1.442695, %v19192_v35  ;;  %v19147_v14 = vpop.xlane.xlu1 %19146  ;;  %v19325_v49 = vsel %vm768_vm3, %v28908_v37, 0.0 }
 0xd2e   :  { %v19193_v46 = vsub.f32 %v28772_v48, %v19147_v14  ;;  %19326 = vadd.xlane.f32.xlu1 %v19325_v49 }
 0xd2f   :  { %24683 = vpow2.f32 %v19247_v1 }
 0xd30   :  { %v19249_v0 = vmul.f32 1.442695, %v19193_v46 }
 0xd31   :  { %v28913_v13 = vpop.eup %24679 }
 0xd32   :  { %24685 = vpow2.f32 %v19249_v0  ;;  %v19150_v38 = vpop.xlane.xlu0 %19149  ;;  %v19328_v29 = vsel %vm768_vm3, %v28913_v13, 0.0 }
 0xd33   :  { %v19194_v61 = vsub.f32 %v28776_v56, %v19150_v38  ;;  %19329 = vadd.xlane.f32.xlu0 %v19328_v29 }
 0xd34   :  { %v28918_v20 = vpop.eup %24681 }
 0xd35   :  { %v19251_v3 = vmul.f32 1.442695, %v19194_v61  ;;  %v19153_v2 = vpop.xlane.xlu1 %19152  ;;  %v19331_v48 = vsel %vm768_vm3, %v28918_v20, 0.0 }
 0xd36   :  { %v19195_v45 = vsub.f32 %v28780_v62, %v19153_v2  ;;  %19332 = vadd.xlane.f32.xlu1 %v19331_v48 }
 0xd37   :  { %24687 = vpow2.f32 %v19251_v3 }
 0xd38   :  { %v19253_v63 = vmul.f32 1.442695, %v19195_v45 }
 0xd39   :  { %v28923_v30 = vpop.eup %24683 }
 0xd3a   :  { %24689 = vpow2.f32 %v19253_v63  ;;  %v19156_v11 = vpop.xlane.xlu0 %19155  ;;  %v19334_v56 = vsel %vm768_vm3, %v28923_v30, 0.0 }
 0xd3b   :  { %v19196_v35 = vsub.f32 %v28784_v15, %v19156_v11  ;;  %19335 = vadd.xlane.f32.xlu0 %v19334_v56 }
 0xd3c   :  { %v28928_v1 = vpop.eup %24685 }
 0xd3d   :  { %v19255_v14 = vmul.f32 1.442695, %v19196_v35  ;;  %v19159_v49 = vpop.xlane.xlu1 %19158  ;;  %v19337_v62 = vsel %vm768_vm3, %v28928_v1, 0.0 }
 0xd3e   :  { %v19197_v46 = vsub.f32 %v28788_v6, %v19159_v49  ;;  %19338 = vadd.xlane.f32.xlu1 %v19337_v62 }
 0xd3f   :  { %24691 = vpow2.f32 %v19255_v14 }
 0xd40   :  { %v19257_v0 = vmul.f32 1.442695, %v19197_v46 }
 0xd41   :  { %v28933_v38 = vpop.eup %24687 }
 0xd42   :  { %24693 = vpow2.f32 %v19257_v0  ;;  %v19162_v29 = vpop.xlane.xlu0 %19161  ;;  %v19340_v15 = vsel %vm768_vm3, %v28933_v38, 0.0 }
 0xd43   :  { %v19198_v61 = vsub.f32 %v28792_v41, %v19162_v29  ;;  %19341 = vadd.xlane.f32.xlu0 %v19340_v15 }
 0xd44   :  { %v28938_v3 = vpop.eup %24689 }
 0xd45   :  { %v19259_v2 = vmul.f32 1.442695, %v19198_v61  ;;  %v19165_v48 = vpop.xlane.xlu1 %19164  ;;  %v19343_v6 = vsel %vm768_vm3, %v28938_v3, 0.0 }
 0xd46   :  { %v19199_v45 = vsub.f32 %v28796_v5, %v19165_v48  ;;  %19344 = vadd.xlane.f32.xlu1 %v19343_v6 }
 0xd47   :  { %24695 = vpow2.f32 %v19259_v2 }
 0xd48   :  { %v19261_v63 = vmul.f32 1.442695, %v19199_v45 }
 0xd49   :  { %v28943_v11 = vpop.eup %24691 }
 0xd4a   :  { %24697 = vpow2.f32 %v19261_v63  ;;  %v19168_v56 = vpop.xlane.xlu0 %19167  ;;  %v19346_v41 = vsel %vm768_vm3, %v28943_v11, 0.0 }
 0xd4b   :  { %v19200_v35 = vsub.f32 %v28800_v51, %v19168_v56  ;;  %19347 = vadd.xlane.f32.xlu0 %v19346_v41 }
 0xd4c   :  { %v28948_v14 = vpop.eup %24693 }
 0xd4d   :  { %v19263_v49 = vmul.f32 1.442695, %v19200_v35  ;;  %v19349_v62 = vsel %vm768_vm3, %v28948_v14, 0.0 }
 0xd4e   :  { %19350 = vadd.xlane.f32.xlu1 %v19349_v62 }
 0xd4f   :  { %24699 = vpow2.f32 %v19263_v49 }
 0xd51   :  { %v28952_v5 = vpop.eup %24695 }
 0xd52   :  { %v19352_v46 = vsel %vm768_vm3, %v28952_v5, 0.0 }
 0xd53   :  { %19353 = vadd.xlane.f32.xlu0 %v19352_v46  ;;  %v30173_v46 = vld [vmem:[#allocation11_spill] sm:$0xff] }
 0xd54   :  { %v28956_v0 = vpop.eup %24697 }
 0xd55   :  { %v19355_v51 = vsel %vm768_vm3, %v28956_v0, 0.0 }
 0xd56   :  { %19356 = vadd.xlane.f32.xlu1 %v19355_v51 }
 0xd59   :  { %v28960_v29 = vpop.eup %24699 }
 0xd5a   :  { %v19358_v15 = vsel %vm768_vm3, %v28960_v29, 0.0 }
 0xd5b   :  { %19359 = vadd.xlane.f32.xlu0 %v19358_v15 }
 0xd73   :  { %v19267_v61 = vpop.xlane.xlu1 %19266 }
 0xd74   :  { %24701 = vrcp.f32 %v19267_v61 }
 0xd76   :  { %v19270_v2 = vpop.xlane.xlu0 %19269 }
 0xd77   :  { %24703 = vrcp.f32 %v19270_v2  ;;  %v19273_v48 = vpop.xlane.xlu1 %19272  ;;  %v30175_v2 = vld [vmem:[#allocation19_spill] sm:$0xff] }
 0xd78   :  { %24705 = vrcp.f32 %v19273_v48 }
 0xd7b   :  { %v19276_v6 = vpop.xlane.xlu0 %19275 }
 0xd7c   :  { %24707 = vrcp.f32 %v19276_v6  ;;  %v19279_v45 = vpop.xlane.xlu1 %19278 }
 0xd7d   :  { %24709 = vrcp.f32 %v19279_v45  ;;  %v30176_v45 = vld [vmem:[#allocation23_spill] sm:$0xff] }
 0xd7e   :  { %v24702_v63 = vpop.eup %24701 }
 0xd7f   :  { %v19362_v56 = vmul.f32 %v24702_v63, %v28810_v50  ;;  %v30174_v50 = vld [vmem:[#allocation15_spill] sm:$0xff] }
 0xd80   :  { %v19282_v41 = vpop.xlane.xlu0 %19281 }
 0xd81   :  { %v24704_v35 = vpop.eup %24703  ;;  %24076 = vmatmul.mubr.msk.f32.vlgmr.msra.gmra.mrb[16].mxu1 %vm768_vm3, %v19362_v56  ;;  %24711 = vrcp.f32 %v19282_v41  ;;  %v30177_v56 = vld [vmem:[#allocation27_spill] sm:$0xff] }
 0xd82   :  { %v24706_v49 = vpop.eup %24705  ;;  %v19364_v62 = vmul.f32 %v24704_v35, %v28815_v21  ;;  %24084 = vmatpush3.msra.mxu1 %v30173_v46  ;;  %24085 = vmatprep.mubr.msk.f32.mxu1 %vm24798_vm2, %v29743_v9 }
 0xd83   :  { %v19366_v51 = vmul.f32 %v24706_v49, %v28817_v27  ;;  %24093 = vmatprep.subr.mxu1 %v29743_v9  ;;  %v19285_v15 = vpop.xlane.xlu1 %19284  ;;  %v30178_v49 = vld [vmem:[#allocation31_spill] sm:$0xff] }
 0xd84   :  { %24081 = vmatmul.mubr.msk.f32.vlgmr.msra.gmra.mrb[16].mxu0 %vm768_vm3, %v19364_v62  ;;  %24713 = vrcp.f32 %v19285_v15 }
 0xd85   :  { %24089 = vmatpush3.msra.mxu0 %v30174_v50  ;;  %24086 = vmatmul.mubr.msk.f32.vlgmr.msra.gmra.mrb[18].mxu1 %vm768_vm3, %v19366_v51 }
 0xd86   :  { %v24708_v61 = vpop.eup %24707  ;;  %24094 = vmatpush3.msra.mxu1 %v30175_v2  ;;  %24090 = vmatprep.mubr.msk.f32.mxu0 %vm24798_vm2, %v29743_v9 }
 0xd87   :  { %v24710_v21 = vpop.eup %24709  ;;  %v19368_v48 = vmul.f32 %v24708_v61, %v28824_v36  ;;  %24098 = vmatprep.subr.mxu0 %v29743_v9  ;;  %24095 = vmatprep.mubr.msk.f32.mxu1 %vm24798_vm2, %v29743_v9  ;;  %v30180_v61 = vld [vmem:[#allocation39_spill] sm:$0xff] }
 0xd88   :  { %v19370_v27 = vmul.f32 %v24710_v21, %v28826_v26  ;;  %v19288_v6 = vpop.xlane.xlu0 %19287  ;;  %24103 = vmatprep.subr.mxu1 %v29743_v9  ;;  %v30181_v21 = vld [vmem:[#allocation43_spill] sm:$0xff] }
 0xd89   :  { %24091 = vmatmul.mubr.msk.f32.vlgmr.msra.gmra.mrb[18].mxu0 %vm768_vm3, %v19368_v48  ;;  %24715 = vrcp.f32 %v19288_v6 }
 0xd8a   :  { %24099 = vmatpush3.msra.mxu0 %v30176_v45  ;;  %24096 = vmatmul.mubr.msk.f32.vlgmr.msra.gmra.mrb[20].mxu1 %vm768_vm3, %v19370_v27  ;;  %v30182_v45 = vld [vmem:[#allocation47_spill] sm:$0xff] }
 0xd8b   :  { %v24712_v63 = vpop.eup %24711  ;;  %24104 = vmatpush3.msra.mxu1 %v30177_v56  ;;  %v19291_v36 = vpop.xlane.xlu1 %19290  ;;  %24100 = vmatprep.mubr.msk.f32.mxu0 %vm24798_vm2, %v29743_v9  ;;  %v30183_v56 = vld [vmem:[#allocation51_spill] sm:$0xff] }
 0xd8c   :  { %v19372_v41 = vmul.f32 %v24712_v63, %v28833_v42  ;;  %24717 = vrcp.f32 %v19291_v36  ;;  %24108 = vmatprep.subr.mxu0 %v29743_v9  ;;  %24105 = vmatprep.mubr.msk.f32.mxu1 %vm24798_vm2, %v29743_v9  ;;  %v30179_v42 = vld [vmem:[#allocation35_spill] sm:$0xff] }
 0xd8d   :  { %24113 = vmatprep.subr.mxu1 %v29743_v9 }
 0xd8e   :  { %v24714_v26 = vpop.eup %24713  ;;  %24101 = vmatmul.mubr.msk.f32.vlgmr.msra.gmra.mrb[20].mxu0 %vm768_vm3, %v19372_v41 }
 0xd8f   :  { %v19374_v35 = vmul.f32 %v24714_v26, %v28838_v59  ;;  %24109 = vmatpush3.msra.mxu0 %v30178_v49  ;;  %24110 = vmatprep.mubr.msk.f32.mxu0 %vm24798_vm2, %v29743_v9 }
 0xd90   :  { %v19294_v62 = vpop.xlane.xlu0 %19293  ;;  %24118 = vmatprep.subr.mxu0 %v29743_v9 }
 0xd91   :  { %24719 = vrcp.f32 %v19294_v62  ;;  %24106 = vmatmul.mubr.msk.f32.vlgmr.msra.gmra.mrb[22].mxu1 %vm768_vm3, %v19374_v35  ;;  %v30184_v35 = vld [vmem:[#allocation55_spill] sm:$0xff] }
 0xd92   :  { %24114 = vmatpush3.msra.mxu1 %v30179_v42  ;;  %24115 = vmatprep.mubr.msk.f32.mxu1 %vm24798_vm2, %v29743_v9  ;;  %v30185_v62 = vld [vmem:[#allocation59_spill] sm:$0xff] }
 0xd93   :  { %v24716_v46 = vpop.eup %24715  ;;  %v19297_v51 = vpop.xlane.xlu1 %19296  ;;  %24123 = vmatprep.subr.mxu1 %v29743_v9 }
 0xd94   :  { %v19376_v59 = vmul.f32 %v24716_v46, %v28843_v16  ;;  %24721 = vrcp.f32 %v19297_v51 }
 0xd96   :  { %v24718_v15 = vpop.eup %24717  ;;  %24111 = vmatmul.mubr.msk.f32.vlgmr.msra.gmra.mrb[22].mxu0 %vm768_vm3, %v19376_v59  ;;  %v30186_v59 = vld [vmem:[#allocation63_spill] sm:$0xff] }
 0xd97   :  { %v19378_v50 = vmul.f32 %v24718_v15, %v28848_v39  ;;  %24119 = vmatpush3.msra.mxu0 %v30180_v61  ;;  %24120 = vmatprep.mubr.msk.f32.mxu0 %vm24798_vm2, %v29743_v9 }
 0xd98   :  { %v19300_v2 = vpop.xlane.xlu0 %19299  ;;  %24128 = vmatprep.subr.mxu0 %v29743_v9 }
 0xd99   :  { %24723 = vrcp.f32 %v19300_v2  ;;  %24116 = vmatmul.mubr.msk.f32.vlgmr.msra.gmra.mrb[24].mxu1 %vm768_vm3, %v19378_v50  ;;  %v30187_v50 = vld [vmem:[#allocation67_spill] sm:$0xff] }
 0xd9a   :  { %24124 = vmatpush3.msra.mxu1 %v30181_v21  ;;  %24125 = vmatprep.mubr.msk.f32.mxu1 %vm24798_vm2, %v29743_v9 }
 0xd9b   :  { %v24720_v16 = vpop.eup %24719  ;;  %v19303_v48 = vpop.xlane.xlu1 %19302  ;;  %24133 = vmatprep.subr.mxu1 %v29743_v9 }
 0xd9c   :  { %v19380_v39 = vmul.f32 %v24720_v16, %v28853_v17  ;;  %24725 = vrcp.f32 %v19303_v48  ;;  %v30188_v16 = vld [vmem:[#allocation69_spill] sm:$0xff] }
 0xd9e   :  { %v24722_v27 = vpop.eup %24721  ;;  %24121 = vmatmul.mubr.msk.f32.vlgmr.msra.gmra.mrb[24].mxu0 %vm768_vm3, %v19380_v39  ;;  %v30189_v39 = vld [vmem:[#allocation71_spill] sm:$0xff] }
 0xd9f   :  { %v19382_v6 = vmul.f32 %v24722_v27, %v28858_v28  ;;  %24129 = vmatpush3.msra.mxu0 %v30182_v45  ;;  %24130 = vmatprep.mubr.msk.f32.mxu0 %vm24798_vm2, %v29743_v9 }
 0xda0   :  { %v19306_v63 = vpop.xlane.xlu0 %19305  ;;  %24138 = vmatprep.subr.mxu0 %v29743_v9 }
 0xda1   :  { %24727 = vrcp.f32 %v19306_v63  ;;  %24126 = vmatmul.mubr.msk.f32.vlgmr.msra.gmra.mrb[26].mxu1 %vm768_vm3, %v19382_v6  ;;  %v30190_v63 = vld [vmem:[#allocation73_spill] sm:$0xff] }
 0xda2   :  { %24134 = vmatpush3.msra.mxu1 %v30183_v56  ;;  %24135 = vmatprep.mubr.msk.f32.mxu1 %vm24798_vm2, %v29743_v9 }
 0xda3   :  { %v24724_v17 = vpop.eup %24723  ;;  %v19309_v36 = vpop.xlane.xlu1 %19308  ;;  %24143 = vmatprep.subr.mxu1 %v29743_v9 }
 0xda4   :  { %v19384_v28 = vmul.f32 %v24724_v17, %v28863_v32  ;;  %24729 = vrcp.f32 %v19309_v36  ;;  %v30191_v17 = vld [vmem:[#allocation75_spill] sm:$0xff] }
 0xda6   :  { %v24726_v41 = vpop.eup %24725  ;;  %24131 = vmatmul.mubr.msk.f32.vlgmr.msra.gmra.mrb[26].mxu0 %vm768_vm3, %v19384_v28 }
 0xda7   :  { %v19386_v26 = vmul.f32 %v24726_v41, %v28868_v60  ;;  %24139 = vmatpush3.msra.mxu0 %v30184_v35  ;;  %24140 = vmatprep.mubr.msk.f32.mxu0 %vm24798_vm2, %v29743_v9 }
 0xda8   :  { %v19312_v49 = vpop.xlane.xlu0 %19311  ;;  %24148 = vmatprep.subr.mxu0 %v29743_v9 }
 0xda9   :  { %24731 = vrcp.f32 %v19312_v49  ;;  %24136 = vmatmul.mubr.msk.f32.vlgmr.msra.gmra.mrb[28].mxu1 %vm768_vm3, %v19386_v26  ;;  %v30192_v26 = vld [vmem:[#allocation77_spill] sm:$0xff]  ;;  %v30193_v49 = vld [vmem:[#allocation79_spill] sm:$0xff] }
 0xdaa   :  { %24144 = vmatpush3.msra.mxu1 %v30185_v62  ;;  %24145 = vmatprep.mubr.msk.f32.mxu1 %vm24798_vm2, %v29743_v9 }
 0xdab   :  { %v24728_v32 = vpop.eup %24727  ;;  %v19315_v42 = vpop.xlane.xlu1 %19314  ;;  %24153 = vmatprep.subr.mxu1 %v29743_v9 }
 0xdac   :  { %v19388_v60 = vmul.f32 %v24728_v32, %v28873_v19  ;;  %24733 = vrcp.f32 %v19315_v42 }
 0xdae   :  { %v24730_v46 = vpop.eup %24729  ;;  %24141 = vmatmul.mubr.msk.f32.vlgmr.msra.gmra.mrb[28].mxu0 %vm768_vm3, %v19388_v60  ;;  %v30194_v60 = vld [vmem:[#allocation81_spill] sm:$0xff] }
 0xdaf   :  { %v19390_v51 = vmul.f32 %v24730_v46, %v28878_v57  ;;  %24149 = vmatpush3.msra.mxu0 %v30186_v59  ;;  %24150 = vmatprep.mubr.msk.f32.mxu0 %vm24798_vm2, %v29743_v9 }
 0xdb0   :  { %v19318_v15 = vpop.xlane.xlu0 %19317  ;;  %24158 = vmatprep.subr.mxu0 %v29743_v9 }
 0xdb1   :  { %24735 = vrcp.f32 %v19318_v15  ;;  %24146 = vmatmul.mubr.msk.f32.vlgmr.msra.gmra.mrb[30].mxu1 %vm768_vm3, %v19390_v51  ;;  %v30195_v51 = vld [vmem:[#allocation83_spill] sm:$0xff] }
 0xdb2   :  { %24154 = vmatpush3.msra.mxu1 %v30187_v50  ;;  %24155 = vmatprep.mubr.msk.f32.mxu1 %vm24798_vm2, %v29743_v9 }
 0xdb3   :  { %v24732_v19 = vpop.eup %24731  ;;  %v19321_v61 = vpop.xlane.xlu1 %19320  ;;  %24163 = vmatprep.subr.mxu1 %v29743_v9 }
 0xdb4   :  { %v19392_v57 = vmul.f32 %v24732_v19, %v28883_v4  ;;  %24737 = vrcp.f32 %v19321_v61  ;;  %v30196_v19 = vld [vmem:[#allocation85_spill] sm:$0xff] }
 0xdb6   :  { %v24734_v2 = vpop.eup %24733  ;;  %24151 = vmatmul.mubr.msk.f32.vlgmr.msra.gmra.mrb[30].mxu0 %vm768_vm3, %v19392_v57  ;;  %v30197_v57 = vld [vmem:[#allocation87_spill] sm:$0xff] }
 0xdb7   :  { %v19394_v21 = vmul.f32 %v24734_v2, %v28888_v8  ;;  %24159 = vmatpush3.msra.mxu0 %v30188_v16  ;;  %24160 = vmatprep.mubr.msk.f32.mxu0 %vm24798_vm2, %v29743_v9 }
 0xdb8   :  { %v19324_v48 = vpop.xlane.xlu0 %19323  ;;  %24168 = vmatprep.subr.mxu0 %v29743_v9 }
 0xdb9   :  { %24739 = vrcp.f32 %v19324_v48  ;;  %24156 = vmatmul.mubr.msk.f32.vlgmr.msra.gmra.mrb[32].mxu1 %vm768_vm3, %v19394_v21  ;;  %v30198_v48 = vld [vmem:[#allocation89_spill] sm:$0xff] }
 0xdba   :  { %24164 = vmatpush3.msra.mxu1 %v30189_v39  ;;  %24165 = vmatprep.mubr.msk.f32.mxu1 %vm24798_vm2, %v29743_v9 }
 0xdbb   :  { %v24736_v4 = vpop.eup %24735  ;;  %v19327_v27 = vpop.xlane.xlu1 %19326  ;;  %24173 = vmatprep.subr.mxu1 %v29743_v9 }
 0xdbc   :  { %v19396_v8 = vmul.f32 %v24736_v4, %v28893_v31  ;;  %24741 = vrcp.f32 %v19327_v27  ;;  %v30199_v4 = vld [vmem:[#allocation91_spill] sm:$0xff] }
 0xdbe   :  { %v24738_v6 = vpop.eup %24737  ;;  %24161 = vmatmul.mubr.msk.f32.vlgmr.msra.gmra.mrb[32].mxu0 %vm768_vm3, %v19396_v8 }
 0xdbf   :  { %v19398_v45 = vmul.f32 %v24738_v6, %v28898_v22  ;;  %24169 = vmatpush3.msra.mxu0 %v30190_v63  ;;  %24170 = vmatprep.mubr.msk.f32.mxu0 %vm24798_vm2, %v29743_v9 }
 0xdc0   :  { %v19330_v56 = vpop.xlane.xlu0 %19329  ;;  %24178 = vmatprep.subr.mxu0 %v29743_v9 }
 0xdc1   :  { %24743 = vrcp.f32 %v19330_v56  ;;  %24166 = vmatmul.mubr.msk.f32.vlgmr.msra.gmra.mrb[34].mxu1 %vm768_vm3, %v19398_v45  ;;  %v30200_v45 = vld [vmem:[#allocation93_spill] sm:$0xff]  ;;  %v30201_v56 = vld [vmem:[#allocation95_spill] sm:$0xff] }
 0xdc2   :  { %24174 = vmatpush3.msra.mxu1 %v30191_v17  ;;  %24175 = vmatprep.mubr.msk.f32.mxu1 %vm24798_vm2, %v29743_v9 }
 0xdc3   :  { %v24740_v31 = vpop.eup %24739  ;;  %v19333_v36 = vpop.xlane.xlu1 %19332  ;;  %24183 = vmatprep.subr.mxu1 %v29743_v9 }
 0xdc4   :  { %v19400_v22 = vmul.f32 %v24740_v31, %v28903_v44  ;;  %24745 = vrcp.f32 %v19333_v36  ;;  %v30202_v36 = vld [vmem:[#allocation97_spill] sm:$0xff] }
 0xdc6   :  { %v24742_v28 = vpop.eup %24741  ;;  %24171 = vmatmul.mubr.msk.f32.vlgmr.msra.gmra.mrb[34].mxu0 %vm768_vm3, %v19400_v22 }
 0xdc7   :  { %v19402_v41 = vmul.f32 %v24742_v28, %v28908_v37  ;;  %24179 = vmatpush3.msra.mxu0 %v30192_v26  ;;  %24180 = vmatprep.mubr.msk.f32.mxu0 %vm24798_vm2, %v29743_v9 }
 0xdc8   :  { %v19336_v35 = vpop.xlane.xlu0 %19335  ;;  %24188 = vmatprep.subr.mxu0 %v29743_v9 }
 0xdc9   :  { %24747 = vrcp.f32 %v19336_v35  ;;  %24176 = vmatmul.mubr.msk.f32.vlgmr.msra.gmra.mrb[36].mxu1 %vm768_vm3, %v19402_v41 }
 0xdca   :  { %24184 = vmatpush3.msra.mxu1 %v30193_v49  ;;  %24185 = vmatprep.mubr.msk.f32.mxu1 %vm24798_vm2, %v29743_v9 }
 0xdcb   :  { %v24744_v44 = vpop.eup %24743  ;;  %v19339_v62 = vpop.xlane.xlu1 %19338  ;;  %24193 = vmatprep.subr.mxu1 %v29743_v9 }
 0xdcc   :  { %v19404_v37 = vmul.f32 %v24744_v44, %v28913_v13  ;;  %24749 = vrcp.f32 %v19339_v62 }
 0xdce   :  { %v24746_v32 = vpop.eup %24745  ;;  %24181 = vmatmul.mubr.msk.f32.vlgmr.msra.gmra.mrb[36].mxu0 %vm768_vm3, %v19404_v37 }
 0xdcf   :  { %v19406_v42 = vmul.f32 %v24746_v32, %v28918_v20  ;;  %24189 = vmatpush3.msra.mxu0 %v30194_v60  ;;  %24190 = vmatprep.mubr.msk.f32.mxu0 %vm24798_vm2, %v29743_v9 }
 0xdd0   :  { %v19342_v46 = vpop.xlane.xlu0 %19341  ;;  %24198 = vmatprep.subr.mxu0 %v29743_v9 }
 0xdd1   :  { %24751 = vrcp.f32 %v19342_v46  ;;  %24186 = vmatmul.mubr.msk.f32.vlgmr.msra.gmra.mrb[38].mxu1 %vm768_vm3, %v19406_v42  ;;  %v30204_v42 = vld [vmem:[#allocation138_spill] sm:$0xff] }
 0xdd2   :  { %24194 = vmatpush3.msra.mxu1 %v30195_v51  ;;  %24195 = vmatprep.mubr.msk.f32.mxu1 %vm24798_vm2, %v29743_v9 }
 0xdd3   :  { %v24748_v13 = vpop.eup %24747  ;;  %v19345_v59 = vpop.xlane.xlu1 %19344  ;;  %24203 = vmatprep.subr.mxu1 %v29743_v9 }
 0xdd4   :  { %v19408_v20 = vmul.f32 %v24748_v13, %v28923_v30  ;;  %24753 = vrcp.f32 %v19345_v59  ;;  %v24766_v13 = vld [vmem:[%s29441_s0 + $0x8] sm:$0xff] }
 0xdd6   :  { %v24750_v15 = vpop.eup %24749  ;;  %24191 = vmatmul.mubr.msk.f32.vlgmr.msra.gmra.mrb[38].mxu0 %vm768_vm3, %v19408_v20 }
 0xdd7   :  { %v19410_v50 = vmul.f32 %v24750_v15, %v28928_v1  ;;  %24199 = vmatpush3.msra.mxu0 %v30196_v19  ;;  %24200 = vmatprep.mubr.msk.f32.mxu0 %vm24798_vm2, %v29743_v9  ;;  %v24767_v15 = vld [vmem:[%s29441_s0 + $0x10] sm:$0xff]  ;;  %v30205_v19 = vld [vmem:[#allocation101_spill] sm:$0xff] }
 0xdd8   :  { %v19348_v61 = vpop.xlane.xlu0 %19347  ;;  %24208 = vmatprep.subr.mxu0 %v29743_v9 }
 0xdd9   :  { %24755 = vrcp.f32 %v19348_v61  ;;  %24196 = vmatmul.mubr.msk.f32.vlgmr.msra.gmra.mrb[40].mxu1 %vm768_vm3, %v19410_v50 }
 0xdda   :  { %24204 = vmatpush3.msra.mxu1 %v30197_v57  ;;  %24205 = vmatprep.mubr.msk.f32.mxu1 %vm24798_vm2, %v29743_v9 }
 0xddb   :  { %v24752_v30 = vpop.eup %24751  ;;  %v19351_v2 = vpop.xlane.xlu1 %19350  ;;  %24213 = vmatprep.subr.mxu1 %v29743_v9 }
 0xddc   :  { %v19412_v1 = vmul.f32 %v24752_v30, %v28933_v38  ;;  %24757 = vrcp.f32 %v19351_v2  ;;  %v30206_v2 = vld [vmem:[#allocation107_spill] sm:$0xff] }
 0xdde   :  { %v24754_v21 = vpop.eup %24753  ;;  %24201 = vmatmul.mubr.msk.f32.vlgmr.msra.gmra.mrb[40].mxu0 %vm768_vm3, %v19412_v1 }
 0xddf   :  { %v19414_v16 = vmul.f32 %v24754_v21, %v28938_v3  ;;  %24209 = vmatpush3.msra.mxu0 %v30198_v48  ;;  %24210 = vmatprep.mubr.msk.f32.mxu0 %vm24798_vm2, %v29743_v9 }
 0xde0   :  { %v19354_v39 = vpop.xlane.xlu0 %19353  ;;  %24218 = vmatprep.subr.mxu0 %v29743_v9 }
 0xde1   :  { %24759 = vrcp.f32 %v19354_v39  ;;  %24206 = vmatmul.mubr.msk.f32.vlgmr.msra.gmra.mrb[42].mxu1 %vm768_vm3, %v19414_v16  ;;  %v24768_v39 = vld [vmem:[%s29441_s0 + $0x18] sm:$0xff] }
 0xde2   :  { %24214 = vmatpush3.msra.mxu1 %v30199_v4  ;;  %24215 = vmatprep.mubr.msk.f32.mxu1 %vm24798_vm2, %v29743_v9 }
 0xde3   :  { %v24756_v38 = vpop.eup %24755  ;;  %v19357_v27 = vpop.xlane.xlu1 %19356  ;;  %24223 = vmatprep.subr.mxu1 %v29743_v9 }
 0xde4   :  { %v19416_v3 = vmul.f32 %v24756_v38, %v28943_v11  ;;  %24761 = vrcp.f32 %v19357_v27  ;;  %v24769_v27 = vld [vmem:[%s29441_s0 + $0x20] sm:$0xff] }
 0xde6   :  { %v24758_v8 = vpop.eup %24757  ;;  %24211 = vmatmul.mubr.msk.f32.vlgmr.msra.gmra.mrb[42].mxu0 %vm768_vm3, %v19416_v3 }
 0xde7   :  { %v19418_v6 = vmul.f32 %v24758_v8, %v28948_v14  ;;  %24219 = vmatpush3.msra.mxu0 %v30200_v45  ;;  %24220 = vmatprep.mubr.msk.f32.mxu0 %vm24798_vm2, %v29743_v9  ;;  %v30207_v8 = vld [vmem:[#allocation140_spill] sm:$0xff] }
 0xde8   :  { %v19360_v63 = vpop.xlane.xlu0 %19359  ;;  %24228 = vmatprep.subr.mxu0 %v29743_v9 }
 0xde9   :  { %24763 = vrcp.f32 %v19360_v63  ;;  %24216 = vmatmul.mubr.msk.f32.vlgmr.msra.gmra.mrb[44].mxu1 %vm768_vm3, %v19418_v6 }
 0xdea   :  { %24224 = vmatpush3.msra.mxu1 %v30201_v56  ;;  %24225 = vmatprep.mubr.msk.f32.mxu1 %vm24798_vm2, %v29743_v9 }
 0xdeb   :  { %v24760_v11 = vpop.eup %24759 }
 0xdec   :  { %v19420_v17 = vmul.f32 %v24760_v11, %v28952_v5  ;;  %v29149_v5 = vld [vmem:[%s29443_s4] ss:$0 sm:$0xff] }
 0xdee   :  { %v24762_v14 = vpop.eup %24761  ;;  %24221 = vmatmul.mubr.msk.f32.vlgmr.msra.gmra.mrb[44].mxu0 %vm768_vm3, %v19420_v17 }
 0xdef   :  { %v19422_v31 = vmul.f32 %v24762_v14, %v28956_v0  ;;  %24229 = vmatpush3.msra.mxu0 %v30202_v36  ;;  %24230 = vmatprep.mubr.msk.f32.mxu0 %vm24798_vm2, %v29743_v9  ;;  %v30203_v9 = vld [vmem:[#allocation143_spill] sm:$0xff] }
 0xdf0   :  { %v24770_v14 = vld [vmem:[%s29441_s0 + $0x28] sm:$0xff] }
 0xdf1   :  { %24226 = vmatmul.mubr.msk.f32.vlgmr.msra.gmra.mrb[46].mxu1 %vm768_vm3, %v19422_v31 }
 0xdf3   :  { %v24764_v22 = vpop.eup %24763 }
 0xdf4   :  { %v19424_v28 = vmul.f32 %v24764_v22, %v28960_v29  ;;  %v24765_v29 = vld [vmem:[%s29441_s0] sm:$0xff]  ;;  %v24771_v22 = vld [vmem:[%s29441_s0 + $0x30] sm:$0xff] }
 0xdf6   :  { %24231 = vmatmul.mubr.msk.f32.vlgmr.msra.gmra.mrb[46].mxu0 %vm768_vm3, %v19424_v28 }
 0xe54   :  { %v19494_v41 = vpop.f32.mrb[16].mxu1 }
 0xe55   :  { %v21761_v0 = vadd.f32 %v19494_v41, %v28060_v55  ;;  %v24077_v26 = vpop.f32.mrb[17].mxu1 }
 0xe57   :  { %v21800_v35 = vadd.f32 %v29149_v5, %v21761_v0  ;;  %v19567_v49 = vpop.f32.mrb[16].mxu0 }
 0xe58   :  { %v21762_v44 = vadd.f32 %v19567_v49, %v30203_v9  ;;  %v24082_v62 = vpop.f32.mrb[17].mxu0  ;;  %v19640_v37 = vpop.f32.mrb[18].mxu1 }
 0xe59   :  { %v21832_v32 = vadd.f32 %v24765_v29, %v21800_v35  ;;  %v21763_v60 = vadd.f32 %v19640_v37, %v30204_v42  ;;  %v24087_v46 = vpop.f32.mrb[19].mxu1 }
 0xe5a   :  { %v21801_v51 = vadd.f32 %v29149_v5, %v21762_v44  ;;  %v24772_v44 = vld [vmem:[%s29441_s0 + $0x38] sm:$0xff] }
 0xe5b   :  { %21864 = vst.msk [vmem:[%s29444_s5] sm:$0xff] %vm88_vm0, %v21832_v32  ;;  %v21802_v55 = vadd.f32 %v29149_v5, %v21763_v60 }
 0xe5c   :  { %v21833_v59 = vadd.f32 %v24766_v13, %v21801_v51  ;;  %v19713_v20 = vpop.f32.mrb[18].mxu0  ;;  %v24774_v13 = vld [vmem:[%s29441_s0 + $0x48] sm:$0xff] }
 0xe5d   :  { %v21834_v50 = vadd.f32 %v24767_v15, %v21802_v55  ;;  %v21764_v61 = vadd.f32 %v19713_v20, %v30205_v19  ;;  %v24092_v57 = vpop.f32.mrb[19].mxu0  ;;  %v19786_v30 = vpop.f32.mrb[20].mxu1 }
 0xe5e   :  { %21865 = vst.msk [vmem:[%s29444_s5 + $0x8] sm:$0xff] %vm88_vm0, %v21833_v59  ;;  %v21765_v1 = vadd.f32 %v19786_v30, %v30206_v2  ;;  %v24097_v21 = vpop.f32.mrb[21].mxu1 }
 0xe5f   :  { %21866 = vst.msk [vmem:[%s29444_s5 + $0x10] sm:$0xff] %vm88_vm0, %v21834_v50  ;;  %v21803_v16 = vadd.f32 %v29149_v5, %v21764_v61 }
 0xe60   :  { %v21804_v48 = vadd.f32 %v29149_v5, %v21765_v1  ;;  %v24776_v1 = vld [vmem:[%s29441_s0 + $0x58] sm:$0xff] }
 0xe61   :  { %v21835_v4 = vadd.f32 %v24768_v39, %v21803_v16  ;;  %v19859_v38 = vpop.f32.mrb[20].mxu0 }
 0xe62   :  { %v21836_v3 = vadd.f32 %v24769_v27, %v21804_v48  ;;  %v21766_v6 = vadd.f32 %v19859_v38, %v30207_v8  ;;  %v24102_v45 = vpop.f32.mrb[21].mxu0 }
 0xe63   :  { %21867 = vst.msk [vmem:[%s29444_s5 + $0x18] sm:$0xff] %vm88_vm0, %v21835_v4 }
 0xe64   :  { %21868 = vst.msk [vmem:[%s29444_s5 + $0x20] sm:$0xff] %vm88_vm0, %v21836_v3  ;;  %v21805_v63 = vadd.f32 %v29149_v5, %v21766_v6  ;;  %v19932_v56 = vpop.f32.mrb[22].mxu1  ;;  %v24778_v6 = vld [vmem:[%s29441_s0 + $0x68] sm:$0xff] }
 0xe65   :  { %v21767_v11 = vadd.f32 %v19932_v56, %v28186_v25  ;;  %v24107_v17 = vpop.f32.mrb[23].mxu1 }
 0xe66   :  { %v21837_v31 = vadd.f32 %v24770_v14, %v21805_v63 }
 0xe67   :  { %v21806_v36 = vadd.f32 %v29149_v5, %v21767_v11 }
 0xe68   :  { %21869 = vst.msk [vmem:[%s29444_s5 + $0x28] sm:$0xff] %vm88_vm0, %v21837_v31 }
 0xe69   :  { %v21838_v28 = vadd.f32 %v24771_v22, %v21806_v36  ;;  %v20005_v41 = vpop.f32.mrb[22].mxu0 }
 0xe6a   :  { %v21768_v25 = vadd.f32 %v20005_v41, %v28198_v24  ;;  %v24112_v0 = vpop.f32.mrb[23].mxu0  ;;  %v24773_v24 = vld [vmem:[%s29441_s0 + $0x40] sm:$0xff] }
 0xe6b   :  { %21870 = vst.msk [vmem:[%s29444_s5 + $0x30] sm:$0xff] %vm88_vm0, %v21838_v28  ;;  %v24780_v28 = vld [vmem:[%s29441_s0 + $0x78] sm:$0xff] }
 0xe6c   :  { %v21807_v26 = vadd.f32 %v29149_v5, %v21768_v25  ;;  %v20078_v35 = vpop.f32.mrb[24].mxu1 }
 0xe6d   :  { %v21769_v49 = vadd.f32 %v20078_v35, %v28262_v53  ;;  %v24117_v9 = vpop.f32.mrb[25].mxu1 }
 0xe6e   :  { %v21839_v62 = vadd.f32 %v24772_v44, %v21807_v26 }
 0xe6f   :  { %v21808_v37 = vadd.f32 %v29149_v5, %v21769_v49 }
 0xe70   :  { %21871 = vst.msk [vmem:[%s29444_s5 + $0x38] sm:$0xff] %vm88_vm0, %v21839_v62 }
 0xe71   :  { %v21840_v29 = vadd.f32 %v24773_v24, %v21808_v37  ;;  %v20151_v32 = vpop.f32.mrb[24].mxu0  ;;  %v24782_v37 = vld [vmem:[%s29441_s0 + $0x88] sm:$0xff] }
 0xe72   :  { %v21770_v53 = vadd.f32 %v20151_v32, %v28274_v23  ;;  %v24122_v42 = vpop.f32.mrb[25].mxu0  ;;  %v24775_v23 = vld [vmem:[%s29441_s0 + $0x50] sm:$0xff] }
 0xe73   :  { %21872 = vst.msk [vmem:[%s29444_s5 + $0x40] sm:$0xff] %vm88_vm0, %v21840_v29 }
 0xe74   :  { %v21809_v60 = vadd.f32 %v29149_v5, %v21770_v53  ;;  %v20224_v46 = vpop.f32.mrb[26].mxu1 }
 0xe75   :  { %v21771_v51 = vadd.f32 %v20224_v46, %v28343_v40  ;;  %v24127_v55 = vpop.f32.mrb[27].mxu1 }
 0xe76   :  { %v21841_v59 = vadd.f32 %v24774_v13, %v21809_v60  ;;  %v24784_v13 = vld [vmem:[%s29441_s0 + $0x98] sm:$0xff] }
 0xe77   :  { %v21810_v20 = vadd.f32 %v29149_v5, %v21771_v51 }
 0xe78   :  { %21873 = vst.msk [vmem:[%s29444_s5 + $0x48] sm:$0xff] %vm88_vm0, %v21841_v59 }
 0xe79   :  { %v21842_v15 = vadd.f32 %v24775_v23, %v21810_v20  ;;  %v20297_v50 = vpop.f32.mrb[26].mxu0 }
 0xe7a   :  { %v21772_v40 = vadd.f32 %v20297_v50, %v28357_v34  ;;  %v24132_v19 = vpop.f32.mrb[27].mxu0  ;;  %v24777_v34 = vld [vmem:[%s29441_s0 + $0x60] sm:$0xff] }
 0xe7b   :  { %21874 = vst.msk [vmem:[%s29444_s5 + $0x50] sm:$0xff] %vm88_vm0, %v21842_v15 }
 0xe7c   :  { %v21811_v61 = vadd.f32 %v29149_v5, %v21772_v40  ;;  %v20370_v57 = vpop.f32.mrb[28].mxu1 }
 0xe7d   :  { %v21773_v30 = vadd.f32 %v20370_v57, %v28485_v58  ;;  %v24137_v2 = vpop.f32.mrb[29].mxu1 }
 0xe7e   :  { %v21843_v21 = vadd.f32 %v24776_v1, %v21811_v61  ;;  %v30208_v61 = vld [vmem:[#allocation99_spill] sm:$0xff] }
 0xe7f   :  { %v21812_v16 = vadd.f32 %v29149_v5, %v21773_v30  ;;  %v24786_v2 = vld [vmem:[%s29441_s0 + $0xa8] sm:$0xff] }
 0xe80   :  { %21875 = vst.msk [vmem:[%s29444_s5 + $0x58] sm:$0xff] %vm88_vm0, %v21843_v21 }
 0xe81   :  { %v21844_v48 = vadd.f32 %v24777_v34, %v21812_v16  ;;  %v20443_v39 = vpop.f32.mrb[28].mxu0 }
 0xe82   :  { %v21774_v58 = vadd.f32 %v20443_v39, %v28492_v33  ;;  %v24142_v4 = vpop.f32.mrb[29].mxu0  ;;  %v24779_v33 = vld [vmem:[%s29441_s0 + $0x70] sm:$0xff] }
 0xe83   :  { %21876 = vst.msk [vmem:[%s29444_s5 + $0x60] sm:$0xff] %vm88_vm0, %v21844_v48  ;;  %v30209_v48 = vld [vmem:[#allocation111_spill] sm:$0xff] }
 0xe84   :  { %v21813_v38 = vadd.f32 %v29149_v5, %v21774_v58  ;;  %v20516_v27 = vpop.f32.mrb[30].mxu1 }
 0xe85   :  { %v21775_v3 = vadd.f32 %v20516_v27, %v28556_v43  ;;  %v24147_v8 = vpop.f32.mrb[31].mxu1  ;;  %v30210_v27 = vld [vmem:[#allocation142_spill] sm:$0xff] }
 0xe86   :  { %v21845_v45 = vadd.f32 %v24778_v6, %v21813_v38  ;;  %v24788_v6 = vld [vmem:[%s29441_s0 + $0xb8] sm:$0xff] }
 0xe87   :  { %v21814_v63 = vadd.f32 %v29149_v5, %v21775_v3 }
 0xe88   :  { %21877 = vst.msk [vmem:[%s29444_s5 + $0x68] sm:$0xff] %vm88_vm0, %v21845_v45 }
 0xe89   :  { %v21846_v56 = vadd.f32 %v24779_v33, %v21814_v63  ;;  %v20589_v11 = vpop.f32.mrb[30].mxu0  ;;  %v24789_v33 = vld [vmem:[%s29441_s0 + $0xc0] sm:$0xff] }
 0xe8a   :  { %v21776_v43 = vadd.f32 %v20589_v11, %v28564_v7  ;;  %v24152_v17 = vpop.f32.mrb[31].mxu0  ;;  %v24781_v7 = vld [vmem:[%s29441_s0 + $0x80] sm:$0xff] }
 0xe8b   :  { %21878 = vst.msk [vmem:[%s29444_s5 + $0x70] sm:$0xff] %vm88_vm0, %v21846_v56 }
 0xe8c   :  { %v21815_v14 = vadd.f32 %v29149_v5, %v21776_v43  ;;  %v20662_v31 = vpop.f32.mrb[32].mxu1  ;;  %v30211_v43 = vld [vmem:[#allocation113_spill] sm:$0xff] }
 0xe8d   :  { %v21777_v36 = vadd.f32 %v20662_v31, %v28629_v54  ;;  %v24157_v22 = vpop.f32.mrb[33].mxu1 }
 0xe8e   :  { %v21847_v41 = vadd.f32 %v24780_v28, %v21815_v14  ;;  %v30212_v22 = vld [vmem:[#allocation115_spill] sm:$0xff] }
 0xe8f   :  { %v21816_v25 = vadd.f32 %v29149_v5, %v21777_v36 }
 0xe90   :  { %21879 = vst.msk [vmem:[%s29444_s5 + $0x78] sm:$0xff] %vm88_vm0, %v21847_v41 }
 0xe91   :  { %v21848_v0 = vadd.f32 %v24781_v7, %v21816_v25  ;;  %v20735_v26 = vpop.f32.mrb[32].mxu0  ;;  %v24790_v25 = vld [vmem:[%s29441_s0 + $0xc8] sm:$0xff] }
 0xe92   :  { %v21778_v54 = vadd.f32 %v20735_v26, %v28632_v10  ;;  %v24162_v35 = vpop.f32.mrb[33].mxu0  ;;  %v24783_v10 = vld [vmem:[%s29441_s0 + $0x90] sm:$0xff] }
 0xe93   :  { %21880 = vst.msk [vmem:[%s29444_s5 + $0x80] sm:$0xff] %vm88_vm0, %v21848_v0  ;;  %v24791_v26 = vld [vmem:[%s29441_s0 + $0xd0] sm:$0xff] }
 0xe94   :  { %v21817_v49 = vadd.f32 %v29149_v5, %v21778_v54  ;;  %v20808_v9 = vpop.f32.mrb[34].mxu1 }
 0xe95   :  { %v21779_v44 = vadd.f32 %v20808_v9, %v28635_v47  ;;  %v24167_v62 = vpop.f32.mrb[35].mxu1 }
 0xe96   :  { %v21849_v24 = vadd.f32 %v24782_v37, %v21817_v49  ;;  %v30213_v49 = vld [vmem:[#allocation145_spill] sm:$0xff] }
 0xe97   :  { %v21818_v29 = vadd.f32 %v29149_v5, %v21779_v44 }
 0xe98   :  { %21881 = vst.msk [vmem:[%s29444_s5 + $0x88] sm:$0xff] %vm88_vm0, %v21849_v24  ;;  %v30214_v24 = vld [vmem:[#allocation161_spill] sm:$0xff] }
 0xe99   :  { %v21850_v32 = vadd.f32 %v24783_v10, %v21818_v29  ;;  %v20881_v53 = vpop.f32.mrb[34].mxu0 }
 0xe9a   :  { %v21780_v47 = vadd.f32 %v20881_v53, %v28638_v18  ;;  %v24172_v42 = vpop.f32.mrb[35].mxu0  ;;  %v24785_v18 = vld [vmem:[%s29441_s0 + $0xa0] sm:$0xff] }
 0xe9b   :  { %21882 = vst.msk [vmem:[%s29444_s5 + $0x90] sm:$0xff] %vm88_vm0, %v21850_v32  ;;  %v24792_v32 = vld [vmem:[%s29441_s0 + $0xd8] sm:$0xff]  ;;  %v24793_v42 = vld [vmem:[%s29441_s0 + $0xe0] sm:$0xff] }
 0xe9c   :  { %v21819_v60 = vadd.f32 %v29149_v5, %v21780_v47  ;;  %v20954_v46 = vpop.f32.mrb[36].mxu1 }
 0xe9d   :  { %v21781_v51 = vadd.f32 %v20954_v46, %v28641_v12  ;;  %v24177_v55 = vpop.f32.mrb[37].mxu1 }
 0xe9e   :  { %v21851_v59 = vadd.f32 %v24784_v13, %v21819_v60 }
 0xe9f   :  { %v21820_v20 = vadd.f32 %v29149_v5, %v21781_v51  ;;  %v30215_v51 = vld [vmem:[#allocation134_spill] sm:$0xff] }
 0xea0   :  { %21883 = vst.msk [vmem:[%s29444_s5 + $0x98] sm:$0xff] %vm88_vm0, %v21851_v59 }
 0xea1   :  { %v21852_v23 = vadd.f32 %v24785_v18, %v21820_v20  ;;  %v21027_v15 = vpop.f32.mrb[36].mxu0  ;;  %v30216_v18 = vld [vmem:[#allocation102_spill] sm:$0xff] }
 0xea2   :  { %v21782_v12 = vadd.f32 %v21027_v15, %v28644_v52  ;;  %v24182_v50 = vpop.f32.mrb[37].mxu0  ;;  %v24787_v52 = vld [vmem:[%s29441_s0 + $0xb0] sm:$0xff] }
 0xea3   :  { %21884 = vst.msk [vmem:[%s29444_s5 + $0xa0] sm:$0xff] %vm88_vm0, %v21852_v23 }
 0xea4   :  { %v21821_v40 = vadd.f32 %v29149_v5, %v21782_v12  ;;  %v21100_v19 = vpop.f32.mrb[38].mxu1  ;;  %v24794_v12 = vld [vmem:[%s29441_s0 + $0xe8] sm:$0xff] }
 0xea5   :  { %v21783_v57 = vadd.f32 %v21100_v19, %v30208_v61  ;;  %v24187_v30 = vpop.f32.mrb[39].mxu1  ;;  %v24795_v19 = vld [vmem:[%s29441_s0 + $0xf0] sm:$0xff] }
 0xea6   :  { %v21853_v1 = vadd.f32 %v24786_v2, %v21821_v40  ;;  %v30217_v30 = vld [vmem:[#allocation100_spill] sm:$0xff] }
 0xea7   :  { %v21822_v21 = vadd.f32 %v29149_v5, %v21783_v57 }
 0xea8   :  { %21885 = vst.msk [vmem:[%s29444_s5 + $0xa8] sm:$0xff] %vm88_vm0, %v21853_v1 }
 0xea9   :  { %v21854_v16 = vadd.f32 %v24787_v52, %v21822_v21  ;;  %v21173_v34 = vpop.f32.mrb[38].mxu0  ;;  %v24796_v52 = vld [vmem:[%s29441_s0 + $0xf8] sm:$0xff] }
 0xeaa   :  { %v21784_v39 = vadd.f32 %v21173_v34, %v30209_v48  ;;  %v24192_v58 = vpop.f32.mrb[39].mxu0 }
 0xeab   :  { %21886 = vst.msk [vmem:[%s29444_s5 + $0xb0] sm:$0xff] %vm88_vm0, %v21854_v16 }
 0xeac   :  { %v21823_v4 = vadd.f32 %v29149_v5, %v21784_v39  ;;  %v21246_v38 = vpop.f32.mrb[40].mxu1 }
 0xead   :  { %v21785_v3 = vadd.f32 %v21246_v38, %v30210_v27  ;;  %v24197_v8 = vpop.f32.mrb[41].mxu1 }
 0xeae   :  { %v21855_v45 = vadd.f32 %v24788_v6, %v21823_v4 }
 0xeaf   :  { %v21824_v63 = vadd.f32 %v29149_v5, %v21785_v3 }
 0xeb0   :  { %21887 = vst.msk [vmem:[%s29444_s5 + $0xb8] sm:$0xff] %vm88_vm0, %v21855_v45 }
 0xeb1   :  { %v21856_v56 = vadd.f32 %v24789_v33, %v21824_v63  ;;  %v21319_v11 = vpop.f32.mrb[40].mxu0 }
 0xeb2   :  { %v21786_v17 = vadd.f32 %v21319_v11, %v30211_v43  ;;  %v24202_v14 = vpop.f32.mrb[41].mxu0 }
 0xeb3   :  { %21888 = vst.msk [vmem:[%s29444_s5 + $0xc0] sm:$0xff] %vm88_vm0, %v21856_v56 }
 0xeb4   :  { %v21825_v31 = vadd.f32 %v29149_v5, %v21786_v17  ;;  %v21392_v36 = vpop.f32.mrb[42].mxu1 }
 0xeb5   :  { %v21787_v28 = vadd.f32 %v21392_v36, %v30212_v22  ;;  %v24207_v41 = vpop.f32.mrb[43].mxu1 }
 0xeb6   :  { %v21857_v7 = vadd.f32 %v24790_v25, %v21825_v31 }
 0xeb7   :  { %v21826_v0 = vadd.f32 %v29149_v5, %v21787_v28 }
 0xeb8   :  { %21889 = vst.msk [vmem:[%s29444_s5 + $0xc8] sm:$0xff] %vm88_vm0, %v21857_v7 }
 0xeb9   :  { %v21858_v54 = vadd.f32 %v24791_v26, %v21826_v0  ;;  %v21465_v35 = vpop.f32.mrb[42].mxu0 }
 0xeba   :  { %v21788_v9 = vadd.f32 %v21465_v35, %v30213_v49  ;;  %v24212_v44 = vpop.f32.mrb[43].mxu0 }
 0xebb   :  { %21890 = vst.msk [vmem:[%s29444_s5 + $0xd0] sm:$0xff] %vm88_vm0, %v21858_v54 }
 0xebc   :  { %v21827_v62 = vadd.f32 %v29149_v5, %v21788_v9  ;;  %v21538_v37 = vpop.f32.mrb[44].mxu1 }
 0xebd   :  { %v21789_v29 = vadd.f32 %v21538_v37, %v30214_v24  ;;  %v24217_v10 = vpop.f32.mrb[45].mxu1 }
 0xebe   :  { %v21859_v53 = vadd.f32 %v24792_v32, %v21827_v62 }
 0xebf   :  { %v21828_v47 = vadd.f32 %v29149_v5, %v21789_v29 }
 0xec0   :  { %21891 = vst.msk [vmem:[%s29444_s5 + $0xd8] sm:$0xff] %vm88_vm0, %v21859_v53 }
 0xec1   :  { %v21860_v60 = vadd.f32 %v24793_v42, %v21828_v47  ;;  %v21611_v46 = vpop.f32.mrb[44].mxu0 }
 0xec2   :  { %v21790_v55 = vadd.f32 %v21611_v46, %v30215_v51  ;;  %v24222_v13 = vpop.f32.mrb[45].mxu0 }
 0xec3   :  { %21892 = vst.msk [vmem:[%s29444_s5 + $0xe0] sm:$0xff] %vm88_vm0, %v21860_v60 }
 0xec4   :  { %v21829_v59 = vadd.f32 %v29149_v5, %v21790_v55  ;;  %v21684_v20 = vpop.f32.mrb[46].mxu1 }
 0xec5   :  { %v21791_v23 = vadd.f32 %v21684_v20, %v30216_v18  ;;  %v24227_v15 = vpop.f32.mrb[47].mxu1 }
 0xec6   :  { %v21861_v50 = vadd.f32 %v24794_v12, %v21829_v59 }
 0xec7   :  { %v21830_v40 = vadd.f32 %v29149_v5, %v21791_v23 }
 0xec8   :  { %21893 = vst.msk [vmem:[%s29444_s5 + $0xe8] sm:$0xff] %vm88_vm0, %v21861_v50 }
 0xec9   :  { %v21862_v61 = vadd.f32 %v24795_v19, %v21830_v40  ;;  %v21757_v57 = vpop.f32.mrb[46].mxu0 }
 0xeca   :  { %v21792_v2 = vadd.f32 %v21757_v57, %v30217_v30  ;;  %v24232_v1 = vpop.f32.mrb[47].mxu0 }
 0xecb   :  { %21894 = vst.msk [vmem:[%s29444_s5 + $0xf0] sm:$0xff] %vm88_vm0, %v21862_v61 }
 0xecc   :  { %v21831_v21 = vadd.f32 %v29149_v5, %v21792_v2 }
 0xece   :  { %v21863_v16 = vadd.f32 %v24796_v52, %v21831_v21 }
 0xed0   :  { %21895 = vst.msk [vmem:[%s29444_s5 + $0xf8] sm:$0xff] %vm88_vm0, %v21863_v16 }

</bundles_post_ra>
